<compile_context>
chip_gen: v5e
topology: v5e:2x2
jax: 0.10.0
libtpu: 0.0.40
codegen_flags: <defaults>
</compile_context>

<pallas_src>
import functools
import jax
import jax.numpy as jnp
from jax.experimental import pallas as pl
from jax.experimental.pallas import tpu as pltpu


def _round_up(x, m):
    return ((x + m - 1) // m) * m


_VMEM_LIMIT = 48 * 1024 * 1024  # <= v7x 64 MiB VMEM; plenty on v5e/v6e.


# ----------------------- Pallas kernels (hot path) -----------------------

def _conv_mm_kernel(a_ref, w_ref, b_ref, o_ref, *, nwin, relu):
    # a_ref: (nwin, TM, K) bf16 window-stacked activations
    # w_ref: (nwin, K, TC) bf16 scale-folded weights
    # Whole K reduction (all windows) in one grid step -> f32 register acc,
    # epilogue = bias (+ReLU), single store per output tile.
    acc = jnp.dot(a_ref[0], w_ref[0], preferred_element_type=jnp.float32)
    for g in range(1, nwin):
        acc = acc + jnp.dot(a_ref[g], w_ref[g],
                            preferred_element_type=jnp.float32)
    y = acc + b_ref[...]
    if relu:
        y = jnp.maximum(y, 0.0)
    o_ref[...] = y.astype(o_ref.dtype)


def _conv_mm_res_kernel(a_ref, w_ref, b_ref, r_ref, o_ref, *, nwin, relu):
    # Same as above, plus residual add before the final ReLU (BasicBlock tail).
    acc = jnp.dot(a_ref[0], w_ref[0], preferred_element_type=jnp.float32)
    for g in range(1, nwin):
        acc = acc + jnp.dot(a_ref[g], w_ref[g],
                            preferred_element_type=jnp.float32)
    y = acc + b_ref[...] + r_ref[...].astype(jnp.float32)
    if relu:
        y = jnp.maximum(y, 0.0)
    o_ref[...] = y.astype(o_ref.dtype)


def _maxpool_kernel(p_ref, o_ref):
    # p_ref: (nwin, TT, 128) lane-dense window-stacked tiles; max over windows.
    o_ref[...] = jnp.max(p_ref[...], axis=0)


# ----------------------- pallas_call wrappers -----------------------

def conv_windows_matmul(a, w, b, residual=None, relu=True):
    """sum_g a[g] @ w[g] + b [+ residual] [ReLU], tiled over (M, Cout).

    a: (G, M, K) bf16, w: (G, K, Cout) bf16 (scale already folded),
    b: (1, Cout) f32, residual: (M, Cout) bf16 or None.
    """
    G, M, K = a.shape
    _, _, Cp = w.shape

    # TM=256 keeps an M-grid extent >= 2 on the big layers (v7x: 2 TCs);
    # smaller M collapses to one row tile (8-aligned).
    TM = min(256, _round_up(M, 8))
    Mp = _round_up(M, TM)
    # 256-wide output tiles for the 256-lane MXU (v6e/v7x) when widths allow;
    # small real widths stay unpadded (full-dim block is legal).
    if Cp <= 256:
        TC = Cp
    elif Cp % 256 == 0:
        TC = 256
    elif Cp % 128 == 0:
        TC = 128
    else:
        TC = Cp

    if Mp != M:
        a = jnp.pad(a, ((0, 0), (0, Mp - M), (0, 0)))
        if residual is not None:
            residual = jnp.pad(residual, ((0, Mp - M), (0, 0)))

    in_specs = [
        pl.BlockSpec((G, TM, K), lambda i, j: (0, i, 0)),
        pl.BlockSpec((G, K, TC), lambda i, j: (0, 0, j)),
        pl.BlockSpec((1, TC), lambda i, j: (0, j)),
    ]
    operands = [a, w, b]
    if residual is None:
        kernel = functools.partial(_conv_mm_kernel, nwin=G, relu=relu)
    else:
        in_specs.append(pl.BlockSpec((TM, TC), lambda i, j: (i, j)))
        operands.append(residual)
        kernel = functools.partial(_conv_mm_res_kernel, nwin=G, relu=relu)

    flops = 2 * Mp * G * K * Cp
    bytes_acc = (a.size + w.size + Mp * Cp) * 2 + b.size * 4
    if residual is not None:
        bytes_acc += residual.size * 2

    out = pl.pallas_call(
        kernel,
        out_shape=jax.ShapeDtypeStruct((Mp, Cp), jnp.bfloat16),
        grid=(Mp // TM, Cp // TC),
        in_specs=in_specs,
        out_specs=pl.BlockSpec((TM, TC), lambda i, j: (i, j)),
        compiler_params=pltpu.CompilerParams(
            dimension_semantics=("parallel", "parallel"),
            vmem_limit_bytes=_VMEM_LIMIT,
        ),
        cost_estimate=pl.CostEstimate(flops=flops, transcendentals=0,
                                      bytes_accessed=bytes_acc),
    )(*operands)
    return out[:M] if Mp != M else out


def maxpool_reduce(patches):
    """patches: (nwin, M, C) -> (M, C) max over windows, lane-dense tiles."""
    nwin, M, C = patches.shape
    total = M * C
    lanes = _round_up(pl.cdiv(total, 128), 8)   # rows of 128 lanes, 8-aligned
    TT = min(512, lanes)
    rows = _round_up(lanes, TT)
    total_pad = rows * 128

    p = patches.reshape(nwin, total)
    p = jnp.pad(p, ((0, 0), (0, total_pad - total)))
    p = p.reshape(nwin, rows, 128)

    out = pl.pallas_call(
        _maxpool_kernel,
        out_shape=jax.ShapeDtypeStruct((rows, 128), patches.dtype),
        grid=(rows // TT,),
        in_specs=[pl.BlockSpec((nwin, TT, 128), lambda i: (0, i, 0))],
        out_specs=pl.BlockSpec((TT, 128), lambda i: (i, 0)),
        compiler_params=pltpu.CompilerParams(
            dimension_semantics=("parallel",),
            vmem_limit_bytes=_VMEM_LIMIT,
        ),
    )(p)
    return out.reshape(total_pad)[:total].reshape(M, C)


# ----------------------- plain-JAX glue -----------------------

def extract_patches(x, kh, kw, stride, pad, pad_value=0.0):
    """x: (N,H,W,C) NHWC -> ((kh*kw, N, oh, ow, C) stacked windows, (oh, ow))."""
    if pad:
        x = jnp.pad(x, ((0, 0), (pad, pad), (pad, pad), (0, 0)),
                    constant_values=pad_value)
    N, H, W, C = x.shape
    oh = (H - kh) // stride + 1
    ow = (W - kw) // stride + 1
    cols = []
    for i in range(kh):
        for j in range(kw):
            cols.append(x[:, i:i + (oh - 1) * stride + 1:stride,
                          j:j + (ow - 1) * stride + 1:stride, :])
    return jnp.stack(cols, axis=0), (oh, ow)


def conv_bn(x, prep, kh, kw, stride, pad, relu=True, residual=None):
    """Conv2d + folded inference BN (+ optional residual, ReLU). x: NHWC bf16."""
    N, _, _, cin = x.shape
    patches, (oh, ow) = extract_patches(x, kh, kw, stride, pad, 0.0)
    M = N * oh * ow
    a = patches.reshape(kh * kw, M, cin)       # contiguous reshape (no copy)

    wq, bq = prep["w"], prep["b"]
    cout = wq.shape[-1]
    if wq.shape[0] != kh * kw:
        # Flattened-im2col path (conv1, cin=3): one lane-dense K=256 dot.
        kp = wq.shape[1]
        a = jnp.transpose(a, (1, 0, 2)).reshape(M, kh * kw * cin)
        a = jnp.pad(a, ((0, 0), (0, kp - kh * kw * cin)))[None]

    res = None if residual is None else residual.reshape(M, cout)
    y = conv_windows_matmul(a, wq, bq, residual=res, relu=relu)
    return y.reshape(N, oh, ow, cout)


def maxpool(x, k=3, stride=2, pad=1):
    neg = jnp.finfo(x.dtype).min   # PyTorch maxpool effectively pads with -inf
    patches, (oh, ow) = extract_patches(x, k, k, stride, pad, neg)
    N = x.shape[0]
    C = x.shape[-1]
    p = patches.reshape(k * k, N * oh * ow, C)
    return maxpool_reduce(p).reshape(N, oh, ow, C)


def basic_block(x, bp, stride):
    identity = x
    out = conv_bn(x, bp["conv1"], 3, 3, stride, 1, relu=True)
    if "down" in bp:
        identity = conv_bn(x, bp["down"], 1, 1, stride, 0, relu=False)
    out = conv_bn(out, bp["conv2"], 3, 3, 1, 1, relu=True, residual=identity)
    return out


def resnet_forward(x_nchw, params):
    # layout: NCHW in (PyTorch) -> NHWC bf16 internally -> NCHW f32 out.
    # Activations carried in bf16 (~1e-2 rel drift vs f32 PyTorch; inference OK).
    x = jnp.transpose(x_nchw, (0, 2, 3, 1)).astype(jnp.bfloat16)
    x = conv_bn(x, params["conv1"], 7, 7, stride=2, pad=3, relu=True)
    x = maxpool(x, k=3, stride=2, pad=1)
    for layer, first_stride in zip(params["layers"], (1, 2, 2, 2)):
        for bi, bp in enumerate(layer):
            x = basic_block(x, bp, stride=first_stride if bi == 0 else 1)
    # avgpool / fc_dim exist on the module but are unused in forward().
    return jnp.transpose(x, (0, 3, 1, 2)).astype(jnp.float32)


# ----------------------- parameter init & one-time prep -----------------------

def _conv_bn_params(key, kh, kw, cin, cout):
    kw_, kg, kb, km, kv = jax.random.split(key, 5)
    w = jax.random.normal(kw_, (kh, kw, cin, cout), jnp.float32) * (
        2.0 / (kh * kw * cin)) ** 0.5
    gamma = 1.0 + 0.1 * jax.random.normal(kg, (cout,), jnp.float32)
    beta = 0.1 * jax.random.normal(kb, (cout,), jnp.float32)
    mean = 0.1 * jax.random.normal(km, (cout,), jnp.float32)
    var = jnp.abs(1.0 + 0.1 * jax.random.normal(kv, (cout,), jnp.float32))
    scale = gamma / jnp.sqrt(var + 1e-5)  # folded inference BatchNorm
    bias = beta - mean * scale
    return {"w": w, "scale": scale, "bias": bias}


def init_params(key, in_ch=3, base=16, blocks=(2, 2, 2, 2)):
    keys = jax.random.split(key, 64)
    kidx = 0

    def nk():
        nonlocal kidx
        k = keys[kidx]
        kidx += 1
        return k

    params = {"conv1": _conv_bn_params(nk(), 7, 7, in_ch, base), "layers": []}
    cin = base
    for li, nb in enumerate(blocks):
        cout = base * (2 ** li)
        stride = 1 if li == 0 else 2
        layer = []
        for bi in range(nb):
            s = stride if bi == 0 else 1
            bcin = cin if bi == 0 else cout
            bp = {
                "conv1": _conv_bn_params(nk(), 3, 3, bcin, cout),
                "conv2": _conv_bn_params(nk(), 3, 3, cout, cout),
            }
            if s != 1 or bcin != cout:
                bp["down"] = _conv_bn_params(nk(), 1, 1, bcin, cout)
            layer.append(bp)
        params["layers"].append(layer)
        cin = cout
    return params


def _prepare_conv(p):
    """Fold BN scale into the weights once, reshape/cast for the kernel."""
    w = p["w"]                                  # (kh, kw, cin, cout) f32
    kh, kw, cin, cout = w.shape
    w = w * p["scale"]                          # fold scale (f32)
    b = p["bias"].reshape(1, cout).astype(jnp.float32)
    if cin < 8 and kh * kw > 1:
        # conv1: flatten windows*cin into one lane-dense K (147 -> 256).
        k = kh * kw * cin
        kp = _round_up(k, 128)
        wq = jnp.pad(w.reshape(k, cout), ((0, kp - k), (0, 0)))[None]
    else:
        wq = w.reshape(kh * kw, cin, cout)      # window-folded K
    return {"w": wq.astype(jnp.bfloat16), "b": b}


def prepare_params(raw):
    prepped = {"conv1": _prepare_conv(raw["conv1"]), "layers": []}
    for layer in raw["layers"]:
        new_layer = []
        for bp in layer:
            q = {"conv1": _prepare_conv(bp["conv1"]),
                 "conv2": _prepare_conv(bp["conv2"])}
            if "down" in bp:
                q["down"] = _prepare_conv(bp["down"])
            new_layer.append(q)
        prepped["layers"].append(new_layer)
    return prepped


if __name__ == "__main__":
    key = jax.random.PRNGKey(0)
    kx, kp = jax.random.split(key)
    x = jax.random.normal(kx, (2, 3, 32, 32), jnp.float32)  # NCHW like PyTorch
    params = prepare_params(init_params(kp, in_ch=3, base=16))
    fwd = jax.jit(resnet_forward)
    out = jax.block_until_ready(fwd(x, params))
    assert out.shape == (2, 128, 1, 1), out.shape  # (N, base*8, H/32, W/32)
    assert bool(jnp.all(jnp.isfinite(out)))
    print("KERNEL_OK")
</pallas_src>

<mosaic_0001>
module attributes {stable_mosaic.version = 11 : i64} {
  func.func @_conv_mm_kernel(%arg0: i32, %arg1: i32, %arg2: memref<1x256x256xbf16, #tpu.memory_space<vmem>>, %arg3: memref<1x256x16xbf16, #tpu.memory_space<vmem>>, %arg4: memref<1x16xf32, #tpu.memory_space<vmem>>, %arg5: memref<256x16xbf16, #tpu.memory_space<vmem>>) attributes {dimension_semantics = [#tpu.dimension_semantics<parallel>, #tpu.dimension_semantics<parallel>], iteration_bounds = array<i64: 2, 1>, scalar_prefetch = 0 : i64, scratch_operands = 0 : i64, tpu.core_type = #tpu.core_type<tc>, window_params = [{transform_indices = @transform_0, window_bounds = array<i64: 1, 256, 256>}, {transform_indices = @transform_1, window_bounds = array<i64: 1, 256, 16>}, {transform_indices = @transform_2, window_bounds = array<i64: 1, 16>}, {transform_indices = @transform_3, window_bounds = array<i64: 256, 16>}]} {
    %c0 = arith.constant 0 : index
    %c0_0 = arith.constant 0 : index
    %c0_1 = arith.constant 0 : index
    %0 = vector.load %arg2[%c0, %c0_0, %c0_1] : memref<1x256x256xbf16, #tpu.memory_space<vmem>>, vector<1x256x256xbf16>
    %1 = vector.shape_cast %0 : vector<1x256x256xbf16> to vector<256x256xbf16>
    %c0_2 = arith.constant 0 : index
    %c0_3 = arith.constant 0 : index
    %c0_4 = arith.constant 0 : index
    %2 = vector.load %arg3[%c0_2, %c0_3, %c0_4] : memref<1x256x16xbf16, #tpu.memory_space<vmem>>, vector<1x256x16xbf16>
    %3 = vector.shape_cast %2 : vector<1x256x16xbf16> to vector<256x16xbf16>
    %cst = arith.constant dense<0.000000e+00> : vector<256x16xf32>
    %4 = tpu.matmul %1, %3, %cst {dimension_numbers = #tpu.dot_dimension_numbers<[1], [0], [0], [1], [0, 0, 1, 1], [], []>} : vector<256x256xbf16>, vector<256x16xbf16>, vector<256x16xf32> -> vector<256x16xf32>
    %c0_5 = arith.constant 0 : index
    %c0_6 = arith.constant 0 : index
    %5 = vector.load %arg4[%c0_5, %c0_6] : memref<1x16xf32, #tpu.memory_space<vmem>>, vector<1x16xf32>
    %6 = vector.broadcast %5 : vector<1x16xf32> to vector<256x16xf32>
    %7 = arith.addf %4, %6 : vector<256x16xf32>
    %cst_7 = arith.constant 0.000000e+00 : f32
    %8 = vector.broadcast %cst_7 : f32 to vector<256x16xf32>
    %9 = arith.maximumf %7, %8 : vector<256x16xf32>
    %10 = arith.truncf %9 : vector<256x16xf32> to vector<256x16xbf16>
    %c0_8 = arith.constant 0 : index
    %c0_9 = arith.constant 0 : index
    %11 = vector.load %arg5[%c0_8, %c0_9] : memref<256x16xbf16, #tpu.memory_space<vmem>>, vector<256x16xbf16>
    tpu.vector_store %arg5[%c0_8, %c0_9], %10 {strides = array<i32>} : memref<256x16xbf16, #tpu.memory_space<vmem>>, vector<256x16xbf16>,
    return
  }
  func.func @transform_0(%arg0: i32, %arg1: i32) -> (i32, i32, i32) {
    %c0_i32 = arith.constant 0 : i32
    %c0_i32_0 = arith.constant 0 : i32
    %c0_i32_1 = arith.constant 0 : i32
    return %c0_i32, %arg0, %c0_i32_0 : i32, i32, i32
  }
  func.func @transform_1(%arg0: i32, %arg1: i32) -> (i32, i32, i32) {
    %c0_i32 = arith.constant 0 : i32
    %c0_i32_0 = arith.constant 0 : i32
    %c0_i32_1 = arith.constant 0 : i32
    return %c0_i32, %c0_i32_0, %arg1 : i32, i32, i32
  }
  func.func @transform_2(%arg0: i32, %arg1: i32) -> (i32, i32) {
    %c0_i32 = arith.constant 0 : i32
    %c0_i32_0 = arith.constant 0 : i32
    return %c0_i32, %arg1 : i32, i32
  }
  func.func @transform_3(%arg0: i32, %arg1: i32) -> (i32, i32) {
    %c0_i32 = arith.constant 0 : i32
    return %arg0, %arg1 : i32, i32
  }
}

module attributes {stable_mosaic.version = 11 : i64} {
  func.func @_maxpool_kernel(%arg0: i32, %arg1: memref<9x16x128xbf16, #tpu.memory_space<vmem>>, %arg2: memref<16x128xbf16, #tpu.memory_space<vmem>>) attributes {dimension_semantics = [#tpu.dimension_semantics<parallel>], iteration_bounds = array<i64: 1>, scalar_prefetch = 0 : i64, scratch_operands = 0 : i64, tpu.core_type = #tpu.core_type<tc>, window_params = [{transform_indices = @transform_0, window_bounds = array<i64: 9, 16, 128>}, {transform_indices = @transform_1, window_bounds = array<i64: 16, 128>}]} {
    %c0 = arith.constant 0 : index
    %c0_0 = arith.constant 0 : index
    %c0_1 = arith.constant 0 : index
    %0 = vector.load %arg1[%c0, %c0_0, %c0_1] : memref<9x16x128xbf16, #tpu.memory_space<vmem>>, vector<9x16x128xbf16>
    %cst = arith.constant dense<0xFF80> : vector<16x128xbf16>
    %1 = vector.multi_reduction <maximumf>, %0, %cst [0] : vector<9x16x128xbf16> to vector<16x128xbf16>
    %c0_2 = arith.constant 0 : index
    %c0_3 = arith.constant 0 : index
    %2 = vector.load %arg2[%c0_2, %c0_3] : memref<16x128xbf16, #tpu.memory_space<vmem>>, vector<16x128xbf16>
    tpu.vector_store %arg2[%c0_2, %c0_3], %1 {strides = array<i32>} : memref<16x128xbf16, #tpu.memory_space<vmem>>, vector<16x128xbf16>,
    return
  }
  func.func @transform_0(%arg0: i32) -> (i32, i32, i32) {
    %c0_i32 = arith.constant 0 : i32
    %c0_i32_0 = arith.constant 0 : i32
    %c0_i32_1 = arith.constant 0 : i32
    return %c0_i32, %arg0, %c0_i32_0 : i32, i32, i32
  }
  func.func @transform_1(%arg0: i32) -> (i32, i32) {
    %c0_i32 = arith.constant 0 : i32
    %c0_i32_0 = arith.constant 0 : i32
    return %arg0, %c0_i32 : i32, i32
  }
}

module attributes {stable_mosaic.version = 11 : i64} {
  func.func @_conv_mm_kernel(%arg0: i32, %arg1: i32, %arg2: memref<9x128x16xbf16, #tpu.memory_space<vmem>>, %arg3: memref<9x16x16xbf16, #tpu.memory_space<vmem>>, %arg4: memref<1x16xf32, #tpu.memory_space<vmem>>, %arg5: memref<128x16xbf16, #tpu.memory_space<vmem>>) attributes {dimension_semantics = [#tpu.dimension_semantics<parallel>, #tpu.dimension_semantics<parallel>], iteration_bounds = array<i64: 1, 1>, scalar_prefetch = 0 : i64, scratch_operands = 0 : i64, tpu.core_type = #tpu.core_type<tc>, window_params = [{transform_indices = @transform_0, window_bounds = array<i64: 9, 128, 16>}, {transform_indices = @transform_1, window_bounds = array<i64: 9, 16, 16>}, {transform_indices = @transform_2, window_bounds = array<i64: 1, 16>}, {transform_indices = @transform_3, window_bounds = array<i64: 128, 16>}]} {
    %c0 = arith.constant 0 : index
    %c0_0 = arith.constant 0 : index
    %c0_1 = arith.constant 0 : index
    %0 = vector.load %arg2[%c0, %c0_0, %c0_1] : memref<9x128x16xbf16, #tpu.memory_space<vmem>>, vector<1x128x16xbf16>
    %1 = vector.shape_cast %0 : vector<1x128x16xbf16> to vector<128x16xbf16>
    %c0_2 = arith.constant 0 : index
    %c0_3 = arith.constant 0 : index
    %c0_4 = arith.constant 0 : index
    %2 = vector.load %arg3[%c0_2, %c0_3, %c0_4] : memref<9x16x16xbf16, #tpu.memory_space<vmem>>, vector<1x16x16xbf16>
    %3 = vector.shape_cast %2 : vector<1x16x16xbf16> to vector<16x16xbf16>
    %cst = arith.constant dense<0.000000e+00> : vector<128x16xf32>
    %4 = tpu.matmul %1, %3, %cst {dimension_numbers = #tpu.dot_dimension_numbers<[1], [0], [0], [1], [0, 0, 1, 1], [], []>} : vector<128x16xbf16>, vector<16x16xbf16>, vector<128x16xf32> -> vector<128x16xf32>
    %c1 = arith.constant 1 : index
    %c0_5 = arith.constant 0 : index
    %c0_6 = arith.constant 0 : index
    %5 = vector.load %arg2[%c1, %c0_5, %c0_6] : memref<9x128x16xbf16, #tpu.memory_space<vmem>>, vector<1x128x16xbf16>
    %6 = vector.shape_cast %5 : vector<1x128x16xbf16> to vector<128x16xbf16>
    %c1_7 = arith.constant 1 : index
    %c0_8 = arith.constant 0 : index
    %c0_9 = arith.constant 0 : index
    %7 = vector.load %arg3[%c1_7, %c0_8, %c0_9] : memref<9x16x16xbf16, #tpu.memory_space<vmem>>, vector<1x16x16xbf16>
    %8 = vector.shape_cast %7 : vector<1x16x16xbf16> to vector<16x16xbf16>
    %cst_10 = arith.constant dense<0.000000e+00> : vector<128x16xf32>
    %9 = tpu.matmul %6, %8, %cst_10 {dimension_numbers = #tpu.dot_dimension_numbers<[1], [0], [0], [1], [0, 0, 1, 1], [], []>} : vector<128x16xbf16>, vector<16x16xbf16>, vector<128x16xf32> -> vector<128x16xf32>
    %10 = arith.addf %4, %9 : vector<128x16xf32>
    %c2 = arith.constant 2 : index
    %c0_11 = arith.constant 0 : index
    %c0_12 = arith.constant 0 : index
    %11 = vector.load %arg2[%c2, %c0_11, %c0_12] : memref<9x128x16xbf16, #tpu.memory_space<vmem>>, vector<1x128x16xbf16>
    %12 = vector.shape_cast %11 : vector<1x128x16xbf16> to vector<128x16xbf16>
    %c2_13 = arith.constant 2 : index
    %c0_14 = arith.constant 0 : index
    %c0_15 = arith.constant 0 : index
    %13 = vector.load %arg3[%c2_13, %c0_14, %c0_15] : memref<9x16x16xbf16, #tpu.memory_space<vmem>>, vector<1x16x16xbf16>
    %14 = vector.shape_cast %13 : vector<1x16x16xbf16> to vector<16x16xbf16>
    %cst_16 = arith.constant dense<0.000000e+00> : vector<128x16xf32>
    %15 = tpu.matmul %12, %14, %cst_16 {dimension_numbers = #tpu.dot_dimension_numbers<[1], [0], [0], [1], [0, 0, 1, 1], [], []>} : vector<128x16xbf16>, vector<16x16xbf16>, vector<128x16xf32> -> vector<128x16xf32>
    %16 = arith.addf %10, %15 : vector<128x16xf32>
    %c3 = arith.constant 3 : index
    %c0_17 = arith.constant 0 : index
    %c0_18 = arith.constant 0 : index
    %17 = vector.load %arg2[%c3, %c0_17, %c0_18] : memref<9x128x16xbf16, #tpu.memory_space<vmem>>, vector<1x128x16xbf16>
    %18 = vector.shape_cast %17 : vector<1x128x16xbf16> to vector<128x16xbf16>
    %c3_19 = arith.constant 3 : index
    %c0_20 = arith.constant 0 : index
    %c0_21 = arith.constant 0 : index
    %19 = vector.load %arg3[%c3_19, %c0_20, %c0_21] : memref<9x16x16xbf16, #tpu.memory_space<vmem>>, vector<1x16x16xbf16>
    %20 = vector.shape_cast %19 : vector<1x16x16xbf16> to vector<16x16xbf16>
    %cst_22 = arith.constant dense<0.000000e+00> : vector<128x16xf32>
    %21 = tpu.matmul %18, %20, %cst_22 {dimension_numbers = #tpu.dot_dimension_numbers<[1], [0], [0], [1], [0, 0, 1, 1], [], []>} : vector<128x16xbf16>, vector<16x16xbf16>, vector<128x16xf32> -> vector<128x16xf32>
    %22 = arith.addf %16, %21 : vector<128x16xf32>
    %c4 = arith.constant 4 : index
    %c0_23 = arith.constant 0 : index
    %c0_24 = arith.constant 0 : index
    %23 = vector.load %arg2[%c4, %c0_23, %c0_24] : memref<9x128x16xbf16, #tpu.memory_space<vmem>>, vector<1x128x16xbf16>
    %24 = vector.shape_cast %23 : vector<1x128x16xbf16> to vector<128x16xbf16>
    %c4_25 = arith.constant 4 : index
    %c0_26 = arith.constant 0 : index
    %c0_27 = arith.constant 0 : index
    %25 = vector.load %arg3[%c4_25, %c0_26, %c0_27] : memref<9x16x16xbf16, #tpu.memory_space<vmem>>, vector<1x16x16xbf16>
    %26 = vector.shape_cast %25 : vector<1x16x16xbf16> to vector<16x16xbf16>
    %cst_28 = arith.constant dense<0.000000e+00> : vector<128x16xf32>
    %27 = tpu.matmul %24, %26, %cst_28 {dimension_numbers = #tpu.dot_dimension_numbers<[1], [0], [0], [1], [0, 0, 1, 1], [], []>} : vector<128x16xbf16>, vector<16x16xbf16>, vector<128x16xf32> -> vector<128x16xf32>
    %28 = arith.addf %22, %27 : vector<128x16xf32>
    %c5 = arith.constant 5 : index
    %c0_29 = arith.constant 0 : index
    %c0_30 = arith.constant 0 : index
    %29 = vector.load %arg2[%c5, %c0_29, %c0_30] : memref<9x128x16xbf16, #tpu.memory_space<vmem>>, vector<1x128x16xbf16>
    %30 = vector.shape_cast %29 : vector<1x128x16xbf16> to vector<128x16xbf16>
    %c5_31 = arith.constant 5 : index
    %c0_32 = arith.constant 0 : index
    %c0_33 = arith.constant 0 : index
    %31 = vector.load %arg3[%c5_31, %c0_32, %c0_33] : memref<9x16x16xbf16, #tpu.memory_space<vmem>>, vector<1x16x16xbf16>
    %32 = vector.shape_cast %31 : vector<1x16x16xbf16> to vector<16x16xbf16>
    %cst_34 = arith.constant dense<0.000000e+00> : vector<128x16xf32>
    %33 = tpu.matmul %30, %32, %cst_34 {dimension_numbers = #tpu.dot_dimension_numbers<[1], [0], [0], [1], [0, 0, 1, 1], [], []>} : vector<128x16xbf16>, vector<16x16xbf16>, vector<128x16xf32> -> vector<128x16xf32>
    %34 = arith.addf %28, %33 : vector<128x16xf32>
    %c6 = arith.constant 6 : index
    %c0_35 = arith.constant 0 : index
    %c0_36 = arith.constant 0 : index
    %35 = vector.load %arg2[%c6, %c0_35, %c0_36] : memref<9x128x16xbf16, #tpu.memory_space<vmem>>, vector<1x128x16xbf16>
    %36 = vector.shape_cast %35 : vector<1x128x16xbf16> to vector<128x16xbf16>
    %c6_37 = arith.constant 6 : index
    %c0_38 = arith.constant 0 : index
    %c0_39 = arith.constant 0 : index
    %37 = vector.load %arg3[%c6_37, %c0_38, %c0_39] : memref<9x16x16xbf16, #tpu.memory_space<vmem>>, vector<1x16x16xbf16>
    %38 = vector.shape_cast %37 : vector<1x16x16xbf16> to vector<16x16xbf16>
    %cst_40 = arith.constant dense<0.000000e+00> : vector<128x16xf32>
    %39 = tpu.matmul %36, %38, %cst_40 {dimension_numbers = #tpu.dot_dimension_numbers<[1], [0], [0], [1], [0, 0, 1, 1], [], []>} : vector<128x16xbf16>, vector<16x16xbf16>, vector<128x16xf32> -> vector<128x16xf32>
    %40 = arith.addf %34, %39 : vector<128x16xf32>
    %c7 = arith.constant 7 : index
    %c0_41 = arith.constant 0 : index
    %c0_42 = arith.constant 0 : index
    %41 = vector.load %arg2[%c7, %c0_41, %c0_42] : memref<9x128x16xbf16, #tpu.memory_space<vmem>>, vector<1x128x16xbf16>
    %42 = vector.shape_cast %41 : vector<1x128x16xbf16> to vector<128x16xbf16>
    %c7_43 = arith.constant 7 : index
    %c0_44 = arith.constant 0 : index
    %c0_45 = arith.constant 0 : index
    %43 = vector.load %arg3[%c7_43, %c0_44, %c0_45] : memref<9x16x16xbf16, #tpu.memory_space<vmem>>, vector<1x16x16xbf16>
    %44 = vector.shape_cast %43 : vector<1x16x16xbf16> to vector<16x16xbf16>
    %cst_46 = arith.constant dense<0.000000e+00> : vector<128x16xf32>
    %45 = tpu.matmul %42, %44, %cst_46 {dimension_numbers = #tpu.dot_dimension_numbers<[1], [0], [0], [1], [0, 0, 1, 1], [], []>} : vector<128x16xbf16>, vector<16x16xbf16>, vector<128x16xf32> -> vector<128x16xf32>
    %46 = arith.addf %40, %45 : vector<128x16xf32>
    %c8 = arith.constant 8 : index
    %c0_47 = arith.constant 0 : index
    %c0_48 = arith.constant 0 : index
    %47 = vector.load %arg2[%c8, %c0_47, %c0_48] : memref<9x128x16xbf16, #tpu.memory_space<vmem>>, vector<1x128x16xbf16>
    %48 = vector.shape_cast %47 : vector<1x128x16xbf16> to vector<128x16xbf16>
    %c8_49 = arith.constant 8 : index
    %c0_50 = arith.constant 0 : index
    %c0_51 = arith.constant 0 : index
    %49 = vector.load %arg3[%c8_49, %c0_50, %c0_51] : memref<9x16x16xbf16, #tpu.memory_space<vmem>>, vector<1x16x16xbf16>
    %50 = vector.shape_cast %49 : vector<1x16x16xbf16> to vector<16x16xbf16>
    %cst_52 = arith.constant dense<0.000000e+00> : vector<128x16xf32>
    %51 = tpu.matmul %48, %50, %cst_52 {dimension_numbers = #tpu.dot_dimension_numbers<[1], [0], [0], [1], [0, 0, 1, 1], [], []>} : vector<128x16xbf16>, vector<16x16xbf16>, vector<128x16xf32> -> vector<128x16xf32>
    %52 = arith.addf %46, %51 : vector<128x16xf32>
    %c0_53 = arith.constant 0 : index
    %c0_54 = arith.constant 0 : index
    %53 = vector.load %arg4[%c0_53, %c0_54] : memref<1x16xf32, #tpu.memory_space<vmem>>, vector<1x16xf32>
    %54 = vector.broadcast %53 : vector<1x16xf32> to vector<128x16xf32>
    %55 = arith.addf %52, %54 : vector<128x16xf32>
    %cst_55 = arith.constant 0.000000e+00 : f32
    %56 = vector.broadcast %cst_55 : f32 to vector<128x16xf32>
    %57 = arith.maximumf %55, %56 : vector<128x16xf32>
    %58 = arith.truncf %57 : vector<128x16xf32> to vector<128x16xbf16>
    %c0_56 = arith.constant 0 : index
    %c0_57 = arith.constant 0 : index
    %59 = vector.load %arg5[%c0_56, %c0_57] : memref<128x16xbf16, #tpu.memory_space<vmem>>, vector<128x16xbf16>
    tpu.vector_store %arg5[%c0_56, %c0_57], %58 {strides = array<i32>} : memref<128x16xbf16, #tpu.memory_space<vmem>>, vector<128x16xbf16>,
    return
  }
  func.func @transform_0(%arg0: i32, %arg1: i32) -> (i32, i32, i32) {
    %c0_i32 = arith.constant 0 : i32
    %c0_i32_0 = arith.constant 0 : i32
    %c0_i32_1 = arith.constant 0 : i32
    return %c0_i32, %arg0, %c0_i32_0 : i32, i32, i32
  }
  func.func @transform_1(%arg0: i32, %arg1: i32) -> (i32, i32, i32) {
    %c0_i32 = arith.constant 0 : i32
    %c0_i32_0 = arith.constant 0 : i32
    %c0_i32_1 = arith.constant 0 : i32
    return %c0_i32, %c0_i32_0, %arg1 : i32, i32, i32
  }
  func.func @transform_2(%arg0: i32, %arg1: i32) -> (i32, i32) {
    %c0_i32 = arith.constant 0 : i32
    %c0_i32_0 = arith.constant 0 : i32
    return %c0_i32, %arg1 : i32, i32
  }
  func.func @transform_3(%arg0: i32, %arg1: i32) -> (i32, i32) {
    %c0_i32 = arith.constant 0 : i32
    return %arg0, %arg1 : i32, i32
  }
}

module attributes {stable_mosaic.version = 11 : i64} {
  func.func @_conv_mm_res_kernel(%arg0: i32, %arg1: i32, %arg2: memref<9x128x16xbf16, #tpu.memory_space<vmem>>, %arg3: memref<9x16x16xbf16, #tpu.memory_space<vmem>>, %arg4: memref<1x16xf32, #tpu.memory_space<vmem>>, %arg5: memref<128x16xbf16, #tpu.memory_space<vmem>>, %arg6: memref<128x16xbf16, #tpu.memory_space<vmem>>) attributes {dimension_semantics = [#tpu.dimension_semantics<parallel>, #tpu.dimension_semantics<parallel>], iteration_bounds = array<i64: 1, 1>, scalar_prefetch = 0 : i64, scratch_operands = 0 : i64, tpu.core_type = #tpu.core_type<tc>, window_params = [{transform_indices = @transform_0, window_bounds = array<i64: 9, 128, 16>}, {transform_indices = @transform_1, window_bounds = array<i64: 9, 16, 16>}, {transform_indices = @transform_2, window_bounds = array<i64: 1, 16>}, {transform_indices = @transform_3, window_bounds = array<i64: 128, 16>}, {transform_indices = @transform_4, window_bounds = array<i64: 128, 16>}]} {
    %c0 = arith.constant 0 : index
    %c0_0 = arith.constant 0 : index
    %c0_1 = arith.constant 0 : index
    %0 = vector.load %arg2[%c0, %c0_0, %c0_1] : memref<9x128x16xbf16, #tpu.memory_space<vmem>>, vector<1x128x16xbf16>
    %1 = vector.shape_cast %0 : vector<1x128x16xbf16> to vector<128x16xbf16>
    %c0_2 = arith.constant 0 : index
    %c0_3 = arith.constant 0 : index
    %c0_4 = arith.constant 0 : index
    %2 = vector.load %arg3[%c0_2, %c0_3, %c0_4] : memref<9x16x16xbf16, #tpu.memory_space<vmem>>, vector<1x16x16xbf16>
    %3 = vector.shape_cast %2 : vector<1x16x16xbf16> to vector<16x16xbf16>
    %cst = arith.constant dense<0.000000e+00> : vector<128x16xf32>
    %4 = tpu.matmul %1, %3, %cst {dimension_numbers = #tpu.dot_dimension_numbers<[1], [0], [0], [1], [0, 0, 1, 1], [], []>} : vector<128x16xbf16>, vector<16x16xbf16>, vector<128x16xf32> -> vector<128x16xf32>
    %c1 = arith.constant 1 : index
    %c0_5 = arith.constant 0 : index
    %c0_6 = arith.constant 0 : index
    %5 = vector.load %arg2[%c1, %c0_5, %c0_6] : memref<9x128x16xbf16, #tpu.memory_space<vmem>>, vector<1x128x16xbf16>
    %6 = vector.shape_cast %5 : vector<1x128x16xbf16> to vector<128x16xbf16>
    %c1_7 = arith.constant 1 : index
    %c0_8 = arith.constant 0 : index
    %c0_9 = arith.constant 0 : index
    %7 = vector.load %arg3[%c1_7, %c0_8, %c0_9] : memref<9x16x16xbf16, #tpu.memory_space<vmem>>, vector<1x16x16xbf16>
    %8 = vector.shape_cast %7 : vector<1x16x16xbf16> to vector<16x16xbf16>
    %cst_10 = arith.constant dense<0.000000e+00> : vector<128x16xf32>
    %9 = tpu.matmul %6, %8, %cst_10 {dimension_numbers = #tpu.dot_dimension_numbers<[1], [0], [0], [1], [0, 0, 1, 1], [], []>} : vector<128x16xbf16>, vector<16x16xbf16>, vector<128x16xf32> -> vector<128x16xf32>
    %10 = arith.addf %4, %9 : vector<128x16xf32>
    %c2 = arith.constant 2 : index
    %c0_11 = arith.constant 0 : index
    %c0_12 = arith.constant 0 : index
    %11 = vector.load %arg2[%c2, %c0_11, %c0_12] : memref<9x128x16xbf16, #tpu.memory_space<vmem>>, vector<1x128x16xbf16>
    %12 = vector.shape_cast %11 : vector<1x128x16xbf16> to vector<128x16xbf16>
    %c2_13 = arith.constant 2 : index
    %c0_14 = arith.constant 0 : index
    %c0_15 = arith.constant 0 : index
    %13 = vector.load %arg3[%c2_13, %c0_14, %c0_15] : memref<9x16x16xbf16, #tpu.memory_space<vmem>>, vector<1x16x16xbf16>
    %14 = vector.shape_cast %13 : vector<1x16x16xbf16> to vector<16x16xbf16>
    %cst_16 = arith.constant dense<0.000000e+00> : vector<128x16xf32>
    %15 = tpu.matmul %12, %14, %cst_16 {dimension_numbers = #tpu.dot_dimension_numbers<[1], [0], [0], [1], [0, 0, 1, 1], [], []>} : vector<128x16xbf16>, vector<16x16xbf16>, vector<128x16xf32> -> vector<128x16xf32>
    %16 = arith.addf %10, %15 : vector<128x16xf32>
    %c3 = arith.constant 3 : index
    %c0_17 = arith.constant 0 : index
    %c0_18 = arith.constant 0 : index
    %17 = vector.load %arg2[%c3, %c0_17, %c0_18] : memref<9x128x16xbf16, #tpu.memory_space<vmem>>, vector<1x128x16xbf16>
    %18 = vector.shape_cast %17 : vector<1x128x16xbf16> to vector<128x16xbf16>
    %c3_19 = arith.constant 3 : index
    %c0_20 = arith.constant 0 : index
    %c0_21 = arith.constant 0 : index
    %19 = vector.load %arg3[%c3_19, %c0_20, %c0_21] : memref<9x16x16xbf16, #tpu.memory_space<vmem>>, vector<1x16x16xbf16>
    %20 = vector.shape_cast %19 : vector<1x16x16xbf16> to vector<16x16xbf16>
    %cst_22 = arith.constant dense<0.000000e+00> : vector<128x16xf32>
    %21 = tpu.matmul %18, %20, %cst_22 {dimension_numbers = #tpu.dot_dimension_numbers<[1], [0], [0], [1], [0, 0, 1, 1], [], []>} : vector<128x16xbf16>, vector<16x16xbf16>, vector<128x16xf32> -> vector<128x16xf32>
    %22 = arith.addf %16, %21 : vector<128x16xf32>
    %c4 = arith.constant 4 : index
    %c0_23 = arith.constant 0 : index
    %c0_24 = arith.constant 0 : index
    %23 = vector.load %arg2[%c4, %c0_23, %c0_24] : memref<9x128x16xbf16, #tpu.memory_space<vmem>>, vector<1x128x16xbf16>
    %24 = vector.shape_cast %23 : vector<1x128x16xbf16> to vector<128x16xbf16>
    %c4_25 = arith.constant 4 : index
    %c0_26 = arith.constant 0 : index
    %c0_27 = arith.constant 0 : index
    %25 = vector.load %arg3[%c4_25, %c0_26, %c0_27] : memref<9x16x16xbf16, #tpu.memory_space<vmem>>, vector<1x16x16xbf16>
    %26 = vector.shape_cast %25 : vector<1x16x16xbf16> to vector<16x16xbf16>
    %cst_28 = arith.constant dense<0.000000e+00> : vector<128x16xf32>
    %27 = tpu.matmul %24, %26, %cst_28 {dimension_numbers = #tpu.dot_dimension_numbers<[1], [0], [0], [1], [0, 0, 1, 1], [], []>} : vector<128x16xbf16>, vector<16x16xbf16>, vector<128x16xf32> -> vector<128x16xf32>
    %28 = arith.addf %22, %27 : vector<128x16xf32>
    %c5 = arith.constant 5 : index
    %c0_29 = arith.constant 0 : index
    %c0_30 = arith.constant 0 : index
    %29 = vector.load %arg2[%c5, %c0_29, %c0_30] : memref<9x128x16xbf16, #tpu.memory_space<vmem>>, vector<1x128x16xbf16>
    %30 = vector.shape_cast %29 : vector<1x128x16xbf16> to vector<128x16xbf16>
    %c5_31 = arith.constant 5 : index
    %c0_32 = arith.constant 0 : index
    %c0_33 = arith.constant 0 : index
    %31 = vector.load %arg3[%c5_31, %c0_32, %c0_33] : memref<9x16x16xbf16, #tpu.memory_space<vmem>>, vector<1x16x16xbf16>
    %32 = vector.shape_cast %31 : vector<1x16x16xbf16> to vector<16x16xbf16>
    %cst_34 = arith.constant dense<0.000000e+00> : vector<128x16xf32>
    %33 = tpu.matmul %30, %32, %cst_34 {dimension_numbers = #tpu.dot_dimension_numbers<[1], [0], [0], [1], [0, 0, 1, 1], [], []>} : vector<128x16xbf16>, vector<16x16xbf16>, vector<128x16xf32> -> vector<128x16xf32>
    %34 = arith.addf %28, %33 : vector<128x16xf32>
    %c6 = arith.constant 6 : index
    %c0_35 = arith.constant 0 : index
    %c0_36 = arith.constant 0 : index
    %35 = vector.load %arg2[%c6, %c0_35, %c0_36] : memref<9x128x16xbf16, #tpu.memory_space<vmem>>, vector<1x128x16xbf16>
    %36 = vector.shape_cast %35 : vector<1x128x16xbf16> to vector<128x16xbf16>
    %c6_37 = arith.constant 6 : index
    %c0_38 = arith.constant 0 : index
    %c0_39 = arith.constant 0 : index
    %37 = vector.load %arg3[%c6_37, %c0_38, %c0_39] : memref<9x16x16xbf16, #tpu.memory_space<vmem>>, vector<1x16x16xbf16>
    %38 = vector.shape_cast %37 : vector<1x16x16xbf16> to vector<16x16xbf16>
    %cst_40 = arith.constant dense<0.000000e+00> : vector<128x16xf32>
    %39 = tpu.matmul %36, %38, %cst_40 {dimension_numbers = #tpu.dot_dimension_numbers<[1], [0], [0], [1], [0, 0, 1, 1], [], []>} : vector<128x16xbf16>, vector<16x16xbf16>, vector<128x16xf32> -> vector<128x16xf32>
    %40 = arith.addf %34, %39 : vector<128x16xf32>
    %c7 = arith.constant 7 : index
    %c0_41 = arith.constant 0 : index
    %c0_42 = arith.constant 0 : index
    %41 = vector.load %arg2[%c7, %c0_41, %c0_42] : memref<9x128x16xbf16, #tpu.memory_space<vmem>>, vector<1x128x16xbf16>
    %42 = vector.shape_cast %41 : vector<1x128x16xbf16> to vector<128x16xbf16>
    %c7_43 = arith.constant 7 : index
    %c0_44 = arith.constant 0 : index
    %c0_45 = arith.constant 0 : index
    %43 = vector.load %arg3[%c7_43, %c0_44, %c0_45] : memref<9x16x16xbf16, #tpu.memory_space<vmem>>, vector<1x16x16xbf16>
    %44 = vector.shape_cast %43 : vector<1x16x16xbf16> to vector<16x16xbf16>
    %cst_46 = arith.constant dense<0.000000e+00> : vector<128x16xf32>
    %45 = tpu.matmul %42, %44, %cst_46 {dimension_numbers = #tpu.dot_dimension_numbers<[1], [0], [0], [1], [0, 0, 1, 1], [], []>} : vector<128x16xbf16>, vector<16x16xbf16>, vector<128x16xf32> -> vector<128x16xf32>
    %46 = arith.addf %40, %45 : vector<128x16xf32>
    %c8 = arith.constant 8 : index
    %c0_47 = arith.constant 0 : index
    %c0_48 = arith.constant 0 : index
    %47 = vector.load %arg2[%c8, %c0_47, %c0_48] : memref<9x128x16xbf16, #tpu.memory_space<vmem>>, vector<1x128x16xbf16>
    %48 = vector.shape_cast %47 : vector<1x128x16xbf16> to vector<128x16xbf16>
    %c8_49 = arith.constant 8 : index
    %c0_50 = arith.constant 0 : index
    %c0_51 = arith.constant 0 : index
    %49 = vector.load %arg3[%c8_49, %c0_50, %c0_51] : memref<9x16x16xbf16, #tpu.memory_space<vmem>>, vector<1x16x16xbf16>
    %50 = vector.shape_cast %49 : vector<1x16x16xbf16> to vector<16x16xbf16>
    %cst_52 = arith.constant dense<0.000000e+00> : vector<128x16xf32>
    %51 = tpu.matmul %48, %50, %cst_52 {dimension_numbers = #tpu.dot_dimension_numbers<[1], [0], [0], [1], [0, 0, 1, 1], [], []>} : vector<128x16xbf16>, vector<16x16xbf16>, vector<128x16xf32> -> vector<128x16xf32>
    %52 = arith.addf %46, %51 : vector<128x16xf32>
    %c0_53 = arith.constant 0 : index
    %c0_54 = arith.constant 0 : index
    %53 = vector.load %arg4[%c0_53, %c0_54] : memref<1x16xf32, #tpu.memory_space<vmem>>, vector<1x16xf32>
    %54 = vector.broadcast %53 : vector<1x16xf32> to vector<128x16xf32>
    %55 = arith.addf %52, %54 : vector<128x16xf32>
    %c0_55 = arith.constant 0 : index
    %c0_56 = arith.constant 0 : index
    %56 = vector.load %arg5[%c0_55, %c0_56] : memref<128x16xbf16, #tpu.memory_space<vmem>>, vector<128x16xbf16>
    %57 = arith.extf %56 : vector<128x16xbf16> to vector<128x16xf32>
    %58 = arith.addf %55, %57 : vector<128x16xf32>
    %cst_57 = arith.constant 0.000000e+00 : f32
    %59 = vector.broadcast %cst_57 : f32 to vector<128x16xf32>
    %60 = arith.maximumf %58, %59 : vector<128x16xf32>
    %61 = arith.truncf %60 : vector<128x16xf32> to vector<128x16xbf16>
    %c0_58 = arith.constant 0 : index
    %c0_59 = arith.constant 0 : index
    %62 = vector.load %arg6[%c0_58, %c0_59] : memref<128x16xbf16, #tpu.memory_space<vmem>>, vector<128x16xbf16>
    tpu.vector_store %arg6[%c0_58, %c0_59], %61 {strides = array<i32>} : memref<128x16xbf16, #tpu.memory_space<vmem>>, vector<128x16xbf16>,
    return
  }
  func.func @transform_0(%arg0: i32, %arg1: i32) -> (i32, i32, i32) {
    %c0_i32 = arith.constant 0 : i32
    %c0_i32_0 = arith.constant 0 : i32
    %c0_i32_1 = arith.constant 0 : i32
    return %c0_i32, %arg0, %c0_i32_0 : i32, i32, i32
  }
  func.func @transform_1(%arg0: i32, %arg1: i32) -> (i32, i32, i32) {
    %c0_i32 = arith.constant 0 : i32
    %c0_i32_0 = arith.constant 0 : i32
    %c0_i32_1 = arith.constant 0 : i32
    return %c0_i32, %c0_i32_0, %arg1 : i32, i32, i32
  }
  func.func @transform_2(%arg0: i32, %arg1: i32) -> (i32, i32) {
    %c0_i32 = arith.constant 0 : i32
    %c0_i32_0 = arith.constant 0 : i32
    return %c0_i32, %arg1 : i32, i32
  }
  func.func @transform_3(%arg0: i32, %arg1: i32) -> (i32, i32) {
    %c0_i32 = arith.constant 0 : i32
    return %arg0, %arg1 : i32, i32
  }
  func.func @transform_4(%arg0: i32, %arg1: i32) -> (i32, i32) {
    %c0_i32 = arith.constant 0 : i32
    return %arg0, %arg1 : i32, i32
  }
}

module attributes {stable_mosaic.version = 11 : i64} {
  func.func @_conv_mm_kernel(%arg0: i32, %arg1: i32, %arg2: memref<9x32x16xbf16, #tpu.memory_space<vmem>>, %arg3: memref<9x16x32xbf16, #tpu.memory_space<vmem>>, %arg4: memref<1x32xf32, #tpu.memory_space<vmem>>, %arg5: memref<32x32xbf16, #tpu.memory_space<vmem>>) attributes {dimension_semantics = [#tpu.dimension_semantics<parallel>, #tpu.dimension_semantics<parallel>], iteration_bounds = array<i64: 1, 1>, scalar_prefetch = 0 : i64, scratch_operands = 0 : i64, tpu.core_type = #tpu.core_type<tc>, window_params = [{transform_indices = @transform_0, window_bounds = array<i64: 9, 32, 16>}, {transform_indices = @transform_1, window_bounds = array<i64: 9, 16, 32>}, {transform_indices = @transform_2, window_bounds = array<i64: 1, 32>}, {transform_indices = @transform_3, window_bounds = array<i64: 32, 32>}]} {
    %c0 = arith.constant 0 : index
    %c0_0 = arith.constant 0 : index
    %c0_1 = arith.constant 0 : index
    %0 = vector.load %arg2[%c0, %c0_0, %c0_1] : memref<9x32x16xbf16, #tpu.memory_space<vmem>>, vector<1x32x16xbf16>
    %1 = vector.shape_cast %0 : vector<1x32x16xbf16> to vector<32x16xbf16>
    %c0_2 = arith.constant 0 : index
    %c0_3 = arith.constant 0 : index
    %c0_4 = arith.constant 0 : index
    %2 = vector.load %arg3[%c0_2, %c0_3, %c0_4] : memref<9x16x32xbf16, #tpu.memory_space<vmem>>, vector<1x16x32xbf16>
    %3 = vector.shape_cast %2 : vector<1x16x32xbf16> to vector<16x32xbf16>
    %cst = arith.constant dense<0.000000e+00> : vector<32x32xf32>
    %4 = tpu.matmul %1, %3, %cst {dimension_numbers = #tpu.dot_dimension_numbers<[1], [0], [0], [1], [0, 0, 1, 1], [], []>} : vector<32x16xbf16>, vector<16x32xbf16>, vector<32x32xf32> -> vector<32x32xf32>
    %c1 = arith.constant 1 : index
    %c0_5 = arith.constant 0 : index
    %c0_6 = arith.constant 0 : index
    %5 = vector.load %arg2[%c1, %c0_5, %c0_6] : memref<9x32x16xbf16, #tpu.memory_space<vmem>>, vector<1x32x16xbf16>
    %6 = vector.shape_cast %5 : vector<1x32x16xbf16> to vector<32x16xbf16>
    %c1_7 = arith.constant 1 : index
    %c0_8 = arith.constant 0 : index
    %c0_9 = arith.constant 0 : index
    %7 = vector.load %arg3[%c1_7, %c0_8, %c0_9] : memref<9x16x32xbf16, #tpu.memory_space<vmem>>, vector<1x16x32xbf16>
    %8 = vector.shape_cast %7 : vector<1x16x32xbf16> to vector<16x32xbf16>
    %cst_10 = arith.constant dense<0.000000e+00> : vector<32x32xf32>
    %9 = tpu.matmul %6, %8, %cst_10 {dimension_numbers = #tpu.dot_dimension_numbers<[1], [0], [0], [1], [0, 0, 1, 1], [], []>} : vector<32x16xbf16>, vector<16x32xbf16>, vector<32x32xf32> -> vector<32x32xf32>
    %10 = arith.addf %4, %9 : vector<32x32xf32>
    %c2 = arith.constant 2 : index
    %c0_11 = arith.constant 0 : index
    %c0_12 = arith.constant 0 : index
    %11 = vector.load %arg2[%c2, %c0_11, %c0_12] : memref<9x32x16xbf16, #tpu.memory_space<vmem>>, vector<1x32x16xbf16>
    %12 = vector.shape_cast %11 : vector<1x32x16xbf16> to vector<32x16xbf16>
    %c2_13 = arith.constant 2 : index
    %c0_14 = arith.constant 0 : index
    %c0_15 = arith.constant 0 : index
    %13 = vector.load %arg3[%c2_13, %c0_14, %c0_15] : memref<9x16x32xbf16, #tpu.memory_space<vmem>>, vector<1x16x32xbf16>
    %14 = vector.shape_cast %13 : vector<1x16x32xbf16> to vector<16x32xbf16>
    %cst_16 = arith.constant dense<0.000000e+00> : vector<32x32xf32>
    %15 = tpu.matmul %12, %14, %cst_16 {dimension_numbers = #tpu.dot_dimension_numbers<[1], [0], [0], [1], [0, 0, 1, 1], [], []>} : vector<32x16xbf16>, vector<16x32xbf16>, vector<32x32xf32> -> vector<32x32xf32>
    %16 = arith.addf %10, %15 : vector<32x32xf32>
    %c3 = arith.constant 3 : index
    %c0_17 = arith.constant 0 : index
    %c0_18 = arith.constant 0 : index
    %17 = vector.load %arg2[%c3, %c0_17, %c0_18] : memref<9x32x16xbf16, #tpu.memory_space<vmem>>, vector<1x32x16xbf16>
    %18 = vector.shape_cast %17 : vector<1x32x16xbf16> to vector<32x16xbf16>
    %c3_19 = arith.constant 3 : index
    %c0_20 = arith.constant 0 : index
    %c0_21 = arith.constant 0 : index
    %19 = vector.load %arg3[%c3_19, %c0_20, %c0_21] : memref<9x16x32xbf16, #tpu.memory_space<vmem>>, vector<1x16x32xbf16>
    %20 = vector.shape_cast %19 : vector<1x16x32xbf16> to vector<16x32xbf16>
    %cst_22 = arith.constant dense<0.000000e+00> : vector<32x32xf32>
    %21 = tpu.matmul %18, %20, %cst_22 {dimension_numbers = #tpu.dot_dimension_numbers<[1], [0], [0], [1], [0, 0, 1, 1], [], []>} : vector<32x16xbf16>, vector<16x32xbf16>, vector<32x32xf32> -> vector<32x32xf32>
    %22 = arith.addf %16, %21 : vector<32x32xf32>
    %c4 = arith.constant 4 : index
    %c0_23 = arith.constant 0 : index
    %c0_24 = arith.constant 0 : index
    %23 = vector.load %arg2[%c4, %c0_23, %c0_24] : memref<9x32x16xbf16, #tpu.memory_space<vmem>>, vector<1x32x16xbf16>
    %24 = vector.shape_cast %23 : vector<1x32x16xbf16> to vector<32x16xbf16>
    %c4_25 = arith.constant 4 : index
    %c0_26 = arith.constant 0 : index
    %c0_27 = arith.constant 0 : index
    %25 = vector.load %arg3[%c4_25, %c0_26, %c0_27] : memref<9x16x32xbf16, #tpu.memory_space<vmem>>, vector<1x16x32xbf16>
    %26 = vector.shape_cast %25 : vector<1x16x32xbf16> to vector<16x32xbf16>
    %cst_28 = arith.constant dense<0.000000e+00> : vector<32x32xf32>
    %27 = tpu.matmul %24, %26, %cst_28 {dimension_numbers = #tpu.dot_dimension_numbers<[1], [0], [0], [1], [0, 0, 1, 1], [], []>} : vector<32x16xbf16>, vector<16x32xbf16>, vector<32x32xf32> -> vector<32x32xf32>
    %28 = arith.addf %22, %27 : vector<32x32xf32>
    %c5 = arith.constant 5 : index
    %c0_29 = arith.constant 0 : index
    %c0_30 = arith.constant 0 : index
    %29 = vector.load %arg2[%c5, %c0_29, %c0_30] : memref<9x32x16xbf16, #tpu.memory_space<vmem>>, vector<1x32x16xbf16>
    %30 = vector.shape_cast %29 : vector<1x32x16xbf16> to vector<32x16xbf16>
    %c5_31 = arith.constant 5 : index
    %c0_32 = arith.constant 0 : index
    %c0_33 = arith.constant 0 : index
    %31 = vector.load %arg3[%c5_31, %c0_32, %c0_33] : memref<9x16x32xbf16, #tpu.memory_space<vmem>>, vector<1x16x32xbf16>
    %32 = vector.shape_cast %31 : vector<1x16x32xbf16> to vector<16x32xbf16>
    %cst_34 = arith.constant dense<0.000000e+00> : vector<32x32xf32>
    %33 = tpu.matmul %30, %32, %cst_34 {dimension_numbers = #tpu.dot_dimension_numbers<[1], [0], [0], [1], [0, 0, 1, 1], [], []>} : vector<32x16xbf16>, vector<16x32xbf16>, vector<32x32xf32> -> vector<32x32xf32>
    %34 = arith.addf %28, %33 : vector<32x32xf32>
    %c6 = arith.constant 6 : index
    %c0_35 = arith.constant 0 : index
    %c0_36 = arith.constant 0 : index
    %35 = vector.load %arg2[%c6, %c0_35, %c0_36] : memref<9x32x16xbf16, #tpu.memory_space<vmem>>, vector<1x32x16xbf16>
    %36 = vector.shape_cast %35 : vector<1x32x16xbf16> to vector<32x16xbf16>
    %c6_37 = arith.constant 6 : index
    %c0_38 = arith.constant 0 : index
    %c0_39 = arith.constant 0 : index
    %37 = vector.load %arg3[%c6_37, %c0_38, %c0_39] : memref<9x16x32xbf16, #tpu.memory_space<vmem>>, vector<1x16x32xbf16>
    %38 = vector.shape_cast %37 : vector<1x16x32xbf16> to vector<16x32xbf16>
    %cst_40 = arith.constant dense<0.000000e+00> : vector<32x32xf32>
    %39 = tpu.matmul %36, %38, %cst_40 {dimension_numbers = #tpu.dot_dimension_numbers<[1], [0], [0], [1], [0, 0, 1, 1], [], []>} : vector<32x16xbf16>, vector<16x32xbf16>, vector<32x32xf32> -> vector<32x32xf32>
    %40 = arith.addf %34, %39 : vector<32x32xf32>
    %c7 = arith.constant 7 : index
    %c0_41 = arith.constant 0 : index
    %c0_42 = arith.constant 0 : index
    %41 = vector.load %arg2[%c7, %c0_41, %c0_42] : memref<9x32x16xbf16, #tpu.memory_space<vmem>>, vector<1x32x16xbf16>
    %42 = vector.shape_cast %41 : vector<1x32x16xbf16> to vector<32x16xbf16>
    %c7_43 = arith.constant 7 : index
    %c0_44 = arith.constant 0 : index
    %c0_45 = arith.constant 0 : index
    %43 = vector.load %arg3[%c7_43, %c0_44, %c0_45] : memref<9x16x32xbf16, #tpu.memory_space<vmem>>, vector<1x16x32xbf16>
    %44 = vector.shape_cast %43 : vector<1x16x32xbf16> to vector<16x32xbf16>
    %cst_46 = arith.constant dense<0.000000e+00> : vector<32x32xf32>
    %45 = tpu.matmul %42, %44, %cst_46 {dimension_numbers = #tpu.dot_dimension_numbers<[1], [0], [0], [1], [0, 0, 1, 1], [], []>} : vector<32x16xbf16>, vector<16x32xbf16>, vector<32x32xf32> -> vector<32x32xf32>
    %46 = arith.addf %40, %45 : vector<32x32xf32>
    %c8 = arith.constant 8 : index
    %c0_47 = arith.constant 0 : index
    %c0_48 = arith.constant 0 : index
    %47 = vector.load %arg2[%c8, %c0_47, %c0_48] : memref<9x32x16xbf16, #tpu.memory_space<vmem>>, vector<1x32x16xbf16>
    %48 = vector.shape_cast %47 : vector<1x32x16xbf16> to vector<32x16xbf16>
    %c8_49 = arith.constant 8 : index
    %c0_50 = arith.constant 0 : index
    %c0_51 = arith.constant 0 : index
    %49 = vector.load %arg3[%c8_49, %c0_50, %c0_51] : memref<9x16x32xbf16, #tpu.memory_space<vmem>>, vector<1x16x32xbf16>
    %50 = vector.shape_cast %49 : vector<1x16x32xbf16> to vector<16x32xbf16>
    %cst_52 = arith.constant dense<0.000000e+00> : vector<32x32xf32>
    %51 = tpu.matmul %48, %50, %cst_52 {dimension_numbers = #tpu.dot_dimension_numbers<[1], [0], [0], [1], [0, 0, 1, 1], [], []>} : vector<32x16xbf16>, vector<16x32xbf16>, vector<32x32xf32> -> vector<32x32xf32>
    %52 = arith.addf %46, %51 : vector<32x32xf32>
    %c0_53 = arith.constant 0 : index
    %c0_54 = arith.constant 0 : index
    %53 = vector.load %arg4[%c0_53, %c0_54] : memref<1x32xf32, #tpu.memory_space<vmem>>, vector<1x32xf32>
    %54 = vector.broadcast %53 : vector<1x32xf32> to vector<32x32xf32>
    %55 = arith.addf %52, %54 : vector<32x32xf32>
    %cst_55 = arith.constant 0.000000e+00 : f32
    %56 = vector.broadcast %cst_55 : f32 to vector<32x32xf32>
    %57 = arith.maximumf %55, %56 : vector<32x32xf32>
    %58 = arith.truncf %57 : vector<32x32xf32> to vector<32x32xbf16>
    %c0_56 = arith.constant 0 : index
    %c0_57 = arith.constant 0 : index
    %59 = vector.load %arg5[%c0_56, %c0_57] : memref<32x32xbf16, #tpu.memory_space<vmem>>, vector<32x32xbf16>
    tpu.vector_store %arg5[%c0_56, %c0_57], %58 {strides = array<i32>} : memref<32x32xbf16, #tpu.memory_space<vmem>>, vector<32x32xbf16>,
    return
  }
  func.func @transform_0(%arg0: i32, %arg1: i32) -> (i32, i32, i32) {
    %c0_i32 = arith.constant 0 : i32
    %c0_i32_0 = arith.constant 0 : i32
    %c0_i32_1 = arith.constant 0 : i32
    return %c0_i32, %arg0, %c0_i32_0 : i32, i32, i32
  }
  func.func @transform_1(%arg0: i32, %arg1: i32) -> (i32, i32, i32) {
    %c0_i32 = arith.constant 0 : i32
    %c0_i32_0 = arith.constant 0 : i32
    %c0_i32_1 = arith.constant 0 : i32
    return %c0_i32, %c0_i32_0, %arg1 : i32, i32, i32
  }
  func.func @transform_2(%arg0: i32, %arg1: i32) -> (i32, i32) {
    %c0_i32 = arith.constant 0 : i32
    %c0_i32_0 = arith.constant 0 : i32
    return %c0_i32, %arg1 : i32, i32
  }
  func.func @transform_3(%arg0: i32, %arg1: i32) -> (i32, i32) {
    %c0_i32 = arith.constant 0 : i32
    return %arg0, %arg1 : i32, i32
  }
}

module attributes {stable_mosaic.version = 11 : i64} {
  func.func @_conv_mm_kernel(%arg0: i32, %arg1: i32, %arg2: memref<1x32x16xbf16, #tpu.memory_space<vmem>>, %arg3: memref<1x16x32xbf16, #tpu.memory_space<vmem>>, %arg4: memref<1x32xf32, #tpu.memory_space<vmem>>, %arg5: memref<32x32xbf16, #tpu.memory_space<vmem>>) attributes {dimension_semantics = [#tpu.dimension_semantics<parallel>, #tpu.dimension_semantics<parallel>], iteration_bounds = array<i64: 1, 1>, scalar_prefetch = 0 : i64, scratch_operands = 0 : i64, tpu.core_type = #tpu.core_type<tc>, window_params = [{transform_indices = @transform_0, window_bounds = array<i64: 1, 32, 16>}, {transform_indices = @transform_1, window_bounds = array<i64: 1, 16, 32>}, {transform_indices = @transform_2, window_bounds = array<i64: 1, 32>}, {transform_indices = @transform_3, window_bounds = array<i64: 32, 32>}]} {
    %c0 = arith.constant 0 : index
    %c0_0 = arith.constant 0 : index
    %c0_1 = arith.constant 0 : index
    %0 = vector.load %arg2[%c0, %c0_0, %c0_1] : memref<1x32x16xbf16, #tpu.memory_space<vmem>>, vector<1x32x16xbf16>
    %1 = vector.shape_cast %0 : vector<1x32x16xbf16> to vector<32x16xbf16>
    %c0_2 = arith.constant 0 : index
    %c0_3 = arith.constant 0 : index
    %c0_4 = arith.constant 0 : index
    %2 = vector.load %arg3[%c0_2, %c0_3, %c0_4] : memref<1x16x32xbf16, #tpu.memory_space<vmem>>, vector<1x16x32xbf16>
    %3 = vector.shape_cast %2 : vector<1x16x32xbf16> to vector<16x32xbf16>
    %cst = arith.constant dense<0.000000e+00> : vector<32x32xf32>
    %4 = tpu.matmul %1, %3, %cst {dimension_numbers = #tpu.dot_dimension_numbers<[1], [0], [0], [1], [0, 0, 1, 1], [], []>} : vector<32x16xbf16>, vector<16x32xbf16>, vector<32x32xf32> -> vector<32x32xf32>
    %c0_5 = arith.constant 0 : index
    %c0_6 = arith.constant 0 : index
    %5 = vector.load %arg4[%c0_5, %c0_6] : memref<1x32xf32, #tpu.memory_space<vmem>>, vector<1x32xf32>
    %6 = vector.broadcast %5 : vector<1x32xf32> to vector<32x32xf32>
    %7 = arith.addf %4, %6 : vector<32x32xf32>
    %8 = arith.truncf %7 : vector<32x32xf32> to vector<32x32xbf16>
    %c0_7 = arith.constant 0 : index
    %c0_8 = arith.constant 0 : index
    %9 = vector.load %arg5[%c0_7, %c0_8] : memref<32x32xbf16, #tpu.memory_space<vmem>>, vector<32x32xbf16>
    tpu.vector_store %arg5[%c0_7, %c0_8], %8 {strides = array<i32>} : memref<32x32xbf16, #tpu.memory_space<vmem>>, vector<32x32xbf16>,
    return
  }
  func.func @transform_0(%arg0: i32, %arg1: i32) -> (i32, i32, i32) {
    %c0_i32 = arith.constant 0 : i32
    %c0_i32_0 = arith.constant 0 : i32
    %c0_i32_1 = arith.constant 0 : i32
    return %c0_i32, %arg0, %c0_i32_0 : i32, i32, i32
  }
  func.func @transform_1(%arg0: i32, %arg1: i32) -> (i32, i32, i32) {
    %c0_i32 = arith.constant 0 : i32
    %c0_i32_0 = arith.constant 0 : i32
    %c0_i32_1 = arith.constant 0 : i32
    return %c0_i32, %c0_i32_0, %arg1 : i32, i32, i32
  }
  func.func @transform_2(%arg0: i32, %arg1: i32) -> (i32, i32) {
    %c0_i32 = arith.constant 0 : i32
    %c0_i32_0 = arith.constant 0 : i32
    return %c0_i32, %arg1 : i32, i32
  }
  func.func @transform_3(%arg0: i32, %arg1: i32) -> (i32, i32) {
    %c0_i32 = arith.constant 0 : i32
    return %arg0, %arg1 : i32, i32
  }
}

module attributes {stable_mosaic.version = 11 : i64} {
  func.func @_conv_mm_kernel(%arg0: i32, %arg1: i32, %arg2: memref<9x32x32xbf16, #tpu.memory_space<vmem>>, %arg3: memref<9x32x32xbf16, #tpu.memory_space<vmem>>, %arg4: memref<1x32xf32, #tpu.memory_space<vmem>>, %arg5: memref<32x32xbf16, #tpu.memory_space<vmem>>) attributes {dimension_semantics = [#tpu.dimension_semantics<parallel>, #tpu.dimension_semantics<parallel>], iteration_bounds = array<i64: 1, 1>, scalar_prefetch = 0 : i64, scratch_operands = 0 : i64, tpu.core_type = #tpu.core_type<tc>, window_params = [{transform_indices = @transform_0, window_bounds = array<i64: 9, 32, 32>}, {transform_indices = @transform_1, window_bounds = array<i64: 9, 32, 32>}, {transform_indices = @transform_2, window_bounds = array<i64: 1, 32>}, {transform_indices = @transform_3, window_bounds = array<i64: 32, 32>}]} {
    %c0 = arith.constant 0 : index
    %c0_0 = arith.constant 0 : index
    %c0_1 = arith.constant 0 : index
    %0 = vector.load %arg2[%c0, %c0_0, %c0_1] : memref<9x32x32xbf16, #tpu.memory_space<vmem>>, vector<1x32x32xbf16>
    %1 = vector.shape_cast %0 : vector<1x32x32xbf16> to vector<32x32xbf16>
    %c0_2 = arith.constant 0 : index
    %c0_3 = arith.constant 0 : index
    %c0_4 = arith.constant 0 : index
    %2 = vector.load %arg3[%c0_2, %c0_3, %c0_4] : memref<9x32x32xbf16, #tpu.memory_space<vmem>>, vector<1x32x32xbf16>
    %3 = vector.shape_cast %2 : vector<1x32x32xbf16> to vector<32x32xbf16>
    %cst = arith.constant dense<0.000000e+00> : vector<32x32xf32>
    %4 = tpu.matmul %1, %3, %cst {dimension_numbers = #tpu.dot_dimension_numbers<[1], [0], [0], [1], [0, 0, 1, 1], [], []>} : vector<32x32xbf16>, vector<32x32xbf16>, vector<32x32xf32> -> vector<32x32xf32>
    %c1 = arith.constant 1 : index
    %c0_5 = arith.constant 0 : index
    %c0_6 = arith.constant 0 : index
    %5 = vector.load %arg2[%c1, %c0_5, %c0_6] : memref<9x32x32xbf16, #tpu.memory_space<vmem>>, vector<1x32x32xbf16>
    %6 = vector.shape_cast %5 : vector<1x32x32xbf16> to vector<32x32xbf16>
    %c1_7 = arith.constant 1 : index
    %c0_8 = arith.constant 0 : index
    %c0_9 = arith.constant 0 : index
    %7 = vector.load %arg3[%c1_7, %c0_8, %c0_9] : memref<9x32x32xbf16, #tpu.memory_space<vmem>>, vector<1x32x32xbf16>
    %8 = vector.shape_cast %7 : vector<1x32x32xbf16> to vector<32x32xbf16>
    %cst_10 = arith.constant dense<0.000000e+00> : vector<32x32xf32>
    %9 = tpu.matmul %6, %8, %cst_10 {dimension_numbers = #tpu.dot_dimension_numbers<[1], [0], [0], [1], [0, 0, 1, 1], [], []>} : vector<32x32xbf16>, vector<32x32xbf16>, vector<32x32xf32> -> vector<32x32xf32>
    %10 = arith.addf %4, %9 : vector<32x32xf32>
    %c2 = arith.constant 2 : index
    %c0_11 = arith.constant 0 : index
    %c0_12 = arith.constant 0 : index
    %11 = vector.load %arg2[%c2, %c0_11, %c0_12] : memref<9x32x32xbf16, #tpu.memory_space<vmem>>, vector<1x32x32xbf16>
    %12 = vector.shape_cast %11 : vector<1x32x32xbf16> to vector<32x32xbf16>
    %c2_13 = arith.constant 2 : index
    %c0_14 = arith.constant 0 : index
    %c0_15 = arith.constant 0 : index
    %13 = vector.load %arg3[%c2_13, %c0_14, %c0_15] : memref<9x32x32xbf16, #tpu.memory_space<vmem>>, vector<1x32x32xbf16>
    %14 = vector.shape_cast %13 : vector<1x32x32xbf16> to vector<32x32xbf16>
    %cst_16 = arith.constant dense<0.000000e+00> : vector<32x32xf32>
    %15 = tpu.matmul %12, %14, %cst_16 {dimension_numbers = #tpu.dot_dimension_numbers<[1], [0], [0], [1], [0, 0, 1, 1], [], []>} : vector<32x32xbf16>, vector<32x32xbf16>, vector<32x32xf32> -> vector<32x32xf32>
    %16 = arith.addf %10, %15 : vector<32x32xf32>
    %c3 = arith.constant 3 : index
    %c0_17 = arith.constant 0 : index
    %c0_18 = arith.constant 0 : index
    %17 = vector.load %arg2[%c3, %c0_17, %c0_18] : memref<9x32x32xbf16, #tpu.memory_space<vmem>>, vector<1x32x32xbf16>
    %18 = vector.shape_cast %17 : vector<1x32x32xbf16> to vector<32x32xbf16>
    %c3_19 = arith.constant 3 : index
    %c0_20 = arith.constant 0 : index
    %c0_21 = arith.constant 0 : index
    %19 = vector.load %arg3[%c3_19, %c0_20, %c0_21] : memref<9x32x32xbf16, #tpu.memory_space<vmem>>, vector<1x32x32xbf16>
    %20 = vector.shape_cast %19 : vector<1x32x32xbf16> to vector<32x32xbf16>
    %cst_22 = arith.constant dense<0.000000e+00> : vector<32x32xf32>
    %21 = tpu.matmul %18, %20, %cst_22 {dimension_numbers = #tpu.dot_dimension_numbers<[1], [0], [0], [1], [0, 0, 1, 1], [], []>} : vector<32x32xbf16>, vector<32x32xbf16>, vector<32x32xf32> -> vector<32x32xf32>
    %22 = arith.addf %16, %21 : vector<32x32xf32>
    %c4 = arith.constant 4 : index
    %c0_23 = arith.constant 0 : index
    %c0_24 = arith.constant 0 : index
    %23 = vector.load %arg2[%c4, %c0_23, %c0_24] : memref<9x32x32xbf16, #tpu.memory_space<vmem>>, vector<1x32x32xbf16>
    %24 = vector.shape_cast %23 : vector<1x32x32xbf16> to vector<32x32xbf16>
    %c4_25 = arith.constant 4 : index
    %c0_26 = arith.constant 0 : index
    %c0_27 = arith.constant 0 : index
    %25 = vector.load %arg3[%c4_25, %c0_26, %c0_27] : memref<9x32x32xbf16, #tpu.memory_space<vmem>>, vector<1x32x32xbf16>
    %26 = vector.shape_cast %25 : vector<1x32x32xbf16> to vector<32x32xbf16>
    %cst_28 = arith.constant dense<0.000000e+00> : vector<32x32xf32>
    %27 = tpu.matmul %24, %26, %cst_28 {dimension_numbers = #tpu.dot_dimension_numbers<[1], [0], [0], [1], [0, 0, 1, 1], [], []>} : vector<32x32xbf16>, vector<32x32xbf16>, vector<32x32xf32> -> vector<32x32xf32>
    %28 = arith.addf %22, %27 : vector<32x32xf32>
    %c5 = arith.constant 5 : index
    %c0_29 = arith.constant 0 : index
    %c0_30 = arith.constant 0 : index
    %29 = vector.load %arg2[%c5, %c0_29, %c0_30] : memref<9x32x32xbf16, #tpu.memory_space<vmem>>, vector<1x32x32xbf16>
    %30 = vector.shape_cast %29 : vector<1x32x32xbf16> to vector<32x32xbf16>
    %c5_31 = arith.constant 5 : index
    %c0_32 = arith.constant 0 : index
    %c0_33 = arith.constant 0 : index
    %31 = vector.load %arg3[%c5_31, %c0_32, %c0_33] : memref<9x32x32xbf16, #tpu.memory_space<vmem>>, vector<1x32x32xbf16>
    %32 = vector.shape_cast %31 : vector<1x32x32xbf16> to vector<32x32xbf16>
    %cst_34 = arith.constant dense<0.000000e+00> : vector<32x32xf32>
    %33 = tpu.matmul %30, %32, %cst_34 {dimension_numbers = #tpu.dot_dimension_numbers<[1], [0], [0], [1], [0, 0, 1, 1], [], []>} : vector<32x32xbf16>, vector<32x32xbf16>, vector<32x32xf32> -> vector<32x32xf32>
    %34 = arith.addf %28, %33 : vector<32x32xf32>
    %c6 = arith.constant 6 : index
    %c0_35 = arith.constant 0 : index
    %c0_36 = arith.constant 0 : index
    %35 = vector.load %arg2[%c6, %c0_35, %c0_36] : memref<9x32x32xbf16, #tpu.memory_space<vmem>>, vector<1x32x32xbf16>
    %36 = vector.shape_cast %35 : vector<1x32x32xbf16> to vector<32x32xbf16>
    %c6_37 = arith.constant 6 : index
    %c0_38 = arith.constant 0 : index
    %c0_39 = arith.constant 0 : index
    %37 = vector.load %arg3[%c6_37, %c0_38, %c0_39] : memref<9x32x32xbf16, #tpu.memory_space<vmem>>, vector<1x32x32xbf16>
    %38 = vector.shape_cast %37 : vector<1x32x32xbf16> to vector<32x32xbf16>
    %cst_40 = arith.constant dense<0.000000e+00> : vector<32x32xf32>
    %39 = tpu.matmul %36, %38, %cst_40 {dimension_numbers = #tpu.dot_dimension_numbers<[1], [0], [0], [1], [0, 0, 1, 1], [], []>} : vector<32x32xbf16>, vector<32x32xbf16>, vector<32x32xf32> -> vector<32x32xf32>
    %40 = arith.addf %34, %39 : vector<32x32xf32>
    %c7 = arith.constant 7 : index
    %c0_41 = arith.constant 0 : index
    %c0_42 = arith.constant 0 : index
    %41 = vector.load %arg2[%c7, %c0_41, %c0_42] : memref<9x32x32xbf16, #tpu.memory_space<vmem>>, vector<1x32x32xbf16>
    %42 = vector.shape_cast %41 : vector<1x32x32xbf16> to vector<32x32xbf16>
    %c7_43 = arith.constant 7 : index
    %c0_44 = arith.constant 0 : index
    %c0_45 = arith.constant 0 : index
    %43 = vector.load %arg3[%c7_43, %c0_44, %c0_45] : memref<9x32x32xbf16, #tpu.memory_space<vmem>>, vector<1x32x32xbf16>
    %44 = vector.shape_cast %43 : vector<1x32x32xbf16> to vector<32x32xbf16>
    %cst_46 = arith.constant dense<0.000000e+00> : vector<32x32xf32>
    %45 = tpu.matmul %42, %44, %cst_46 {dimension_numbers = #tpu.dot_dimension_numbers<[1], [0], [0], [1], [0, 0, 1, 1], [], []>} : vector<32x32xbf16>, vector<32x32xbf16>, vector<32x32xf32> -> vector<32x32xf32>
    %46 = arith.addf %40, %45 : vector<32x32xf32>
    %c8 = arith.constant 8 : index
    %c0_47 = arith.constant 0 : index
    %c0_48 = arith.constant 0 : index
    %47 = vector.load %arg2[%c8, %c0_47, %c0_48] : memref<9x32x32xbf16, #tpu.memory_space<vmem>>, vector<1x32x32xbf16>
    %48 = vector.shape_cast %47 : vector<1x32x32xbf16> to vector<32x32xbf16>
    %c8_49 = arith.constant 8 : index
    %c0_50 = arith.constant 0 : index
    %c0_51 = arith.constant 0 : index
    %49 = vector.load %arg3[%c8_49, %c0_50, %c0_51] : memref<9x32x32xbf16, #tpu.memory_space<vmem>>, vector<1x32x32xbf16>
    %50 = vector.shape_cast %49 : vector<1x32x32xbf16> to vector<32x32xbf16>
    %cst_52 = arith.constant dense<0.000000e+00> : vector<32x32xf32>
    %51 = tpu.matmul %48, %50, %cst_52 {dimension_numbers = #tpu.dot_dimension_numbers<[1], [0], [0], [1], [0, 0, 1, 1], [], []>} : vector<32x32xbf16>, vector<32x32xbf16>, vector<32x32xf32> -> vector<32x32xf32>
    %52 = arith.addf %46, %51 : vector<32x32xf32>
    %c0_53 = arith.constant 0 : index
    %c0_54 = arith.constant 0 : index
    %53 = vector.load %arg4[%c0_53, %c0_54] : memref<1x32xf32, #tpu.memory_space<vmem>>, vector<1x32xf32>
    %54 = vector.broadcast %53 : vector<1x32xf32> to vector<32x32xf32>
    %55 = arith.addf %52, %54 : vector<32x32xf32>
    %cst_55 = arith.constant 0.000000e+00 : f32
    %56 = vector.broadcast %cst_55 : f32 to vector<32x32xf32>
    %57 = arith.maximumf %55, %56 : vector<32x32xf32>
    %58 = arith.truncf %57 : vector<32x32xf32> to vector<32x32xbf16>
    %c0_56 = arith.constant 0 : index
    %c0_57 = arith.constant 0 : index
    %59 = vector.load %arg5[%c0_56, %c0_57] : memref<32x32xbf16, #tpu.memory_space<vmem>>, vector<32x32xbf16>
    tpu.vector_store %arg5[%c0_56, %c0_57], %58 {strides = array<i32>} : memref<32x32xbf16, #tpu.memory_space<vmem>>, vector<32x32xbf16>,
    return
  }
  func.func @transform_0(%arg0: i32, %arg1: i32) -> (i32, i32, i32) {
    %c0_i32 = arith.constant 0 : i32
    %c0_i32_0 = arith.constant 0 : i32
    %c0_i32_1 = arith.constant 0 : i32
    return %c0_i32, %arg0, %c0_i32_0 : i32, i32, i32
  }
  func.func @transform_1(%arg0: i32, %arg1: i32) -> (i32, i32, i32) {
    %c0_i32 = arith.constant 0 : i32
    %c0_i32_0 = arith.constant 0 : i32
    %c0_i32_1 = arith.constant 0 : i32
    return %c0_i32, %c0_i32_0, %arg1 : i32, i32, i32
  }
  func.func @transform_2(%arg0: i32, %arg1: i32) -> (i32, i32) {
    %c0_i32 = arith.constant 0 : i32
    %c0_i32_0 = arith.constant 0 : i32
    return %c0_i32, %arg1 : i32, i32
  }
  func.func @transform_3(%arg0: i32, %arg1: i32) -> (i32, i32) {
    %c0_i32 = arith.constant 0 : i32
    return %arg0, %arg1 : i32, i32
  }
}

module attributes {stable_mosaic.version = 11 : i64} {
  func.func @_conv_mm_res_kernel(%arg0: i32, %arg1: i32, %arg2: memref<9x32x32xbf16, #tpu.memory_space<vmem>>, %arg3: memref<9x32x32xbf16, #tpu.memory_space<vmem>>, %arg4: memref<1x32xf32, #tpu.memory_space<vmem>>, %arg5: memref<32x32xbf16, #tpu.memory_space<vmem>>, %arg6: memref<32x32xbf16, #tpu.memory_space<vmem>>) attributes {dimension_semantics = [#tpu.dimension_semantics<parallel>, #tpu.dimension_semantics<parallel>], iteration_bounds = array<i64: 1, 1>, scalar_prefetch = 0 : i64, scratch_operands = 0 : i64, tpu.core_type = #tpu.core_type<tc>, window_params = [{transform_indices = @transform_0, window_bounds = array<i64: 9, 32, 32>}, {transform_indices = @transform_1, window_bounds = array<i64: 9, 32, 32>}, {transform_indices = @transform_2, window_bounds = array<i64: 1, 32>}, {transform_indices = @transform_3, window_bounds = array<i64: 32, 32>}, {transform_indices = @transform_4, window_bounds = array<i64: 32, 32>}]} {
    %c0 = arith.constant 0 : index
    %c0_0 = arith.constant 0 : index
    %c0_1 = arith.constant 0 : index
    %0 = vector.load %arg2[%c0, %c0_0, %c0_1] : memref<9x32x32xbf16, #tpu.memory_space<vmem>>, vector<1x32x32xbf16>
    %1 = vector.shape_cast %0 : vector<1x32x32xbf16> to vector<32x32xbf16>
    %c0_2 = arith.constant 0 : index
    %c0_3 = arith.constant 0 : index
    %c0_4 = arith.constant 0 : index
    %2 = vector.load %arg3[%c0_2, %c0_3, %c0_4] : memref<9x32x32xbf16, #tpu.memory_space<vmem>>, vector<1x32x32xbf16>
    %3 = vector.shape_cast %2 : vector<1x32x32xbf16> to vector<32x32xbf16>
    %cst = arith.constant dense<0.000000e+00> : vector<32x32xf32>
    %4 = tpu.matmul %1, %3, %cst {dimension_numbers = #tpu.dot_dimension_numbers<[1], [0], [0], [1], [0, 0, 1, 1], [], []>} : vector<32x32xbf16>, vector<32x32xbf16>, vector<32x32xf32> -> vector<32x32xf32>
    %c1 = arith.constant 1 : index
    %c0_5 = arith.constant 0 : index
    %c0_6 = arith.constant 0 : index
    %5 = vector.load %arg2[%c1, %c0_5, %c0_6] : memref<9x32x32xbf16, #tpu.memory_space<vmem>>, vector<1x32x32xbf16>
    %6 = vector.shape_cast %5 : vector<1x32x32xbf16> to vector<32x32xbf16>
    %c1_7 = arith.constant 1 : index
    %c0_8 = arith.constant 0 : index
    %c0_9 = arith.constant 0 : index
    %7 = vector.load %arg3[%c1_7, %c0_8, %c0_9] : memref<9x32x32xbf16, #tpu.memory_space<vmem>>, vector<1x32x32xbf16>
    %8 = vector.shape_cast %7 : vector<1x32x32xbf16> to vector<32x32xbf16>
    %cst_10 = arith.constant dense<0.000000e+00> : vector<32x32xf32>
    %9 = tpu.matmul %6, %8, %cst_10 {dimension_numbers = #tpu.dot_dimension_numbers<[1], [0], [0], [1], [0, 0, 1, 1], [], []>} : vector<32x32xbf16>, vector<32x32xbf16>, vector<32x32xf32> -> vector<32x32xf32>
    %10 = arith.addf %4, %9 : vector<32x32xf32>
    %c2 = arith.constant 2 : index
    %c0_11 = arith.constant 0 : index
    %c0_12 = arith.constant 0 : index
    %11 = vector.load %arg2[%c2, %c0_11, %c0_12] : memref<9x32x32xbf16, #tpu.memory_space<vmem>>, vector<1x32x32xbf16>
    %12 = vector.shape_cast %11 : vector<1x32x32xbf16> to vector<32x32xbf16>
    %c2_13 = arith.constant 2 : index
    %c0_14 = arith.constant 0 : index
    %c0_15 = arith.constant 0 : index
    %13 = vector.load %arg3[%c2_13, %c0_14, %c0_15] : memref<9x32x32xbf16, #tpu.memory_space<vmem>>, vector<1x32x32xbf16>
    %14 = vector.shape_cast %13 : vector<1x32x32xbf16> to vector<32x32xbf16>
    %cst_16 = arith.constant dense<0.000000e+00> : vector<32x32xf32>
    %15 = tpu.matmul %12, %14, %cst_16 {dimension_numbers = #tpu.dot_dimension_numbers<[1], [0], [0], [1], [0, 0, 1, 1], [], []>} : vector<32x32xbf16>, vector<32x32xbf16>, vector<32x32xf32> -> vector<32x32xf32>
    %16 = arith.addf %10, %15 : vector<32x32xf32>
    %c3 = arith.constant 3 : index
    %c0_17 = arith.constant 0 : index
    %c0_18 = arith.constant 0 : index
    %17 = vector.load %arg2[%c3, %c0_17, %c0_18] : memref<9x32x32xbf16, #tpu.memory_space<vmem>>, vector<1x32x32xbf16>
    %18 = vector.shape_cast %17 : vector<1x32x32xbf16> to vector<32x32xbf16>
    %c3_19 = arith.constant 3 : index
    %c0_20 = arith.constant 0 : index
    %c0_21 = arith.constant 0 : index
    %19 = vector.load %arg3[%c3_19, %c0_20, %c0_21] : memref<9x32x32xbf16, #tpu.memory_space<vmem>>, vector<1x32x32xbf16>
    %20 = vector.shape_cast %19 : vector<1x32x32xbf16> to vector<32x32xbf16>
    %cst_22 = arith.constant dense<0.000000e+00> : vector<32x32xf32>
    %21 = tpu.matmul %18, %20, %cst_22 {dimension_numbers = #tpu.dot_dimension_numbers<[1], [0], [0], [1], [0, 0, 1, 1], [], []>} : vector<32x32xbf16>, vector<32x32xbf16>, vector<32x32xf32> -> vector<32x32xf32>
    %22 = arith.addf %16, %21 : vector<32x32xf32>
    %c4 = arith.constant 4 : index
    %c0_23 = arith.constant 0 : index
    %c0_24 = arith.constant 0 : index
    %23 = vector.load %arg2[%c4, %c0_23, %c0_24] : memref<9x32x32xbf16, #tpu.memory_space<vmem>>, vector<1x32x32xbf16>
    %24 = vector.shape_cast %23 : vector<1x32x32xbf16> to vector<32x32xbf16>
    %c4_25 = arith.constant 4 : index
    %c0_26 = arith.constant 0 : index
    %c0_27 = arith.constant 0 : index
    %25 = vector.load %arg3[%c4_25, %c0_26, %c0_27] : memref<9x32x32xbf16, #tpu.memory_space<vmem>>, vector<1x32x32xbf16>
    %26 = vector.shape_cast %25 : vector<1x32x32xbf16> to vector<32x32xbf16>
    %cst_28 = arith.constant dense<0.000000e+00> : vector<32x32xf32>
    %27 = tpu.matmul %24, %26, %cst_28 {dimension_numbers = #tpu.dot_dimension_numbers<[1], [0], [0], [1], [0, 0, 1, 1], [], []>} : vector<32x32xbf16>, vector<32x32xbf16>, vector<32x32xf32> -> vector<32x32xf32>
    %28 = arith.addf %22, %27 : vector<32x32xf32>
    %c5 = arith.constant 5 : index
    %c0_29 = arith.constant 0 : index
    %c0_30 = arith.constant 0 : index
    %29 = vector.load %arg2[%c5, %c0_29, %c0_30] : memref<9x32x32xbf16, #tpu.memory_space<vmem>>, vector<1x32x32xbf16>
    %30 = vector.shape_cast %29 : vector<1x32x32xbf16> to vector<32x32xbf16>
    %c5_31 = arith.constant 5 : index
    %c0_32 = arith.constant 0 : index
    %c0_33 = arith.constant 0 : index
    %31 = vector.load %arg3[%c5_31, %c0_32, %c0_33] : memref<9x32x32xbf16, #tpu.memory_space<vmem>>, vector<1x32x32xbf16>
    %32 = vector.shape_cast %31 : vector<1x32x32xbf16> to vector<32x32xbf16>
    %cst_34 = arith.constant dense<0.000000e+00> : vector<32x32xf32>
    %33 = tpu.matmul %30, %32, %cst_34 {dimension_numbers = #tpu.dot_dimension_numbers<[1], [0], [0], [1], [0, 0, 1, 1], [], []>} : vector<32x32xbf16>, vector<32x32xbf16>, vector<32x32xf32> -> vector<32x32xf32>
    %34 = arith.addf %28, %33 : vector<32x32xf32>
    %c6 = arith.constant 6 : index
    %c0_35 = arith.constant 0 : index
    %c0_36 = arith.constant 0 : index
    %35 = vector.load %arg2[%c6, %c0_35, %c0_36] : memref<9x32x32xbf16, #tpu.memory_space<vmem>>, vector<1x32x32xbf16>
    %36 = vector.shape_cast %35 : vector<1x32x32xbf16> to vector<32x32xbf16>
    %c6_37 = arith.constant 6 : index
    %c0_38 = arith.constant 0 : index
    %c0_39 = arith.constant 0 : index
    %37 = vector.load %arg3[%c6_37, %c0_38, %c0_39] : memref<9x32x32xbf16, #tpu.memory_space<vmem>>, vector<1x32x32xbf16>
    %38 = vector.shape_cast %37 : vector<1x32x32xbf16> to vector<32x32xbf16>
    %cst_40 = arith.constant dense<0.000000e+00> : vector<32x32xf32>
    %39 = tpu.matmul %36, %38, %cst_40 {dimension_numbers = #tpu.dot_dimension_numbers<[1], [0], [0], [1], [0, 0, 1, 1], [], []>} : vector<32x32xbf16>, vector<32x32xbf16>, vector<32x32xf32> -> vector<32x32xf32>
    %40 = arith.addf %34, %39 : vector<32x32xf32>
    %c7 = arith.constant 7 : index
    %c0_41 = arith.constant 0 : index
    %c0_42 = arith.constant 0 : index
    %41 = vector.load %arg2[%c7, %c0_41, %c0_42] : memref<9x32x32xbf16, #tpu.memory_space<vmem>>, vector<1x32x32xbf16>
    %42 = vector.shape_cast %41 : vector<1x32x32xbf16> to vector<32x32xbf16>
    %c7_43 = arith.constant 7 : index
    %c0_44 = arith.constant 0 : index
    %c0_45 = arith.constant 0 : index
    %43 = vector.load %arg3[%c7_43, %c0_44, %c0_45] : memref<9x32x32xbf16, #tpu.memory_space<vmem>>, vector<1x32x32xbf16>
    %44 = vector.shape_cast %43 : vector<1x32x32xbf16> to vector<32x32xbf16>
    %cst_46 = arith.constant dense<0.000000e+00> : vector<32x32xf32>
    %45 = tpu.matmul %42, %44, %cst_46 {dimension_numbers = #tpu.dot_dimension_numbers<[1], [0], [0], [1], [0, 0, 1, 1], [], []>} : vector<32x32xbf16>, vector<32x32xbf16>, vector<32x32xf32> -> vector<32x32xf32>
    %46 = arith.addf %40, %45 : vector<32x32xf32>
    %c8 = arith.constant 8 : index
    %c0_47 = arith.constant 0 : index
    %c0_48 = arith.constant 0 : index
    %47 = vector.load %arg2[%c8, %c0_47, %c0_48] : memref<9x32x32xbf16, #tpu.memory_space<vmem>>, vector<1x32x32xbf16>
    %48 = vector.shape_cast %47 : vector<1x32x32xbf16> to vector<32x32xbf16>
    %c8_49 = arith.constant 8 : index
    %c0_50 = arith.constant 0 : index
    %c0_51 = arith.constant 0 : index
    %49 = vector.load %arg3[%c8_49, %c0_50, %c0_51] : memref<9x32x32xbf16, #tpu.memory_space<vmem>>, vector<1x32x32xbf16>
    %50 = vector.shape_cast %49 : vector<1x32x32xbf16> to vector<32x32xbf16>
    %cst_52 = arith.constant dense<0.000000e+00> : vector<32x32xf32>
    %51 = tpu.matmul %48, %50, %cst_52 {dimension_numbers = #tpu.dot_dimension_numbers<[1], [0], [0], [1], [0, 0, 1, 1], [], []>} : vector<32x32xbf16>, vector<32x32xbf16>, vector<32x32xf32> -> vector<32x32xf32>
    %52 = arith.addf %46, %51 : vector<32x32xf32>
    %c0_53 = arith.constant 0 : index
    %c0_54 = arith.constant 0 : index
    %53 = vector.load %arg4[%c0_53, %c0_54] : memref<1x32xf32, #tpu.memory_space<vmem>>, vector<1x32xf32>
    %54 = vector.broadcast %53 : vector<1x32xf32> to vector<32x32xf32>
    %55 = arith.addf %52, %54 : vector<32x32xf32>
    %c0_55 = arith.constant 0 : index
    %c0_56 = arith.constant 0 : index
    %56 = vector.load %arg5[%c0_55, %c0_56] : memref<32x32xbf16, #tpu.memory_space<vmem>>, vector<32x32xbf16>
    %57 = arith.extf %56 : vector<32x32xbf16> to vector<32x32xf32>
    %58 = arith.addf %55, %57 : vector<32x32xf32>
    %cst_57 = arith.constant 0.000000e+00 : f32
    %59 = vector.broadcast %cst_57 : f32 to vector<32x32xf32>
    %60 = arith.maximumf %58, %59 : vector<32x32xf32>
    %61 = arith.truncf %60 : vector<32x32xf32> to vector<32x32xbf16>
    %c0_58 = arith.constant 0 : index
    %c0_59 = arith.constant 0 : index
    %62 = vector.load %arg6[%c0_58, %c0_59] : memref<32x32xbf16, #tpu.memory_space<vmem>>, vector<32x32xbf16>
    tpu.vector_store %arg6[%c0_58, %c0_59], %61 {strides = array<i32>} : memref<32x32xbf16, #tpu.memory_space<vmem>>, vector<32x32xbf16>,
    return
  }
  func.func @transform_0(%arg0: i32, %arg1: i32) -> (i32, i32, i32) {
    %c0_i32 = arith.constant 0 : i32
    %c0_i32_0 = arith.constant 0 : i32
    %c0_i32_1 = arith.constant 0 : i32
    return %c0_i32, %arg0, %c0_i32_0 : i32, i32, i32
  }
  func.func @transform_1(%arg0: i32, %arg1: i32) -> (i32, i32, i32) {
    %c0_i32 = arith.constant 0 : i32
    %c0_i32_0 = arith.constant 0 : i32
    %c0_i32_1 = arith.constant 0 : i32
    return %c0_i32, %c0_i32_0, %arg1 : i32, i32, i32
  }
  func.func @transform_2(%arg0: i32, %arg1: i32) -> (i32, i32) {
    %c0_i32 = arith.constant 0 : i32
    %c0_i32_0 = arith.constant 0 : i32
    return %c0_i32, %arg1 : i32, i32
  }
  func.func @transform_3(%arg0: i32, %arg1: i32) -> (i32, i32) {
    %c0_i32 = arith.constant 0 : i32
    return %arg0, %arg1 : i32, i32
  }
  func.func @transform_4(%arg0: i32, %arg1: i32) -> (i32, i32) {
    %c0_i32 = arith.constant 0 : i32
    return %arg0, %arg1 : i32, i32
  }
}

module attributes {stable_mosaic.version = 11 : i64} {
  func.func @_conv_mm_kernel(%arg0: i32, %arg1: i32, %arg2: memref<9x8x32xbf16, #tpu.memory_space<vmem>>, %arg3: memref<9x32x64xbf16, #tpu.memory_space<vmem>>, %arg4: memref<1x64xf32, #tpu.memory_space<vmem>>, %arg5: memref<8x64xbf16, #tpu.memory_space<vmem>>) attributes {dimension_semantics = [#tpu.dimension_semantics<parallel>, #tpu.dimension_semantics<parallel>], iteration_bounds = array<i64: 1, 1>, scalar_prefetch = 0 : i64, scratch_operands = 0 : i64, tpu.core_type = #tpu.core_type<tc>, window_params = [{transform_indices = @transform_0, window_bounds = array<i64: 9, 8, 32>}, {transform_indices = @transform_1, window_bounds = array<i64: 9, 32, 64>}, {transform_indices = @transform_2, window_bounds = array<i64: 1, 64>}, {transform_indices = @transform_3, window_bounds = array<i64: 8, 64>}]} {
    %c0 = arith.constant 0 : index
    %c0_0 = arith.constant 0 : index
    %c0_1 = arith.constant 0 : index
    %0 = vector.load %arg2[%c0, %c0_0, %c0_1] : memref<9x8x32xbf16, #tpu.memory_space<vmem>>, vector<1x8x32xbf16>
    %1 = vector.shape_cast %0 : vector<1x8x32xbf16> to vector<8x32xbf16>
    %c0_2 = arith.constant 0 : index
    %c0_3 = arith.constant 0 : index
    %c0_4 = arith.constant 0 : index
    %2 = vector.load %arg3[%c0_2, %c0_3, %c0_4] : memref<9x32x64xbf16, #tpu.memory_space<vmem>>, vector<1x32x64xbf16>
    %3 = vector.shape_cast %2 : vector<1x32x64xbf16> to vector<32x64xbf16>
    %cst = arith.constant dense<0.000000e+00> : vector<8x64xf32>
    %4 = tpu.matmul %1, %3, %cst {dimension_numbers = #tpu.dot_dimension_numbers<[1], [0], [0], [1], [0, 0, 1, 1], [], []>} : vector<8x32xbf16>, vector<32x64xbf16>, vector<8x64xf32> -> vector<8x64xf32>
    %c1 = arith.constant 1 : index
    %c0_5 = arith.constant 0 : index
    %c0_6 = arith.constant 0 : index
    %5 = vector.load %arg2[%c1, %c0_5, %c0_6] : memref<9x8x32xbf16, #tpu.memory_space<vmem>>, vector<1x8x32xbf16>
    %6 = vector.shape_cast %5 : vector<1x8x32xbf16> to vector<8x32xbf16>
    %c1_7 = arith.constant 1 : index
    %c0_8 = arith.constant 0 : index
    %c0_9 = arith.constant 0 : index
    %7 = vector.load %arg3[%c1_7, %c0_8, %c0_9] : memref<9x32x64xbf16, #tpu.memory_space<vmem>>, vector<1x32x64xbf16>
    %8 = vector.shape_cast %7 : vector<1x32x64xbf16> to vector<32x64xbf16>
    %cst_10 = arith.constant dense<0.000000e+00> : vector<8x64xf32>
    %9 = tpu.matmul %6, %8, %cst_10 {dimension_numbers = #tpu.dot_dimension_numbers<[1], [0], [0], [1], [0, 0, 1, 1], [], []>} : vector<8x32xbf16>, vector<32x64xbf16>, vector<8x64xf32> -> vector<8x64xf32>
    %10 = arith.addf %4, %9 : vector<8x64xf32>
    %c2 = arith.constant 2 : index
    %c0_11 = arith.constant 0 : index
    %c0_12 = arith.constant 0 : index
    %11 = vector.load %arg2[%c2, %c0_11, %c0_12] : memref<9x8x32xbf16, #tpu.memory_space<vmem>>, vector<1x8x32xbf16>
    %12 = vector.shape_cast %11 : vector<1x8x32xbf16> to vector<8x32xbf16>
    %c2_13 = arith.constant 2 : index
    %c0_14 = arith.constant 0 : index
    %c0_15 = arith.constant 0 : index
    %13 = vector.load %arg3[%c2_13, %c0_14, %c0_15] : memref<9x32x64xbf16, #tpu.memory_space<vmem>>, vector<1x32x64xbf16>
    %14 = vector.shape_cast %13 : vector<1x32x64xbf16> to vector<32x64xbf16>
    %cst_16 = arith.constant dense<0.000000e+00> : vector<8x64xf32>
    %15 = tpu.matmul %12, %14, %cst_16 {dimension_numbers = #tpu.dot_dimension_numbers<[1], [0], [0], [1], [0, 0, 1, 1], [], []>} : vector<8x32xbf16>, vector<32x64xbf16>, vector<8x64xf32> -> vector<8x64xf32>
    %16 = arith.addf %10, %15 : vector<8x64xf32>
    %c3 = arith.constant 3 : index
    %c0_17 = arith.constant 0 : index
    %c0_18 = arith.constant 0 : index
    %17 = vector.load %arg2[%c3, %c0_17, %c0_18] : memref<9x8x32xbf16, #tpu.memory_space<vmem>>, vector<1x8x32xbf16>
    %18 = vector.shape_cast %17 : vector<1x8x32xbf16> to vector<8x32xbf16>
    %c3_19 = arith.constant 3 : index
    %c0_20 = arith.constant 0 : index
    %c0_21 = arith.constant 0 : index
    %19 = vector.load %arg3[%c3_19, %c0_20, %c0_21] : memref<9x32x64xbf16, #tpu.memory_space<vmem>>, vector<1x32x64xbf16>
    %20 = vector.shape_cast %19 : vector<1x32x64xbf16> to vector<32x64xbf16>
    %cst_22 = arith.constant dense<0.000000e+00> : vector<8x64xf32>
    %21 = tpu.matmul %18, %20, %cst_22 {dimension_numbers = #tpu.dot_dimension_numbers<[1], [0], [0], [1], [0, 0, 1, 1], [], []>} : vector<8x32xbf16>, vector<32x64xbf16>, vector<8x64xf32> -> vector<8x64xf32>
    %22 = arith.addf %16, %21 : vector<8x64xf32>
    %c4 = arith.constant 4 : index
    %c0_23 = arith.constant 0 : index
    %c0_24 = arith.constant 0 : index
    %23 = vector.load %arg2[%c4, %c0_23, %c0_24] : memref<9x8x32xbf16, #tpu.memory_space<vmem>>, vector<1x8x32xbf16>
    %24 = vector.shape_cast %23 : vector<1x8x32xbf16> to vector<8x32xbf16>
    %c4_25 = arith.constant 4 : index
    %c0_26 = arith.constant 0 : index
    %c0_27 = arith.constant 0 : index
    %25 = vector.load %arg3[%c4_25, %c0_26, %c0_27] : memref<9x32x64xbf16, #tpu.memory_space<vmem>>, vector<1x32x64xbf16>
    %26 = vector.shape_cast %25 : vector<1x32x64xbf16> to vector<32x64xbf16>
    %cst_28 = arith.constant dense<0.000000e+00> : vector<8x64xf32>
    %27 = tpu.matmul %24, %26, %cst_28 {dimension_numbers = #tpu.dot_dimension_numbers<[1], [0], [0], [1], [0, 0, 1, 1], [], []>} : vector<8x32xbf16>, vector<32x64xbf16>, vector<8x64xf32> -> vector<8x64xf32>
    %28 = arith.addf %22, %27 : vector<8x64xf32>
    %c5 = arith.constant 5 : index
    %c0_29 = arith.constant 0 : index
    %c0_30 = arith.constant 0 : index
    %29 = vector.load %arg2[%c5, %c0_29, %c0_30] : memref<9x8x32xbf16, #tpu.memory_space<vmem>>, vector<1x8x32xbf16>
    %30 = vector.shape_cast %29 : vector<1x8x32xbf16> to vector<8x32xbf16>
    %c5_31 = arith.constant 5 : index
    %c0_32 = arith.constant 0 : index
    %c0_33 = arith.constant 0 : index
    %31 = vector.load %arg3[%c5_31, %c0_32, %c0_33] : memref<9x32x64xbf16, #tpu.memory_space<vmem>>, vector<1x32x64xbf16>
    %32 = vector.shape_cast %31 : vector<1x32x64xbf16> to vector<32x64xbf16>
    %cst_34 = arith.constant dense<0.000000e+00> : vector<8x64xf32>
    %33 = tpu.matmul %30, %32, %cst_34 {dimension_numbers = #tpu.dot_dimension_numbers<[1], [0], [0], [1], [0, 0, 1, 1], [], []>} : vector<8x32xbf16>, vector<32x64xbf16>, vector<8x64xf32> -> vector<8x64xf32>
    %34 = arith.addf %28, %33 : vector<8x64xf32>
    %c6 = arith.constant 6 : index
    %c0_35 = arith.constant 0 : index
    %c0_36 = arith.constant 0 : index
    %35 = vector.load %arg2[%c6, %c0_35, %c0_36] : memref<9x8x32xbf16, #tpu.memory_space<vmem>>, vector<1x8x32xbf16>
    %36 = vector.shape_cast %35 : vector<1x8x32xbf16> to vector<8x32xbf16>
    %c6_37 = arith.constant 6 : index
    %c0_38 = arith.constant 0 : index
    %c0_39 = arith.constant 0 : index
    %37 = vector.load %arg3[%c6_37, %c0_38, %c0_39] : memref<9x32x64xbf16, #tpu.memory_space<vmem>>, vector<1x32x64xbf16>
    %38 = vector.shape_cast %37 : vector<1x32x64xbf16> to vector<32x64xbf16>
    %cst_40 = arith.constant dense<0.000000e+00> : vector<8x64xf32>
    %39 = tpu.matmul %36, %38, %cst_40 {dimension_numbers = #tpu.dot_dimension_numbers<[1], [0], [0], [1], [0, 0, 1, 1], [], []>} : vector<8x32xbf16>, vector<32x64xbf16>, vector<8x64xf32> -> vector<8x64xf32>
    %40 = arith.addf %34, %39 : vector<8x64xf32>
    %c7 = arith.constant 7 : index
    %c0_41 = arith.constant 0 : index
    %c0_42 = arith.constant 0 : index
    %41 = vector.load %arg2[%c7, %c0_41, %c0_42] : memref<9x8x32xbf16, #tpu.memory_space<vmem>>, vector<1x8x32xbf16>
    %42 = vector.shape_cast %41 : vector<1x8x32xbf16> to vector<8x32xbf16>
    %c7_43 = arith.constant 7 : index
    %c0_44 = arith.constant 0 : index
    %c0_45 = arith.constant 0 : index
    %43 = vector.load %arg3[%c7_43, %c0_44, %c0_45] : memref<9x32x64xbf16, #tpu.memory_space<vmem>>, vector<1x32x64xbf16>
    %44 = vector.shape_cast %43 : vector<1x32x64xbf16> to vector<32x64xbf16>
    %cst_46 = arith.constant dense<0.000000e+00> : vector<8x64xf32>
    %45 = tpu.matmul %42, %44, %cst_46 {dimension_numbers = #tpu.dot_dimension_numbers<[1], [0], [0], [1], [0, 0, 1, 1], [], []>} : vector<8x32xbf16>, vector<32x64xbf16>, vector<8x64xf32> -> vector<8x64xf32>
    %46 = arith.addf %40, %45 : vector<8x64xf32>
    %c8 = arith.constant 8 : index
    %c0_47 = arith.constant 0 : index
    %c0_48 = arith.constant 0 : index
    %47 = vector.load %arg2[%c8, %c0_47, %c0_48] : memref<9x8x32xbf16, #tpu.memory_space<vmem>>, vector<1x8x32xbf16>
    %48 = vector.shape_cast %47 : vector<1x8x32xbf16> to vector<8x32xbf16>
    %c8_49 = arith.constant 8 : index
    %c0_50 = arith.constant 0 : index
    %c0_51 = arith.constant 0 : index
    %49 = vector.load %arg3[%c8_49, %c0_50, %c0_51] : memref<9x32x64xbf16, #tpu.memory_space<vmem>>, vector<1x32x64xbf16>
    %50 = vector.shape_cast %49 : vector<1x32x64xbf16> to vector<32x64xbf16>
    %cst_52 = arith.constant dense<0.000000e+00> : vector<8x64xf32>
    %51 = tpu.matmul %48, %50, %cst_52 {dimension_numbers = #tpu.dot_dimension_numbers<[1], [0], [0], [1], [0, 0, 1, 1], [], []>} : vector<8x32xbf16>, vector<32x64xbf16>, vector<8x64xf32> -> vector<8x64xf32>
    %52 = arith.addf %46, %51 : vector<8x64xf32>
    %c0_53 = arith.constant 0 : index
    %c0_54 = arith.constant 0 : index
    %53 = vector.load %arg4[%c0_53, %c0_54] : memref<1x64xf32, #tpu.memory_space<vmem>>, vector<1x64xf32>
    %54 = vector.broadcast %53 : vector<1x64xf32> to vector<8x64xf32>
    %55 = arith.addf %52, %54 : vector<8x64xf32>
    %cst_55 = arith.constant 0.000000e+00 : f32
    %56 = vector.broadcast %cst_55 : f32 to vector<8x64xf32>
    %57 = arith.maximumf %55, %56 : vector<8x64xf32>
    %58 = arith.truncf %57 : vector<8x64xf32> to vector<8x64xbf16>
    %c0_56 = arith.constant 0 : index
    %c0_57 = arith.constant 0 : index
    %59 = vector.load %arg5[%c0_56, %c0_57] : memref<8x64xbf16, #tpu.memory_space<vmem>>, vector<8x64xbf16>
    tpu.vector_store %arg5[%c0_56, %c0_57], %58 {strides = array<i32>} : memref<8x64xbf16, #tpu.memory_space<vmem>>, vector<8x64xbf16>,
    return
  }
  func.func @transform_0(%arg0: i32, %arg1: i32) -> (i32, i32, i32) {
    %c0_i32 = arith.constant 0 : i32
    %c0_i32_0 = arith.constant 0 : i32
    %c0_i32_1 = arith.constant 0 : i32
    return %c0_i32, %arg0, %c0_i32_0 : i32, i32, i32
  }
  func.func @transform_1(%arg0: i32, %arg1: i32) -> (i32, i32, i32) {
    %c0_i32 = arith.constant 0 : i32
    %c0_i32_0 = arith.constant 0 : i32
    %c0_i32_1 = arith.constant 0 : i32
    return %c0_i32, %c0_i32_0, %arg1 : i32, i32, i32
  }
  func.func @transform_2(%arg0: i32, %arg1: i32) -> (i32, i32) {
    %c0_i32 = arith.constant 0 : i32
    %c0_i32_0 = arith.constant 0 : i32
    return %c0_i32, %arg1 : i32, i32
  }
  func.func @transform_3(%arg0: i32, %arg1: i32) -> (i32, i32) {
    %c0_i32 = arith.constant 0 : i32
    return %arg0, %arg1 : i32, i32
  }
}

module attributes {stable_mosaic.version = 11 : i64} {
  func.func @_conv_mm_kernel(%arg0: i32, %arg1: i32, %arg2: memref<1x8x32xbf16, #tpu.memory_space<vmem>>, %arg3: memref<1x32x64xbf16, #tpu.memory_space<vmem>>, %arg4: memref<1x64xf32, #tpu.memory_space<vmem>>, %arg5: memref<8x64xbf16, #tpu.memory_space<vmem>>) attributes {dimension_semantics = [#tpu.dimension_semantics<parallel>, #tpu.dimension_semantics<parallel>], iteration_bounds = array<i64: 1, 1>, scalar_prefetch = 0 : i64, scratch_operands = 0 : i64, tpu.core_type = #tpu.core_type<tc>, window_params = [{transform_indices = @transform_0, window_bounds = array<i64: 1, 8, 32>}, {transform_indices = @transform_1, window_bounds = array<i64: 1, 32, 64>}, {transform_indices = @transform_2, window_bounds = array<i64: 1, 64>}, {transform_indices = @transform_3, window_bounds = array<i64: 8, 64>}]} {
    %c0 = arith.constant 0 : index
    %c0_0 = arith.constant 0 : index
    %c0_1 = arith.constant 0 : index
    %0 = vector.load %arg2[%c0, %c0_0, %c0_1] : memref<1x8x32xbf16, #tpu.memory_space<vmem>>, vector<1x8x32xbf16>
    %1 = vector.shape_cast %0 : vector<1x8x32xbf16> to vector<8x32xbf16>
    %c0_2 = arith.constant 0 : index
    %c0_3 = arith.constant 0 : index
    %c0_4 = arith.constant 0 : index
    %2 = vector.load %arg3[%c0_2, %c0_3, %c0_4] : memref<1x32x64xbf16, #tpu.memory_space<vmem>>, vector<1x32x64xbf16>
    %3 = vector.shape_cast %2 : vector<1x32x64xbf16> to vector<32x64xbf16>
    %cst = arith.constant dense<0.000000e+00> : vector<8x64xf32>
    %4 = tpu.matmul %1, %3, %cst {dimension_numbers = #tpu.dot_dimension_numbers<[1], [0], [0], [1], [0, 0, 1, 1], [], []>} : vector<8x32xbf16>, vector<32x64xbf16>, vector<8x64xf32> -> vector<8x64xf32>
    %c0_5 = arith.constant 0 : index
    %c0_6 = arith.constant 0 : index
    %5 = vector.load %arg4[%c0_5, %c0_6] : memref<1x64xf32, #tpu.memory_space<vmem>>, vector<1x64xf32>
    %6 = vector.broadcast %5 : vector<1x64xf32> to vector<8x64xf32>
    %7 = arith.addf %4, %6 : vector<8x64xf32>
    %8 = arith.truncf %7 : vector<8x64xf32> to vector<8x64xbf16>
    %c0_7 = arith.constant 0 : index
    %c0_8 = arith.constant 0 : index
    %9 = vector.load %arg5[%c0_7, %c0_8] : memref<8x64xbf16, #tpu.memory_space<vmem>>, vector<8x64xbf16>
    tpu.vector_store %arg5[%c0_7, %c0_8], %8 {strides = array<i32>} : memref<8x64xbf16, #tpu.memory_space<vmem>>, vector<8x64xbf16>,
    return
  }
  func.func @transform_0(%arg0: i32, %arg1: i32) -> (i32, i32, i32) {
    %c0_i32 = arith.constant 0 : i32
    %c0_i32_0 = arith.constant 0 : i32
    %c0_i32_1 = arith.constant 0 : i32
    return %c0_i32, %arg0, %c0_i32_0 : i32, i32, i32
  }
  func.func @transform_1(%arg0: i32, %arg1: i32) -> (i32, i32, i32) {
    %c0_i32 = arith.constant 0 : i32
    %c0_i32_0 = arith.constant 0 : i32
    %c0_i32_1 = arith.constant 0 : i32
    return %c0_i32, %c0_i32_0, %arg1 : i32, i32, i32
  }
  func.func @transform_2(%arg0: i32, %arg1: i32) -> (i32, i32) {
    %c0_i32 = arith.constant 0 : i32
    %c0_i32_0 = arith.constant 0 : i32
    return %c0_i32, %arg1 : i32, i32
  }
  func.func @transform_3(%arg0: i32, %arg1: i32) -> (i32, i32) {
    %c0_i32 = arith.constant 0 : i32
    return %arg0, %arg1 : i32, i32
  }
}

module attributes {stable_mosaic.version = 11 : i64} {
  func.func @_conv_mm_res_kernel(%arg0: i32, %arg1: i32, %arg2: memref<9x8x64xbf16, #tpu.memory_space<vmem>>, %arg3: memref<9x64x64xbf16, #tpu.memory_space<vmem>>, %arg4: memref<1x64xf32, #tpu.memory_space<vmem>>, %arg5: memref<8x64xbf16, #tpu.memory_space<vmem>>, %arg6: memref<8x64xbf16, #tpu.memory_space<vmem>>) attributes {dimension_semantics = [#tpu.dimension_semantics<parallel>, #tpu.dimension_semantics<parallel>], iteration_bounds = array<i64: 1, 1>, scalar_prefetch = 0 : i64, scratch_operands = 0 : i64, tpu.core_type = #tpu.core_type<tc>, window_params = [{transform_indices = @transform_0, window_bounds = array<i64: 9, 8, 64>}, {transform_indices = @transform_1, window_bounds = array<i64: 9, 64, 64>}, {transform_indices = @transform_2, window_bounds = array<i64: 1, 64>}, {transform_indices = @transform_3, window_bounds = array<i64: 8, 64>}, {transform_indices = @transform_4, window_bounds = array<i64: 8, 64>}]} {
    %c0 = arith.constant 0 : index
    %c0_0 = arith.constant 0 : index
    %c0_1 = arith.constant 0 : index
    %0 = vector.load %arg2[%c0, %c0_0, %c0_1] : memref<9x8x64xbf16, #tpu.memory_space<vmem>>, vector<1x8x64xbf16>
    %1 = vector.shape_cast %0 : vector<1x8x64xbf16> to vector<8x64xbf16>
    %c0_2 = arith.constant 0 : index
    %c0_3 = arith.constant 0 : index
    %c0_4 = arith.constant 0 : index
    %2 = vector.load %arg3[%c0_2, %c0_3, %c0_4] : memref<9x64x64xbf16, #tpu.memory_space<vmem>>, vector<1x64x64xbf16>
    %3 = vector.shape_cast %2 : vector<1x64x64xbf16> to vector<64x64xbf16>
    %cst = arith.constant dense<0.000000e+00> : vector<8x64xf32>
    %4 = tpu.matmul %1, %3, %cst {dimension_numbers = #tpu.dot_dimension_numbers<[1], [0], [0], [1], [0, 0, 1, 1], [], []>} : vector<8x64xbf16>, vector<64x64xbf16>, vector<8x64xf32> -> vector<8x64xf32>
    %c1 = arith.constant 1 : index
    %c0_5 = arith.constant 0 : index
    %c0_6 = arith.constant 0 : index
    %5 = vector.load %arg2[%c1, %c0_5, %c0_6] : memref<9x8x64xbf16, #tpu.memory_space<vmem>>, vector<1x8x64xbf16>
    %6 = vector.shape_cast %5 : vector<1x8x64xbf16> to vector<8x64xbf16>
    %c1_7 = arith.constant 1 : index
    %c0_8 = arith.constant 0 : index
    %c0_9 = arith.constant 0 : index
    %7 = vector.load %arg3[%c1_7, %c0_8, %c0_9] : memref<9x64x64xbf16, #tpu.memory_space<vmem>>, vector<1x64x64xbf16>
    %8 = vector.shape_cast %7 : vector<1x64x64xbf16> to vector<64x64xbf16>
    %cst_10 = arith.constant dense<0.000000e+00> : vector<8x64xf32>
    %9 = tpu.matmul %6, %8, %cst_10 {dimension_numbers = #tpu.dot_dimension_numbers<[1], [0], [0], [1], [0, 0, 1, 1], [], []>} : vector<8x64xbf16>, vector<64x64xbf16>, vector<8x64xf32> -> vector<8x64xf32>
    %10 = arith.addf %4, %9 : vector<8x64xf32>
    %c2 = arith.constant 2 : index
    %c0_11 = arith.constant 0 : index
    %c0_12 = arith.constant 0 : index
    %11 = vector.load %arg2[%c2, %c0_11, %c0_12] : memref<9x8x64xbf16, #tpu.memory_space<vmem>>, vector<1x8x64xbf16>
    %12 = vector.shape_cast %11 : vector<1x8x64xbf16> to vector<8x64xbf16>
    %c2_13 = arith.constant 2 : index
    %c0_14 = arith.constant 0 : index
    %c0_15 = arith.constant 0 : index
    %13 = vector.load %arg3[%c2_13, %c0_14, %c0_15] : memref<9x64x64xbf16, #tpu.memory_space<vmem>>, vector<1x64x64xbf16>
    %14 = vector.shape_cast %13 : vector<1x64x64xbf16> to vector<64x64xbf16>
    %cst_16 = arith.constant dense<0.000000e+00> : vector<8x64xf32>
    %15 = tpu.matmul %12, %14, %cst_16 {dimension_numbers = #tpu.dot_dimension_numbers<[1], [0], [0], [1], [0, 0, 1, 1], [], []>} : vector<8x64xbf16>, vector<64x64xbf16>, vector<8x64xf32> -> vector<8x64xf32>
    %16 = arith.addf %10, %15 : vector<8x64xf32>
    %c3 = arith.constant 3 : index
    %c0_17 = arith.constant 0 : index
    %c0_18 = arith.constant 0 : index
    %17 = vector.load %arg2[%c3, %c0_17, %c0_18] : memref<9x8x64xbf16, #tpu.memory_space<vmem>>, vector<1x8x64xbf16>
    %18 = vector.shape_cast %17 : vector<1x8x64xbf16> to vector<8x64xbf16>
    %c3_19 = arith.constant 3 : index
    %c0_20 = arith.constant 0 : index
    %c0_21 = arith.constant 0 : index
    %19 = vector.load %arg3[%c3_19, %c0_20, %c0_21] : memref<9x64x64xbf16, #tpu.memory_space<vmem>>, vector<1x64x64xbf16>
    %20 = vector.shape_cast %19 : vector<1x64x64xbf16> to vector<64x64xbf16>
    %cst_22 = arith.constant dense<0.000000e+00> : vector<8x64xf32>
    %21 = tpu.matmul %18, %20, %cst_22 {dimension_numbers = #tpu.dot_dimension_numbers<[1], [0], [0], [1], [0, 0, 1, 1], [], []>} : vector<8x64xbf16>, vector<64x64xbf16>, vector<8x64xf32> -> vector<8x64xf32>
    %22 = arith.addf %16, %21 : vector<8x64xf32>
    %c4 = arith.constant 4 : index
    %c0_23 = arith.constant 0 : index
    %c0_24 = arith.constant 0 : index
    %23 = vector.load %arg2[%c4, %c0_23, %c0_24] : memref<9x8x64xbf16, #tpu.memory_space<vmem>>, vector<1x8x64xbf16>
    %24 = vector.shape_cast %23 : vector<1x8x64xbf16> to vector<8x64xbf16>
    %c4_25 = arith.constant 4 : index
    %c0_26 = arith.constant 0 : index
    %c0_27 = arith.constant 0 : index
    %25 = vector.load %arg3[%c4_25, %c0_26, %c0_27] : memref<9x64x64xbf16, #tpu.memory_space<vmem>>, vector<1x64x64xbf16>
    %26 = vector.shape_cast %25 : vector<1x64x64xbf16> to vector<64x64xbf16>
    %cst_28 = arith.constant dense<0.000000e+00> : vector<8x64xf32>
    %27 = tpu.matmul %24, %26, %cst_28 {dimension_numbers = #tpu.dot_dimension_numbers<[1], [0], [0], [1], [0, 0, 1, 1], [], []>} : vector<8x64xbf16>, vector<64x64xbf16>, vector<8x64xf32> -> vector<8x64xf32>
    %28 = arith.addf %22, %27 : vector<8x64xf32>
    %c5 = arith.constant 5 : index
    %c0_29 = arith.constant 0 : index
    %c0_30 = arith.constant 0 : index
    %29 = vector.load %arg2[%c5, %c0_29, %c0_30] : memref<9x8x64xbf16, #tpu.memory_space<vmem>>, vector<1x8x64xbf16>
    %30 = vector.shape_cast %29 : vector<1x8x64xbf16> to vector<8x64xbf16>
    %c5_31 = arith.constant 5 : index
    %c0_32 = arith.constant 0 : index
    %c0_33 = arith.constant 0 : index
    %31 = vector.load %arg3[%c5_31, %c0_32, %c0_33] : memref<9x64x64xbf16, #tpu.memory_space<vmem>>, vector<1x64x64xbf16>
    %32 = vector.shape_cast %31 : vector<1x64x64xbf16> to vector<64x64xbf16>
    %cst_34 = arith.constant dense<0.000000e+00> : vector<8x64xf32>
    %33 = tpu.matmul %30, %32, %cst_34 {dimension_numbers = #tpu.dot_dimension_numbers<[1], [0], [0], [1], [0, 0, 1, 1], [], []>} : vector<8x64xbf16>, vector<64x64xbf16>, vector<8x64xf32> -> vector<8x64xf32>
    %34 = arith.addf %28, %33 : vector<8x64xf32>
    %c6 = arith.constant 6 : index
    %c0_35 = arith.constant 0 : index
    %c0_36 = arith.constant 0 : index
    %35 = vector.load %arg2[%c6, %c0_35, %c0_36] : memref<9x8x64xbf16, #tpu.memory_space<vmem>>, vector<1x8x64xbf16>
    %36 = vector.shape_cast %35 : vector<1x8x64xbf16> to vector<8x64xbf16>
    %c6_37 = arith.constant 6 : index
    %c0_38 = arith.constant 0 : index
    %c0_39 = arith.constant 0 : index
    %37 = vector.load %arg3[%c6_37, %c0_38, %c0_39] : memref<9x64x64xbf16, #tpu.memory_space<vmem>>, vector<1x64x64xbf16>
    %38 = vector.shape_cast %37 : vector<1x64x64xbf16> to vector<64x64xbf16>
    %cst_40 = arith.constant dense<0.000000e+00> : vector<8x64xf32>
    %39 = tpu.matmul %36, %38, %cst_40 {dimension_numbers = #tpu.dot_dimension_numbers<[1], [0], [0], [1], [0, 0, 1, 1], [], []>} : vector<8x64xbf16>, vector<64x64xbf16>, vector<8x64xf32> -> vector<8x64xf32>
    %40 = arith.addf %34, %39 : vector<8x64xf32>
    %c7 = arith.constant 7 : index
    %c0_41 = arith.constant 0 : index
    %c0_42 = arith.constant 0 : index
    %41 = vector.load %arg2[%c7, %c0_41, %c0_42] : memref<9x8x64xbf16, #tpu.memory_space<vmem>>, vector<1x8x64xbf16>
    %42 = vector.shape_cast %41 : vector<1x8x64xbf16> to vector<8x64xbf16>
    %c7_43 = arith.constant 7 : index
    %c0_44 = arith.constant 0 : index
    %c0_45 = arith.constant 0 : index
    %43 = vector.load %arg3[%c7_43, %c0_44, %c0_45] : memref<9x64x64xbf16, #tpu.memory_space<vmem>>, vector<1x64x64xbf16>
    %44 = vector.shape_cast %43 : vector<1x64x64xbf16> to vector<64x64xbf16>
    %cst_46 = arith.constant dense<0.000000e+00> : vector<8x64xf32>
    %45 = tpu.matmul %42, %44, %cst_46 {dimension_numbers = #tpu.dot_dimension_numbers<[1], [0], [0], [1], [0, 0, 1, 1], [], []>} : vector<8x64xbf16>, vector<64x64xbf16>, vector<8x64xf32> -> vector<8x64xf32>
    %46 = arith.addf %40, %45 : vector<8x64xf32>
    %c8 = arith.constant 8 : index
    %c0_47 = arith.constant 0 : index
    %c0_48 = arith.constant 0 : index
    %47 = vector.load %arg2[%c8, %c0_47, %c0_48] : memref<9x8x64xbf16, #tpu.memory_space<vmem>>, vector<1x8x64xbf16>
    %48 = vector.shape_cast %47 : vector<1x8x64xbf16> to vector<8x64xbf16>
    %c8_49 = arith.constant 8 : index
    %c0_50 = arith.constant 0 : index
    %c0_51 = arith.constant 0 : index
    %49 = vector.load %arg3[%c8_49, %c0_50, %c0_51] : memref<9x64x64xbf16, #tpu.memory_space<vmem>>, vector<1x64x64xbf16>
    %50 = vector.shape_cast %49 : vector<1x64x64xbf16> to vector<64x64xbf16>
    %cst_52 = arith.constant dense<0.000000e+00> : vector<8x64xf32>
    %51 = tpu.matmul %48, %50, %cst_52 {dimension_numbers = #tpu.dot_dimension_numbers<[1], [0], [0], [1], [0, 0, 1, 1], [], []>} : vector<8x64xbf16>, vector<64x64xbf16>, vector<8x64xf32> -> vector<8x64xf32>
    %52 = arith.addf %46, %51 : vector<8x64xf32>
    %c0_53 = arith.constant 0 : index
    %c0_54 = arith.constant 0 : index
    %53 = vector.load %arg4[%c0_53, %c0_54] : memref<1x64xf32, #tpu.memory_space<vmem>>, vector<1x64xf32>
    %54 = vector.broadcast %53 : vector<1x64xf32> to vector<8x64xf32>
    %55 = arith.addf %52, %54 : vector<8x64xf32>
    %c0_55 = arith.constant 0 : index
    %c0_56 = arith.constant 0 : index
    %56 = vector.load %arg5[%c0_55, %c0_56] : memref<8x64xbf16, #tpu.memory_space<vmem>>, vector<8x64xbf16>
    %57 = arith.extf %56 : vector<8x64xbf16> to vector<8x64xf32>
    %58 = arith.addf %55, %57 : vector<8x64xf32>
    %cst_57 = arith.constant 0.000000e+00 : f32
    %59 = vector.broadcast %cst_57 : f32 to vector<8x64xf32>
    %60 = arith.maximumf %58, %59 : vector<8x64xf32>
    %61 = arith.truncf %60 : vector<8x64xf32> to vector<8x64xbf16>
    %c0_58 = arith.constant 0 : index
    %c0_59 = arith.constant 0 : index
    %62 = vector.load %arg6[%c0_58, %c0_59] : memref<8x64xbf16, #tpu.memory_space<vmem>>, vector<8x64xbf16>
    tpu.vector_store %arg6[%c0_58, %c0_59], %61 {strides = array<i32>} : memref<8x64xbf16, #tpu.memory_space<vmem>>, vector<8x64xbf16>,
    return
  }
  func.func @transform_0(%arg0: i32, %arg1: i32) -> (i32, i32, i32) {
    %c0_i32 = arith.constant 0 : i32
    %c0_i32_0 = arith.constant 0 : i32
    %c0_i32_1 = arith.constant 0 : i32
    return %c0_i32, %arg0, %c0_i32_0 : i32, i32, i32
  }
  func.func @transform_1(%arg0: i32, %arg1: i32) -> (i32, i32, i32) {
    %c0_i32 = arith.constant 0 : i32
    %c0_i32_0 = arith.constant 0 : i32
    %c0_i32_1 = arith.constant 0 : i32
    return %c0_i32, %c0_i32_0, %arg1 : i32, i32, i32
  }
  func.func @transform_2(%arg0: i32, %arg1: i32) -> (i32, i32) {
    %c0_i32 = arith.constant 0 : i32
    %c0_i32_0 = arith.constant 0 : i32
    return %c0_i32, %arg1 : i32, i32
  }
  func.func @transform_3(%arg0: i32, %arg1: i32) -> (i32, i32) {
    %c0_i32 = arith.constant 0 : i32
    return %arg0, %arg1 : i32, i32
  }
  func.func @transform_4(%arg0: i32, %arg1: i32) -> (i32, i32) {
    %c0_i32 = arith.constant 0 : i32
    return %arg0, %arg1 : i32, i32
  }
}

module attributes {stable_mosaic.version = 11 : i64} {
  func.func @_conv_mm_kernel(%arg0: i32, %arg1: i32, %arg2: memref<9x8x64xbf16, #tpu.memory_space<vmem>>, %arg3: memref<9x64x64xbf16, #tpu.memory_space<vmem>>, %arg4: memref<1x64xf32, #tpu.memory_space<vmem>>, %arg5: memref<8x64xbf16, #tpu.memory_space<vmem>>) attributes {dimension_semantics = [#tpu.dimension_semantics<parallel>, #tpu.dimension_semantics<parallel>], iteration_bounds = array<i64: 1, 1>, scalar_prefetch = 0 : i64, scratch_operands = 0 : i64, tpu.core_type = #tpu.core_type<tc>, window_params = [{transform_indices = @transform_0, window_bounds = array<i64: 9, 8, 64>}, {transform_indices = @transform_1, window_bounds = array<i64: 9, 64, 64>}, {transform_indices = @transform_2, window_bounds = array<i64: 1, 64>}, {transform_indices = @transform_3, window_bounds = array<i64: 8, 64>}]} {
    %c0 = arith.constant 0 : index
    %c0_0 = arith.constant 0 : index
    %c0_1 = arith.constant 0 : index
    %0 = vector.load %arg2[%c0, %c0_0, %c0_1] : memref<9x8x64xbf16, #tpu.memory_space<vmem>>, vector<1x8x64xbf16>
    %1 = vector.shape_cast %0 : vector<1x8x64xbf16> to vector<8x64xbf16>
    %c0_2 = arith.constant 0 : index
    %c0_3 = arith.constant 0 : index
    %c0_4 = arith.constant 0 : index
    %2 = vector.load %arg3[%c0_2, %c0_3, %c0_4] : memref<9x64x64xbf16, #tpu.memory_space<vmem>>, vector<1x64x64xbf16>
    %3 = vector.shape_cast %2 : vector<1x64x64xbf16> to vector<64x64xbf16>
    %cst = arith.constant dense<0.000000e+00> : vector<8x64xf32>
    %4 = tpu.matmul %1, %3, %cst {dimension_numbers = #tpu.dot_dimension_numbers<[1], [0], [0], [1], [0, 0, 1, 1], [], []>} : vector<8x64xbf16>, vector<64x64xbf16>, vector<8x64xf32> -> vector<8x64xf32>
    %c1 = arith.constant 1 : index
    %c0_5 = arith.constant 0 : index
    %c0_6 = arith.constant 0 : index
    %5 = vector.load %arg2[%c1, %c0_5, %c0_6] : memref<9x8x64xbf16, #tpu.memory_space<vmem>>, vector<1x8x64xbf16>
    %6 = vector.shape_cast %5 : vector<1x8x64xbf16> to vector<8x64xbf16>
    %c1_7 = arith.constant 1 : index
    %c0_8 = arith.constant 0 : index
    %c0_9 = arith.constant 0 : index
    %7 = vector.load %arg3[%c1_7, %c0_8, %c0_9] : memref<9x64x64xbf16, #tpu.memory_space<vmem>>, vector<1x64x64xbf16>
    %8 = vector.shape_cast %7 : vector<1x64x64xbf16> to vector<64x64xbf16>
    %cst_10 = arith.constant dense<0.000000e+00> : vector<8x64xf32>
    %9 = tpu.matmul %6, %8, %cst_10 {dimension_numbers = #tpu.dot_dimension_numbers<[1], [0], [0], [1], [0, 0, 1, 1], [], []>} : vector<8x64xbf16>, vector<64x64xbf16>, vector<8x64xf32> -> vector<8x64xf32>
    %10 = arith.addf %4, %9 : vector<8x64xf32>
    %c2 = arith.constant 2 : index
    %c0_11 = arith.constant 0 : index
    %c0_12 = arith.constant 0 : index
    %11 = vector.load %arg2[%c2, %c0_11, %c0_12] : memref<9x8x64xbf16, #tpu.memory_space<vmem>>, vector<1x8x64xbf16>
    %12 = vector.shape_cast %11 : vector<1x8x64xbf16> to vector<8x64xbf16>
    %c2_13 = arith.constant 2 : index
    %c0_14 = arith.constant 0 : index
    %c0_15 = arith.constant 0 : index
    %13 = vector.load %arg3[%c2_13, %c0_14, %c0_15] : memref<9x64x64xbf16, #tpu.memory_space<vmem>>, vector<1x64x64xbf16>
    %14 = vector.shape_cast %13 : vector<1x64x64xbf16> to vector<64x64xbf16>
    %cst_16 = arith.constant dense<0.000000e+00> : vector<8x64xf32>
    %15 = tpu.matmul %12, %14, %cst_16 {dimension_numbers = #tpu.dot_dimension_numbers<[1], [0], [0], [1], [0, 0, 1, 1], [], []>} : vector<8x64xbf16>, vector<64x64xbf16>, vector<8x64xf32> -> vector<8x64xf32>
    %16 = arith.addf %10, %15 : vector<8x64xf32>
    %c3 = arith.constant 3 : index
    %c0_17 = arith.constant 0 : index
    %c0_18 = arith.constant 0 : index
    %17 = vector.load %arg2[%c3, %c0_17, %c0_18] : memref<9x8x64xbf16, #tpu.memory_space<vmem>>, vector<1x8x64xbf16>
    %18 = vector.shape_cast %17 : vector<1x8x64xbf16> to vector<8x64xbf16>
    %c3_19 = arith.constant 3 : index
    %c0_20 = arith.constant 0 : index
    %c0_21 = arith.constant 0 : index
    %19 = vector.load %arg3[%c3_19, %c0_20, %c0_21] : memref<9x64x64xbf16, #tpu.memory_space<vmem>>, vector<1x64x64xbf16>
    %20 = vector.shape_cast %19 : vector<1x64x64xbf16> to vector<64x64xbf16>
    %cst_22 = arith.constant dense<0.000000e+00> : vector<8x64xf32>
    %21 = tpu.matmul %18, %20, %cst_22 {dimension_numbers = #tpu.dot_dimension_numbers<[1], [0], [0], [1], [0, 0, 1, 1], [], []>} : vector<8x64xbf16>, vector<64x64xbf16>, vector<8x64xf32> -> vector<8x64xf32>
    %22 = arith.addf %16, %21 : vector<8x64xf32>
    %c4 = arith.constant 4 : index
    %c0_23 = arith.constant 0 : index
    %c0_24 = arith.constant 0 : index
    %23 = vector.load %arg2[%c4, %c0_23, %c0_24] : memref<9x8x64xbf16, #tpu.memory_space<vmem>>, vector<1x8x64xbf16>
    %24 = vector.shape_cast %23 : vector<1x8x64xbf16> to vector<8x64xbf16>
    %c4_25 = arith.constant 4 : index
    %c0_26 = arith.constant 0 : index
    %c0_27 = arith.constant 0 : index
    %25 = vector.load %arg3[%c4_25, %c0_26, %c0_27] : memref<9x64x64xbf16, #tpu.memory_space<vmem>>, vector<1x64x64xbf16>
    %26 = vector.shape_cast %25 : vector<1x64x64xbf16> to vector<64x64xbf16>
    %cst_28 = arith.constant dense<0.000000e+00> : vector<8x64xf32>
    %27 = tpu.matmul %24, %26, %cst_28 {dimension_numbers = #tpu.dot_dimension_numbers<[1], [0], [0], [1], [0, 0, 1, 1], [], []>} : vector<8x64xbf16>, vector<64x64xbf16>, vector<8x64xf32> -> vector<8x64xf32>
    %28 = arith.addf %22, %27 : vector<8x64xf32>
    %c5 = arith.constant 5 : index
    %c0_29 = arith.constant 0 : index
    %c0_30 = arith.constant 0 : index
    %29 = vector.load %arg2[%c5, %c0_29, %c0_30] : memref<9x8x64xbf16, #tpu.memory_space<vmem>>, vector<1x8x64xbf16>
    %30 = vector.shape_cast %29 : vector<1x8x64xbf16> to vector<8x64xbf16>
    %c5_31 = arith.constant 5 : index
    %c0_32 = arith.constant 0 : index
    %c0_33 = arith.constant 0 : index
    %31 = vector.load %arg3[%c5_31, %c0_32, %c0_33] : memref<9x64x64xbf16, #tpu.memory_space<vmem>>, vector<1x64x64xbf16>
    %32 = vector.shape_cast %31 : vector<1x64x64xbf16> to vector<64x64xbf16>
    %cst_34 = arith.constant dense<0.000000e+00> : vector<8x64xf32>
    %33 = tpu.matmul %30, %32, %cst_34 {dimension_numbers = #tpu.dot_dimension_numbers<[1], [0], [0], [1], [0, 0, 1, 1], [], []>} : vector<8x64xbf16>, vector<64x64xbf16>, vector<8x64xf32> -> vector<8x64xf32>
    %34 = arith.addf %28, %33 : vector<8x64xf32>
    %c6 = arith.constant 6 : index
    %c0_35 = arith.constant 0 : index
    %c0_36 = arith.constant 0 : index
    %35 = vector.load %arg2[%c6, %c0_35, %c0_36] : memref<9x8x64xbf16, #tpu.memory_space<vmem>>, vector<1x8x64xbf16>
    %36 = vector.shape_cast %35 : vector<1x8x64xbf16> to vector<8x64xbf16>
    %c6_37 = arith.constant 6 : index
    %c0_38 = arith.constant 0 : index
    %c0_39 = arith.constant 0 : index
    %37 = vector.load %arg3[%c6_37, %c0_38, %c0_39] : memref<9x64x64xbf16, #tpu.memory_space<vmem>>, vector<1x64x64xbf16>
    %38 = vector.shape_cast %37 : vector<1x64x64xbf16> to vector<64x64xbf16>
    %cst_40 = arith.constant dense<0.000000e+00> : vector<8x64xf32>
    %39 = tpu.matmul %36, %38, %cst_40 {dimension_numbers = #tpu.dot_dimension_numbers<[1], [0], [0], [1], [0, 0, 1, 1], [], []>} : vector<8x64xbf16>, vector<64x64xbf16>, vector<8x64xf32> -> vector<8x64xf32>
    %40 = arith.addf %34, %39 : vector<8x64xf32>
    %c7 = arith.constant 7 : index
    %c0_41 = arith.constant 0 : index
    %c0_42 = arith.constant 0 : index
    %41 = vector.load %arg2[%c7, %c0_41, %c0_42] : memref<9x8x64xbf16, #tpu.memory_space<vmem>>, vector<1x8x64xbf16>
    %42 = vector.shape_cast %41 : vector<1x8x64xbf16> to vector<8x64xbf16>
    %c7_43 = arith.constant 7 : index
    %c0_44 = arith.constant 0 : index
    %c0_45 = arith.constant 0 : index
    %43 = vector.load %arg3[%c7_43, %c0_44, %c0_45] : memref<9x64x64xbf16, #tpu.memory_space<vmem>>, vector<1x64x64xbf16>
    %44 = vector.shape_cast %43 : vector<1x64x64xbf16> to vector<64x64xbf16>
    %cst_46 = arith.constant dense<0.000000e+00> : vector<8x64xf32>
    %45 = tpu.matmul %42, %44, %cst_46 {dimension_numbers = #tpu.dot_dimension_numbers<[1], [0], [0], [1], [0, 0, 1, 1], [], []>} : vector<8x64xbf16>, vector<64x64xbf16>, vector<8x64xf32> -> vector<8x64xf32>
    %46 = arith.addf %40, %45 : vector<8x64xf32>
    %c8 = arith.constant 8 : index
    %c0_47 = arith.constant 0 : index
    %c0_48 = arith.constant 0 : index
    %47 = vector.load %arg2[%c8, %c0_47, %c0_48] : memref<9x8x64xbf16, #tpu.memory_space<vmem>>, vector<1x8x64xbf16>
    %48 = vector.shape_cast %47 : vector<1x8x64xbf16> to vector<8x64xbf16>
    %c8_49 = arith.constant 8 : index
    %c0_50 = arith.constant 0 : index
    %c0_51 = arith.constant 0 : index
    %49 = vector.load %arg3[%c8_49, %c0_50, %c0_51] : memref<9x64x64xbf16, #tpu.memory_space<vmem>>, vector<1x64x64xbf16>
    %50 = vector.shape_cast %49 : vector<1x64x64xbf16> to vector<64x64xbf16>
    %cst_52 = arith.constant dense<0.000000e+00> : vector<8x64xf32>
    %51 = tpu.matmul %48, %50, %cst_52 {dimension_numbers = #tpu.dot_dimension_numbers<[1], [0], [0], [1], [0, 0, 1, 1], [], []>} : vector<8x64xbf16>, vector<64x64xbf16>, vector<8x64xf32> -> vector<8x64xf32>
    %52 = arith.addf %46, %51 : vector<8x64xf32>
    %c0_53 = arith.constant 0 : index
    %c0_54 = arith.constant 0 : index
    %53 = vector.load %arg4[%c0_53, %c0_54] : memref<1x64xf32, #tpu.memory_space<vmem>>, vector<1x64xf32>
    %54 = vector.broadcast %53 : vector<1x64xf32> to vector<8x64xf32>
    %55 = arith.addf %52, %54 : vector<8x64xf32>
    %cst_55 = arith.constant 0.000000e+00 : f32
    %56 = vector.broadcast %cst_55 : f32 to vector<8x64xf32>
    %57 = arith.maximumf %55, %56 : vector<8x64xf32>
    %58 = arith.truncf %57 : vector<8x64xf32> to vector<8x64xbf16>
    %c0_56 = arith.constant 0 : index
    %c0_57 = arith.constant 0 : index
    %59 = vector.load %arg5[%c0_56, %c0_57] : memref<8x64xbf16, #tpu.memory_space<vmem>>, vector<8x64xbf16>
    tpu.vector_store %arg5[%c0_56, %c0_57], %58 {strides = array<i32>} : memref<8x64xbf16, #tpu.memory_space<vmem>>, vector<8x64xbf16>,
    return
  }
  func.func @transform_0(%arg0: i32, %arg1: i32) -> (i32, i32, i32) {
    %c0_i32 = arith.constant 0 : i32
    %c0_i32_0 = arith.constant 0 : i32
    %c0_i32_1 = arith.constant 0 : i32
    return %c0_i32, %arg0, %c0_i32_0 : i32, i32, i32
  }
  func.func @transform_1(%arg0: i32, %arg1: i32) -> (i32, i32, i32) {
    %c0_i32 = arith.constant 0 : i32
    %c0_i32_0 = arith.constant 0 : i32
    %c0_i32_1 = arith.constant 0 : i32
    return %c0_i32, %c0_i32_0, %arg1 : i32, i32, i32
  }
  func.func @transform_2(%arg0: i32, %arg1: i32) -> (i32, i32) {
    %c0_i32 = arith.constant 0 : i32
    %c0_i32_0 = arith.constant 0 : i32
    return %c0_i32, %arg1 : i32, i32
  }
  func.func @transform_3(%arg0: i32, %arg1: i32) -> (i32, i32) {
    %c0_i32 = arith.constant 0 : i32
    return %arg0, %arg1 : i32, i32
  }
}

module attributes {stable_mosaic.version = 11 : i64} {
  func.func @_conv_mm_kernel(%arg0: i32, %arg1: i32, %arg2: memref<9x8x64xbf16, #tpu.memory_space<vmem>>, %arg3: memref<9x64x128xbf16, #tpu.memory_space<vmem>>, %arg4: memref<1x128xf32, #tpu.memory_space<vmem>>, %arg5: memref<8x128xbf16, #tpu.memory_space<vmem>>) attributes {dimension_semantics = [#tpu.dimension_semantics<parallel>, #tpu.dimension_semantics<parallel>], iteration_bounds = array<i64: 1, 1>, scalar_prefetch = 0 : i64, scratch_operands = 0 : i64, tpu.core_type = #tpu.core_type<tc>, window_params = [{transform_indices = @transform_0, window_bounds = array<i64: 9, 8, 64>}, {transform_indices = @transform_1, window_bounds = array<i64: 9, 64, 128>}, {transform_indices = @transform_2, window_bounds = array<i64: 1, 128>}, {transform_indices = @transform_3, window_bounds = array<i64: 8, 128>}]} {
    %c0 = arith.constant 0 : index
    %c0_0 = arith.constant 0 : index
    %c0_1 = arith.constant 0 : index
    %0 = vector.load %arg2[%c0, %c0_0, %c0_1] : memref<9x8x64xbf16, #tpu.memory_space<vmem>>, vector<1x8x64xbf16>
    %1 = vector.shape_cast %0 : vector<1x8x64xbf16> to vector<8x64xbf16>
    %c0_2 = arith.constant 0 : index
    %c0_3 = arith.constant 0 : index
    %c0_4 = arith.constant 0 : index
    %2 = vector.load %arg3[%c0_2, %c0_3, %c0_4] : memref<9x64x128xbf16, #tpu.memory_space<vmem>>, vector<1x64x128xbf16>
    %3 = vector.shape_cast %2 : vector<1x64x128xbf16> to vector<64x128xbf16>
    %cst = arith.constant dense<0.000000e+00> : vector<8x128xf32>
    %4 = tpu.matmul %1, %3, %cst {dimension_numbers = #tpu.dot_dimension_numbers<[1], [0], [0], [1], [0, 0, 1, 1], [], []>} : vector<8x64xbf16>, vector<64x128xbf16>, vector<8x128xf32> -> vector<8x128xf32>
    %c1 = arith.constant 1 : index
    %c0_5 = arith.constant 0 : index
    %c0_6 = arith.constant 0 : index
    %5 = vector.load %arg2[%c1, %c0_5, %c0_6] : memref<9x8x64xbf16, #tpu.memory_space<vmem>>, vector<1x8x64xbf16>
    %6 = vector.shape_cast %5 : vector<1x8x64xbf16> to vector<8x64xbf16>
    %c1_7 = arith.constant 1 : index
    %c0_8 = arith.constant 0 : index
    %c0_9 = arith.constant 0 : index
    %7 = vector.load %arg3[%c1_7, %c0_8, %c0_9] : memref<9x64x128xbf16, #tpu.memory_space<vmem>>, vector<1x64x128xbf16>
    %8 = vector.shape_cast %7 : vector<1x64x128xbf16> to vector<64x128xbf16>
    %cst_10 = arith.constant dense<0.000000e+00> : vector<8x128xf32>
    %9 = tpu.matmul %6, %8, %cst_10 {dimension_numbers = #tpu.dot_dimension_numbers<[1], [0], [0], [1], [0, 0, 1, 1], [], []>} : vector<8x64xbf16>, vector<64x128xbf16>, vector<8x128xf32> -> vector<8x128xf32>
    %10 = arith.addf %4, %9 : vector<8x128xf32>
    %c2 = arith.constant 2 : index
    %c0_11 = arith.constant 0 : index
    %c0_12 = arith.constant 0 : index
    %11 = vector.load %arg2[%c2, %c0_11, %c0_12] : memref<9x8x64xbf16, #tpu.memory_space<vmem>>, vector<1x8x64xbf16>
    %12 = vector.shape_cast %11 : vector<1x8x64xbf16> to vector<8x64xbf16>
    %c2_13 = arith.constant 2 : index
    %c0_14 = arith.constant 0 : index
    %c0_15 = arith.constant 0 : index
    %13 = vector.load %arg3[%c2_13, %c0_14, %c0_15] : memref<9x64x128xbf16, #tpu.memory_space<vmem>>, vector<1x64x128xbf16>
    %14 = vector.shape_cast %13 : vector<1x64x128xbf16> to vector<64x128xbf16>
    %cst_16 = arith.constant dense<0.000000e+00> : vector<8x128xf32>
    %15 = tpu.matmul %12, %14, %cst_16 {dimension_numbers = #tpu.dot_dimension_numbers<[1], [0], [0], [1], [0, 0, 1, 1], [], []>} : vector<8x64xbf16>, vector<64x128xbf16>, vector<8x128xf32> -> vector<8x128xf32>
    %16 = arith.addf %10, %15 : vector<8x128xf32>
    %c3 = arith.constant 3 : index
    %c0_17 = arith.constant 0 : index
    %c0_18 = arith.constant 0 : index
    %17 = vector.load %arg2[%c3, %c0_17, %c0_18] : memref<9x8x64xbf16, #tpu.memory_space<vmem>>, vector<1x8x64xbf16>
    %18 = vector.shape_cast %17 : vector<1x8x64xbf16> to vector<8x64xbf16>
    %c3_19 = arith.constant 3 : index
    %c0_20 = arith.constant 0 : index
    %c0_21 = arith.constant 0 : index
    %19 = vector.load %arg3[%c3_19, %c0_20, %c0_21] : memref<9x64x128xbf16, #tpu.memory_space<vmem>>, vector<1x64x128xbf16>
    %20 = vector.shape_cast %19 : vector<1x64x128xbf16> to vector<64x128xbf16>
    %cst_22 = arith.constant dense<0.000000e+00> : vector<8x128xf32>
    %21 = tpu.matmul %18, %20, %cst_22 {dimension_numbers = #tpu.dot_dimension_numbers<[1], [0], [0], [1], [0, 0, 1, 1], [], []>} : vector<8x64xbf16>, vector<64x128xbf16>, vector<8x128xf32> -> vector<8x128xf32>
    %22 = arith.addf %16, %21 : vector<8x128xf32>
    %c4 = arith.constant 4 : index
    %c0_23 = arith.constant 0 : index
    %c0_24 = arith.constant 0 : index
    %23 = vector.load %arg2[%c4, %c0_23, %c0_24] : memref<9x8x64xbf16, #tpu.memory_space<vmem>>, vector<1x8x64xbf16>
    %24 = vector.shape_cast %23 : vector<1x8x64xbf16> to vector<8x64xbf16>
    %c4_25 = arith.constant 4 : index
    %c0_26 = arith.constant 0 : index
    %c0_27 = arith.constant 0 : index
    %25 = vector.load %arg3[%c4_25, %c0_26, %c0_27] : memref<9x64x128xbf16, #tpu.memory_space<vmem>>, vector<1x64x128xbf16>
    %26 = vector.shape_cast %25 : vector<1x64x128xbf16> to vector<64x128xbf16>
    %cst_28 = arith.constant dense<0.000000e+00> : vector<8x128xf32>
    %27 = tpu.matmul %24, %26, %cst_28 {dimension_numbers = #tpu.dot_dimension_numbers<[1], [0], [0], [1], [0, 0, 1, 1], [], []>} : vector<8x64xbf16>, vector<64x128xbf16>, vector<8x128xf32> -> vector<8x128xf32>
    %28 = arith.addf %22, %27 : vector<8x128xf32>
    %c5 = arith.constant 5 : index
    %c0_29 = arith.constant 0 : index
    %c0_30 = arith.constant 0 : index
    %29 = vector.load %arg2[%c5, %c0_29, %c0_30] : memref<9x8x64xbf16, #tpu.memory_space<vmem>>, vector<1x8x64xbf16>
    %30 = vector.shape_cast %29 : vector<1x8x64xbf16> to vector<8x64xbf16>
    %c5_31 = arith.constant 5 : index
    %c0_32 = arith.constant 0 : index
    %c0_33 = arith.constant 0 : index
    %31 = vector.load %arg3[%c5_31, %c0_32, %c0_33] : memref<9x64x128xbf16, #tpu.memory_space<vmem>>, vector<1x64x128xbf16>
    %32 = vector.shape_cast %31 : vector<1x64x128xbf16> to vector<64x128xbf16>
    %cst_34 = arith.constant dense<0.000000e+00> : vector<8x128xf32>
    %33 = tpu.matmul %30, %32, %cst_34 {dimension_numbers = #tpu.dot_dimension_numbers<[1], [0], [0], [1], [0, 0, 1, 1], [], []>} : vector<8x64xbf16>, vector<64x128xbf16>, vector<8x128xf32> -> vector<8x128xf32>
    %34 = arith.addf %28, %33 : vector<8x128xf32>
    %c6 = arith.constant 6 : index
    %c0_35 = arith.constant 0 : index
    %c0_36 = arith.constant 0 : index
    %35 = vector.load %arg2[%c6, %c0_35, %c0_36] : memref<9x8x64xbf16, #tpu.memory_space<vmem>>, vector<1x8x64xbf16>
    %36 = vector.shape_cast %35 : vector<1x8x64xbf16> to vector<8x64xbf16>
    %c6_37 = arith.constant 6 : index
    %c0_38 = arith.constant 0 : index
    %c0_39 = arith.constant 0 : index
    %37 = vector.load %arg3[%c6_37, %c0_38, %c0_39] : memref<9x64x128xbf16, #tpu.memory_space<vmem>>, vector<1x64x128xbf16>
    %38 = vector.shape_cast %37 : vector<1x64x128xbf16> to vector<64x128xbf16>
    %cst_40 = arith.constant dense<0.000000e+00> : vector<8x128xf32>
    %39 = tpu.matmul %36, %38, %cst_40 {dimension_numbers = #tpu.dot_dimension_numbers<[1], [0], [0], [1], [0, 0, 1, 1], [], []>} : vector<8x64xbf16>, vector<64x128xbf16>, vector<8x128xf32> -> vector<8x128xf32>
    %40 = arith.addf %34, %39 : vector<8x128xf32>
    %c7 = arith.constant 7 : index
    %c0_41 = arith.constant 0 : index
    %c0_42 = arith.constant 0 : index
    %41 = vector.load %arg2[%c7, %c0_41, %c0_42] : memref<9x8x64xbf16, #tpu.memory_space<vmem>>, vector<1x8x64xbf16>
    %42 = vector.shape_cast %41 : vector<1x8x64xbf16> to vector<8x64xbf16>
    %c7_43 = arith.constant 7 : index
    %c0_44 = arith.constant 0 : index
    %c0_45 = arith.constant 0 : index
    %43 = vector.load %arg3[%c7_43, %c0_44, %c0_45] : memref<9x64x128xbf16, #tpu.memory_space<vmem>>, vector<1x64x128xbf16>
    %44 = vector.shape_cast %43 : vector<1x64x128xbf16> to vector<64x128xbf16>
    %cst_46 = arith.constant dense<0.000000e+00> : vector<8x128xf32>
    %45 = tpu.matmul %42, %44, %cst_46 {dimension_numbers = #tpu.dot_dimension_numbers<[1], [0], [0], [1], [0, 0, 1, 1], [], []>} : vector<8x64xbf16>, vector<64x128xbf16>, vector<8x128xf32> -> vector<8x128xf32>
    %46 = arith.addf %40, %45 : vector<8x128xf32>
    %c8 = arith.constant 8 : index
    %c0_47 = arith.constant 0 : index
    %c0_48 = arith.constant 0 : index
    %47 = vector.load %arg2[%c8, %c0_47, %c0_48] : memref<9x8x64xbf16, #tpu.memory_space<vmem>>, vector<1x8x64xbf16>
    %48 = vector.shape_cast %47 : vector<1x8x64xbf16> to vector<8x64xbf16>
    %c8_49 = arith.constant 8 : index
    %c0_50 = arith.constant 0 : index
    %c0_51 = arith.constant 0 : index
    %49 = vector.load %arg3[%c8_49, %c0_50, %c0_51] : memref<9x64x128xbf16, #tpu.memory_space<vmem>>, vector<1x64x128xbf16>
    %50 = vector.shape_cast %49 : vector<1x64x128xbf16> to vector<64x128xbf16>
    %cst_52 = arith.constant dense<0.000000e+00> : vector<8x128xf32>
    %51 = tpu.matmul %48, %50, %cst_52 {dimension_numbers = #tpu.dot_dimension_numbers<[1], [0], [0], [1], [0, 0, 1, 1], [], []>} : vector<8x64xbf16>, vector<64x128xbf16>, vector<8x128xf32> -> vector<8x128xf32>
    %52 = arith.addf %46, %51 : vector<8x128xf32>
    %c0_53 = arith.constant 0 : index
    %c0_54 = arith.constant 0 : index
    %53 = vector.load %arg4[%c0_53, %c0_54] : memref<1x128xf32, #tpu.memory_space<vmem>>, vector<1x128xf32>
    %54 = vector.broadcast %53 : vector<1x128xf32> to vector<8x128xf32>
    %55 = arith.addf %52, %54 : vector<8x128xf32>
    %cst_55 = arith.constant 0.000000e+00 : f32
    %56 = vector.broadcast %cst_55 : f32 to vector<8x128xf32>
    %57 = arith.maximumf %55, %56 : vector<8x128xf32>
    %58 = arith.truncf %57 : vector<8x128xf32> to vector<8x128xbf16>
    %c0_56 = arith.constant 0 : index
    %c0_57 = arith.constant 0 : index
    %59 = vector.load %arg5[%c0_56, %c0_57] : memref<8x128xbf16, #tpu.memory_space<vmem>>, vector<8x128xbf16>
    tpu.vector_store %arg5[%c0_56, %c0_57], %58 {strides = array<i32>} : memref<8x128xbf16, #tpu.memory_space<vmem>>, vector<8x128xbf16>,
    return
  }
  func.func @transform_0(%arg0: i32, %arg1: i32) -> (i32, i32, i32) {
    %c0_i32 = arith.constant 0 : i32
    %c0_i32_0 = arith.constant 0 : i32
    %c0_i32_1 = arith.constant 0 : i32
    return %c0_i32, %arg0, %c0_i32_0 : i32, i32, i32
  }
  func.func @transform_1(%arg0: i32, %arg1: i32) -> (i32, i32, i32) {
    %c0_i32 = arith.constant 0 : i32
    %c0_i32_0 = arith.constant 0 : i32
    %c0_i32_1 = arith.constant 0 : i32
    return %c0_i32, %c0_i32_0, %arg1 : i32, i32, i32
  }
  func.func @transform_2(%arg0: i32, %arg1: i32) -> (i32, i32) {
    %c0_i32 = arith.constant 0 : i32
    %c0_i32_0 = arith.constant 0 : i32
    return %c0_i32, %arg1 : i32, i32
  }
  func.func @transform_3(%arg0: i32, %arg1: i32) -> (i32, i32) {
    %c0_i32 = arith.constant 0 : i32
    return %arg0, %arg1 : i32, i32
  }
}

module attributes {stable_mosaic.version = 11 : i64} {
  func.func @_conv_mm_kernel(%arg0: i32, %arg1: i32, %arg2: memref<1x8x64xbf16, #tpu.memory_space<vmem>>, %arg3: memref<1x64x128xbf16, #tpu.memory_space<vmem>>, %arg4: memref<1x128xf32, #tpu.memory_space<vmem>>, %arg5: memref<8x128xbf16, #tpu.memory_space<vmem>>) attributes {dimension_semantics = [#tpu.dimension_semantics<parallel>, #tpu.dimension_semantics<parallel>], iteration_bounds = array<i64: 1, 1>, scalar_prefetch = 0 : i64, scratch_operands = 0 : i64, tpu.core_type = #tpu.core_type<tc>, window_params = [{transform_indices = @transform_0, window_bounds = array<i64: 1, 8, 64>}, {transform_indices = @transform_1, window_bounds = array<i64: 1, 64, 128>}, {transform_indices = @transform_2, window_bounds = array<i64: 1, 128>}, {transform_indices = @transform_3, window_bounds = array<i64: 8, 128>}]} {
    %c0 = arith.constant 0 : index
    %c0_0 = arith.constant 0 : index
    %c0_1 = arith.constant 0 : index
    %0 = vector.load %arg2[%c0, %c0_0, %c0_1] : memref<1x8x64xbf16, #tpu.memory_space<vmem>>, vector<1x8x64xbf16>
    %1 = vector.shape_cast %0 : vector<1x8x64xbf16> to vector<8x64xbf16>
    %c0_2 = arith.constant 0 : index
    %c0_3 = arith.constant 0 : index
    %c0_4 = arith.constant 0 : index
    %2 = vector.load %arg3[%c0_2, %c0_3, %c0_4] : memref<1x64x128xbf16, #tpu.memory_space<vmem>>, vector<1x64x128xbf16>
    %3 = vector.shape_cast %2 : vector<1x64x128xbf16> to vector<64x128xbf16>
    %cst = arith.constant dense<0.000000e+00> : vector<8x128xf32>
    %4 = tpu.matmul %1, %3, %cst {dimension_numbers = #tpu.dot_dimension_numbers<[1], [0], [0], [1], [0, 0, 1, 1], [], []>} : vector<8x64xbf16>, vector<64x128xbf16>, vector<8x128xf32> -> vector<8x128xf32>
    %c0_5 = arith.constant 0 : index
    %c0_6 = arith.constant 0 : index
    %5 = vector.load %arg4[%c0_5, %c0_6] : memref<1x128xf32, #tpu.memory_space<vmem>>, vector<1x128xf32>
    %6 = vector.broadcast %5 : vector<1x128xf32> to vector<8x128xf32>
    %7 = arith.addf %4, %6 : vector<8x128xf32>
    %8 = arith.truncf %7 : vector<8x128xf32> to vector<8x128xbf16>
    %c0_7 = arith.constant 0 : index
    %c0_8 = arith.constant 0 : index
    %9 = vector.load %arg5[%c0_7, %c0_8] : memref<8x128xbf16, #tpu.memory_space<vmem>>, vector<8x128xbf16>
    tpu.vector_store %arg5[%c0_7, %c0_8], %8 {strides = array<i32>} : memref<8x128xbf16, #tpu.memory_space<vmem>>, vector<8x128xbf16>,
    return
  }
  func.func @transform_0(%arg0: i32, %arg1: i32) -> (i32, i32, i32) {
    %c0_i32 = arith.constant 0 : i32
    %c0_i32_0 = arith.constant 0 : i32
    %c0_i32_1 = arith.constant 0 : i32
    return %c0_i32, %arg0, %c0_i32_0 : i32, i32, i32
  }
  func.func @transform_1(%arg0: i32, %arg1: i32) -> (i32, i32, i32) {
    %c0_i32 = arith.constant 0 : i32
    %c0_i32_0 = arith.constant 0 : i32
    %c0_i32_1 = arith.constant 0 : i32
    return %c0_i32, %c0_i32_0, %arg1 : i32, i32, i32
  }
  func.func @transform_2(%arg0: i32, %arg1: i32) -> (i32, i32) {
    %c0_i32 = arith.constant 0 : i32
    %c0_i32_0 = arith.constant 0 : i32
    return %c0_i32, %arg1 : i32, i32
  }
  func.func @transform_3(%arg0: i32, %arg1: i32) -> (i32, i32) {
    %c0_i32 = arith.constant 0 : i32
    return %arg0, %arg1 : i32, i32
  }
}

module attributes {stable_mosaic.version = 11 : i64} {
  func.func @_conv_mm_res_kernel(%arg0: i32, %arg1: i32, %arg2: memref<9x8x128xbf16, #tpu.memory_space<vmem>>, %arg3: memref<9x128x128xbf16, #tpu.memory_space<vmem>>, %arg4: memref<1x128xf32, #tpu.memory_space<vmem>>, %arg5: memref<8x128xbf16, #tpu.memory_space<vmem>>, %arg6: memref<8x128xbf16, #tpu.memory_space<vmem>>) attributes {dimension_semantics = [#tpu.dimension_semantics<parallel>, #tpu.dimension_semantics<parallel>], iteration_bounds = array<i64: 1, 1>, scalar_prefetch = 0 : i64, scratch_operands = 0 : i64, tpu.core_type = #tpu.core_type<tc>, window_params = [{transform_indices = @transform_0, window_bounds = array<i64: 9, 8, 128>}, {transform_indices = @transform_1, window_bounds = array<i64: 9, 128, 128>}, {transform_indices = @transform_2, window_bounds = array<i64: 1, 128>}, {transform_indices = @transform_3, window_bounds = array<i64: 8, 128>}, {transform_indices = @transform_4, window_bounds = array<i64: 8, 128>}]} {
    %c0 = arith.constant 0 : index
    %c0_0 = arith.constant 0 : index
    %c0_1 = arith.constant 0 : index
    %0 = vector.load %arg2[%c0, %c0_0, %c0_1] : memref<9x8x128xbf16, #tpu.memory_space<vmem>>, vector<1x8x128xbf16>
    %1 = vector.shape_cast %0 : vector<1x8x128xbf16> to vector<8x128xbf16>
    %c0_2 = arith.constant 0 : index
    %c0_3 = arith.constant 0 : index
    %c0_4 = arith.constant 0 : index
    %2 = vector.load %arg3[%c0_2, %c0_3, %c0_4] : memref<9x128x128xbf16, #tpu.memory_space<vmem>>, vector<1x128x128xbf16>
    %3 = vector.shape_cast %2 : vector<1x128x128xbf16> to vector<128x128xbf16>
    %cst = arith.constant dense<0.000000e+00> : vector<8x128xf32>
    %4 = tpu.matmul %1, %3, %cst {dimension_numbers = #tpu.dot_dimension_numbers<[1], [0], [0], [1], [0, 0, 1, 1], [], []>} : vector<8x128xbf16>, vector<128x128xbf16>, vector<8x128xf32> -> vector<8x128xf32>
    %c1 = arith.constant 1 : index
    %c0_5 = arith.constant 0 : index
    %c0_6 = arith.constant 0 : index
    %5 = vector.load %arg2[%c1, %c0_5, %c0_6] : memref<9x8x128xbf16, #tpu.memory_space<vmem>>, vector<1x8x128xbf16>
    %6 = vector.shape_cast %5 : vector<1x8x128xbf16> to vector<8x128xbf16>
    %c1_7 = arith.constant 1 : index
    %c0_8 = arith.constant 0 : index
    %c0_9 = arith.constant 0 : index
    %7 = vector.load %arg3[%c1_7, %c0_8, %c0_9] : memref<9x128x128xbf16, #tpu.memory_space<vmem>>, vector<1x128x128xbf16>
    %8 = vector.shape_cast %7 : vector<1x128x128xbf16> to vector<128x128xbf16>
    %cst_10 = arith.constant dense<0.000000e+00> : vector<8x128xf32>
    %9 = tpu.matmul %6, %8, %cst_10 {dimension_numbers = #tpu.dot_dimension_numbers<[1], [0], [0], [1], [0, 0, 1, 1], [], []>} : vector<8x128xbf16>, vector<128x128xbf16>, vector<8x128xf32> -> vector<8x128xf32>
    %10 = arith.addf %4, %9 : vector<8x128xf32>
    %c2 = arith.constant 2 : index
    %c0_11 = arith.constant 0 : index
    %c0_12 = arith.constant 0 : index
    %11 = vector.load %arg2[%c2, %c0_11, %c0_12] : memref<9x8x128xbf16, #tpu.memory_space<vmem>>, vector<1x8x128xbf16>
    %12 = vector.shape_cast %11 : vector<1x8x128xbf16> to vector<8x128xbf16>
    %c2_13 = arith.constant 2 : index
    %c0_14 = arith.constant 0 : index
    %c0_15 = arith.constant 0 : index
    %13 = vector.load %arg3[%c2_13, %c0_14, %c0_15] : memref<9x128x128xbf16, #tpu.memory_space<vmem>>, vector<1x128x128xbf16>
    %14 = vector.shape_cast %13 : vector<1x128x128xbf16> to vector<128x128xbf16>
    %cst_16 = arith.constant dense<0.000000e+00> : vector<8x128xf32>
    %15 = tpu.matmul %12, %14, %cst_16 {dimension_numbers = #tpu.dot_dimension_numbers<[1], [0], [0], [1], [0, 0, 1, 1], [], []>} : vector<8x128xbf16>, vector<128x128xbf16>, vector<8x128xf32> -> vector<8x128xf32>
    %16 = arith.addf %10, %15 : vector<8x128xf32>
    %c3 = arith.constant 3 : index
    %c0_17 = arith.constant 0 : index
    %c0_18 = arith.constant 0 : index
    %17 = vector.load %arg2[%c3, %c0_17, %c0_18] : memref<9x8x128xbf16, #tpu.memory_space<vmem>>, vector<1x8x128xbf16>
    %18 = vector.shape_cast %17 : vector<1x8x128xbf16> to vector<8x128xbf16>
    %c3_19 = arith.constant 3 : index
    %c0_20 = arith.constant 0 : index
    %c0_21 = arith.constant 0 : index
    %19 = vector.load %arg3[%c3_19, %c0_20, %c0_21] : memref<9x128x128xbf16, #tpu.memory_space<vmem>>, vector<1x128x128xbf16>
    %20 = vector.shape_cast %19 : vector<1x128x128xbf16> to vector<128x128xbf16>
    %cst_22 = arith.constant dense<0.000000e+00> : vector<8x128xf32>
    %21 = tpu.matmul %18, %20, %cst_22 {dimension_numbers = #tpu.dot_dimension_numbers<[1], [0], [0], [1], [0, 0, 1, 1], [], []>} : vector<8x128xbf16>, vector<128x128xbf16>, vector<8x128xf32> -> vector<8x128xf32>
    %22 = arith.addf %16, %21 : vector<8x128xf32>
    %c4 = arith.constant 4 : index
    %c0_23 = arith.constant 0 : index
    %c0_24 = arith.constant 0 : index
    %23 = vector.load %arg2[%c4, %c0_23, %c0_24] : memref<9x8x128xbf16, #tpu.memory_space<vmem>>, vector<1x8x128xbf16>
    %24 = vector.shape_cast %23 : vector<1x8x128xbf16> to vector<8x128xbf16>
    %c4_25 = arith.constant 4 : index
    %c0_26 = arith.constant 0 : index
    %c0_27 = arith.constant 0 : index
    %25 = vector.load %arg3[%c4_25, %c0_26, %c0_27] : memref<9x128x128xbf16, #tpu.memory_space<vmem>>, vector<1x128x128xbf16>
    %26 = vector.shape_cast %25 : vector<1x128x128xbf16> to vector<128x128xbf16>
    %cst_28 = arith.constant dense<0.000000e+00> : vector<8x128xf32>
    %27 = tpu.matmul %24, %26, %cst_28 {dimension_numbers = #tpu.dot_dimension_numbers<[1], [0], [0], [1], [0, 0, 1, 1], [], []>} : vector<8x128xbf16>, vector<128x128xbf16>, vector<8x128xf32> -> vector<8x128xf32>
    %28 = arith.addf %22, %27 : vector<8x128xf32>
    %c5 = arith.constant 5 : index
    %c0_29 = arith.constant 0 : index
    %c0_30 = arith.constant 0 : index
    %29 = vector.load %arg2[%c5, %c0_29, %c0_30] : memref<9x8x128xbf16, #tpu.memory_space<vmem>>, vector<1x8x128xbf16>
    %30 = vector.shape_cast %29 : vector<1x8x128xbf16> to vector<8x128xbf16>
    %c5_31 = arith.constant 5 : index
    %c0_32 = arith.constant 0 : index
    %c0_33 = arith.constant 0 : index
    %31 = vector.load %arg3[%c5_31, %c0_32, %c0_33] : memref<9x128x128xbf16, #tpu.memory_space<vmem>>, vector<1x128x128xbf16>
    %32 = vector.shape_cast %31 : vector<1x128x128xbf16> to vector<128x128xbf16>
    %cst_34 = arith.constant dense<0.000000e+00> : vector<8x128xf32>
    %33 = tpu.matmul %30, %32, %cst_34 {dimension_numbers = #tpu.dot_dimension_numbers<[1], [0], [0], [1], [0, 0, 1, 1], [], []>} : vector<8x128xbf16>, vector<128x128xbf16>, vector<8x128xf32> -> vector<8x128xf32>
    %34 = arith.addf %28, %33 : vector<8x128xf32>
    %c6 = arith.constant 6 : index
    %c0_35 = arith.constant 0 : index
    %c0_36 = arith.constant 0 : index
    %35 = vector.load %arg2[%c6, %c0_35, %c0_36] : memref<9x8x128xbf16, #tpu.memory_space<vmem>>, vector<1x8x128xbf16>
    %36 = vector.shape_cast %35 : vector<1x8x128xbf16> to vector<8x128xbf16>
    %c6_37 = arith.constant 6 : index
    %c0_38 = arith.constant 0 : index
    %c0_39 = arith.constant 0 : index
    %37 = vector.load %arg3[%c6_37, %c0_38, %c0_39] : memref<9x128x128xbf16, #tpu.memory_space<vmem>>, vector<1x128x128xbf16>
    %38 = vector.shape_cast %37 : vector<1x128x128xbf16> to vector<128x128xbf16>
    %cst_40 = arith.constant dense<0.000000e+00> : vector<8x128xf32>
    %39 = tpu.matmul %36, %38, %cst_40 {dimension_numbers = #tpu.dot_dimension_numbers<[1], [0], [0], [1], [0, 0, 1, 1], [], []>} : vector<8x128xbf16>, vector<128x128xbf16>, vector<8x128xf32> -> vector<8x128xf32>
    %40 = arith.addf %34, %39 : vector<8x128xf32>
    %c7 = arith.constant 7 : index
    %c0_41 = arith.constant 0 : index
    %c0_42 = arith.constant 0 : index
    %41 = vector.load %arg2[%c7, %c0_41, %c0_42] : memref<9x8x128xbf16, #tpu.memory_space<vmem>>, vector<1x8x128xbf16>
    %42 = vector.shape_cast %41 : vector<1x8x128xbf16> to vector<8x128xbf16>
    %c7_43 = arith.constant 7 : index
    %c0_44 = arith.constant 0 : index
    %c0_45 = arith.constant 0 : index
    %43 = vector.load %arg3[%c7_43, %c0_44, %c0_45] : memref<9x128x128xbf16, #tpu.memory_space<vmem>>, vector<1x128x128xbf16>
    %44 = vector.shape_cast %43 : vector<1x128x128xbf16> to vector<128x128xbf16>
    %cst_46 = arith.constant dense<0.000000e+00> : vector<8x128xf32>
    %45 = tpu.matmul %42, %44, %cst_46 {dimension_numbers = #tpu.dot_dimension_numbers<[1], [0], [0], [1], [0, 0, 1, 1], [], []>} : vector<8x128xbf16>, vector<128x128xbf16>, vector<8x128xf32> -> vector<8x128xf32>
    %46 = arith.addf %40, %45 : vector<8x128xf32>
    %c8 = arith.constant 8 : index
    %c0_47 = arith.constant 0 : index
    %c0_48 = arith.constant 0 : index
    %47 = vector.load %arg2[%c8, %c0_47, %c0_48] : memref<9x8x128xbf16, #tpu.memory_space<vmem>>, vector<1x8x128xbf16>
    %48 = vector.shape_cast %47 : vector<1x8x128xbf16> to vector<8x128xbf16>
    %c8_49 = arith.constant 8 : index
    %c0_50 = arith.constant 0 : index
    %c0_51 = arith.constant 0 : index
    %49 = vector.load %arg3[%c8_49, %c0_50, %c0_51] : memref<9x128x128xbf16, #tpu.memory_space<vmem>>, vector<1x128x128xbf16>
    %50 = vector.shape_cast %49 : vector<1x128x128xbf16> to vector<128x128xbf16>
    %cst_52 = arith.constant dense<0.000000e+00> : vector<8x128xf32>
    %51 = tpu.matmul %48, %50, %cst_52 {dimension_numbers = #tpu.dot_dimension_numbers<[1], [0], [0], [1], [0, 0, 1, 1], [], []>} : vector<8x128xbf16>, vector<128x128xbf16>, vector<8x128xf32> -> vector<8x128xf32>
    %52 = arith.addf %46, %51 : vector<8x128xf32>
    %c0_53 = arith.constant 0 : index
    %c0_54 = arith.constant 0 : index
    %53 = vector.load %arg4[%c0_53, %c0_54] : memref<1x128xf32, #tpu.memory_space<vmem>>, vector<1x128xf32>
    %54 = vector.broadcast %53 : vector<1x128xf32> to vector<8x128xf32>
    %55 = arith.addf %52, %54 : vector<8x128xf32>
    %c0_55 = arith.constant 0 : index
    %c0_56 = arith.constant 0 : index
    %56 = vector.load %arg5[%c0_55, %c0_56] : memref<8x128xbf16, #tpu.memory_space<vmem>>, vector<8x128xbf16>
    %57 = arith.extf %56 : vector<8x128xbf16> to vector<8x128xf32>
    %58 = arith.addf %55, %57 : vector<8x128xf32>
    %cst_57 = arith.constant 0.000000e+00 : f32
    %59 = vector.broadcast %cst_57 : f32 to vector<8x128xf32>
    %60 = arith.maximumf %58, %59 : vector<8x128xf32>
    %61 = arith.truncf %60 : vector<8x128xf32> to vector<8x128xbf16>
    %c0_58 = arith.constant 0 : index
    %c0_59 = arith.constant 0 : index
    %62 = vector.load %arg6[%c0_58, %c0_59] : memref<8x128xbf16, #tpu.memory_space<vmem>>, vector<8x128xbf16>
    tpu.vector_store %arg6[%c0_58, %c0_59], %61 {strides = array<i32>} : memref<8x128xbf16, #tpu.memory_space<vmem>>, vector<8x128xbf16>,
    return
  }
  func.func @transform_0(%arg0: i32, %arg1: i32) -> (i32, i32, i32) {
    %c0_i32 = arith.constant 0 : i32
    %c0_i32_0 = arith.constant 0 : i32
    %c0_i32_1 = arith.constant 0 : i32
    return %c0_i32, %arg0, %c0_i32_0 : i32, i32, i32
  }
  func.func @transform_1(%arg0: i32, %arg1: i32) -> (i32, i32, i32) {
    %c0_i32 = arith.constant 0 : i32
    %c0_i32_0 = arith.constant 0 : i32
    %c0_i32_1 = arith.constant 0 : i32
    return %c0_i32, %c0_i32_0, %arg1 : i32, i32, i32
  }
  func.func @transform_2(%arg0: i32, %arg1: i32) -> (i32, i32) {
    %c0_i32 = arith.constant 0 : i32
    %c0_i32_0 = arith.constant 0 : i32
    return %c0_i32, %arg1 : i32, i32
  }
  func.func @transform_3(%arg0: i32, %arg1: i32) -> (i32, i32) {
    %c0_i32 = arith.constant 0 : i32
    return %arg0, %arg1 : i32, i32
  }
  func.func @transform_4(%arg0: i32, %arg1: i32) -> (i32, i32) {
    %c0_i32 = arith.constant 0 : i32
    return %arg0, %arg1 : i32, i32
  }
}

module attributes {stable_mosaic.version = 11 : i64} {
  func.func @_conv_mm_kernel(%arg0: i32, %arg1: i32, %arg2: memref<9x8x128xbf16, #tpu.memory_space<vmem>>, %arg3: memref<9x128x128xbf16, #tpu.memory_space<vmem>>, %arg4: memref<1x128xf32, #tpu.memory_space<vmem>>, %arg5: memref<8x128xbf16, #tpu.memory_space<vmem>>) attributes {dimension_semantics = [#tpu.dimension_semantics<parallel>, #tpu.dimension_semantics<parallel>], iteration_bounds = array<i64: 1, 1>, scalar_prefetch = 0 : i64, scratch_operands = 0 : i64, tpu.core_type = #tpu.core_type<tc>, window_params = [{transform_indices = @transform_0, window_bounds = array<i64: 9, 8, 128>}, {transform_indices = @transform_1, window_bounds = array<i64: 9, 128, 128>}, {transform_indices = @transform_2, window_bounds = array<i64: 1, 128>}, {transform_indices = @transform_3, window_bounds = array<i64: 8, 128>}]} {
    %c0 = arith.constant 0 : index
    %c0_0 = arith.constant 0 : index
    %c0_1 = arith.constant 0 : index
    %0 = vector.load %arg2[%c0, %c0_0, %c0_1] : memref<9x8x128xbf16, #tpu.memory_space<vmem>>, vector<1x8x128xbf16>
    %1 = vector.shape_cast %0 : vector<1x8x128xbf16> to vector<8x128xbf16>
    %c0_2 = arith.constant 0 : index
    %c0_3 = arith.constant 0 : index
    %c0_4 = arith.constant 0 : index
    %2 = vector.load %arg3[%c0_2, %c0_3, %c0_4] : memref<9x128x128xbf16, #tpu.memory_space<vmem>>, vector<1x128x128xbf16>
    %3 = vector.shape_cast %2 : vector<1x128x128xbf16> to vector<128x128xbf16>
    %cst = arith.constant dense<0.000000e+00> : vector<8x128xf32>
    %4 = tpu.matmul %1, %3, %cst {dimension_numbers = #tpu.dot_dimension_numbers<[1], [0], [0], [1], [0, 0, 1, 1], [], []>} : vector<8x128xbf16>, vector<128x128xbf16>, vector<8x128xf32> -> vector<8x128xf32>
    %c1 = arith.constant 1 : index
    %c0_5 = arith.constant 0 : index
    %c0_6 = arith.constant 0 : index
    %5 = vector.load %arg2[%c1, %c0_5, %c0_6] : memref<9x8x128xbf16, #tpu.memory_space<vmem>>, vector<1x8x128xbf16>
    %6 = vector.shape_cast %5 : vector<1x8x128xbf16> to vector<8x128xbf16>
    %c1_7 = arith.constant 1 : index
    %c0_8 = arith.constant 0 : index
    %c0_9 = arith.constant 0 : index
    %7 = vector.load %arg3[%c1_7, %c0_8, %c0_9] : memref<9x128x128xbf16, #tpu.memory_space<vmem>>, vector<1x128x128xbf16>
    %8 = vector.shape_cast %7 : vector<1x128x128xbf16> to vector<128x128xbf16>
    %cst_10 = arith.constant dense<0.000000e+00> : vector<8x128xf32>
    %9 = tpu.matmul %6, %8, %cst_10 {dimension_numbers = #tpu.dot_dimension_numbers<[1], [0], [0], [1], [0, 0, 1, 1], [], []>} : vector<8x128xbf16>, vector<128x128xbf16>, vector<8x128xf32> -> vector<8x128xf32>
    %10 = arith.addf %4, %9 : vector<8x128xf32>
    %c2 = arith.constant 2 : index
    %c0_11 = arith.constant 0 : index
    %c0_12 = arith.constant 0 : index
    %11 = vector.load %arg2[%c2, %c0_11, %c0_12] : memref<9x8x128xbf16, #tpu.memory_space<vmem>>, vector<1x8x128xbf16>
    %12 = vector.shape_cast %11 : vector<1x8x128xbf16> to vector<8x128xbf16>
    %c2_13 = arith.constant 2 : index
    %c0_14 = arith.constant 0 : index
    %c0_15 = arith.constant 0 : index
    %13 = vector.load %arg3[%c2_13, %c0_14, %c0_15] : memref<9x128x128xbf16, #tpu.memory_space<vmem>>, vector<1x128x128xbf16>
    %14 = vector.shape_cast %13 : vector<1x128x128xbf16> to vector<128x128xbf16>
    %cst_16 = arith.constant dense<0.000000e+00> : vector<8x128xf32>
    %15 = tpu.matmul %12, %14, %cst_16 {dimension_numbers = #tpu.dot_dimension_numbers<[1], [0], [0], [1], [0, 0, 1, 1], [], []>} : vector<8x128xbf16>, vector<128x128xbf16>, vector<8x128xf32> -> vector<8x128xf32>
    %16 = arith.addf %10, %15 : vector<8x128xf32>
    %c3 = arith.constant 3 : index
    %c0_17 = arith.constant 0 : index
    %c0_18 = arith.constant 0 : index
    %17 = vector.load %arg2[%c3, %c0_17, %c0_18] : memref<9x8x128xbf16, #tpu.memory_space<vmem>>, vector<1x8x128xbf16>
    %18 = vector.shape_cast %17 : vector<1x8x128xbf16> to vector<8x128xbf16>
    %c3_19 = arith.constant 3 : index
    %c0_20 = arith.constant 0 : index
    %c0_21 = arith.constant 0 : index
    %19 = vector.load %arg3[%c3_19, %c0_20, %c0_21] : memref<9x128x128xbf16, #tpu.memory_space<vmem>>, vector<1x128x128xbf16>
    %20 = vector.shape_cast %19 : vector<1x128x128xbf16> to vector<128x128xbf16>
    %cst_22 = arith.constant dense<0.000000e+00> : vector<8x128xf32>
    %21 = tpu.matmul %18, %20, %cst_22 {dimension_numbers = #tpu.dot_dimension_numbers<[1], [0], [0], [1], [0, 0, 1, 1], [], []>} : vector<8x128xbf16>, vector<128x128xbf16>, vector<8x128xf32> -> vector<8x128xf32>
    %22 = arith.addf %16, %21 : vector<8x128xf32>
    %c4 = arith.constant 4 : index
    %c0_23 = arith.constant 0 : index
    %c0_24 = arith.constant 0 : index
    %23 = vector.load %arg2[%c4, %c0_23, %c0_24] : memref<9x8x128xbf16, #tpu.memory_space<vmem>>, vector<1x8x128xbf16>
    %24 = vector.shape_cast %23 : vector<1x8x128xbf16> to vector<8x128xbf16>
    %c4_25 = arith.constant 4 : index
    %c0_26 = arith.constant 0 : index
    %c0_27 = arith.constant 0 : index
    %25 = vector.load %arg3[%c4_25, %c0_26, %c0_27] : memref<9x128x128xbf16, #tpu.memory_space<vmem>>, vector<1x128x128xbf16>
    %26 = vector.shape_cast %25 : vector<1x128x128xbf16> to vector<128x128xbf16>
    %cst_28 = arith.constant dense<0.000000e+00> : vector<8x128xf32>
    %27 = tpu.matmul %24, %26, %cst_28 {dimension_numbers = #tpu.dot_dimension_numbers<[1], [0], [0], [1], [0, 0, 1, 1], [], []>} : vector<8x128xbf16>, vector<128x128xbf16>, vector<8x128xf32> -> vector<8x128xf32>
    %28 = arith.addf %22, %27 : vector<8x128xf32>
    %c5 = arith.constant 5 : index
    %c0_29 = arith.constant 0 : index
    %c0_30 = arith.constant 0 : index
    %29 = vector.load %arg2[%c5, %c0_29, %c0_30] : memref<9x8x128xbf16, #tpu.memory_space<vmem>>, vector<1x8x128xbf16>
    %30 = vector.shape_cast %29 : vector<1x8x128xbf16> to vector<8x128xbf16>
    %c5_31 = arith.constant 5 : index
    %c0_32 = arith.constant 0 : index
    %c0_33 = arith.constant 0 : index
    %31 = vector.load %arg3[%c5_31, %c0_32, %c0_33] : memref<9x128x128xbf16, #tpu.memory_space<vmem>>, vector<1x128x128xbf16>
    %32 = vector.shape_cast %31 : vector<1x128x128xbf16> to vector<128x128xbf16>
    %cst_34 = arith.constant dense<0.000000e+00> : vector<8x128xf32>
    %33 = tpu.matmul %30, %32, %cst_34 {dimension_numbers = #tpu.dot_dimension_numbers<[1], [0], [0], [1], [0, 0, 1, 1], [], []>} : vector<8x128xbf16>, vector<128x128xbf16>, vector<8x128xf32> -> vector<8x128xf32>
    %34 = arith.addf %28, %33 : vector<8x128xf32>
    %c6 = arith.constant 6 : index
    %c0_35 = arith.constant 0 : index
    %c0_36 = arith.constant 0 : index
    %35 = vector.load %arg2[%c6, %c0_35, %c0_36] : memref<9x8x128xbf16, #tpu.memory_space<vmem>>, vector<1x8x128xbf16>
    %36 = vector.shape_cast %35 : vector<1x8x128xbf16> to vector<8x128xbf16>
    %c6_37 = arith.constant 6 : index
    %c0_38 = arith.constant 0 : index
    %c0_39 = arith.constant 0 : index
    %37 = vector.load %arg3[%c6_37, %c0_38, %c0_39] : memref<9x128x128xbf16, #tpu.memory_space<vmem>>, vector<1x128x128xbf16>
    %38 = vector.shape_cast %37 : vector<1x128x128xbf16> to vector<128x128xbf16>
    %cst_40 = arith.constant dense<0.000000e+00> : vector<8x128xf32>
    %39 = tpu.matmul %36, %38, %cst_40 {dimension_numbers = #tpu.dot_dimension_numbers<[1], [0], [0], [1], [0, 0, 1, 1], [], []>} : vector<8x128xbf16>, vector<128x128xbf16>, vector<8x128xf32> -> vector<8x128xf32>
    %40 = arith.addf %34, %39 : vector<8x128xf32>
    %c7 = arith.constant 7 : index
    %c0_41 = arith.constant 0 : index
    %c0_42 = arith.constant 0 : index
    %41 = vector.load %arg2[%c7, %c0_41, %c0_42] : memref<9x8x128xbf16, #tpu.memory_space<vmem>>, vector<1x8x128xbf16>
    %42 = vector.shape_cast %41 : vector<1x8x128xbf16> to vector<8x128xbf16>
    %c7_43 = arith.constant 7 : index
    %c0_44 = arith.constant 0 : index
    %c0_45 = arith.constant 0 : index
    %43 = vector.load %arg3[%c7_43, %c0_44, %c0_45] : memref<9x128x128xbf16, #tpu.memory_space<vmem>>, vector<1x128x128xbf16>
    %44 = vector.shape_cast %43 : vector<1x128x128xbf16> to vector<128x128xbf16>
    %cst_46 = arith.constant dense<0.000000e+00> : vector<8x128xf32>
    %45 = tpu.matmul %42, %44, %cst_46 {dimension_numbers = #tpu.dot_dimension_numbers<[1], [0], [0], [1], [0, 0, 1, 1], [], []>} : vector<8x128xbf16>, vector<128x128xbf16>, vector<8x128xf32> -> vector<8x128xf32>
    %46 = arith.addf %40, %45 : vector<8x128xf32>
    %c8 = arith.constant 8 : index
    %c0_47 = arith.constant 0 : index
    %c0_48 = arith.constant 0 : index
    %47 = vector.load %arg2[%c8, %c0_47, %c0_48] : memref<9x8x128xbf16, #tpu.memory_space<vmem>>, vector<1x8x128xbf16>
    %48 = vector.shape_cast %47 : vector<1x8x128xbf16> to vector<8x128xbf16>
    %c8_49 = arith.constant 8 : index
    %c0_50 = arith.constant 0 : index
    %c0_51 = arith.constant 0 : index
    %49 = vector.load %arg3[%c8_49, %c0_50, %c0_51] : memref<9x128x128xbf16, #tpu.memory_space<vmem>>, vector<1x128x128xbf16>
    %50 = vector.shape_cast %49 : vector<1x128x128xbf16> to vector<128x128xbf16>
    %cst_52 = arith.constant dense<0.000000e+00> : vector<8x128xf32>
    %51 = tpu.matmul %48, %50, %cst_52 {dimension_numbers = #tpu.dot_dimension_numbers<[1], [0], [0], [1], [0, 0, 1, 1], [], []>} : vector<8x128xbf16>, vector<128x128xbf16>, vector<8x128xf32> -> vector<8x128xf32>
    %52 = arith.addf %46, %51 : vector<8x128xf32>
    %c0_53 = arith.constant 0 : index
    %c0_54 = arith.constant 0 : index
    %53 = vector.load %arg4[%c0_53, %c0_54] : memref<1x128xf32, #tpu.memory_space<vmem>>, vector<1x128xf32>
    %54 = vector.broadcast %53 : vector<1x128xf32> to vector<8x128xf32>
    %55 = arith.addf %52, %54 : vector<8x128xf32>
    %cst_55 = arith.constant 0.000000e+00 : f32
    %56 = vector.broadcast %cst_55 : f32 to vector<8x128xf32>
    %57 = arith.maximumf %55, %56 : vector<8x128xf32>
    %58 = arith.truncf %57 : vector<8x128xf32> to vector<8x128xbf16>
    %c0_56 = arith.constant 0 : index
    %c0_57 = arith.constant 0 : index
    %59 = vector.load %arg5[%c0_56, %c0_57] : memref<8x128xbf16, #tpu.memory_space<vmem>>, vector<8x128xbf16>
    tpu.vector_store %arg5[%c0_56, %c0_57], %58 {strides = array<i32>} : memref<8x128xbf16, #tpu.memory_space<vmem>>, vector<8x128xbf16>,
    return
  }
  func.func @transform_0(%arg0: i32, %arg1: i32) -> (i32, i32, i32) {
    %c0_i32 = arith.constant 0 : i32
    %c0_i32_0 = arith.constant 0 : i32
    %c0_i32_1 = arith.constant 0 : i32
    return %c0_i32, %arg0, %c0_i32_0 : i32, i32, i32
  }
  func.func @transform_1(%arg0: i32, %arg1: i32) -> (i32, i32, i32) {
    %c0_i32 = arith.constant 0 : i32
    %c0_i32_0 = arith.constant 0 : i32
    %c0_i32_1 = arith.constant 0 : i32
    return %c0_i32, %c0_i32_0, %arg1 : i32, i32, i32
  }
  func.func @transform_2(%arg0: i32, %arg1: i32) -> (i32, i32) {
    %c0_i32 = arith.constant 0 : i32
    %c0_i32_0 = arith.constant 0 : i32
    return %c0_i32, %arg1 : i32, i32
  }
  func.func @transform_3(%arg0: i32, %arg1: i32) -> (i32, i32) {
    %c0_i32 = arith.constant 0 : i32
    return %arg0, %arg1 : i32, i32
  }
}

</mosaic_0001>

<bundles_post_ra>
// kernel: resnet_forward.21
= control target key start
LH: loop header
LB: loop body
LE: loop exit
PB: predicated region body
PF: predicated region fallthrough
CT: control target
= control target key end

     0   :  { %s1269_s12 = smov 0   ;;  %s1271_s13 = smov 0   ;;  %s1526_s0 = inlined_call_operand.vmem [shape: bf16[1,512,256], index: 0, kind: input, shape index: {}]   ;;  %s1527_s1 = inlined_call_operand.vmem [shape: bf16[1,256,16], index: 1, kind: input, shape index: {}]   ;;  %s1528_s2 = inlined_call_operand.vmem [shape: f32[1,16], index: 2, kind: input, shape index: {}]   ;;  %s1529_s3 = inlined_call_operand.vmem [shape: bf16[512,16], index: 3, kind: output, shape index: {}]  }
   0x1   :  { %s1273_s14 = smov 0  }
   0x2 LB: > { %s25_s15 = sadd.s32 1, %s1243_s13  ;;  %p935_p0 = scmp.ge.s32.totalorder %s1247_s14, 1  ;;  %s1247_s14 = sphi %s1273_s14, %s13_s14   ;;  %s1243_s13 = sphi %s1271_s13, %s1531_s13   ;;  %s1239_s12 = sphi %s1269_s12, %s1530_s12  }
   0x3   : > { %p27_p1 = scmp.ge.s32.totalorder %s25_s15, 2  ;;  %p170_p2 = scmp.lt.s32.totalorder %s1247_s14, 3 }
   0x5   : > { %s1533_s15 = smov (%p27_p1, %s25_s15), 0  ;;  %p171_p3 = pnand %p935_p0, %p170_p2 }
   0x6   : > { %s936_s28 = sshll.u32 (!%p171_p3), %s1239_s12, 5 }
   0x7   : > { %174 = sbr.rel (%p171_p3) target bundleno = 305 (0x131), region = 32  ;;  %p206_p4 = scmp.lt.s32.totalorder (!%p171_p3), %s936_s28, 63 }
   0xc   : > { %v1175_v0 = vld [vmem:[%s1527_s1 + $0x38] sm:$0xff]  ;;  %v1174_v2 = vld [vmem:[%s1527_s1 + $0x30] sm:$0xff]  ;;  %v1173_v4 = vld [vmem:[%s1527_s1 + $0x28] sm:$0xff]  ;;  %s1535_s28 = smov (!%p206_p4, %s936_s28), 63  ;;  %vm794_vm0 = vcmask 125952  }
   0xd   : > { %v1183_v1 = vld [vmem:[%s1527_s1 + $0x78] sm:$0xff]  ;;  %552 = vmatpush.bf16.msra.mxu0 %v1175_v0  ;;  %1184 = vmatpush.bf16.msra.mxu2 %v1175_v0  ;;  %v1182_v3 = vld [vmem:[%s1527_s1 + $0x70] sm:$0xff]  ;;  %v1181_v5 = vld [vmem:[%s1527_s1 + $0x68] sm:$0xff]  ;;  %s1135_s17 = sshll.u32 %s1535_s28, 3  ;;  %s940_s5 = sshll.u32 %s1535_s28, 2 }
   0xe   : > { %641 = vmatpush.bf16.msra.mxu1 %v1183_v1  ;;  %1192 = vmatpush.bf16.msra.mxu3 %v1183_v1  ;;  %v1172_v6 = vld [vmem:[%s1527_s1 + $0x20] sm:$0xff]  ;;  %v1171_v8 = vld [vmem:[%s1527_s1 + $0x18] sm:$0xff]  ;;  %v1170_v10 = vld [vmem:[%s1527_s1 + $0x10] sm:$0xff]  ;;  %s1335_s22 = scalar_lea.vmem %s1526_s0, %s1135_s17  ;;  %s1420_s8 = scalar_lea.vmem %s1529_s3, %s940_s5 }
   0xf   : > { %v1180_v7 = vld [vmem:[%s1527_s1 + $0x60] sm:$0xff]  ;;  %v1179_v9 = vld [vmem:[%s1527_s1 + $0x58] sm:$0xff]  ;;  %v1178_v11 = vld [vmem:[%s1527_s1 + $0x50] sm:$0xff] }
  0x10   : > { %v1169_v12 = vld [vmem:[%s1527_s1 + $0x8] sm:$0xff]  ;;  %v1168_v14 = vld [vmem:[%s1527_s1] sm:$0xff]  ;;  %v951_v28 = vld [vmem:[%s1335_s22 + $0x10] sm:$0xf] }
  0x11   : > { %553 = vmatpush.bf16.msra.mxu0 %v1174_v2  ;;  %1185 = vmatpush.bf16.msra.mxu2 %v1174_v2  ;;  %v1177_v13 = vld [vmem:[%s1527_s1 + $0x48] sm:$0xff]  ;;  %v1176_v15 = vld [vmem:[%s1527_s1 + $0x40] sm:$0xff]  ;;  %v1139_v29 = vld [vmem:[%s1335_s22 + $0x14] sm:$0xf0] }
  0x12   : > { %642 = vmatpush.bf16.msra.mxu1 %v1182_v3  ;;  %1193 = vmatpush.bf16.msra.mxu3 %v1182_v3  ;;  %v943_v16 = vld [vmem:[%s1335_s22] sm:$0xf]  ;;  %v1137_v17 = vld [vmem:[%s1335_s22 + $0x4] sm:$0xf0]  ;;  %v1136_v20 = vld [vmem:[%s1335_s22 + $0x4] sm:$0xf]  ;;  %v952_v36 = vor.u32 %v1139_v29, %v951_v28 }
  0x13   : > { %v1007_v18 = vld [vmem:[%s1335_s22 + $0x80] sm:$0xf]  ;;  %v1153_v19 = vld [vmem:[%s1335_s22 + $0x84] sm:$0xf0]  ;;  %v945_v21 = vld [vmem:[%s1335_s22 + $0x8] sm:$0xf0]  ;;  %v944_v24 = vor.u32 %v1137_v17, %v943_v16 }
  0x14   : > { %v1152_v22 = vld [vmem:[%s1335_s22 + $0x84] sm:$0xf]  ;;  %v1009_v23 = vld [vmem:[%s1335_s22 + $0x88] sm:$0xf0]  ;;  %v1008_v25 = vor.u32 %v1153_v19, %v1007_v18  ;;  %v948_v26 = vor.u32 %v1136_v20, %v945_v21  ;;  %v1015_v30 = vld [vmem:[%s1335_s22 + $0x90] sm:$0xf] }
  0x15   : > { %554 = vmatpush.bf16.msra.mxu0 %v1173_v4  ;;  %1186 = vmatpush.bf16.msra.mxu2 %v1173_v4  ;;  %v1012_v27 = vor.u32 %v1152_v22, %v1009_v23  ;;  %v1155_v31 = vld [vmem:[%s1335_s22 + $0x94] sm:$0xf0]  ;;  %v1138_v32 = vld [vmem:[%s1335_s22 + $0x14] sm:$0xf]  ;;  %v953_v33 = vld [vmem:[%s1335_s22 + $0x18] sm:$0xf0] }
  0x16   : > { %643 = vmatpush.bf16.msra.mxu1 %v1181_v5  ;;  %1194 = vmatpush.bf16.msra.mxu3 %v1181_v5  ;;  %v1154_v34 = vld [vmem:[%s1335_s22 + $0x94] sm:$0xf]  ;;  %v1017_v35 = vld [vmem:[%s1335_s22 + $0x98] sm:$0xf0]  ;;  %v1016_v37 = vor.u32 %v1155_v31, %v1015_v30  ;;  %v956_v38 = vor.u32 %v1138_v32, %v953_v33  ;;  %v959_v40 = vld [vmem:[%s1335_s22 + $0x20] sm:$0xf] }
  0x17   : > { %v1020_v39 = vor.u32 %v1154_v34, %v1017_v35  ;;  %v1141_v41 = vld [vmem:[%s1335_s22 + $0x24] sm:$0xf0]  ;;  %v1023_v42 = vld [vmem:[%s1335_s22 + $0xa0] sm:$0xf]  ;;  %v1140_v44 = vld [vmem:[%s1335_s22 + $0x24] sm:$0xf] }
  0x18   : > { %v1157_v43 = vld [vmem:[%s1335_s22 + $0xa4] sm:$0xf0]  ;;  %v961_v45 = vld [vmem:[%s1335_s22 + $0x28] sm:$0xf0]  ;;  %v1156_v46 = vld [vmem:[%s1335_s22 + $0xa4] sm:$0xf]  ;;  %v960_v48 = vor.u32 %v1141_v41, %v959_v40 }
  0x19   : > { %555 = vmatpush.bf16.msra.mxu0 %v1172_v6  ;;  %1187 = vmatpush.bf16.msra.mxu2 %v1172_v6  ;;  %v1025_v47 = vld [vmem:[%s1335_s22 + $0xa8] sm:$0xf0]  ;;  %v1024_v49 = vor.u32 %v1157_v43, %v1023_v42  ;;  %v964_v50 = vor.u32 %v1140_v44, %v961_v45  ;;  %v967_v52 = vld [vmem:[%s1335_s22 + $0x30] sm:$0xf]  ;;  %v1143_v53 = vld [vmem:[%s1335_s22 + $0x34] sm:$0xf0] }
  0x1a   : > { %644 = vmatpush.bf16.msra.mxu1 %v1180_v7  ;;  %1195 = vmatpush.bf16.msra.mxu3 %v1180_v7  ;;  %v1028_v51 = vor.u32 %v1156_v46, %v1025_v47  ;;  %v1031_v54 = vld [vmem:[%s1335_s22 + $0xb0] sm:$0xf]  ;;  %v1159_v55 = vld [vmem:[%s1335_s22 + $0xb4] sm:$0xf0]  ;;  %v1142_v56 = vld [vmem:[%s1335_s22 + $0x34] sm:$0xf]  ;;  %v968_v60 = vor.u32 %v1143_v53, %v967_v52 }
  0x1b   : > { %v969_v57 = vld [vmem:[%s1335_s22 + $0x38] sm:$0xf0]  ;;  %v1158_v58 = vld [vmem:[%s1335_s22 + $0xb4] sm:$0xf]  ;;  %v1032_v61 = vor.u32 %v1159_v55, %v1031_v54  ;;  %v975_v0 = vld [vmem:[%s1335_s22 + $0x40] sm:$0xf] }
  0x1c   : > { %v1033_v59 = vld [vmem:[%s1335_s22 + $0xb8] sm:$0xf0]  ;;  %v972_v62 = vor.u32 %v1142_v56, %v969_v57  ;;  %v1145_v1 = vld [vmem:[%s1335_s22 + $0x44] sm:$0xf0]  ;;  %v1039_v2 = vld [vmem:[%s1335_s22 + $0xc0] sm:$0xf] }
  0x1d   : > { %556 = vmatpush.bf16.msra.mxu0 %v1171_v8  ;;  %1188 = vmatpush.bf16.msra.mxu2 %v1171_v8  ;;  %v1036_v63 = vor.u32 %v1158_v58, %v1033_v59  ;;  %v1161_v3 = vld [vmem:[%s1335_s22 + $0xc4] sm:$0xf0]  ;;  %v1144_v4 = vld [vmem:[%s1335_s22 + $0x44] sm:$0xf]  ;;  %v977_v5 = vld [vmem:[%s1335_s22 + $0x48] sm:$0xf0]  ;;  %v976_v8 = vor.u32 %v1145_v1, %v975_v0 }
  0x1e   : > { %645 = vmatpush.bf16.msra.mxu1 %v1179_v9  ;;  %1196 = vmatpush.bf16.msra.mxu3 %v1179_v9  ;;  %v1160_v6 = vld [vmem:[%s1335_s22 + $0xc4] sm:$0xf]  ;;  %v1041_v7 = vld [vmem:[%s1335_s22 + $0xc8] sm:$0xf0]  ;;  %v1040_v9 = vor.u32 %v1161_v3, %v1039_v2  ;;  %v1146_v16 = vld [vmem:[%s1335_s22 + $0x54] sm:$0xf] }
  0x1f   : > { %v985_v17 = vld [vmem:[%s1335_s22 + $0x58] sm:$0xf0]  ;;  %v1162_v18 = vld [vmem:[%s1335_s22 + $0xd4] sm:$0xf]  ;;  %v1148_v28 = vld [vmem:[%s1335_s22 + $0x64] sm:$0xf] }
  0x20   : > { %v1049_v19 = vld [vmem:[%s1335_s22 + $0xd8] sm:$0xf0]  ;;  %v988_v22 = vor.u32 %v1146_v16, %v985_v17  ;;  %v993_v29 = vld [vmem:[%s1335_s22 + $0x68] sm:$0xf0]  ;;  %v1164_v30 = vld [vmem:[%s1335_s22 + $0xe4] sm:$0xf] }
  0x21   : > { %557 = vmatpush.bf16.msra.mxu0 %v1170_v10  ;;  %1189 = vmatpush.bf16.msra.mxu2 %v1170_v10  ;;  %v980_v10 = vor.u32 %v1144_v4, %v977_v5  ;;  %v1052_v23 = vor.u32 %v1162_v18, %v1049_v19  ;;  %v1057_v31 = vld [vmem:[%s1335_s22 + $0xe8] sm:$0xf0]  ;;  %v996_v34 = vor.u32 %v1148_v28, %v993_v29  ;;  %v1150_v40 = vld [vmem:[%s1335_s22 + $0x74] sm:$0xf]  ;;  %v1001_v41 = vld [vmem:[%s1335_s22 + $0x78] sm:$0xf0] }
  0x22   : > { %646 = vmatpush.bf16.msra.mxu1 %v1178_v11  ;;  %1197 = vmatpush.bf16.msra.mxu3 %v1178_v11  ;;  %v1044_v11 = vor.u32 %v1160_v6, %v1041_v7  ;;  %v1060_v35 = vor.u32 %v1164_v30, %v1057_v31  ;;  %v1166_v42 = vld [vmem:[%s1335_s22 + $0xf4] sm:$0xf]  ;;  %v1065_v43 = vld [vmem:[%s1335_s22 + $0xf8] sm:$0xf0]  ;;  %v1004_v46 = vor.u32 %v1150_v40, %v1001_v41 }
  0x23   : > { %v1068_v47 = vor.u32 %v1166_v42, %v1065_v43 }
  0x25   : > { %558 = vmatpush.bf16.msra.mxu0 %v1169_v12  ;;  %1190 = vmatpush.bf16.msra.mxu2 %v1169_v12  ;;  %v983_v12 = vld [vmem:[%s1335_s22 + $0x50] sm:$0xf] }
  0x26   : > { %647 = vmatpush.bf16.msra.mxu1 %v1177_v13  ;;  %1198 = vmatpush.bf16.msra.mxu3 %v1177_v13  ;;  %v1147_v13 = vld [vmem:[%s1335_s22 + $0x54] sm:$0xf0] }
  0x27   : > { %v984_v20 = vor.u32 %v1147_v13, %v983_v12 }
  0x29   : > { %559 = vmatpush.bf16.msra.mxu0 %v1168_v14  ;;  %1191 = vmatpush.bf16.msra.mxu2 %v1168_v14  ;;  %v1047_v14 = vld [vmem:[%s1335_s22 + $0xd0] sm:$0xf] }
  0x2a   : > { %648 = vmatpush.bf16.msra.mxu1 %v1176_v15  ;;  %1199 = vmatpush.bf16.msra.mxu3 %v1176_v15  ;;  %v1163_v15 = vld [vmem:[%s1335_s22 + $0xd4] sm:$0xf0] }
  0x2b   : > { %v1048_v21 = vor.u32 %v1163_v15, %v1047_v14 }
  0x2c   : > { %560 = vmatmul.bf16.vlgmr.msra.gmra.mxu0 %v944_v24  ;;  %600 = vmatmul.bf16.vlgmr.msra.gmra.mxu2 %v1008_v25  ;;  %v991_v24 = vld [vmem:[%s1335_s22 + $0x60] sm:$0xf]  ;;  %v1149_v25 = vld [vmem:[%s1335_s22 + $0x64] sm:$0xf0] }
  0x2d   : > { %649 = vmatmul.bf16.vlgmr.msra.gmra.mxu1 %v948_v26  ;;  %689 = vmatmul.bf16.vlgmr.msra.gmra.mxu3 %v1012_v27  ;;  %v1055_v26 = vld [vmem:[%s1335_s22 + $0xe0] sm:$0xf]  ;;  %v1165_v27 = vld [vmem:[%s1335_s22 + $0xe4] sm:$0xf0]  ;;  %v992_v32 = vor.u32 %v1149_v25, %v991_v24 }
  0x2e   : > { %v1056_v33 = vor.u32 %v1165_v27, %v1055_v26 }
  0x3c   : > { %565 = vmatmul.bf16.gmra.mxu0 %v952_v36  ;;  %605 = vmatmul.bf16.gmra.mxu2 %v1016_v37  ;;  %v999_v36 = vld [vmem:[%s1335_s22 + $0x70] sm:$0xf]  ;;  %v1151_v37 = vld [vmem:[%s1335_s22 + $0x74] sm:$0xf0] }
  0x3d   : > { %654 = vmatmul.bf16.gmra.mxu1 %v956_v38  ;;  %694 = vmatmul.bf16.gmra.mxu3 %v1020_v39  ;;  %v1063_v38 = vld [vmem:[%s1335_s22 + $0xf0] sm:$0xf]  ;;  %v1167_v39 = vld [vmem:[%s1335_s22 + $0xf4] sm:$0xf0]  ;;  %v1000_v44 = vor.u32 %v1151_v37, %v999_v36 }
  0x3e   : > { %v1064_v45 = vor.u32 %v1167_v39, %v1063_v38 }
  0x4c   : > { %570 = vmatmul.bf16.gmra.mxu0 %v960_v48  ;;  %610 = vmatmul.bf16.gmra.mxu2 %v1024_v49  ;;  %v1413_v48 = vld [vmem:[%s1528_s2] ss:$0 sm:$0xff] }
  0x4d   : > { %659 = vmatmul.bf16.gmra.mxu1 %v964_v50  ;;  %699 = vmatmul.bf16.gmra.mxu3 %v1028_v51 }
  0x5c   : > { %575 = vmatmul.bf16.gmra.mxu0 %v968_v60  ;;  %615 = vmatmul.bf16.gmra.mxu2 %v1032_v61 }
  0x5d   : > { %664 = vmatmul.bf16.gmra.mxu1 %v972_v62  ;;  %704 = vmatmul.bf16.gmra.mxu3 %v1036_v63 }
  0x6c   : > { %580 = vmatmul.bf16.gmra.mxu0 %v976_v8  ;;  %620 = vmatmul.bf16.gmra.mxu2 %v1040_v9 }
  0x6d   : > { %669 = vmatmul.bf16.gmra.mxu1 %v980_v10  ;;  %709 = vmatmul.bf16.gmra.mxu3 %v1044_v11 }
  0x7c   : > { %585 = vmatmul.bf16.gmra.mxu0 %v984_v20  ;;  %625 = vmatmul.bf16.gmra.mxu2 %v1048_v21 }
  0x7d   : > { %674 = vmatmul.bf16.gmra.mxu1 %v988_v22  ;;  %714 = vmatmul.bf16.gmra.mxu3 %v1052_v23 }
  0x8c   : > { %590 = vmatmul.bf16.gmra.mxu0 %v992_v32  ;;  %630 = vmatmul.bf16.gmra.mxu2 %v1056_v33 }
  0x8d   : > { %679 = vmatmul.bf16.gmra.mxu1 %v996_v34  ;;  %719 = vmatmul.bf16.gmra.mxu3 %v1060_v35 }
  0x9c   : > { %595 = vmatmul.bf16.gmra.mxu0 %v1000_v44  ;;  %635 = vmatmul.bf16.gmra.mxu2 %v1064_v45 }
  0x9d   : > { %684 = vmatmul.bf16.gmra.mxu1 %v1004_v46  ;;  %724 = vmatmul.bf16.gmra.mxu3 %v1068_v47 }
  0xa9   : > { %v561_v49 = vpop.f32.mrf.mxu0 }
  0xaa   : > { %v562_v50 = vadd.f32 %v1413_v48, %v561_v49  ;;  %v650_v51 = vpop.f32.mrf.mxu1 }
  0xac   : > { %v651_v52 = vadd.f32 %v650_v51, %v562_v50 }
  0xae   : > { %v730_v53 = vmax.f32 %v651_v52, 0.0 }
  0xaf   : > { %v601_v54 = vpop.f32.mrf.mxu2 }
  0xb0   : > { %v762_v55 = vpack.c.bf16 %v730_v53, %v730_v53  ;;  %v602_v56 = vadd.f32 %v1413_v48, %v601_v54  ;;  %v690_v57 = vpop.f32.mrf.mxu3 }
  0xb1   : > { %v563_v58 = vpop.f32.mrf.mxu0 }
  0xb2   : > { %795 = vst.msk [vmem:[%s1420_s8] sm:$0xf] %vm794_vm0, %v762_v55  ;;  %v691_v59 = vadd.f32 %v690_v57, %v602_v56  ;;  %v564_v60 = vadd.f32 %v1413_v48, %v563_v58  ;;  %v652_v61 = vpop.f32.mrf.mxu1 }
  0xb4   : > { %v746_v62 = vmax.f32 %v691_v59, 0.0  ;;  %v653_v63 = vadd.f32 %v652_v61, %v564_v60 }
  0xb6   : > { %v778_v0 = vpack.c.bf16 %v746_v62, %v746_v62  ;;  %v731_v1 = vmax.f32 %v653_v63, 0.0 }
  0xb7   : > { %v603_v2 = vpop.f32.mrf.mxu2 }
  0xb8   : > { %811 = vst.msk [vmem:[%s1420_s8 + $0x40] sm:$0xf] %vm794_vm0, %v778_v0  ;;  %v763_v3 = vpack.c.bf16 %v731_v1, %v731_v1  ;;  %v604_v4 = vadd.f32 %v1413_v48, %v603_v2  ;;  %v692_v5 = vpop.f32.mrf.mxu3 }
  0xb9   : > { %v566_v6 = vpop.f32.mrf.mxu0 }
  0xba   : > { %796 = vst.msk [vmem:[%s1420_s8 + $0x4] sm:$0xf] %vm794_vm0, %v763_v3  ;;  %v693_v7 = vadd.f32 %v692_v5, %v604_v4  ;;  %v567_v8 = vadd.f32 %v1413_v48, %v566_v6  ;;  %v655_v9 = vpop.f32.mrf.mxu1 }
  0xbc   : > { %v747_v10 = vmax.f32 %v693_v7, 0.0  ;;  %v656_v11 = vadd.f32 %v655_v9, %v567_v8 }
  0xbe   : > { %v779_v12 = vpack.c.bf16 %v747_v10, %v747_v10  ;;  %v732_v13 = vmax.f32 %v656_v11, 0.0 }
  0xbf   : > { %v606_v14 = vpop.f32.mrf.mxu2 }
  0xc0   : > { %812 = vst.msk [vmem:[%s1420_s8 + $0x44] sm:$0xf] %vm794_vm0, %v779_v12  ;;  %v764_v15 = vpack.c.bf16 %v732_v13, %v732_v13  ;;  %v607_v16 = vadd.f32 %v1413_v48, %v606_v14  ;;  %v695_v17 = vpop.f32.mrf.mxu3 }
  0xc1   : > { %v568_v18 = vpop.f32.mrf.mxu0 }
  0xc2   : > { %797 = vst.msk [vmem:[%s1420_s8 + $0x8] sm:$0xf] %vm794_vm0, %v764_v15  ;;  %v696_v19 = vadd.f32 %v695_v17, %v607_v16  ;;  %v569_v20 = vadd.f32 %v1413_v48, %v568_v18  ;;  %v657_v21 = vpop.f32.mrf.mxu1 }
  0xc4   : > { %v748_v22 = vmax.f32 %v696_v19, 0.0  ;;  %v658_v23 = vadd.f32 %v657_v21, %v569_v20 }
  0xc6   : > { %v780_v24 = vpack.c.bf16 %v748_v22, %v748_v22  ;;  %v733_v25 = vmax.f32 %v658_v23, 0.0 }
  0xc7   : > { %v608_v26 = vpop.f32.mrf.mxu2 }
  0xc8   : > { %813 = vst.msk [vmem:[%s1420_s8 + $0x48] sm:$0xf] %vm794_vm0, %v780_v24  ;;  %v765_v27 = vpack.c.bf16 %v733_v25, %v733_v25  ;;  %v609_v28 = vadd.f32 %v1413_v48, %v608_v26  ;;  %v697_v29 = vpop.f32.mrf.mxu3 }
  0xc9   : > { %v571_v30 = vpop.f32.mrf.mxu0 }
  0xca   : > { %798 = vst.msk [vmem:[%s1420_s8 + $0xc] sm:$0xf] %vm794_vm0, %v765_v27  ;;  %v698_v31 = vadd.f32 %v697_v29, %v609_v28  ;;  %v572_v32 = vadd.f32 %v1413_v48, %v571_v30  ;;  %v660_v33 = vpop.f32.mrf.mxu1 }
  0xcc   : > { %v749_v34 = vmax.f32 %v698_v31, 0.0  ;;  %v661_v35 = vadd.f32 %v660_v33, %v572_v32 }
  0xce   : > { %v781_v36 = vpack.c.bf16 %v749_v34, %v749_v34  ;;  %v734_v37 = vmax.f32 %v661_v35, 0.0 }
  0xcf   : > { %v611_v38 = vpop.f32.mrf.mxu2 }
  0xd0   : > { %814 = vst.msk [vmem:[%s1420_s8 + $0x4c] sm:$0xf] %vm794_vm0, %v781_v36  ;;  %v766_v39 = vpack.c.bf16 %v734_v37, %v734_v37  ;;  %v612_v40 = vadd.f32 %v1413_v48, %v611_v38  ;;  %v700_v41 = vpop.f32.mrf.mxu3 }
  0xd1   : > { %v573_v42 = vpop.f32.mrf.mxu0 }
  0xd2   : > { %799 = vst.msk [vmem:[%s1420_s8 + $0x10] sm:$0xf] %vm794_vm0, %v766_v39  ;;  %v701_v43 = vadd.f32 %v700_v41, %v612_v40  ;;  %v574_v44 = vadd.f32 %v1413_v48, %v573_v42  ;;  %v662_v45 = vpop.f32.mrf.mxu1 }
  0xd4   : > { %v750_v46 = vmax.f32 %v701_v43, 0.0  ;;  %v663_v47 = vadd.f32 %v662_v45, %v574_v44 }
  0xd6   : > { %v782_v49 = vpack.c.bf16 %v750_v46, %v750_v46  ;;  %v735_v50 = vmax.f32 %v663_v47, 0.0 }
  0xd7   : > { %v613_v51 = vpop.f32.mrf.mxu2 }
  0xd8   : > { %815 = vst.msk [vmem:[%s1420_s8 + $0x50] sm:$0xf] %vm794_vm0, %v782_v49  ;;  %v767_v52 = vpack.c.bf16 %v735_v50, %v735_v50  ;;  %v614_v53 = vadd.f32 %v1413_v48, %v613_v51  ;;  %v702_v54 = vpop.f32.mrf.mxu3 }
  0xd9   : > { %v576_v55 = vpop.f32.mrf.mxu0 }
  0xda   : > { %800 = vst.msk [vmem:[%s1420_s8 + $0x14] sm:$0xf] %vm794_vm0, %v767_v52  ;;  %v703_v56 = vadd.f32 %v702_v54, %v614_v53  ;;  %v577_v57 = vadd.f32 %v1413_v48, %v576_v55  ;;  %v665_v58 = vpop.f32.mrf.mxu1 }
  0xdc   : > { %v751_v59 = vmax.f32 %v703_v56, 0.0  ;;  %v666_v60 = vadd.f32 %v665_v58, %v577_v57 }
  0xde   : > { %v783_v61 = vpack.c.bf16 %v751_v59, %v751_v59  ;;  %v736_v62 = vmax.f32 %v666_v60, 0.0 }
  0xdf   : > { %v616_v63 = vpop.f32.mrf.mxu2 }
  0xe0   : > { %816 = vst.msk [vmem:[%s1420_s8 + $0x54] sm:$0xf] %vm794_vm0, %v783_v61  ;;  %v768_v0 = vpack.c.bf16 %v736_v62, %v736_v62  ;;  %v617_v1 = vadd.f32 %v1413_v48, %v616_v63  ;;  %v705_v2 = vpop.f32.mrf.mxu3 }
  0xe1   : > { %v578_v3 = vpop.f32.mrf.mxu0 }
  0xe2   : > { %801 = vst.msk [vmem:[%s1420_s8 + $0x18] sm:$0xf] %vm794_vm0, %v768_v0  ;;  %v706_v4 = vadd.f32 %v705_v2, %v617_v1  ;;  %v579_v5 = vadd.f32 %v1413_v48, %v578_v3  ;;  %v667_v6 = vpop.f32.mrf.mxu1 }
  0xe4   : > { %v752_v7 = vmax.f32 %v706_v4, 0.0  ;;  %v668_v8 = vadd.f32 %v667_v6, %v579_v5 }
  0xe6   : > { %v784_v9 = vpack.c.bf16 %v752_v7, %v752_v7  ;;  %v737_v10 = vmax.f32 %v668_v8, 0.0 }
  0xe7   : > { %v618_v11 = vpop.f32.mrf.mxu2 }
  0xe8   : > { %817 = vst.msk [vmem:[%s1420_s8 + $0x58] sm:$0xf] %vm794_vm0, %v784_v9  ;;  %v769_v12 = vpack.c.bf16 %v737_v10, %v737_v10  ;;  %v619_v13 = vadd.f32 %v1413_v48, %v618_v11  ;;  %v707_v14 = vpop.f32.mrf.mxu3 }
  0xe9   : > { %v581_v15 = vpop.f32.mrf.mxu0 }
  0xea   : > { %802 = vst.msk [vmem:[%s1420_s8 + $0x1c] sm:$0xf] %vm794_vm0, %v769_v12  ;;  %v708_v16 = vadd.f32 %v707_v14, %v619_v13  ;;  %v582_v17 = vadd.f32 %v1413_v48, %v581_v15  ;;  %v670_v18 = vpop.f32.mrf.mxu1 }
  0xec   : > { %v753_v19 = vmax.f32 %v708_v16, 0.0  ;;  %v671_v20 = vadd.f32 %v670_v18, %v582_v17 }
  0xee   : > { %v785_v21 = vpack.c.bf16 %v753_v19, %v753_v19  ;;  %v738_v22 = vmax.f32 %v671_v20, 0.0 }
  0xef   : > { %v621_v23 = vpop.f32.mrf.mxu2 }
  0xf0   : > { %818 = vst.msk [vmem:[%s1420_s8 + $0x5c] sm:$0xf] %vm794_vm0, %v785_v21  ;;  %v770_v24 = vpack.c.bf16 %v738_v22, %v738_v22  ;;  %v622_v25 = vadd.f32 %v1413_v48, %v621_v23  ;;  %v710_v26 = vpop.f32.mrf.mxu3 }
  0xf1   : > { %v583_v27 = vpop.f32.mrf.mxu0 }
  0xf2   : > { %803 = vst.msk [vmem:[%s1420_s8 + $0x20] sm:$0xf] %vm794_vm0, %v770_v24  ;;  %v711_v28 = vadd.f32 %v710_v26, %v622_v25  ;;  %v584_v29 = vadd.f32 %v1413_v48, %v583_v27  ;;  %v672_v30 = vpop.f32.mrf.mxu1 }
  0xf4   : > { %v754_v31 = vmax.f32 %v711_v28, 0.0  ;;  %v673_v32 = vadd.f32 %v672_v30, %v584_v29 }
  0xf6   : > { %v786_v33 = vpack.c.bf16 %v754_v31, %v754_v31  ;;  %v739_v34 = vmax.f32 %v673_v32, 0.0 }
  0xf7   : > { %v623_v35 = vpop.f32.mrf.mxu2 }
  0xf8   : > { %819 = vst.msk [vmem:[%s1420_s8 + $0x60] sm:$0xf] %vm794_vm0, %v786_v33  ;;  %v771_v36 = vpack.c.bf16 %v739_v34, %v739_v34  ;;  %v624_v37 = vadd.f32 %v1413_v48, %v623_v35  ;;  %v712_v38 = vpop.f32.mrf.mxu3 }
  0xf9   : > { %v586_v39 = vpop.f32.mrf.mxu0 }
  0xfa   : > { %804 = vst.msk [vmem:[%s1420_s8 + $0x24] sm:$0xf] %vm794_vm0, %v771_v36  ;;  %v713_v40 = vadd.f32 %v712_v38, %v624_v37  ;;  %v587_v41 = vadd.f32 %v1413_v48, %v586_v39  ;;  %v675_v42 = vpop.f32.mrf.mxu1 }
  0xfc   : > { %v755_v43 = vmax.f32 %v713_v40, 0.0  ;;  %v676_v44 = vadd.f32 %v675_v42, %v587_v41 }
  0xfe   : > { %v787_v45 = vpack.c.bf16 %v755_v43, %v755_v43  ;;  %v740_v46 = vmax.f32 %v676_v44, 0.0 }
  0xff   : > { %v626_v47 = vpop.f32.mrf.mxu2 }
 0x100   : > { %820 = vst.msk [vmem:[%s1420_s8 + $0x64] sm:$0xf] %vm794_vm0, %v787_v45  ;;  %v772_v49 = vpack.c.bf16 %v740_v46, %v740_v46  ;;  %v627_v50 = vadd.f32 %v1413_v48, %v626_v47  ;;  %v715_v51 = vpop.f32.mrf.mxu3 }
 0x101   : > { %v588_v52 = vpop.f32.mrf.mxu0 }
 0x102   : > { %805 = vst.msk [vmem:[%s1420_s8 + $0x28] sm:$0xf] %vm794_vm0, %v772_v49  ;;  %v716_v53 = vadd.f32 %v715_v51, %v627_v50  ;;  %v589_v54 = vadd.f32 %v1413_v48, %v588_v52  ;;  %v677_v55 = vpop.f32.mrf.mxu1 }
 0x104   : > { %v756_v56 = vmax.f32 %v716_v53, 0.0  ;;  %v678_v57 = vadd.f32 %v677_v55, %v589_v54 }
 0x106   : > { %v788_v58 = vpack.c.bf16 %v756_v56, %v756_v56  ;;  %v741_v59 = vmax.f32 %v678_v57, 0.0 }
 0x107   : > { %v628_v60 = vpop.f32.mrf.mxu2 }
 0x108   : > { %821 = vst.msk [vmem:[%s1420_s8 + $0x68] sm:$0xf] %vm794_vm0, %v788_v58  ;;  %v773_v61 = vpack.c.bf16 %v741_v59, %v741_v59  ;;  %v629_v62 = vadd.f32 %v1413_v48, %v628_v60  ;;  %v717_v63 = vpop.f32.mrf.mxu3 }
 0x109   : > { %v591_v0 = vpop.f32.mrf.mxu0 }
 0x10a   : > { %806 = vst.msk [vmem:[%s1420_s8 + $0x2c] sm:$0xf] %vm794_vm0, %v773_v61  ;;  %v718_v1 = vadd.f32 %v717_v63, %v629_v62  ;;  %v592_v2 = vadd.f32 %v1413_v48, %v591_v0  ;;  %v680_v3 = vpop.f32.mrf.mxu1 }
 0x10c   : > { %v757_v4 = vmax.f32 %v718_v1, 0.0  ;;  %v681_v5 = vadd.f32 %v680_v3, %v592_v2 }
 0x10e   : > { %v789_v6 = vpack.c.bf16 %v757_v4, %v757_v4  ;;  %v742_v7 = vmax.f32 %v681_v5, 0.0 }
 0x10f   : > { %v631_v8 = vpop.f32.mrf.mxu2 }
 0x110   : > { %822 = vst.msk [vmem:[%s1420_s8 + $0x6c] sm:$0xf] %vm794_vm0, %v789_v6  ;;  %v774_v9 = vpack.c.bf16 %v742_v7, %v742_v7  ;;  %v632_v10 = vadd.f32 %v1413_v48, %v631_v8  ;;  %v720_v11 = vpop.f32.mrf.mxu3 }
 0x111   : > { %v593_v12 = vpop.f32.mrf.mxu0 }
 0x112   : > { %807 = vst.msk [vmem:[%s1420_s8 + $0x30] sm:$0xf] %vm794_vm0, %v774_v9  ;;  %v721_v13 = vadd.f32 %v720_v11, %v632_v10  ;;  %v594_v14 = vadd.f32 %v1413_v48, %v593_v12  ;;  %v682_v15 = vpop.f32.mrf.mxu1 }
 0x114   : > { %v758_v16 = vmax.f32 %v721_v13, 0.0  ;;  %v683_v17 = vadd.f32 %v682_v15, %v594_v14 }
 0x116   : > { %v790_v18 = vpack.c.bf16 %v758_v16, %v758_v16  ;;  %v743_v19 = vmax.f32 %v683_v17, 0.0 }
 0x117   : > { %v633_v20 = vpop.f32.mrf.mxu2 }
 0x118   : > { %823 = vst.msk [vmem:[%s1420_s8 + $0x70] sm:$0xf] %vm794_vm0, %v790_v18  ;;  %v775_v21 = vpack.c.bf16 %v743_v19, %v743_v19  ;;  %v634_v22 = vadd.f32 %v1413_v48, %v633_v20  ;;  %v722_v23 = vpop.f32.mrf.mxu3 }
 0x119   : > { %v596_v24 = vpop.f32.mrf.mxu0 }
 0x11a   : > { %808 = vst.msk [vmem:[%s1420_s8 + $0x34] sm:$0xf] %vm794_vm0, %v775_v21  ;;  %v723_v25 = vadd.f32 %v722_v23, %v634_v22  ;;  %v597_v26 = vadd.f32 %v1413_v48, %v596_v24  ;;  %v685_v27 = vpop.f32.mrf.mxu1 }
 0x11c   : > { %v759_v28 = vmax.f32 %v723_v25, 0.0  ;;  %v686_v29 = vadd.f32 %v685_v27, %v597_v26 }
 0x11e   : > { %v791_v30 = vpack.c.bf16 %v759_v28, %v759_v28  ;;  %v744_v31 = vmax.f32 %v686_v29, 0.0 }
 0x11f   : > { %v636_v32 = vpop.f32.mrf.mxu2 }
 0x120   : > { %824 = vst.msk [vmem:[%s1420_s8 + $0x74] sm:$0xf] %vm794_vm0, %v791_v30  ;;  %v776_v33 = vpack.c.bf16 %v744_v31, %v744_v31  ;;  %v637_v34 = vadd.f32 %v1413_v48, %v636_v32  ;;  %v725_v35 = vpop.f32.mrf.mxu3 }
 0x121   : > { %v598_v36 = vpop.f32.mrf.mxu0 }
 0x122   : > { %809 = vst.msk [vmem:[%s1420_s8 + $0x38] sm:$0xf] %vm794_vm0, %v776_v33  ;;  %v726_v37 = vadd.f32 %v725_v35, %v637_v34  ;;  %v599_v38 = vadd.f32 %v1413_v48, %v598_v36  ;;  %v687_v39 = vpop.f32.mrf.mxu1 }
 0x124   : > { %v760_v40 = vmax.f32 %v726_v37, 0.0  ;;  %v688_v41 = vadd.f32 %v687_v39, %v599_v38 }
 0x126   : > { %v792_v42 = vpack.c.bf16 %v760_v40, %v760_v40  ;;  %v745_v43 = vmax.f32 %v688_v41, 0.0 }
 0x127   : > { %v638_v44 = vpop.f32.mrf.mxu2 }
 0x128   : > { %825 = vst.msk [vmem:[%s1420_s8 + $0x78] sm:$0xf] %vm794_vm0, %v792_v42  ;;  %v777_v45 = vpack.c.bf16 %v745_v43, %v745_v43  ;;  %v639_v46 = vadd.f32 %v1413_v48, %v638_v44  ;;  %v727_v47 = vpop.f32.mrf.mxu3 }
 0x12a   : > { %810 = vst.msk [vmem:[%s1420_s8 + $0x3c] sm:$0xf] %vm794_vm0, %v777_v45  ;;  %v728_v49 = vadd.f32 %v727_v47, %v639_v46 }
 0x12c   : > { %v761_v50 = vmax.f32 %v728_v49, 0.0 }
 0x12e   : > { %v793_v51 = vpack.c.bf16 %v761_v50, %v761_v50 }
 0x130   : > { %826 = vst.msk [vmem:[%s1420_s8 + $0x7c] sm:$0xf] %vm794_vm0, %v793_v51 }
 0x131 PF: > { %s13_s14 = sadd.s32 1, %s1247_s14   ;;  %s1530_s12 = smov %s1243_s13 }
 0x132   : > { %p10_p5 = scmp.ge.s32.totalorder %s13_s14, 4   ;;  %s1531_s13 = smov %s1533_s15 }
 0x134   :  { %12 = sbr.rel (!%p10_p5) target bundleno = 2 (0x2), region = 68 }

// kernel: resnet_forward.22
= control target key start
LH: loop header
LB: loop body
LE: loop exit
PB: predicated region body
PF: predicated region fallthrough
CT: control target
= control target key end

     0   :  { %s157_s0 = inlined_call_operand.vmem [shape: bf16[9,16,128], index: 0, kind: input, shape index: {}]   ;;  %s158_s1 = inlined_call_operand.vmem [shape: bf16[16,128], index: 1, kind: output, shape index: {}]  }
   0x1   :  { %v69_v0 = vld [vmem:[%s157_s0] sm:$0xff]   ;;  %v109_v1 = vld [vmem:[%s157_s0 + $0x8] sm:$0xff]   ;;  %v110_v2 = vld [vmem:[%s157_s0 + $0x10] sm:$0xff]  }
   0x2   :  { %v70_v3 = vunpack.c.l.bf16 %v69_v0  ;;  %v71_v4 = vunpack.c.h.bf16 %v69_v0  ;;  %v74_v5 = vunpack.c.l.bf16 %v109_v1  ;;  %v75_v6 = vunpack.c.h.bf16 %v109_v1  ;;  %v111_v7 = vld [vmem:[%s157_s0 + $0x18] sm:$0xff]   ;;  %v112_v8 = vld [vmem:[%s157_s0 + $0x20] sm:$0xff]   ;;  %v113_v9 = vld [vmem:[%s157_s0 + $0x28] sm:$0xff]  }
   0x3   :  { %v78_v10 = vunpack.c.l.bf16 %v110_v2  ;;  %v79_v11 = vunpack.c.h.bf16 %v110_v2  ;;  %v82_v12 = vunpack.c.l.bf16 %v111_v7  ;;  %v83_v13 = vunpack.c.h.bf16 %v111_v7  ;;  %v114_v14 = vld [vmem:[%s157_s0 + $0x30] sm:$0xff]   ;;  %v115_v15 = vld [vmem:[%s157_s0 + $0x38] sm:$0xff]   ;;  %v116_v20 = vld [vmem:[%s157_s0 + $0x40] sm:$0xff]  }
   0x4   :  { %v86_v16 = vunpack.c.l.bf16 %v112_v8  ;;  %v90_v17 = vunpack.c.l.bf16 %v113_v9  ;;  %v87_v18 = vunpack.c.h.bf16 %v112_v8  ;;  %v91_v19 = vunpack.c.h.bf16 %v113_v9 }
   0x5   :  { %v94_v21 = vunpack.c.l.bf16 %v114_v14  ;;  %v98_v22 = vunpack.c.l.bf16 %v115_v15  ;;  %v44_v23 = vmax.f32 %v70_v3, %v78_v10  ;;  %v45_v24 = vmax.f32 %v74_v5, %v82_v12 }
   0x6   :  { %v95_v25 = vunpack.c.h.bf16 %v114_v14  ;;  %v99_v26 = vunpack.c.h.bf16 %v115_v15  ;;  %v52_v27 = vmax.f32 %v71_v4, %v79_v11  ;;  %v53_v28 = vmax.f32 %v75_v6, %v83_v13 }
   0x7   :  { %v102_v29 = vunpack.c.l.bf16 %v116_v20  ;;  %v46_v30 = vmax.f32 %v44_v23, %v86_v16  ;;  %v47_v31 = vmax.f32 %v45_v24, %v90_v17  ;;  %v103_v32 = vunpack.c.h.bf16 %v116_v20 }
   0x8   :  { %v54_v33 = vmax.f32 %v52_v27, %v87_v18  ;;  %v55_v34 = vmax.f32 %v53_v28, %v91_v19 }
   0x9   :  { %v48_v35 = vmax.f32 %v46_v30, %v94_v21  ;;  %v49_v36 = vmax.f32 %v47_v31, %v98_v22 }
   0xa   :  { %v56_v37 = vmax.f32 %v54_v33, %v95_v25  ;;  %v57_v38 = vmax.f32 %v55_v34, %v99_v26 }
   0xb   :  { %v50_v39 = vmax.f32 %v48_v35, %v102_v29 }
   0xc   :  { %v58_v40 = vmax.f32 %v56_v37, %v103_v32 }
   0xd   :  { %v51_v41 = vmax.f32 %v50_v39, %v49_v36 }
   0xe   :  { %v59_v42 = vmax.f32 %v58_v40, %v57_v38 }
  0x10   :  { %v107_v43 = vpack.c.bf16 %v59_v42, %v51_v41 }
  0x12   :  { %108 = vst [vmem:[%s158_s1] sm:$0xff] %v107_v43  }

// kernel: resnet_forward.23
= control target key start
LH: loop header
LB: loop body
LE: loop exit
PB: predicated region body
PF: predicated region fallthrough
CT: control target
= control target key end

     0   :  { %vm99_vm0 = vcmask 130048   ;;  %vm1429_vm1 = vcmask 125952   ;;  %s2579_s1 = inlined_call_operand.vmem [shape: bf16[9,16,16], index: 1, kind: input, shape index: {}]   ;;  %s2580_s0 = inlined_call_operand.vmem [shape: bf16[9,128,16], index: 0, kind: input, shape index: {}]   ;;  %s2581_s2 = inlined_call_operand.vmem [shape: f32[1,16], index: 2, kind: input, shape index: {}]   ;;  %s2582_s3 = inlined_call_operand.vmem [shape: bf16[128,16], index: 3, kind: output, shape index: {}]  }
   0x1   :  { %v2007_v0 = vld [vmem:[%s2579_s1 + $0x8] sm:$0xff]  ;;  %v2001_v1 = vld [vmem:[%s2580_s0 + $0x50] sm:$0xff]  ;;  %v2003_v2 = vld [vmem:[%s2580_s0 + $0x60] sm:$0xff] }
   0x2   :  { %v2016_v3 = vld [vmem:[%s2579_s1 + $0x10] sm:$0xff]  ;;  %2071 = vmatpush.bf16.msra.mxu1 %v2007_v0  ;;  %2072 = vmatpush.bf16.msra.mxu2 %v2007_v0  ;;  %v1999_v5 = vld [vmem:[%s2580_s0 + $0x40] sm:$0xff]  ;;  %v2025_v6 = vld [vmem:[%s2579_s1 + $0x18] sm:$0xff] }
   0x3   :  { %v2005_v4 = vld [vmem:[%s2580_s0 + $0x70] sm:$0xff]  ;;  %2073 = vmatpush.bf16.msra.mxu3 %v2007_v0  ;;  %131 = vmatpush.bf16.msra.mxu0 %v2007_v0  ;;  %v1998_v7 = vld [vmem:[%s2579_s1] sm:$0xff]  ;;  %v2061_v10 = vld [vmem:[%s2579_s1 + $0x38] sm:$0xff] }
   0x4   :  { %v2034_v8 = vld [vmem:[%s2579_s1 + $0x20] sm:$0xff]  ;;  %v2052_v9 = vld [vmem:[%s2579_s1 + $0x30] sm:$0xff]  ;;  %v2043_v11 = vld [vmem:[%s2579_s1 + $0x28] sm:$0xff] }
   0x5   :  { %1506 = vmatmul.msk.bf16.vlgmr.msra.gmra.mxu1 %vm99_vm0, %v2001_v1  ;;  %1508 = vmatmul.msk.bf16.vlgmr.msra.gmra.mxu2 %vm99_vm0, %v2003_v2  ;;  %v2070_v12 = vld [vmem:[%s2579_s1 + $0x40] sm:$0xff]  ;;  %v2002_v13 = vld [vmem:[%s2580_s0 + $0x58] sm:$0xff]  ;;  %v2004_v14 = vld [vmem:[%s2580_s0 + $0x68] sm:$0xff] }
   0x6   :  { %389 = vmatpush.bf16.msrb.mxu2 %v2016_v3  ;;  %1510 = vmatmul.msk.bf16.vlgmr.msra.gmra.mxu3 %vm99_vm0, %v2005_v4  ;;  %v2006_v15 = vld [vmem:[%s2580_s0 + $0x78] sm:$0xff]  ;;  %v2000_v16 = vld [vmem:[%s2580_s0 + $0x48] sm:$0xff]  ;;  %v1990_v17 = vld [vmem:[%s2580_s0] sm:$0xff] }
   0x7   :  { %544 = vmatpush.bf16.msrb.mxu3 %v2025_v6  ;;  %1504 = vmatmul.msk.bf16.vlgmr.msra.gmra.mxu0 %vm99_vm0, %v1999_v5  ;;  %v2008_v18 = vld [vmem:[%s2580_s0 + $0x80] sm:$0xff]  ;;  %v1991_v21 = vld [vmem:[%s2580_s0 + $0x8] sm:$0xff]  ;;  %v1992_v25 = vld [vmem:[%s2580_s0 + $0x10] sm:$0xff] }
   0x8   :  { %250 = vmatpush.bf16.msrb.mxu1 %v1998_v7  ;;  %699 = vmatpush.bf16.msrb.mxu0 %v2034_v8  ;;  %v2017_v19 = vld [vmem:[%s2580_s0 + $0xc0] sm:$0xff]  ;;  %v2009_v22 = vld [vmem:[%s2580_s0 + $0x88] sm:$0xff]  ;;  %v2010_v26 = vld [vmem:[%s2580_s0 + $0x90] sm:$0xff] }
   0x9   :  { %v2026_v20 = vld [vmem:[%s2580_s0 + $0x100] sm:$0xff]  ;;  %v2018_v23 = vld [vmem:[%s2580_s0 + $0xc8] sm:$0xff]  ;;  %v2019_v27 = vld [vmem:[%s2580_s0 + $0xd0] sm:$0xff] }
   0xa   :  { %1009 = vmatpush.bf16.msra.mxu2 %v2052_v9  ;;  %v2027_v24 = vld [vmem:[%s2580_s0 + $0x108] sm:$0xff]  ;;  %v2028_v28 = vld [vmem:[%s2580_s0 + $0x110] sm:$0xff]  ;;  %v1993_v29 = vld [vmem:[%s2580_s0 + $0x18] sm:$0xff] }
   0xb   :  { %1164 = vmatpush.bf16.msra.mxu3 %v2061_v10  ;;  %v2011_v30 = vld [vmem:[%s2580_s0 + $0x98] sm:$0xff]  ;;  %v1994_v33 = vld [vmem:[%s2580_s0 + $0x20] sm:$0xff]  ;;  %v1995_v37 = vld [vmem:[%s2580_s0 + $0x28] sm:$0xff] }
   0xc   :  { %854 = vmatpush.bf16.msra.mxu1 %v2043_v11  ;;  %1319 = vmatpush.bf16.msra.mxu0 %v2070_v12  ;;  %v2020_v31 = vld [vmem:[%s2580_s0 + $0xd8] sm:$0xff]  ;;  %v2012_v34 = vld [vmem:[%s2580_s0 + $0xa0] sm:$0xff]  ;;  %v2013_v38 = vld [vmem:[%s2580_s0 + $0xa8] sm:$0xff] }
   0xd   :  { %v2029_v32 = vld [vmem:[%s2580_s0 + $0x118] sm:$0xff]  ;;  %v2021_v35 = vld [vmem:[%s2580_s0 + $0xe0] sm:$0xff]  ;;  %v2022_v39 = vld [vmem:[%s2580_s0 + $0xe8] sm:$0xff] }
   0xe   :  { %v2030_v36 = vld [vmem:[%s2580_s0 + $0x120] sm:$0xff]  ;;  %v2031_v40 = vld [vmem:[%s2580_s0 + $0x128] sm:$0xff]  ;;  %v1996_v41 = vld [vmem:[%s2580_s0 + $0x30] sm:$0xff] }
   0xf   :  { %v2014_v42 = vld [vmem:[%s2580_s0 + $0xb0] sm:$0xff]  ;;  %v1997_v53 = vld [vmem:[%s2580_s0 + $0x38] sm:$0xff]  ;;  %v2035_v1 = vld [vmem:[%s2580_s0 + $0x140] sm:$0xff] }
  0x10   :  { %v2023_v44 = vld [vmem:[%s2580_s0 + $0xf0] sm:$0xff]  ;;  %v2015_v54 = vld [vmem:[%s2580_s0 + $0xb8] sm:$0xff]  ;;  %v2044_v2 = vld [vmem:[%s2580_s0 + $0x180] sm:$0xff] }
  0x11   :  { %v2032_v45 = vld [vmem:[%s2580_s0 + $0x130] sm:$0xff]  ;;  %v2024_v56 = vld [vmem:[%s2580_s0 + $0xf8] sm:$0xff]  ;;  %v2053_v4 = vld [vmem:[%s2580_s0 + $0x1c0] sm:$0xff] }
  0x12   :  { %v2033_v57 = vld [vmem:[%s2580_s0 + $0x138] sm:$0xff]  ;;  %v2062_v5 = vld [vmem:[%s2580_s0 + $0x200] sm:$0xff] }
  0x15   :  { %1507 = vmatmul.msk.bf16.gmra.mxu1 %vm99_vm0, %v2002_v13  ;;  %1509 = vmatmul.msk.bf16.gmra.mxu2 %vm99_vm0, %v2004_v14 }
  0x16   :  { %1511 = vmatmul.msk.bf16.gmra.mxu3 %vm99_vm0, %v2006_v15 }
  0x17   :  { %1505 = vmatmul.msk.bf16.gmra.mxu0 %vm99_vm0, %v2000_v16 }
  0x25   :  { %1548 = vmatmul.msk.bf16.vlgmr.msrb.gmra.mxu1 %vm99_vm0, %v1990_v17  ;;  %1610 = vmatmul.msk.bf16.vlgmr.msrb.gmra.mxu2 %vm99_vm0, %v2008_v18 }
  0x26   :  { %1672 = vmatmul.msk.bf16.vlgmr.msrb.gmra.mxu3 %vm99_vm0, %v2017_v19  ;;  %v2036_v19 = vld [vmem:[%s2580_s0 + $0x148] sm:$0xff] }
  0x27   :  { %1734 = vmatmul.msk.bf16.vlgmr.msrb.gmra.mxu0 %vm99_vm0, %v2026_v20  ;;  %v2045_v20 = vld [vmem:[%s2580_s0 + $0x188] sm:$0xff] }
  0x35   :  { %1549 = vmatmul.msk.bf16.gmra.mxu1 %vm99_vm0, %v1991_v21  ;;  %1611 = vmatmul.msk.bf16.gmra.mxu2 %vm99_vm0, %v2009_v22  ;;  %v2054_v22 = vld [vmem:[%s2580_s0 + $0x1c8] sm:$0xff] }
  0x36   :  { %1673 = vmatmul.msk.bf16.gmra.mxu3 %vm99_vm0, %v2018_v23  ;;  %v2063_v23 = vld [vmem:[%s2580_s0 + $0x208] sm:$0xff] }
  0x37   :  { %1735 = vmatmul.msk.bf16.gmra.mxu0 %vm99_vm0, %v2027_v24 }
  0x45   :  { %1550 = vmatmul.msk.bf16.gmra.mxu1 %vm99_vm0, %v1992_v25  ;;  %1612 = vmatmul.msk.bf16.gmra.mxu2 %vm99_vm0, %v2010_v26 }
  0x46   :  { %1674 = vmatmul.msk.bf16.gmra.mxu3 %vm99_vm0, %v2019_v27 }
  0x47   :  { %1736 = vmatmul.msk.bf16.gmra.mxu0 %vm99_vm0, %v2028_v28 }
  0x55   :  { %1551 = vmatmul.msk.bf16.gmra.mxu1 %vm99_vm0, %v1993_v29  ;;  %1613 = vmatmul.msk.bf16.gmra.mxu2 %vm99_vm0, %v2011_v30 }
  0x56   :  { %1675 = vmatmul.msk.bf16.gmra.mxu3 %vm99_vm0, %v2020_v31 }
  0x57   :  { %1737 = vmatmul.msk.bf16.gmra.mxu0 %vm99_vm0, %v2029_v32 }
  0x65   :  { %1552 = vmatmul.msk.bf16.gmra.mxu1 %vm99_vm0, %v1994_v33  ;;  %1614 = vmatmul.msk.bf16.gmra.mxu2 %vm99_vm0, %v2012_v34 }
  0x66   :  { %1676 = vmatmul.msk.bf16.gmra.mxu3 %vm99_vm0, %v2021_v35 }
  0x67   :  { %1738 = vmatmul.msk.bf16.gmra.mxu0 %vm99_vm0, %v2030_v36 }
  0x75   :  { %1553 = vmatmul.msk.bf16.gmra.mxu1 %vm99_vm0, %v1995_v37  ;;  %1615 = vmatmul.msk.bf16.gmra.mxu2 %vm99_vm0, %v2013_v38 }
  0x76   :  { %1677 = vmatmul.msk.bf16.gmra.mxu3 %vm99_vm0, %v2022_v39  ;;  %v2037_v39 = vld [vmem:[%s2580_s0 + $0x150] sm:$0xff] }
  0x77   :  { %1739 = vmatmul.msk.bf16.gmra.mxu0 %vm99_vm0, %v2031_v40  ;;  %v2046_v40 = vld [vmem:[%s2580_s0 + $0x190] sm:$0xff] }
  0x82   :  { %v2256_v43 = vpop.f32.mrf.mxu1 }
  0x84   :  { %v133_v46 = vpop.f32.mrf.mxu0 }
  0x85   :  { %1554 = vmatmul.msk.bf16.gmra.mxu1 %vm99_vm0, %v1996_v41  ;;  %1616 = vmatmul.msk.bf16.gmra.mxu2 %vm99_vm0, %v2014_v42  ;;  %v2055_v42 = vld [vmem:[%s2580_s0 + $0x1d0] sm:$0xff] }
  0x86   :  { %1678 = vmatmul.msk.bf16.gmra.mxu3 %vm99_vm0, %v2023_v44  ;;  %v2064_v44 = vld [vmem:[%s2580_s0 + $0x210] sm:$0xff] }
  0x87   :  { %1740 = vmatmul.msk.bf16.gmra.mxu0 %vm99_vm0, %v2032_v45 }
  0x88   :  { %v2268_v47 = vpop.f32.mrf.mxu2 }
  0x89   :  { %v2270_v48 = vpop.f32.mrf.mxu3 }
  0x8a   :  { %v2272_v49 = vpop.f32.mrf.mxu1 }
  0x8c   :  { %v135_v50 = vpop.f32.mrf.mxu0 }
  0x90   :  { %v2274_v51 = vpop.f32.mrf.mxu2 }
  0x91   :  { %v2276_v52 = vpop.f32.mrf.mxu3 }
  0x92   :  { %v2284_v55 = vpop.f32.mrf.mxu1 }
  0x94   :  { %v138_v58 = vpop.f32.mrf.mxu0 }
  0x95   :  { %1555 = vmatmul.msk.bf16.gmra.mxu1 %vm99_vm0, %v1997_v53  ;;  %1617 = vmatmul.msk.bf16.gmra.mxu2 %vm99_vm0, %v2015_v54 }
  0x96   :  { %1679 = vmatmul.msk.bf16.gmra.mxu3 %vm99_vm0, %v2024_v56 }
  0x97   :  { %1741 = vmatmul.msk.bf16.gmra.mxu0 %vm99_vm0, %v2033_v57 }
  0x98   :  { %v2296_v59 = vpop.f32.mrf.mxu2 }
  0x99   :  { %v2298_v60 = vpop.f32.mrf.mxu3 }
  0x9a   :  { %v2300_v61 = vpop.f32.mrf.mxu1 }
  0x9c   :  { %v140_v62 = vpop.f32.mrf.mxu0 }
  0xa0   :  { %v2302_v63 = vpop.f32.mrf.mxu2 }
  0xa1   :  { %v2304_v0 = vpop.f32.mrf.mxu3 }
  0xa2   :  { %v252_v3 = vpop.f32.mrf.mxu1 }
  0xa3   :  { %v253_v6 = vadd.f32 %v252_v3, %v133_v46 }
  0xa4   :  { %v701_v7 = vpop.f32.mrf.mxu0 }
  0xa5   :  { %1796 = vmatmul.msk.bf16.vlgmr.msra.gmra.mxu1 %vm99_vm0, %v2035_v1  ;;  %1858 = vmatmul.msk.bf16.vlgmr.msra.gmra.mxu2 %vm99_vm0, %v2044_v2 }
  0xa6   :  { %1920 = vmatmul.msk.bf16.vlgmr.msra.gmra.mxu3 %vm99_vm0, %v2053_v4 }
  0xa7   :  { %1982 = vmatmul.msk.bf16.vlgmr.msra.gmra.mxu0 %vm99_vm0, %v2062_v5 }
  0xa8   :  { %v391_v8 = vpop.f32.mrf.mxu2 }
  0xa9   :  { %v431_v9 = vadd.f32 %v391_v8, %v253_v6  ;;  %v546_v10 = vpop.f32.mrf.mxu3  ;;  %v2038_v6 = vld [vmem:[%s2580_s0 + $0x158] sm:$0xff] }
  0xaa   :  { %v254_v11 = vpop.f32.mrf.mxu1 }
  0xab   :  { %v586_v12 = vadd.f32 %v546_v10, %v431_v9  ;;  %v255_v13 = vadd.f32 %v254_v11, %v135_v50  ;;  %v2056_v9 = vld [vmem:[%s2580_s0 + $0x1d8] sm:$0xff] }
  0xac   :  { %v703_v14 = vpop.f32.mrf.mxu0 }
  0xad   :  { %v2322_v15 = vadd.f32 %v701_v7, %v586_v12  ;;  %v2047_v7 = vld [vmem:[%s2580_s0 + $0x198] sm:$0xff] }
  0xb0   :  { %v393_v16 = vpop.f32.mrf.mxu2 }
  0xb1   :  { %v432_v17 = vadd.f32 %v393_v16, %v255_v13  ;;  %v548_v18 = vpop.f32.mrf.mxu3 }
  0xb2   :  { %v257_v21 = vpop.f32.mrf.mxu1 }
  0xb3   :  { %v587_v24 = vadd.f32 %v548_v18, %v432_v17  ;;  %v258_v25 = vadd.f32 %v257_v21, %v138_v58 }
  0xb4   :  { %v706_v26 = vpop.f32.mrf.mxu0 }
  0xb5   :  { %1797 = vmatmul.msk.bf16.gmra.mxu1 %vm99_vm0, %v2036_v19  ;;  %1859 = vmatmul.msk.bf16.gmra.mxu2 %vm99_vm0, %v2045_v20  ;;  %v2338_v27 = vadd.f32 %v703_v14, %v587_v24 }
  0xb6   :  { %1921 = vmatmul.msk.bf16.gmra.mxu3 %vm99_vm0, %v2054_v22 }
  0xb7   :  { %1983 = vmatmul.msk.bf16.gmra.mxu0 %vm99_vm0, %v2063_v23 }
  0xb8   :  { %v396_v28 = vpop.f32.mrf.mxu2 }
  0xb9   :  { %v433_v29 = vadd.f32 %v396_v28, %v258_v25  ;;  %v551_v30 = vpop.f32.mrf.mxu3  ;;  %v2039_v25 = vld [vmem:[%s2580_s0 + $0x160] sm:$0xff] }
  0xba   :  { %v259_v31 = vpop.f32.mrf.mxu1 }
  0xbb   :  { %v588_v32 = vadd.f32 %v551_v30, %v433_v29  ;;  %v260_v33 = vadd.f32 %v259_v31, %v140_v62  ;;  %v2057_v29 = vld [vmem:[%s2580_s0 + $0x1e0] sm:$0xff] }
  0xbc   :  { %v708_v34 = vpop.f32.mrf.mxu0 }
  0xbd   :  { %v2342_v35 = vadd.f32 %v706_v26, %v588_v32  ;;  %v2048_v26 = vld [vmem:[%s2580_s0 + $0x1a0] sm:$0xff] }
  0xc0   :  { %v398_v36 = vpop.f32.mrf.mxu2 }
  0xc1   :  { %v434_v37 = vadd.f32 %v398_v36, %v260_v33  ;;  %v553_v38 = vpop.f32.mrf.mxu3 }
  0xc2   :  { %v262_v41 = vpop.f32.mrf.mxu1 }
  0xc3   :  { %v589_v45 = vadd.f32 %v553_v38, %v434_v37  ;;  %v263_v46 = vadd.f32 %v262_v41, %v2256_v43 }
  0xc4   :  { %v711_v50 = vpop.f32.mrf.mxu0 }
  0xc5   :  { %1798 = vmatmul.msk.bf16.gmra.mxu1 %vm99_vm0, %v2037_v39  ;;  %1860 = vmatmul.msk.bf16.gmra.mxu2 %vm99_vm0, %v2046_v40  ;;  %v2359_v53 = vadd.f32 %v708_v34, %v589_v45 }
  0xc6   :  { %1922 = vmatmul.msk.bf16.gmra.mxu3 %vm99_vm0, %v2055_v42 }
  0xc7   :  { %1984 = vmatmul.msk.bf16.gmra.mxu0 %vm99_vm0, %v2064_v44 }
  0xc8   :  { %v401_v54 = vpop.f32.mrf.mxu2 }
  0xc9   :  { %v435_v56 = vadd.f32 %v401_v54, %v263_v46  ;;  %v556_v57 = vpop.f32.mrf.mxu3 }
  0xca   :  { %v264_v58 = vpop.f32.mrf.mxu1 }
  0xcb   :  { %v590_v62 = vadd.f32 %v556_v57, %v435_v56  ;;  %v265_v1 = vadd.f32 %v264_v58, %v2272_v49  ;;  %v2065_v49 = vld [vmem:[%s2580_s0 + $0x218] sm:$0xff]  ;;  %v2058_v56 = vld [vmem:[%s2580_s0 + $0x1e8] sm:$0xff] }
  0xcc   :  { %v713_v2 = vpop.f32.mrf.mxu0 }
  0xcd   :  { %v2364_v43 = vadd.f32 %v711_v50, %v590_v62  ;;  %v2040_v50 = vld [vmem:[%s2580_s0 + $0x168] sm:$0xff] }
  0xd0   :  { %v403_v3 = vpop.f32.mrf.mxu2 }
  0xd1   :  { %v436_v4 = vadd.f32 %v403_v3, %v265_v1  ;;  %v558_v5 = vpop.f32.mrf.mxu3 }
  0xd2   :  { %v267_v8 = vpop.f32.mrf.mxu1 }
  0xd3   :  { %v591_v10 = vadd.f32 %v558_v5, %v436_v4  ;;  %v268_v11 = vadd.f32 %v267_v8, %v2284_v55 }
  0xd4   :  { %v716_v12 = vpop.f32.mrf.mxu0 }
  0xd5   :  { %1799 = vmatmul.msk.bf16.gmra.mxu1 %vm99_vm0, %v2038_v6  ;;  %1861 = vmatmul.msk.bf16.gmra.mxu2 %vm99_vm0, %v2047_v7  ;;  %v2381_v13 = vadd.f32 %v713_v2, %v591_v10 }
  0xd6   :  { %1923 = vmatmul.msk.bf16.gmra.mxu3 %vm99_vm0, %v2056_v9 }
  0xd7   :  { %1985 = vmatmul.msk.bf16.gmra.mxu0 %vm99_vm0, %v2065_v49 }
  0xd8   :  { %v406_v14 = vpop.f32.mrf.mxu2 }
  0xd9   :  { %v437_v16 = vadd.f32 %v406_v14, %v268_v11  ;;  %v561_v17 = vpop.f32.mrf.mxu3 }
  0xda   :  { %v269_v18 = vpop.f32.mrf.mxu1 }
  0xdb   :  { %v592_v19 = vadd.f32 %v561_v17, %v437_v16  ;;  %v270_v20 = vadd.f32 %v269_v18, %v2300_v61  ;;  %v2066_v61 = vld [vmem:[%s2580_s0 + $0x220] sm:$0xff]  ;;  %v2059_v16 = vld [vmem:[%s2580_s0 + $0x1f0] sm:$0xff] }
  0xdc   :  { %v718_v21 = vpop.f32.mrf.mxu0 }
  0xdd   :  { %v2386_v55 = vadd.f32 %v716_v12, %v592_v19  ;;  %v2041_v12 = vld [vmem:[%s2580_s0 + $0x170] sm:$0xff] }
  0xe0   :  { %v408_v22 = vpop.f32.mrf.mxu2 }
  0xe1   :  { %v438_v23 = vadd.f32 %v408_v22, %v270_v20  ;;  %v563_v24 = vpop.f32.mrf.mxu3 }
  0xe2   :  { %v272_v28 = vpop.f32.mrf.mxu1 }
  0xe3   :  { %v593_v30 = vadd.f32 %v563_v24, %v438_v23  ;;  %v273_v33 = vadd.f32 %v272_v28, %v2268_v47  ;;  %v2049_v47 = vld [vmem:[%s2580_s0 + $0x1a8] sm:$0xff] }
  0xe4   :  { %v721_v31 = vpop.f32.mrf.mxu0 }
  0xe5   :  { %1800 = vmatmul.msk.bf16.gmra.mxu1 %vm99_vm0, %v2039_v25  ;;  %1862 = vmatmul.msk.bf16.gmra.mxu2 %vm99_vm0, %v2048_v26  ;;  %v2402_v32 = vadd.f32 %v718_v21, %v593_v30 }
  0xe6   :  { %1924 = vmatmul.msk.bf16.gmra.mxu3 %vm99_vm0, %v2057_v29 }
  0xe7   :  { %1986 = vmatmul.msk.bf16.gmra.mxu0 %vm99_vm0, %v2066_v61 }
  0xe8   :  { %v411_v34 = vpop.f32.mrf.mxu2 }
  0xe9   :  { %v439_v36 = vadd.f32 %v411_v34, %v273_v33  ;;  %v566_v37 = vpop.f32.mrf.mxu3  ;;  %v2042_v33 = vld [vmem:[%s2580_s0 + $0x178] sm:$0xff] }
  0xea   :  { %v274_v38 = vpop.f32.mrf.mxu1 }
  0xeb   :  { %v594_v39 = vadd.f32 %v566_v37, %v439_v36  ;;  %v275_v42 = vadd.f32 %v274_v38, %v2274_v51  ;;  %v2067_v51 = vld [vmem:[%s2580_s0 + $0x228] sm:$0xff]  ;;  %v2060_v36 = vld [vmem:[%s2580_s0 + $0x1f8] sm:$0xff] }
  0xec   :  { %v723_v40 = vpop.f32.mrf.mxu0 }
  0xed   :  { %v2407_v41 = vadd.f32 %v721_v31, %v594_v39 }
  0xf0   :  { %v413_v44 = vpop.f32.mrf.mxu2 }
  0xf1   :  { %v440_v45 = vadd.f32 %v413_v44, %v275_v42  ;;  %v568_v46 = vpop.f32.mrf.mxu3 }
  0xf2   :  { %v277_v54 = vpop.f32.mrf.mxu1 }
  0xf3   :  { %v595_v57 = vadd.f32 %v568_v46, %v440_v45  ;;  %v278_v1 = vadd.f32 %v277_v54, %v2296_v59  ;;  %v2050_v59 = vld [vmem:[%s2580_s0 + $0x1b0] sm:$0xff] }
  0xf4   :  { %v726_v58 = vpop.f32.mrf.mxu0 }
  0xf5   :  { %1801 = vmatmul.msk.bf16.gmra.mxu1 %vm99_vm0, %v2040_v50  ;;  %1863 = vmatmul.msk.bf16.gmra.mxu2 %vm99_vm0, %v2049_v47  ;;  %v2424_v62 = vadd.f32 %v723_v40, %v595_v57 }
  0xf6   :  { %1925 = vmatmul.msk.bf16.gmra.mxu3 %vm99_vm0, %v2058_v56 }
  0xf7   :  { %1987 = vmatmul.msk.bf16.gmra.mxu0 %vm99_vm0, %v2067_v51 }
  0xf8   :  { %v416_v2 = vpop.f32.mrf.mxu2 }
  0xf9   :  { %v441_v3 = vadd.f32 %v416_v2, %v278_v1  ;;  %v571_v4 = vpop.f32.mrf.mxu3 }
  0xfa   :  { %v279_v5 = vpop.f32.mrf.mxu1 }
  0xfb   :  { %v596_v6 = vadd.f32 %v571_v4, %v441_v3  ;;  %v280_v9 = vadd.f32 %v279_v5, %v2302_v63  ;;  %v2068_v63 = vld [vmem:[%s2580_s0 + $0x230] sm:$0xff] }
  0xfc   :  { %v728_v7 = vpop.f32.mrf.mxu0 }
  0xfd   :  { %v2429_v8 = vadd.f32 %v726_v58, %v596_v6 }
 0x100   :  { %v418_v49 = vpop.f32.mrf.mxu2 }
 0x101   :  { %v442_v10 = vadd.f32 %v418_v49, %v280_v9  ;;  %v573_v11 = vpop.f32.mrf.mxu3 }
 0x102   :  { %v282_v14 = vpop.f32.mrf.mxu1 }
 0x103   :  { %v597_v17 = vadd.f32 %v573_v11, %v442_v10  ;;  %v283_v20 = vadd.f32 %v282_v14, %v2270_v48  ;;  %v2051_v48 = vld [vmem:[%s2580_s0 + $0x1b8] sm:$0xff]  ;;  %v2482_v10 = vld [vmem:[%s2581_s2] ss:$0 sm:$0xff] }
 0x104   :  { %v731_v18 = vpop.f32.mrf.mxu0 }
 0x105   :  { %1802 = vmatmul.msk.bf16.gmra.mxu1 %vm99_vm0, %v2041_v12  ;;  %1864 = vmatmul.msk.bf16.gmra.mxu2 %vm99_vm0, %v2050_v59  ;;  %v2446_v19 = vadd.f32 %v728_v7, %v597_v17 }
 0x106   :  { %1926 = vmatmul.msk.bf16.gmra.mxu3 %vm99_vm0, %v2059_v16 }
 0x107   :  { %1988 = vmatmul.msk.bf16.gmra.mxu0 %vm99_vm0, %v2068_v63 }
 0x108   :  { %v421_v21 = vpop.f32.mrf.mxu2 }
 0x109   :  { %v443_v22 = vadd.f32 %v421_v21, %v283_v20  ;;  %v576_v23 = vpop.f32.mrf.mxu3 }
 0x10a   :  { %v284_v24 = vpop.f32.mrf.mxu1 }
 0x10b   :  { %v598_v25 = vadd.f32 %v576_v23, %v443_v22  ;;  %v285_v29 = vadd.f32 %v284_v24, %v2276_v52  ;;  %v2069_v52 = vld [vmem:[%s2580_s0 + $0x238] sm:$0xff] }
 0x10c   :  { %v733_v26 = vpop.f32.mrf.mxu0 }
 0x10d   :  { %v2451_v28 = vadd.f32 %v731_v18, %v598_v25 }
 0x110   :  { %v423_v61 = vpop.f32.mrf.mxu2 }
 0x111   :  { %v444_v30 = vadd.f32 %v423_v61, %v285_v29  ;;  %v578_v31 = vpop.f32.mrf.mxu3 }
 0x112   :  { %v287_v34 = vpop.f32.mrf.mxu1 }
 0x113   :  { %v599_v37 = vadd.f32 %v578_v31, %v444_v30  ;;  %v288_v40 = vadd.f32 %v287_v34, %v2298_v60 }
 0x114   :  { %v736_v38 = vpop.f32.mrf.mxu0 }
 0x115   :  { %1803 = vmatmul.msk.bf16.gmra.mxu1 %vm99_vm0, %v2042_v33  ;;  %1865 = vmatmul.msk.bf16.gmra.mxu2 %vm99_vm0, %v2051_v48  ;;  %v2468_v39 = vadd.f32 %v733_v26, %v599_v37 }
 0x116   :  { %1927 = vmatmul.msk.bf16.gmra.mxu3 %vm99_vm0, %v2060_v36 }
 0x117   :  { %1989 = vmatmul.msk.bf16.gmra.mxu0 %vm99_vm0, %v2069_v52 }
 0x118   :  { %v426_v42 = vpop.f32.mrf.mxu2 }
 0x119   :  { %v445_v44 = vadd.f32 %v426_v42, %v288_v40  ;;  %v581_v45 = vpop.f32.mrf.mxu3 }
 0x11a   :  { %v289_v46 = vpop.f32.mrf.mxu1 }
 0x11b   :  { %v600_v50 = vadd.f32 %v581_v45, %v445_v44  ;;  %v290_v56 = vadd.f32 %v289_v46, %v2304_v0 }
 0x11c   :  { %v738_v47 = vpop.f32.mrf.mxu0 }
 0x11d   :  { %v2473_v54 = vadd.f32 %v736_v38, %v600_v50 }
 0x120   :  { %v428_v51 = vpop.f32.mrf.mxu2 }
 0x121   :  { %v446_v57 = vadd.f32 %v428_v51, %v290_v56  ;;  %v583_v58 = vpop.f32.mrf.mxu3 }
 0x122   :  { %v856_v1 = vpop.f32.mrf.mxu1 }
 0x123   :  { %v601_v2 = vadd.f32 %v583_v58, %v446_v57  ;;  %v896_v60 = vadd.f32 %v856_v1, %v2322_v15 }
 0x124   :  { %v1321_v3 = vpop.f32.mrf.mxu0 }
 0x125   :  { %v2476_v4 = vadd.f32 %v738_v47, %v601_v2 }
 0x128   :  { %v1011_v5 = vpop.f32.mrf.mxu2 }
 0x129   :  { %v1051_v6 = vadd.f32 %v1011_v5, %v896_v60  ;;  %v1166_v7 = vpop.f32.mrf.mxu3 }
 0x12a   :  { %v858_v9 = vpop.f32.mrf.mxu1 }
 0x12b   :  { %v1206_v49 = vadd.f32 %v1166_v7, %v1051_v6  ;;  %v897_v59 = vadd.f32 %v858_v9, %v2338_v27 }
 0x12c   :  { %v1323_v0 = vpop.f32.mrf.mxu0 }
 0x12d   :  { %v1361_v11 = vadd.f32 %v1321_v3, %v1206_v49 }
 0x12f   :  { %v1381_v12 = vadd.f32 %v2482_v10, %v1361_v11 }
 0x130   :  { %v1013_v14 = vpop.f32.mrf.mxu2 }
 0x131   :  { %v1397_v16 = vmax.f32 %v1381_v12, 0.0  ;;  %v1052_v63 = vadd.f32 %v1013_v14, %v897_v59  ;;  %v1168_v15 = vpop.f32.mrf.mxu3 }
 0x132   :  { %v861_v17 = vpop.f32.mrf.mxu1 }
 0x133   :  { %v1413_v18 = vpack.c.bf16 %v1397_v16, %v1397_v16  ;;  %v1207_v20 = vadd.f32 %v1168_v15, %v1052_v63  ;;  %v898_v24 = vadd.f32 %v861_v17, %v2342_v35 }
 0x134   :  { %v1326_v21 = vpop.f32.mrf.mxu0 }
 0x135   :  { %1430 = vst.msk [vmem:[%s2582_s3] sm:$0xf] %vm1429_vm1, %v1413_v18  ;;  %v1362_v22 = vadd.f32 %v1323_v0, %v1207_v20 }
 0x137   :  { %v1382_v23 = vadd.f32 %v2482_v10, %v1362_v22 }
 0x138   :  { %v1016_v27 = vpop.f32.mrf.mxu2 }
 0x139   :  { %v1398_v25 = vmax.f32 %v1382_v23, 0.0  ;;  %v1053_v26 = vadd.f32 %v1016_v27, %v898_v24  ;;  %v1171_v29 = vpop.f32.mrf.mxu3 }
 0x13a   :  { %v863_v61 = vpop.f32.mrf.mxu1 }
 0x13b   :  { %v1414_v30 = vpack.c.bf16 %v1398_v25, %v1398_v25  ;;  %v1208_v31 = vadd.f32 %v1171_v29, %v1053_v26  ;;  %v899_v36 = vadd.f32 %v863_v61, %v2359_v53 }
 0x13c   :  { %v1328_v33 = vpop.f32.mrf.mxu0 }
 0x13d   :  { %1431 = vst.msk [vmem:[%s2582_s3 + $0x4] sm:$0xf] %vm1429_vm1, %v1414_v30  ;;  %v1363_v48 = vadd.f32 %v1326_v21, %v1208_v31 }
 0x13f   :  { %v1383_v34 = vadd.f32 %v2482_v10, %v1363_v48 }
 0x140   :  { %v1018_v52 = vpop.f32.mrf.mxu2 }
 0x141   :  { %v1399_v35 = vmax.f32 %v1383_v34, 0.0  ;;  %v1054_v37 = vadd.f32 %v1018_v52, %v899_v36  ;;  %v1173_v38 = vpop.f32.mrf.mxu3 }
 0x142   :  { %v866_v40 = vpop.f32.mrf.mxu1 }
 0x143   :  { %v1415_v42 = vpack.c.bf16 %v1399_v35, %v1399_v35  ;;  %v1209_v44 = vadd.f32 %v1173_v38, %v1054_v37  ;;  %v900_v47 = vadd.f32 %v866_v40, %v2364_v43 }
 0x144   :  { %v1331_v45 = vpop.f32.mrf.mxu0 }
 0x145   :  { %1432 = vst.msk [vmem:[%s2582_s3 + $0x8] sm:$0xf] %vm1429_vm1, %v1415_v42  ;;  %v1364_v46 = vadd.f32 %v1328_v33, %v1209_v44 }
 0x147   :  { %v1384_v50 = vadd.f32 %v2482_v10, %v1364_v46 }
 0x148   :  { %v1021_v56 = vpop.f32.mrf.mxu2 }
 0x149   :  { %v1400_v53 = vmax.f32 %v1384_v50, 0.0  ;;  %v1055_v51 = vadd.f32 %v1021_v56, %v900_v47  ;;  %v1176_v57 = vpop.f32.mrf.mxu3 }
 0x14a   :  { %v868_v58 = vpop.f32.mrf.mxu1 }
 0x14b   :  { %v1416_v1 = vpack.c.bf16 %v1400_v53, %v1400_v53  ;;  %v1210_v2 = vadd.f32 %v1176_v57, %v1055_v51  ;;  %v901_v6 = vadd.f32 %v868_v58, %v2381_v13 }
 0x14c   :  { %v1333_v3 = vpop.f32.mrf.mxu0 }
 0x14d   :  { %1433 = vst.msk [vmem:[%s2582_s3 + $0xc] sm:$0xf] %vm1429_vm1, %v1416_v1  ;;  %v1365_v60 = vadd.f32 %v1331_v45, %v1210_v2 }
 0x14f   :  { %v1385_v5 = vadd.f32 %v2482_v10, %v1365_v60 }
 0x150   :  { %v1023_v7 = vpop.f32.mrf.mxu2 }
 0x151   :  { %v1401_v43 = vmax.f32 %v1385_v5, 0.0  ;;  %v1056_v9 = vadd.f32 %v1023_v7, %v901_v6  ;;  %v1178_v49 = vpop.f32.mrf.mxu3 }
 0x152   :  { %v871_v0 = vpop.f32.mrf.mxu1 }
 0x153   :  { %v1417_v11 = vpack.c.bf16 %v1401_v43, %v1401_v43  ;;  %v1211_v12 = vadd.f32 %v1178_v49, %v1056_v9  ;;  %v902_v63 = vadd.f32 %v871_v0, %v2386_v55 }
 0x154   :  { %v1336_v59 = vpop.f32.mrf.mxu0 }
 0x155   :  { %1434 = vst.msk [vmem:[%s2582_s3 + $0x10] sm:$0xf] %vm1429_vm1, %v1417_v11  ;;  %v1366_v14 = vadd.f32 %v1333_v3, %v1211_v12 }
 0x157   :  { %v1386_v16 = vadd.f32 %v2482_v10, %v1366_v14 }
 0x158   :  { %v1026_v15 = vpop.f32.mrf.mxu2 }
 0x159   :  { %v1402_v13 = vmax.f32 %v1386_v16, 0.0  ;;  %v1057_v17 = vadd.f32 %v1026_v15, %v902_v63  ;;  %v1181_v18 = vpop.f32.mrf.mxu3 }
 0x15a   :  { %v873_v20 = vpop.f32.mrf.mxu1 }
 0x15b   :  { %v1418_v21 = vpack.c.bf16 %v1402_v13, %v1402_v13  ;;  %v1212_v22 = vadd.f32 %v1181_v18, %v1057_v17  ;;  %v903_v25 = vadd.f32 %v873_v20, %v2402_v32 }
 0x15c   :  { %v1338_v23 = vpop.f32.mrf.mxu0 }
 0x15d   :  { %1435 = vst.msk [vmem:[%s2582_s3 + $0x14] sm:$0xf] %vm1429_vm1, %v1418_v21  ;;  %v1367_v24 = vadd.f32 %v1336_v59, %v1212_v22 }
 0x15f   :  { %v1387_v27 = vadd.f32 %v2482_v10, %v1367_v24 }
 0x160   :  { %v1028_v26 = vpop.f32.mrf.mxu2 }
 0x161   :  { %v1403_v55 = vmax.f32 %v1387_v27, 0.0  ;;  %v1058_v29 = vadd.f32 %v1028_v26, %v903_v25  ;;  %v1183_v61 = vpop.f32.mrf.mxu3 }
 0x162   :  { %v876_v30 = vpop.f32.mrf.mxu1 }
 0x163   :  { %v1419_v31 = vpack.c.bf16 %v1403_v55, %v1403_v55  ;;  %v1213_v33 = vadd.f32 %v1183_v61, %v1058_v29  ;;  %v904_v52 = vadd.f32 %v876_v30, %v2407_v41 }
 0x164   :  { %v1341_v48 = vpop.f32.mrf.mxu0 }
 0x165   :  { %1436 = vst.msk [vmem:[%s2582_s3 + $0x18] sm:$0xf] %vm1429_vm1, %v1419_v31  ;;  %v1368_v34 = vadd.f32 %v1338_v23, %v1213_v33 }
 0x167   :  { %v1388_v36 = vadd.f32 %v2482_v10, %v1368_v34 }
 0x168   :  { %v1031_v35 = vpop.f32.mrf.mxu2 }
 0x169   :  { %v1404_v32 = vmax.f32 %v1388_v36, 0.0  ;;  %v1059_v37 = vadd.f32 %v1031_v35, %v904_v52  ;;  %v1186_v38 = vpop.f32.mrf.mxu3 }
 0x16a   :  { %v878_v40 = vpop.f32.mrf.mxu1 }
 0x16b   :  { %v1420_v42 = vpack.c.bf16 %v1404_v32, %v1404_v32  ;;  %v1214_v44 = vadd.f32 %v1186_v38, %v1059_v37  ;;  %v905_v47 = vadd.f32 %v878_v40, %v2424_v62 }
 0x16c   :  { %v1343_v45 = vpop.f32.mrf.mxu0 }
 0x16d   :  { %1437 = vst.msk [vmem:[%s2582_s3 + $0x1c] sm:$0xf] %vm1429_vm1, %v1420_v42  ;;  %v1369_v46 = vadd.f32 %v1341_v48, %v1214_v44 }
 0x16f   :  { %v1389_v50 = vadd.f32 %v2482_v10, %v1369_v46 }
 0x170   :  { %v1033_v56 = vpop.f32.mrf.mxu2 }
 0x171   :  { %v1405_v41 = vmax.f32 %v1389_v50, 0.0  ;;  %v1060_v53 = vadd.f32 %v1033_v56, %v905_v47  ;;  %v1188_v51 = vpop.f32.mrf.mxu3 }
 0x172   :  { %v881_v57 = vpop.f32.mrf.mxu1 }
 0x173   :  { %v1421_v58 = vpack.c.bf16 %v1405_v41, %v1405_v41  ;;  %v1215_v1 = vadd.f32 %v1188_v51, %v1060_v53  ;;  %v906_v5 = vadd.f32 %v881_v57, %v2429_v8 }
 0x174   :  { %v1346_v2 = vpop.f32.mrf.mxu0 }
 0x175   :  { %1438 = vst.msk [vmem:[%s2582_s3 + $0x20] sm:$0xf] %vm1429_vm1, %v1421_v58  ;;  %v1370_v3 = vadd.f32 %v1343_v45, %v1215_v1 }
 0x177   :  { %v1390_v60 = vadd.f32 %v2482_v10, %v1370_v3 }
 0x178   :  { %v1036_v6 = vpop.f32.mrf.mxu2 }
 0x179   :  { %v1406_v62 = vmax.f32 %v1390_v60, 0.0  ;;  %v1061_v7 = vadd.f32 %v1036_v6, %v906_v5  ;;  %v1191_v43 = vpop.f32.mrf.mxu3 }
 0x17a   :  { %v883_v9 = vpop.f32.mrf.mxu1 }
 0x17b   :  { %v1422_v49 = vpack.c.bf16 %v1406_v62, %v1406_v62  ;;  %v1216_v0 = vadd.f32 %v1191_v43, %v1061_v7  ;;  %v907_v14 = vadd.f32 %v883_v9, %v2446_v19 }
 0x17c   :  { %v1348_v11 = vpop.f32.mrf.mxu0 }
 0x17d   :  { %1439 = vst.msk [vmem:[%s2582_s3 + $0x24] sm:$0xf] %vm1429_vm1, %v1422_v49  ;;  %v1371_v12 = vadd.f32 %v1346_v2, %v1216_v0 }
 0x17f   :  { %v1391_v59 = vadd.f32 %v2482_v10, %v1371_v12 }
 0x180   :  { %v1038_v16 = vpop.f32.mrf.mxu2 }
 0x181   :  { %v1407_v8 = vmax.f32 %v1391_v59, 0.0  ;;  %v1062_v63 = vadd.f32 %v1038_v16, %v907_v14  ;;  %v1193_v15 = vpop.f32.mrf.mxu3 }
 0x182   :  { %v886_v13 = vpop.f32.mrf.mxu1 }
 0x183   :  { %v1423_v17 = vpack.c.bf16 %v1407_v8, %v1407_v8  ;;  %v1217_v18 = vadd.f32 %v1193_v15, %v1062_v63  ;;  %v908_v23 = vadd.f32 %v886_v13, %v2451_v28 }
 0x184   :  { %v1351_v21 = vpop.f32.mrf.mxu0 }
 0x185   :  { %1440 = vst.msk [vmem:[%s2582_s3 + $0x28] sm:$0xf] %vm1429_vm1, %v1423_v17  ;;  %v1372_v20 = vadd.f32 %v1348_v11, %v1217_v18 }
 0x187   :  { %v1392_v22 = vadd.f32 %v2482_v10, %v1372_v20 }
 0x188   :  { %v1041_v24 = vpop.f32.mrf.mxu2 }
 0x189   :  { %v1408_v19 = vmax.f32 %v1392_v22, 0.0  ;;  %v1063_v27 = vadd.f32 %v1041_v24, %v908_v23  ;;  %v1196_v25 = vpop.f32.mrf.mxu3 }
 0x18a   :  { %v888_v26 = vpop.f32.mrf.mxu1 }
 0x18b   :  { %v1424_v55 = vpack.c.bf16 %v1408_v19, %v1408_v19  ;;  %v1218_v29 = vadd.f32 %v1196_v25, %v1063_v27  ;;  %v909_v31 = vadd.f32 %v888_v26, %v2468_v39 }
 0x18c   :  { %v1353_v33 = vpop.f32.mrf.mxu0 }
 0x18d   :  { %1441 = vst.msk [vmem:[%s2582_s3 + $0x2c] sm:$0xf] %vm1429_vm1, %v1424_v55  ;;  %v1373_v61 = vadd.f32 %v1351_v21, %v1218_v29 }
 0x18f   :  { %v1393_v30 = vadd.f32 %v2482_v10, %v1373_v61 }
 0x190   :  { %v1043_v48 = vpop.f32.mrf.mxu2 }
 0x191   :  { %v1409_v28 = vmax.f32 %v1393_v30, 0.0  ;;  %v1064_v34 = vadd.f32 %v1043_v48, %v909_v31  ;;  %v1198_v36 = vpop.f32.mrf.mxu3 }
 0x192   :  { %v891_v52 = vpop.f32.mrf.mxu1 }
 0x193   :  { %v1425_v35 = vpack.c.bf16 %v1409_v28, %v1409_v28  ;;  %v1219_v32 = vadd.f32 %v1198_v36, %v1064_v34  ;;  %v910_v40 = vadd.f32 %v891_v52, %v2473_v54 }
 0x194   :  { %v1356_v46 = vpop.f32.mrf.mxu0 }
 0x195   :  { %1442 = vst.msk [vmem:[%s2582_s3 + $0x30] sm:$0xf] %vm1429_vm1, %v1425_v35  ;;  %v1374_v37 = vadd.f32 %v1353_v33, %v1219_v32 }
 0x197   :  { %v1394_v38 = vadd.f32 %v2482_v10, %v1374_v37 }
 0x198   :  { %v1046_v42 = vpop.f32.mrf.mxu2 }
 0x199   :  { %v1410_v39 = vmax.f32 %v1394_v38, 0.0  ;;  %v1065_v44 = vadd.f32 %v1046_v42, %v910_v40  ;;  %v1201_v45 = vpop.f32.mrf.mxu3 }
 0x19a   :  { %v893_v56 = vpop.f32.mrf.mxu1 }
 0x19b   :  { %v1426_v50 = vpack.c.bf16 %v1410_v39, %v1410_v39  ;;  %v1220_v47 = vadd.f32 %v1201_v45, %v1065_v44  ;;  %v911_v51 = vadd.f32 %v893_v56, %v2476_v4 }
 0x19c   :  { %v1358_v60 = vpop.f32.mrf.mxu0 }
 0x19d   :  { %1443 = vst.msk [vmem:[%s2582_s3 + $0x34] sm:$0xf] %vm1429_vm1, %v1426_v50  ;;  %v1375_v41 = vadd.f32 %v1356_v46, %v1220_v47 }
 0x19f   :  { %v1395_v53 = vadd.f32 %v2482_v10, %v1375_v41 }
 0x1a0   :  { %v1048_v57 = vpop.f32.mrf.mxu2 }
 0x1a1   :  { %v1411_v54 = vmax.f32 %v1395_v53, 0.0  ;;  %v1066_v58 = vadd.f32 %v1048_v57, %v911_v51  ;;  %v1203_v1 = vpop.f32.mrf.mxu3 }
 0x1a3   :  { %v1427_v2 = vpack.c.bf16 %v1411_v54, %v1411_v54  ;;  %v1221_v3 = vadd.f32 %v1203_v1, %v1066_v58 }
 0x1a5   :  { %1444 = vst.msk [vmem:[%s2582_s3 + $0x38] sm:$0xf] %vm1429_vm1, %v1427_v2  ;;  %v1376_v5 = vadd.f32 %v1358_v60, %v1221_v3 }
 0x1a7   :  { %v1396_v6 = vadd.f32 %v2482_v10, %v1376_v5 }
 0x1a9   :  { %v1412_v62 = vmax.f32 %v1396_v6, 0.0 }
 0x1ab   :  { %v1428_v7 = vpack.c.bf16 %v1412_v62, %v1412_v62 }
 0x1ad   :  { %1445 = vst.msk [vmem:[%s2582_s3 + $0x3c] sm:$0xf] %vm1429_vm1, %v1428_v7 }

// kernel: resnet_forward.24
= control target key start
LH: loop header
LB: loop body
LE: loop exit
PB: predicated region body
PF: predicated region fallthrough
CT: control target
= control target key end

     0   :  { %vm102_vm0 = vcmask 130048   ;;  %vm1480_vm1 = vcmask 125952   ;;  %s2698_s1 = inlined_call_operand.vmem [shape: bf16[9,16,16], index: 1, kind: input, shape index: {}]   ;;  %s2699_s0 = inlined_call_operand.vmem [shape: bf16[9,128,16], index: 0, kind: input, shape index: {}]   ;;  %s2700_s2 = inlined_call_operand.vmem [shape: f32[1,16], index: 2, kind: input, shape index: {}]   ;;  %s2701_s3 = inlined_call_operand.vmem [shape: bf16[128,16], index: 3, kind: input, shape index: {}]   ;;  %s2702_s4 = inlined_call_operand.vmem [shape: bf16[128,16], index: 4, kind: output, shape index: {}]  }
   0x1   :  { %v2058_v0 = vld [vmem:[%s2698_s1 + $0x8] sm:$0xff]  ;;  %v2052_v1 = vld [vmem:[%s2699_s0 + $0x50] sm:$0xff]  ;;  %v2054_v2 = vld [vmem:[%s2699_s0 + $0x60] sm:$0xff] }
   0x2   :  { %v2067_v3 = vld [vmem:[%s2698_s1 + $0x10] sm:$0xff]  ;;  %2161 = vmatpush.bf16.msra.mxu1 %v2058_v0  ;;  %2162 = vmatpush.bf16.msra.mxu2 %v2058_v0  ;;  %v2050_v5 = vld [vmem:[%s2699_s0 + $0x40] sm:$0xff]  ;;  %v2076_v6 = vld [vmem:[%s2698_s1 + $0x18] sm:$0xff] }
   0x3   :  { %v2056_v4 = vld [vmem:[%s2699_s0 + $0x70] sm:$0xff]  ;;  %2163 = vmatpush.bf16.msra.mxu3 %v2058_v0  ;;  %134 = vmatpush.bf16.msra.mxu0 %v2058_v0  ;;  %v2049_v7 = vld [vmem:[%s2698_s1] sm:$0xff]  ;;  %v2112_v10 = vld [vmem:[%s2698_s1 + $0x38] sm:$0xff] }
   0x4   :  { %v2085_v8 = vld [vmem:[%s2698_s1 + $0x20] sm:$0xff]  ;;  %v2103_v9 = vld [vmem:[%s2698_s1 + $0x30] sm:$0xff]  ;;  %v2094_v11 = vld [vmem:[%s2698_s1 + $0x28] sm:$0xff] }
   0x5   :  { %1557 = vmatmul.msk.bf16.vlgmr.msra.gmra.mxu1 %vm102_vm0, %v2052_v1  ;;  %1559 = vmatmul.msk.bf16.vlgmr.msra.gmra.mxu2 %vm102_vm0, %v2054_v2  ;;  %v2121_v12 = vld [vmem:[%s2698_s1 + $0x40] sm:$0xff]  ;;  %v2053_v13 = vld [vmem:[%s2699_s0 + $0x58] sm:$0xff]  ;;  %v2055_v14 = vld [vmem:[%s2699_s0 + $0x68] sm:$0xff] }
   0x6   :  { %392 = vmatpush.bf16.msrb.mxu2 %v2067_v3  ;;  %1561 = vmatmul.msk.bf16.vlgmr.msra.gmra.mxu3 %vm102_vm0, %v2056_v4  ;;  %v2057_v15 = vld [vmem:[%s2699_s0 + $0x78] sm:$0xff]  ;;  %v2051_v16 = vld [vmem:[%s2699_s0 + $0x48] sm:$0xff]  ;;  %v2041_v17 = vld [vmem:[%s2699_s0] sm:$0xff] }
   0x7   :  { %547 = vmatpush.bf16.msrb.mxu3 %v2076_v6  ;;  %1555 = vmatmul.msk.bf16.vlgmr.msra.gmra.mxu0 %vm102_vm0, %v2050_v5  ;;  %v2059_v18 = vld [vmem:[%s2699_s0 + $0x80] sm:$0xff]  ;;  %v2042_v21 = vld [vmem:[%s2699_s0 + $0x8] sm:$0xff]  ;;  %v2043_v25 = vld [vmem:[%s2699_s0 + $0x10] sm:$0xff] }
   0x8   :  { %253 = vmatpush.bf16.msrb.mxu1 %v2049_v7  ;;  %702 = vmatpush.bf16.msrb.mxu0 %v2085_v8  ;;  %v2068_v19 = vld [vmem:[%s2699_s0 + $0xc0] sm:$0xff]  ;;  %v2060_v22 = vld [vmem:[%s2699_s0 + $0x88] sm:$0xff]  ;;  %v2061_v26 = vld [vmem:[%s2699_s0 + $0x90] sm:$0xff] }
   0x9   :  { %v2077_v20 = vld [vmem:[%s2699_s0 + $0x100] sm:$0xff]  ;;  %v2069_v23 = vld [vmem:[%s2699_s0 + $0xc8] sm:$0xff]  ;;  %v2070_v27 = vld [vmem:[%s2699_s0 + $0xd0] sm:$0xff] }
   0xa   :  { %1012 = vmatpush.bf16.msra.mxu2 %v2103_v9  ;;  %v2078_v24 = vld [vmem:[%s2699_s0 + $0x108] sm:$0xff]  ;;  %v2079_v28 = vld [vmem:[%s2699_s0 + $0x110] sm:$0xff]  ;;  %v2044_v29 = vld [vmem:[%s2699_s0 + $0x18] sm:$0xff] }
   0xb   :  { %1167 = vmatpush.bf16.msra.mxu3 %v2112_v10  ;;  %v2062_v30 = vld [vmem:[%s2699_s0 + $0x98] sm:$0xff]  ;;  %v2045_v33 = vld [vmem:[%s2699_s0 + $0x20] sm:$0xff]  ;;  %v2046_v37 = vld [vmem:[%s2699_s0 + $0x28] sm:$0xff] }
   0xc   :  { %857 = vmatpush.bf16.msra.mxu1 %v2094_v11  ;;  %1322 = vmatpush.bf16.msra.mxu0 %v2121_v12  ;;  %v2071_v31 = vld [vmem:[%s2699_s0 + $0xd8] sm:$0xff]  ;;  %v2063_v34 = vld [vmem:[%s2699_s0 + $0xa0] sm:$0xff]  ;;  %v2064_v38 = vld [vmem:[%s2699_s0 + $0xa8] sm:$0xff] }
   0xd   :  { %v2080_v32 = vld [vmem:[%s2699_s0 + $0x118] sm:$0xff]  ;;  %v2072_v35 = vld [vmem:[%s2699_s0 + $0xe0] sm:$0xff]  ;;  %v2073_v39 = vld [vmem:[%s2699_s0 + $0xe8] sm:$0xff] }
   0xe   :  { %v2081_v36 = vld [vmem:[%s2699_s0 + $0x120] sm:$0xff]  ;;  %v2082_v40 = vld [vmem:[%s2699_s0 + $0x128] sm:$0xff]  ;;  %v2047_v41 = vld [vmem:[%s2699_s0 + $0x30] sm:$0xff] }
   0xf   :  { %v2065_v42 = vld [vmem:[%s2699_s0 + $0xb0] sm:$0xff]  ;;  %v2048_v53 = vld [vmem:[%s2699_s0 + $0x38] sm:$0xff]  ;;  %v2086_v1 = vld [vmem:[%s2699_s0 + $0x140] sm:$0xff] }
  0x10   :  { %v2074_v44 = vld [vmem:[%s2699_s0 + $0xf0] sm:$0xff]  ;;  %v2066_v54 = vld [vmem:[%s2699_s0 + $0xb8] sm:$0xff]  ;;  %v2095_v2 = vld [vmem:[%s2699_s0 + $0x180] sm:$0xff] }
  0x11   :  { %v2083_v45 = vld [vmem:[%s2699_s0 + $0x130] sm:$0xff]  ;;  %v2075_v56 = vld [vmem:[%s2699_s0 + $0xf8] sm:$0xff]  ;;  %v2104_v4 = vld [vmem:[%s2699_s0 + $0x1c0] sm:$0xff] }
  0x12   :  { %v2084_v57 = vld [vmem:[%s2699_s0 + $0x138] sm:$0xff]  ;;  %v2113_v5 = vld [vmem:[%s2699_s0 + $0x200] sm:$0xff] }
  0x15   :  { %1558 = vmatmul.msk.bf16.gmra.mxu1 %vm102_vm0, %v2053_v13  ;;  %1560 = vmatmul.msk.bf16.gmra.mxu2 %vm102_vm0, %v2055_v14 }
  0x16   :  { %1562 = vmatmul.msk.bf16.gmra.mxu3 %vm102_vm0, %v2057_v15 }
  0x17   :  { %1556 = vmatmul.msk.bf16.gmra.mxu0 %vm102_vm0, %v2051_v16 }
  0x25   :  { %1599 = vmatmul.msk.bf16.vlgmr.msrb.gmra.mxu1 %vm102_vm0, %v2041_v17  ;;  %1661 = vmatmul.msk.bf16.vlgmr.msrb.gmra.mxu2 %vm102_vm0, %v2059_v18 }
  0x26   :  { %1723 = vmatmul.msk.bf16.vlgmr.msrb.gmra.mxu3 %vm102_vm0, %v2068_v19  ;;  %v2087_v19 = vld [vmem:[%s2699_s0 + $0x148] sm:$0xff] }
  0x27   :  { %1785 = vmatmul.msk.bf16.vlgmr.msrb.gmra.mxu0 %vm102_vm0, %v2077_v20  ;;  %v2096_v20 = vld [vmem:[%s2699_s0 + $0x188] sm:$0xff] }
  0x35   :  { %1600 = vmatmul.msk.bf16.gmra.mxu1 %vm102_vm0, %v2042_v21  ;;  %1662 = vmatmul.msk.bf16.gmra.mxu2 %vm102_vm0, %v2060_v22  ;;  %v2105_v22 = vld [vmem:[%s2699_s0 + $0x1c8] sm:$0xff] }
  0x36   :  { %1724 = vmatmul.msk.bf16.gmra.mxu3 %vm102_vm0, %v2069_v23  ;;  %v2114_v23 = vld [vmem:[%s2699_s0 + $0x208] sm:$0xff] }
  0x37   :  { %1786 = vmatmul.msk.bf16.gmra.mxu0 %vm102_vm0, %v2078_v24 }
  0x45   :  { %1601 = vmatmul.msk.bf16.gmra.mxu1 %vm102_vm0, %v2043_v25  ;;  %1663 = vmatmul.msk.bf16.gmra.mxu2 %vm102_vm0, %v2061_v26 }
  0x46   :  { %1725 = vmatmul.msk.bf16.gmra.mxu3 %vm102_vm0, %v2070_v27 }
  0x47   :  { %1787 = vmatmul.msk.bf16.gmra.mxu0 %vm102_vm0, %v2079_v28 }
  0x55   :  { %1602 = vmatmul.msk.bf16.gmra.mxu1 %vm102_vm0, %v2044_v29  ;;  %1664 = vmatmul.msk.bf16.gmra.mxu2 %vm102_vm0, %v2062_v30 }
  0x56   :  { %1726 = vmatmul.msk.bf16.gmra.mxu3 %vm102_vm0, %v2071_v31 }
  0x57   :  { %1788 = vmatmul.msk.bf16.gmra.mxu0 %vm102_vm0, %v2080_v32 }
  0x65   :  { %1603 = vmatmul.msk.bf16.gmra.mxu1 %vm102_vm0, %v2045_v33  ;;  %1665 = vmatmul.msk.bf16.gmra.mxu2 %vm102_vm0, %v2063_v34 }
  0x66   :  { %1727 = vmatmul.msk.bf16.gmra.mxu3 %vm102_vm0, %v2072_v35 }
  0x67   :  { %1789 = vmatmul.msk.bf16.gmra.mxu0 %vm102_vm0, %v2081_v36 }
  0x75   :  { %1604 = vmatmul.msk.bf16.gmra.mxu1 %vm102_vm0, %v2046_v37  ;;  %1666 = vmatmul.msk.bf16.gmra.mxu2 %vm102_vm0, %v2064_v38 }
  0x76   :  { %1728 = vmatmul.msk.bf16.gmra.mxu3 %vm102_vm0, %v2073_v39  ;;  %v2088_v39 = vld [vmem:[%s2699_s0 + $0x150] sm:$0xff] }
  0x77   :  { %1790 = vmatmul.msk.bf16.gmra.mxu0 %vm102_vm0, %v2082_v40  ;;  %v2097_v40 = vld [vmem:[%s2699_s0 + $0x190] sm:$0xff] }
  0x82   :  { %v2351_v43 = vpop.f32.mrf.mxu1 }
  0x84   :  { %v136_v46 = vpop.f32.mrf.mxu0 }
  0x85   :  { %1605 = vmatmul.msk.bf16.gmra.mxu1 %vm102_vm0, %v2047_v41  ;;  %1667 = vmatmul.msk.bf16.gmra.mxu2 %vm102_vm0, %v2065_v42  ;;  %v2106_v42 = vld [vmem:[%s2699_s0 + $0x1d0] sm:$0xff] }
  0x86   :  { %1729 = vmatmul.msk.bf16.gmra.mxu3 %vm102_vm0, %v2074_v44  ;;  %v2115_v44 = vld [vmem:[%s2699_s0 + $0x210] sm:$0xff] }
  0x87   :  { %1791 = vmatmul.msk.bf16.gmra.mxu0 %vm102_vm0, %v2083_v45 }
  0x88   :  { %v2363_v47 = vpop.f32.mrf.mxu2 }
  0x89   :  { %v2365_v48 = vpop.f32.mrf.mxu3 }
  0x8a   :  { %v2367_v49 = vpop.f32.mrf.mxu1 }
  0x8c   :  { %v138_v50 = vpop.f32.mrf.mxu0 }
  0x90   :  { %v2369_v51 = vpop.f32.mrf.mxu2 }
  0x91   :  { %v2371_v52 = vpop.f32.mrf.mxu3 }
  0x92   :  { %v2379_v55 = vpop.f32.mrf.mxu1 }
  0x94   :  { %v141_v58 = vpop.f32.mrf.mxu0 }
  0x95   :  { %1606 = vmatmul.msk.bf16.gmra.mxu1 %vm102_vm0, %v2048_v53  ;;  %1668 = vmatmul.msk.bf16.gmra.mxu2 %vm102_vm0, %v2066_v54 }
  0x96   :  { %1730 = vmatmul.msk.bf16.gmra.mxu3 %vm102_vm0, %v2075_v56 }
  0x97   :  { %1792 = vmatmul.msk.bf16.gmra.mxu0 %vm102_vm0, %v2084_v57 }
  0x98   :  { %v2391_v59 = vpop.f32.mrf.mxu2 }
  0x99   :  { %v2393_v60 = vpop.f32.mrf.mxu3 }
  0x9a   :  { %v2395_v61 = vpop.f32.mrf.mxu1 }
  0x9c   :  { %v143_v62 = vpop.f32.mrf.mxu0 }
  0xa0   :  { %v2397_v63 = vpop.f32.mrf.mxu2 }
  0xa1   :  { %v2399_v0 = vpop.f32.mrf.mxu3 }
  0xa2   :  { %v255_v3 = vpop.f32.mrf.mxu1 }
  0xa3   :  { %v256_v6 = vadd.f32 %v255_v3, %v136_v46 }
  0xa4   :  { %v704_v7 = vpop.f32.mrf.mxu0 }
  0xa5   :  { %1847 = vmatmul.msk.bf16.vlgmr.msra.gmra.mxu1 %vm102_vm0, %v2086_v1  ;;  %1909 = vmatmul.msk.bf16.vlgmr.msra.gmra.mxu2 %vm102_vm0, %v2095_v2 }
  0xa6   :  { %1971 = vmatmul.msk.bf16.vlgmr.msra.gmra.mxu3 %vm102_vm0, %v2104_v4 }
  0xa7   :  { %2033 = vmatmul.msk.bf16.vlgmr.msra.gmra.mxu0 %vm102_vm0, %v2113_v5 }
  0xa8   :  { %v394_v8 = vpop.f32.mrf.mxu2 }
  0xa9   :  { %v434_v9 = vadd.f32 %v394_v8, %v256_v6  ;;  %v549_v10 = vpop.f32.mrf.mxu3  ;;  %v2089_v6 = vld [vmem:[%s2699_s0 + $0x158] sm:$0xff] }
  0xaa   :  { %v257_v11 = vpop.f32.mrf.mxu1 }
  0xab   :  { %v589_v12 = vadd.f32 %v549_v10, %v434_v9  ;;  %v258_v13 = vadd.f32 %v257_v11, %v138_v50  ;;  %v2107_v9 = vld [vmem:[%s2699_s0 + $0x1d8] sm:$0xff] }
  0xac   :  { %v706_v14 = vpop.f32.mrf.mxu0 }
  0xad   :  { %v2417_v15 = vadd.f32 %v704_v7, %v589_v12  ;;  %v2098_v7 = vld [vmem:[%s2699_s0 + $0x198] sm:$0xff] }
  0xb0   :  { %v396_v16 = vpop.f32.mrf.mxu2 }
  0xb1   :  { %v435_v17 = vadd.f32 %v396_v16, %v258_v13  ;;  %v551_v18 = vpop.f32.mrf.mxu3 }
  0xb2   :  { %v260_v21 = vpop.f32.mrf.mxu1 }
  0xb3   :  { %v590_v24 = vadd.f32 %v551_v18, %v435_v17  ;;  %v261_v25 = vadd.f32 %v260_v21, %v141_v58 }
  0xb4   :  { %v709_v26 = vpop.f32.mrf.mxu0 }
  0xb5   :  { %1848 = vmatmul.msk.bf16.gmra.mxu1 %vm102_vm0, %v2087_v19  ;;  %1910 = vmatmul.msk.bf16.gmra.mxu2 %vm102_vm0, %v2096_v20  ;;  %v2433_v27 = vadd.f32 %v706_v14, %v590_v24 }
  0xb6   :  { %1972 = vmatmul.msk.bf16.gmra.mxu3 %vm102_vm0, %v2105_v22 }
  0xb7   :  { %2034 = vmatmul.msk.bf16.gmra.mxu0 %vm102_vm0, %v2114_v23 }
  0xb8   :  { %v399_v28 = vpop.f32.mrf.mxu2 }
  0xb9   :  { %v436_v29 = vadd.f32 %v399_v28, %v261_v25  ;;  %v554_v30 = vpop.f32.mrf.mxu3  ;;  %v2090_v25 = vld [vmem:[%s2699_s0 + $0x160] sm:$0xff] }
  0xba   :  { %v262_v31 = vpop.f32.mrf.mxu1 }
  0xbb   :  { %v591_v32 = vadd.f32 %v554_v30, %v436_v29  ;;  %v263_v33 = vadd.f32 %v262_v31, %v143_v62  ;;  %v2108_v29 = vld [vmem:[%s2699_s0 + $0x1e0] sm:$0xff] }
  0xbc   :  { %v711_v34 = vpop.f32.mrf.mxu0 }
  0xbd   :  { %v2437_v35 = vadd.f32 %v709_v26, %v591_v32  ;;  %v2099_v26 = vld [vmem:[%s2699_s0 + $0x1a0] sm:$0xff] }
  0xc0   :  { %v401_v36 = vpop.f32.mrf.mxu2 }
  0xc1   :  { %v437_v37 = vadd.f32 %v401_v36, %v263_v33  ;;  %v556_v38 = vpop.f32.mrf.mxu3 }
  0xc2   :  { %v265_v41 = vpop.f32.mrf.mxu1 }
  0xc3   :  { %v592_v45 = vadd.f32 %v556_v38, %v437_v37  ;;  %v266_v46 = vadd.f32 %v265_v41, %v2351_v43 }
  0xc4   :  { %v714_v50 = vpop.f32.mrf.mxu0 }
  0xc5   :  { %1849 = vmatmul.msk.bf16.gmra.mxu1 %vm102_vm0, %v2088_v39  ;;  %1911 = vmatmul.msk.bf16.gmra.mxu2 %vm102_vm0, %v2097_v40  ;;  %v2454_v53 = vadd.f32 %v711_v34, %v592_v45 }
  0xc6   :  { %1973 = vmatmul.msk.bf16.gmra.mxu3 %vm102_vm0, %v2106_v42 }
  0xc7   :  { %2035 = vmatmul.msk.bf16.gmra.mxu0 %vm102_vm0, %v2115_v44 }
  0xc8   :  { %v404_v54 = vpop.f32.mrf.mxu2 }
  0xc9   :  { %v438_v56 = vadd.f32 %v404_v54, %v266_v46  ;;  %v559_v57 = vpop.f32.mrf.mxu3 }
  0xca   :  { %v267_v58 = vpop.f32.mrf.mxu1 }
  0xcb   :  { %v593_v62 = vadd.f32 %v559_v57, %v438_v56  ;;  %v268_v1 = vadd.f32 %v267_v58, %v2367_v49  ;;  %v2116_v49 = vld [vmem:[%s2699_s0 + $0x218] sm:$0xff]  ;;  %v2109_v56 = vld [vmem:[%s2699_s0 + $0x1e8] sm:$0xff] }
  0xcc   :  { %v716_v2 = vpop.f32.mrf.mxu0 }
  0xcd   :  { %v2459_v43 = vadd.f32 %v714_v50, %v593_v62  ;;  %v2091_v50 = vld [vmem:[%s2699_s0 + $0x168] sm:$0xff] }
  0xd0   :  { %v406_v3 = vpop.f32.mrf.mxu2 }
  0xd1   :  { %v439_v4 = vadd.f32 %v406_v3, %v268_v1  ;;  %v561_v5 = vpop.f32.mrf.mxu3 }
  0xd2   :  { %v270_v8 = vpop.f32.mrf.mxu1 }
  0xd3   :  { %v594_v10 = vadd.f32 %v561_v5, %v439_v4  ;;  %v271_v11 = vadd.f32 %v270_v8, %v2379_v55 }
  0xd4   :  { %v719_v12 = vpop.f32.mrf.mxu0 }
  0xd5   :  { %1850 = vmatmul.msk.bf16.gmra.mxu1 %vm102_vm0, %v2089_v6  ;;  %1912 = vmatmul.msk.bf16.gmra.mxu2 %vm102_vm0, %v2098_v7  ;;  %v2476_v13 = vadd.f32 %v716_v2, %v594_v10 }
  0xd6   :  { %1974 = vmatmul.msk.bf16.gmra.mxu3 %vm102_vm0, %v2107_v9 }
  0xd7   :  { %2036 = vmatmul.msk.bf16.gmra.mxu0 %vm102_vm0, %v2116_v49 }
  0xd8   :  { %v409_v14 = vpop.f32.mrf.mxu2 }
  0xd9   :  { %v440_v16 = vadd.f32 %v409_v14, %v271_v11  ;;  %v564_v17 = vpop.f32.mrf.mxu3 }
  0xda   :  { %v272_v18 = vpop.f32.mrf.mxu1 }
  0xdb   :  { %v595_v19 = vadd.f32 %v564_v17, %v440_v16  ;;  %v273_v20 = vadd.f32 %v272_v18, %v2395_v61  ;;  %v2117_v61 = vld [vmem:[%s2699_s0 + $0x220] sm:$0xff]  ;;  %v2110_v16 = vld [vmem:[%s2699_s0 + $0x1f0] sm:$0xff] }
  0xdc   :  { %v721_v21 = vpop.f32.mrf.mxu0 }
  0xdd   :  { %v2481_v55 = vadd.f32 %v719_v12, %v595_v19  ;;  %v2092_v12 = vld [vmem:[%s2699_s0 + $0x170] sm:$0xff] }
  0xe0   :  { %v411_v22 = vpop.f32.mrf.mxu2 }
  0xe1   :  { %v441_v23 = vadd.f32 %v411_v22, %v273_v20  ;;  %v566_v24 = vpop.f32.mrf.mxu3 }
  0xe2   :  { %v275_v28 = vpop.f32.mrf.mxu1 }
  0xe3   :  { %v596_v30 = vadd.f32 %v566_v24, %v441_v23  ;;  %v276_v33 = vadd.f32 %v275_v28, %v2363_v47  ;;  %v2100_v47 = vld [vmem:[%s2699_s0 + $0x1a8] sm:$0xff] }
  0xe4   :  { %v724_v31 = vpop.f32.mrf.mxu0 }
  0xe5   :  { %1851 = vmatmul.msk.bf16.gmra.mxu1 %vm102_vm0, %v2090_v25  ;;  %1913 = vmatmul.msk.bf16.gmra.mxu2 %vm102_vm0, %v2099_v26  ;;  %v2497_v32 = vadd.f32 %v721_v21, %v596_v30 }
  0xe6   :  { %1975 = vmatmul.msk.bf16.gmra.mxu3 %vm102_vm0, %v2108_v29 }
  0xe7   :  { %2037 = vmatmul.msk.bf16.gmra.mxu0 %vm102_vm0, %v2117_v61 }
  0xe8   :  { %v414_v34 = vpop.f32.mrf.mxu2 }
  0xe9   :  { %v442_v36 = vadd.f32 %v414_v34, %v276_v33  ;;  %v569_v37 = vpop.f32.mrf.mxu3  ;;  %v2093_v33 = vld [vmem:[%s2699_s0 + $0x178] sm:$0xff] }
  0xea   :  { %v277_v38 = vpop.f32.mrf.mxu1 }
  0xeb   :  { %v597_v39 = vadd.f32 %v569_v37, %v442_v36  ;;  %v278_v42 = vadd.f32 %v277_v38, %v2369_v51  ;;  %v2118_v51 = vld [vmem:[%s2699_s0 + $0x228] sm:$0xff]  ;;  %v2111_v36 = vld [vmem:[%s2699_s0 + $0x1f8] sm:$0xff] }
  0xec   :  { %v726_v40 = vpop.f32.mrf.mxu0 }
  0xed   :  { %v2502_v41 = vadd.f32 %v724_v31, %v597_v39 }
  0xf0   :  { %v416_v44 = vpop.f32.mrf.mxu2 }
  0xf1   :  { %v443_v45 = vadd.f32 %v416_v44, %v278_v42  ;;  %v571_v46 = vpop.f32.mrf.mxu3 }
  0xf2   :  { %v280_v54 = vpop.f32.mrf.mxu1 }
  0xf3   :  { %v598_v57 = vadd.f32 %v571_v46, %v443_v45  ;;  %v281_v1 = vadd.f32 %v280_v54, %v2391_v59  ;;  %v2101_v59 = vld [vmem:[%s2699_s0 + $0x1b0] sm:$0xff] }
  0xf4   :  { %v729_v58 = vpop.f32.mrf.mxu0 }
  0xf5   :  { %1852 = vmatmul.msk.bf16.gmra.mxu1 %vm102_vm0, %v2091_v50  ;;  %1914 = vmatmul.msk.bf16.gmra.mxu2 %vm102_vm0, %v2100_v47  ;;  %v2519_v62 = vadd.f32 %v726_v40, %v598_v57 }
  0xf6   :  { %1976 = vmatmul.msk.bf16.gmra.mxu3 %vm102_vm0, %v2109_v56 }
  0xf7   :  { %2038 = vmatmul.msk.bf16.gmra.mxu0 %vm102_vm0, %v2118_v51 }
  0xf8   :  { %v419_v2 = vpop.f32.mrf.mxu2 }
  0xf9   :  { %v444_v3 = vadd.f32 %v419_v2, %v281_v1  ;;  %v574_v4 = vpop.f32.mrf.mxu3 }
  0xfa   :  { %v282_v5 = vpop.f32.mrf.mxu1 }
  0xfb   :  { %v599_v6 = vadd.f32 %v574_v4, %v444_v3  ;;  %v283_v9 = vadd.f32 %v282_v5, %v2397_v63  ;;  %v2119_v63 = vld [vmem:[%s2699_s0 + $0x230] sm:$0xff] }
  0xfc   :  { %v731_v7 = vpop.f32.mrf.mxu0 }
  0xfd   :  { %v2524_v8 = vadd.f32 %v729_v58, %v599_v6 }
 0x100   :  { %v421_v49 = vpop.f32.mrf.mxu2 }
 0x101   :  { %v445_v10 = vadd.f32 %v421_v49, %v283_v9  ;;  %v576_v11 = vpop.f32.mrf.mxu3  ;;  %v2123_v9 = vld [vmem:[%s2701_s3] sm:$0xff]  }
 0x102   :  { %v285_v14 = vpop.f32.mrf.mxu1 }
 0x103   :  { %v600_v17 = vadd.f32 %v576_v11, %v445_v10  ;;  %v286_v20 = vadd.f32 %v285_v14, %v2365_v48  ;;  %v2102_v48 = vld [vmem:[%s2699_s0 + $0x1b8] sm:$0xff] }
 0x104   :  { %v734_v18 = vpop.f32.mrf.mxu0 }
 0x105   :  { %1853 = vmatmul.msk.bf16.gmra.mxu1 %vm102_vm0, %v2092_v12  ;;  %1915 = vmatmul.msk.bf16.gmra.mxu2 %vm102_vm0, %v2101_v59  ;;  %v2541_v19 = vadd.f32 %v731_v7, %v600_v17  ;;  %v2124_v59 = vunpack.c.l.bf16 %v2123_v9 }
 0x106   :  { %1977 = vmatmul.msk.bf16.gmra.mxu3 %vm102_vm0, %v2110_v16 }
 0x107   :  { %2039 = vmatmul.msk.bf16.gmra.mxu0 %vm102_vm0, %v2119_v63 }
 0x108   :  { %v424_v21 = vpop.f32.mrf.mxu2 }
 0x109   :  { %v446_v22 = vadd.f32 %v424_v21, %v286_v20  ;;  %v579_v23 = vpop.f32.mrf.mxu3 }
 0x10a   :  { %v287_v24 = vpop.f32.mrf.mxu1 }
 0x10b   :  { %v601_v25 = vadd.f32 %v579_v23, %v446_v22  ;;  %v288_v29 = vadd.f32 %v287_v24, %v2371_v52  ;;  %v2120_v52 = vld [vmem:[%s2699_s0 + $0x238] sm:$0xff] }
 0x10c   :  { %v736_v26 = vpop.f32.mrf.mxu0 }
 0x10d   :  { %v2546_v28 = vadd.f32 %v734_v18, %v601_v25 }
 0x110   :  { %v426_v61 = vpop.f32.mrf.mxu2 }
 0x111   :  { %v447_v30 = vadd.f32 %v426_v61, %v288_v29  ;;  %v581_v31 = vpop.f32.mrf.mxu3 }
 0x112   :  { %v290_v34 = vpop.f32.mrf.mxu1 }
 0x113   :  { %v602_v37 = vadd.f32 %v581_v31, %v447_v30  ;;  %v291_v40 = vadd.f32 %v290_v34, %v2393_v60 }
 0x114   :  { %v739_v38 = vpop.f32.mrf.mxu0 }
 0x115   :  { %1854 = vmatmul.msk.bf16.gmra.mxu1 %vm102_vm0, %v2093_v33  ;;  %1916 = vmatmul.msk.bf16.gmra.mxu2 %vm102_vm0, %v2102_v48  ;;  %v2563_v39 = vadd.f32 %v736_v26, %v602_v37  ;;  %v2125_v26 = vunpack.c.h.bf16 %v2123_v9  ;;  %v2154_v48 = vld [vmem:[%s2701_s3 + $0x8] sm:$0xff]  }
 0x116   :  { %1978 = vmatmul.msk.bf16.gmra.mxu3 %vm102_vm0, %v2111_v36 }
 0x117   :  { %2040 = vmatmul.msk.bf16.gmra.mxu0 %vm102_vm0, %v2120_v52 }
 0x118   :  { %v429_v42 = vpop.f32.mrf.mxu2 }
 0x119   :  { %v448_v44 = vadd.f32 %v429_v42, %v291_v40  ;;  %v584_v45 = vpop.f32.mrf.mxu3  ;;  %v2128_v42 = vunpack.c.l.bf16 %v2154_v48 }
 0x11a   :  { %v292_v46 = vpop.f32.mrf.mxu1 }
 0x11b   :  { %v603_v50 = vadd.f32 %v584_v45, %v448_v44  ;;  %v293_v56 = vadd.f32 %v292_v46, %v2399_v0  ;;  %v2580_v0 = vld [vmem:[%s2700_s2] ss:$0 sm:$0xff] }
 0x11c   :  { %v741_v47 = vpop.f32.mrf.mxu0 }
 0x11d   :  { %v2568_v54 = vadd.f32 %v739_v38, %v603_v50 }
 0x120   :  { %v431_v51 = vpop.f32.mrf.mxu2 }
 0x121   :  { %v449_v57 = vadd.f32 %v431_v51, %v293_v56  ;;  %v586_v58 = vpop.f32.mrf.mxu3 }
 0x122   :  { %v859_v1 = vpop.f32.mrf.mxu1 }
 0x123   :  { %v604_v2 = vadd.f32 %v586_v58, %v449_v57  ;;  %v899_v60 = vadd.f32 %v859_v1, %v2417_v15 }
 0x124   :  { %v1324_v3 = vpop.f32.mrf.mxu0 }
 0x125   :  { %v2571_v4 = vadd.f32 %v741_v47, %v604_v2 }
 0x128   :  { %v1014_v5 = vpop.f32.mrf.mxu2 }
 0x129   :  { %v1054_v6 = vadd.f32 %v1014_v5, %v899_v60  ;;  %v1169_v7 = vpop.f32.mrf.mxu3 }
 0x12a   :  { %v861_v49 = vpop.f32.mrf.mxu1 }
 0x12b   :  { %v1209_v10 = vadd.f32 %v1169_v7, %v1054_v6  ;;  %v900_v15 = vadd.f32 %v861_v49, %v2433_v27  ;;  %v2155_v49 = vld [vmem:[%s2701_s3 + $0x10] sm:$0xff]  }
 0x12c   :  { %v1326_v11 = vpop.f32.mrf.mxu0 }
 0x12d   :  { %v1364_v12 = vadd.f32 %v1324_v3, %v1209_v10  ;;  %v2129_v3 = vunpack.c.h.bf16 %v2154_v48 }
 0x12f   :  { %v1384_v14 = vadd.f32 %v2580_v0, %v1364_v12 }
 0x130   :  { %v1016_v16 = vpop.f32.mrf.mxu2 }
 0x131   :  { %v1432_v63 = vadd.f32 %v2124_v59, %v1384_v14  ;;  %v1055_v17 = vadd.f32 %v1016_v16, %v900_v15  ;;  %v1171_v18 = vpop.f32.mrf.mxu3  ;;  %v2132_v16 = vunpack.c.l.bf16 %v2155_v49 }
 0x132   :  { %v864_v20 = vpop.f32.mrf.mxu1 }
 0x133   :  { %v1448_v21 = vmax.f32 %v1432_v63, 0.0  ;;  %v1210_v22 = vadd.f32 %v1171_v18, %v1055_v17  ;;  %v901_v27 = vadd.f32 %v864_v20, %v2437_v35 }
 0x134   :  { %v1329_v23 = vpop.f32.mrf.mxu0 }
 0x135   :  { %v1464_v24 = vpack.c.bf16 %v1448_v21, %v1448_v21  ;;  %v1365_v25 = vadd.f32 %v1326_v11, %v1210_v22 }
 0x137   :  { %1481 = vst.msk [vmem:[%s2702_s4] sm:$0xf] %vm1480_vm1, %v1464_v24  ;;  %v1385_v29 = vadd.f32 %v2580_v0, %v1365_v25 }
 0x138   :  { %v1019_v61 = vpop.f32.mrf.mxu2 }
 0x139   :  { %v1433_v30 = vadd.f32 %v2125_v26, %v1385_v29  ;;  %v1056_v31 = vadd.f32 %v1019_v61, %v901_v27  ;;  %v1174_v33 = vpop.f32.mrf.mxu3  ;;  %v2133_v27 = vunpack.c.h.bf16 %v2155_v49 }
 0x13a   :  { %v866_v34 = vpop.f32.mrf.mxu1 }
 0x13b   :  { %v1449_v36 = vmax.f32 %v1433_v30, 0.0  ;;  %v1211_v52 = vadd.f32 %v1174_v33, %v1056_v31  ;;  %v902_v44 = vadd.f32 %v866_v34, %v2454_v53  ;;  %v2156_v34 = vld [vmem:[%s2701_s3 + $0x18] sm:$0xff]  }
 0x13c   :  { %v1331_v37 = vpop.f32.mrf.mxu0 }
 0x13d   :  { %v1465_v38 = vpack.c.bf16 %v1449_v36, %v1449_v36  ;;  %v1366_v40 = vadd.f32 %v1329_v23, %v1211_v52 }
 0x13f   :  { %1482 = vst.msk [vmem:[%s2702_s4 + $0x4] sm:$0xf] %vm1480_vm1, %v1465_v38  ;;  %v1386_v35 = vadd.f32 %v2580_v0, %v1366_v40 }
 0x140   :  { %v1021_v45 = vpop.f32.mrf.mxu2 }
 0x141   :  { %v1434_v46 = vadd.f32 %v2128_v42, %v1386_v35  ;;  %v1057_v50 = vadd.f32 %v1021_v45, %v902_v44  ;;  %v1176_v47 = vpop.f32.mrf.mxu3  ;;  %v2136_v35 = vunpack.c.l.bf16 %v2156_v34 }
 0x142   :  { %v869_v56 = vpop.f32.mrf.mxu1 }
 0x143   :  { %v1450_v51 = vmax.f32 %v1434_v46, 0.0  ;;  %v1212_v57 = vadd.f32 %v1176_v47, %v1057_v50  ;;  %v903_v53 = vadd.f32 %v869_v56, %v2459_v43 }
 0x144   :  { %v1334_v58 = vpop.f32.mrf.mxu0 }
 0x145   :  { %v1466_v1 = vpack.c.bf16 %v1450_v51, %v1450_v51  ;;  %v1367_v2 = vadd.f32 %v1331_v37, %v1212_v57 }
 0x147   :  { %1483 = vst.msk [vmem:[%s2702_s4 + $0x8] sm:$0xf] %vm1480_vm1, %v1466_v1  ;;  %v1387_v60 = vadd.f32 %v2580_v0, %v1367_v2 }
 0x148   :  { %v1024_v5 = vpop.f32.mrf.mxu2 }
 0x149   :  { %v1435_v6 = vadd.f32 %v2129_v3, %v1387_v60  ;;  %v1058_v7 = vadd.f32 %v1024_v5, %v903_v53  ;;  %v1179_v9 = vpop.f32.mrf.mxu3  ;;  %v2137_v3 = vunpack.c.h.bf16 %v2156_v34 }
 0x14a   :  { %v871_v10 = vpop.f32.mrf.mxu1 }
 0x14b   :  { %v1451_v11 = vmax.f32 %v1435_v6, 0.0  ;;  %v1213_v12 = vadd.f32 %v1179_v9, %v1058_v7  ;;  %v904_v63 = vadd.f32 %v871_v10, %v2476_v13  ;;  %v2157_v9 = vld [vmem:[%s2701_s3 + $0x20] sm:$0xff]  }
 0x14c   :  { %v1336_v59 = vpop.f32.mrf.mxu0 }
 0x14d   :  { %v1467_v14 = vpack.c.bf16 %v1451_v11, %v1451_v11  ;;  %v1368_v15 = vadd.f32 %v1334_v58, %v1213_v12 }
 0x14f   :  { %1484 = vst.msk [vmem:[%s2702_s4 + $0xc] sm:$0xf] %vm1480_vm1, %v1467_v14  ;;  %v1388_v43 = vadd.f32 %v2580_v0, %v1368_v15  ;;  %v2140_v15 = vunpack.c.l.bf16 %v2157_v9 }
 0x150   :  { %v1026_v17 = vpop.f32.mrf.mxu2 }
 0x151   :  { %v1436_v18 = vadd.f32 %v2132_v16, %v1388_v43  ;;  %v1059_v20 = vadd.f32 %v1026_v17, %v904_v63  ;;  %v1181_v21 = vpop.f32.mrf.mxu3 }
 0x152   :  { %v874_v22 = vpop.f32.mrf.mxu1 }
 0x153   :  { %v1452_v23 = vmax.f32 %v1436_v18, 0.0  ;;  %v1214_v24 = vadd.f32 %v1181_v21, %v1059_v20  ;;  %v905_v13 = vadd.f32 %v874_v22, %v2481_v55 }
 0x154   :  { %v1339_v25 = vpop.f32.mrf.mxu0 }
 0x155   :  { %v1468_v26 = vpack.c.bf16 %v1452_v23, %v1452_v23  ;;  %v1369_v29 = vadd.f32 %v1336_v59, %v1214_v24 }
 0x157   :  { %1485 = vst.msk [vmem:[%s2702_s4 + $0x10] sm:$0xf] %vm1480_vm1, %v1468_v26  ;;  %v1389_v61 = vadd.f32 %v2580_v0, %v1369_v29  ;;  %v2141_v26 = vunpack.c.h.bf16 %v2157_v9 }
 0x158   :  { %v1029_v30 = vpop.f32.mrf.mxu2 }
 0x159   :  { %v1437_v31 = vadd.f32 %v2133_v27, %v1389_v61  ;;  %v1060_v33 = vadd.f32 %v1029_v30, %v905_v13  ;;  %v1184_v48 = vpop.f32.mrf.mxu3 }
 0x15a   :  { %v876_v36 = vpop.f32.mrf.mxu1 }
 0x15b   :  { %v1453_v52 = vmax.f32 %v1437_v31, 0.0  ;;  %v1215_v37 = vadd.f32 %v1184_v48, %v1060_v33  ;;  %v906_v44 = vadd.f32 %v876_v36, %v2497_v32  ;;  %v2158_v31 = vld [vmem:[%s2701_s3 + $0x28] sm:$0xff]  }
 0x15c   :  { %v1341_v38 = vpop.f32.mrf.mxu0 }
 0x15d   :  { %v1469_v40 = vpack.c.bf16 %v1453_v52, %v1453_v52  ;;  %v1370_v42 = vadd.f32 %v1339_v25, %v1215_v37 }
 0x15f   :  { %1486 = vst.msk [vmem:[%s2702_s4 + $0x14] sm:$0xf] %vm1480_vm1, %v1469_v40  ;;  %v1390_v55 = vadd.f32 %v2580_v0, %v1370_v42 }
 0x160   :  { %v1031_v45 = vpop.f32.mrf.mxu2 }
 0x161   :  { %v1438_v46 = vadd.f32 %v2136_v35, %v1390_v55  ;;  %v1061_v50 = vadd.f32 %v1031_v45, %v906_v44  ;;  %v1186_v47 = vpop.f32.mrf.mxu3 }
 0x162   :  { %v879_v56 = vpop.f32.mrf.mxu1 }
 0x163   :  { %v1454_v51 = vmax.f32 %v1438_v46, 0.0  ;;  %v1216_v57 = vadd.f32 %v1186_v47, %v1061_v50  ;;  %v907_v32 = vadd.f32 %v879_v56, %v2502_v41 }
 0x164   :  { %v1344_v58 = vpop.f32.mrf.mxu0 }
 0x165   :  { %v1470_v1 = vpack.c.bf16 %v1454_v51, %v1454_v51  ;;  %v1371_v2 = vadd.f32 %v1341_v38, %v1216_v57  ;;  %v2144_v38 = vunpack.c.l.bf16 %v2158_v31  ;;  %v2145_v51 = vunpack.c.h.bf16 %v2158_v31 }
 0x167   :  { %1487 = vst.msk [vmem:[%s2702_s4 + $0x18] sm:$0xf] %vm1480_vm1, %v1470_v1  ;;  %v1391_v60 = vadd.f32 %v2580_v0, %v1371_v2 }
 0x168   :  { %v1034_v53 = vpop.f32.mrf.mxu2 }
 0x169   :  { %v1439_v5 = vadd.f32 %v2137_v3, %v1391_v60  ;;  %v1062_v6 = vadd.f32 %v1034_v53, %v907_v32  ;;  %v1189_v7 = vpop.f32.mrf.mxu3  ;;  %v2159_v32 = vld [vmem:[%s2701_s3 + $0x30] sm:$0xff]  }
 0x16a   :  { %v881_v49 = vpop.f32.mrf.mxu1 }
 0x16b   :  { %v1455_v10 = vmax.f32 %v1439_v5, 0.0  ;;  %v1217_v11 = vadd.f32 %v1189_v7, %v1062_v6  ;;  %v908_v16 = vadd.f32 %v881_v49, %v2519_v62  ;;  %v2148_v49 = vunpack.c.l.bf16 %v2159_v32 }
 0x16c   :  { %v1346_v12 = vpop.f32.mrf.mxu0 }
 0x16d   :  { %v1471_v59 = vpack.c.bf16 %v1455_v10, %v1455_v10  ;;  %v1372_v14 = vadd.f32 %v1344_v58, %v1217_v11 }
 0x16f   :  { %1488 = vst.msk [vmem:[%s2702_s4 + $0x1c] sm:$0xf] %vm1480_vm1, %v1471_v59  ;;  %v1392_v41 = vadd.f32 %v2580_v0, %v1372_v14 }
 0x170   :  { %v1036_v43 = vpop.f32.mrf.mxu2 }
 0x171   :  { %v1440_v63 = vadd.f32 %v2140_v15, %v1392_v41  ;;  %v1063_v17 = vadd.f32 %v1036_v43, %v908_v16  ;;  %v1191_v18 = vpop.f32.mrf.mxu3 }
 0x172   :  { %v884_v20 = vpop.f32.mrf.mxu1 }
 0x173   :  { %v1456_v21 = vmax.f32 %v1440_v63, 0.0  ;;  %v1218_v22 = vadd.f32 %v1191_v18, %v1063_v17  ;;  %v909_v62 = vadd.f32 %v884_v20, %v2524_v8  ;;  %v2149_v18 = vunpack.c.h.bf16 %v2159_v32 }
 0x174   :  { %v1349_v23 = vpop.f32.mrf.mxu0 }
 0x175   :  { %v1472_v24 = vpack.c.bf16 %v1456_v21, %v1456_v21  ;;  %v1373_v25 = vadd.f32 %v1346_v12, %v1218_v22 }
 0x177   :  { %1489 = vst.msk [vmem:[%s2702_s4 + $0x20] sm:$0xf] %vm1480_vm1, %v1472_v24  ;;  %v1393_v29 = vadd.f32 %v2580_v0, %v1373_v25 }
 0x178   :  { %v1039_v27 = vpop.f32.mrf.mxu2 }
 0x179   :  { %v1441_v61 = vadd.f32 %v2141_v26, %v1393_v29  ;;  %v1064_v13 = vadd.f32 %v1039_v27, %v909_v62  ;;  %v1194_v30 = vpop.f32.mrf.mxu3  ;;  %v2160_v26 = vld [vmem:[%s2701_s3 + $0x38] sm:$0xff]  }
 0x17a   :  { %v886_v33 = vpop.f32.mrf.mxu1 }
 0x17b   :  { %v1457_v48 = vmax.f32 %v1441_v61, 0.0  ;;  %v1219_v34 = vadd.f32 %v1194_v30, %v1064_v13  ;;  %v910_v40 = vadd.f32 %v886_v33, %v2541_v19  ;;  %v2152_v30 = vunpack.c.l.bf16 %v2160_v26 }
 0x17c   :  { %v1351_v36 = vpop.f32.mrf.mxu0 }
 0x17d   :  { %v1473_v52 = vpack.c.bf16 %v1457_v48, %v1457_v48  ;;  %v1374_v37 = vadd.f32 %v1349_v23, %v1219_v34 }
 0x17f   :  { %1490 = vst.msk [vmem:[%s2702_s4 + $0x24] sm:$0xf] %vm1480_vm1, %v1473_v52  ;;  %v1394_v8 = vadd.f32 %v2580_v0, %v1374_v37 }
 0x180   :  { %v1041_v42 = vpop.f32.mrf.mxu2 }
 0x181   :  { %v1442_v35 = vadd.f32 %v2144_v38, %v1394_v8  ;;  %v1065_v55 = vadd.f32 %v1041_v42, %v910_v40  ;;  %v1196_v44 = vpop.f32.mrf.mxu3  ;;  %v2153_v42 = vunpack.c.h.bf16 %v2160_v26 }
 0x182   :  { %v889_v45 = vpop.f32.mrf.mxu1 }
 0x183   :  { %v1458_v46 = vmax.f32 %v1442_v35, 0.0  ;;  %v1220_v50 = vadd.f32 %v1196_v44, %v1065_v55  ;;  %v911_v19 = vadd.f32 %v889_v45, %v2546_v28 }
 0x184   :  { %v1354_v57 = vpop.f32.mrf.mxu0 }
 0x185   :  { %v1474_v47 = vpack.c.bf16 %v1458_v46, %v1458_v46  ;;  %v1375_v56 = vadd.f32 %v1351_v36, %v1220_v50 }
 0x187   :  { %1491 = vst.msk [vmem:[%s2702_s4 + $0x28] sm:$0xf] %vm1480_vm1, %v1474_v47  ;;  %v1395_v58 = vadd.f32 %v2580_v0, %v1375_v56 }
 0x188   :  { %v1044_v1 = vpop.f32.mrf.mxu2 }
 0x189   :  { %v1443_v2 = vadd.f32 %v2145_v51, %v1395_v58  ;;  %v1066_v3 = vadd.f32 %v1044_v1, %v911_v19  ;;  %v1199_v60 = vpop.f32.mrf.mxu3 }
 0x18a   :  { %v891_v53 = vpop.f32.mrf.mxu1 }
 0x18b   :  { %v1459_v5 = vmax.f32 %v1443_v2, 0.0  ;;  %v1221_v6 = vadd.f32 %v1199_v60, %v1066_v3  ;;  %v912_v10 = vadd.f32 %v891_v53, %v2563_v39 }
 0x18c   :  { %v1356_v11 = vpop.f32.mrf.mxu0 }
 0x18d   :  { %v1475_v7 = vpack.c.bf16 %v1459_v5, %v1459_v5  ;;  %v1376_v9 = vadd.f32 %v1354_v57, %v1221_v6 }
 0x18f   :  { %1492 = vst.msk [vmem:[%s2702_s4 + $0x2c] sm:$0xf] %vm1480_vm1, %v1475_v7  ;;  %v1396_v28 = vadd.f32 %v2580_v0, %v1376_v9 }
 0x190   :  { %v1046_v12 = vpop.f32.mrf.mxu2 }
 0x191   :  { %v1444_v59 = vadd.f32 %v2148_v49, %v1396_v28  ;;  %v1067_v14 = vadd.f32 %v1046_v12, %v912_v10  ;;  %v1201_v15 = vpop.f32.mrf.mxu3 }
 0x192   :  { %v894_v41 = vpop.f32.mrf.mxu1 }
 0x193   :  { %v1460_v16 = vmax.f32 %v1444_v59, 0.0  ;;  %v1222_v43 = vadd.f32 %v1201_v15, %v1067_v14  ;;  %v913_v39 = vadd.f32 %v894_v41, %v2568_v54 }
 0x194   :  { %v1359_v25 = vpop.f32.mrf.mxu0 }
 0x195   :  { %v1476_v63 = vpack.c.bf16 %v1460_v16, %v1460_v16  ;;  %v1377_v17 = vadd.f32 %v1356_v11, %v1222_v43 }
 0x197   :  { %1493 = vst.msk [vmem:[%s2702_s4 + $0x30] sm:$0xf] %vm1480_vm1, %v1476_v63  ;;  %v1397_v20 = vadd.f32 %v2580_v0, %v1377_v17 }
 0x198   :  { %v1049_v21 = vpop.f32.mrf.mxu2 }
 0x199   :  { %v1445_v22 = vadd.f32 %v2149_v18, %v1397_v20  ;;  %v1068_v23 = vadd.f32 %v1049_v21, %v913_v39  ;;  %v1204_v24 = vpop.f32.mrf.mxu3 }
 0x19a   :  { %v896_v27 = vpop.f32.mrf.mxu1 }
 0x19b   :  { %v1461_v29 = vmax.f32 %v1445_v22, 0.0  ;;  %v1223_v62 = vadd.f32 %v1204_v24, %v1068_v23  ;;  %v914_v31 = vadd.f32 %v896_v27, %v2571_v4 }
 0x19c   :  { %v1361_v38 = vpop.f32.mrf.mxu0 }
 0x19d   :  { %v1477_v61 = vpack.c.bf16 %v1461_v29, %v1461_v29  ;;  %v1378_v13 = vadd.f32 %v1359_v25, %v1223_v62 }
 0x19f   :  { %1494 = vst.msk [vmem:[%s2702_s4 + $0x34] sm:$0xf] %vm1480_vm1, %v1477_v61  ;;  %v1398_v54 = vadd.f32 %v2580_v0, %v1378_v13 }
 0x1a0   :  { %v1051_v33 = vpop.f32.mrf.mxu2 }
 0x1a1   :  { %v1446_v48 = vadd.f32 %v2152_v30, %v1398_v54  ;;  %v1069_v34 = vadd.f32 %v1051_v33, %v914_v31  ;;  %v1206_v36 = vpop.f32.mrf.mxu3 }
 0x1a3   :  { %v1462_v52 = vmax.f32 %v1446_v48, 0.0  ;;  %v1224_v37 = vadd.f32 %v1206_v36, %v1069_v34 }
 0x1a5   :  { %v1478_v8 = vpack.c.bf16 %v1462_v52, %v1462_v52  ;;  %v1379_v40 = vadd.f32 %v1361_v38, %v1224_v37 }
 0x1a7   :  { %1495 = vst.msk [vmem:[%s2702_s4 + $0x38] sm:$0xf] %vm1480_vm1, %v1478_v8  ;;  %v1399_v35 = vadd.f32 %v2580_v0, %v1379_v40 }
 0x1a9   :  { %v1447_v55 = vadd.f32 %v2153_v42, %v1399_v35 }
 0x1ab   :  { %v1463_v44 = vmax.f32 %v1447_v55, 0.0 }
 0x1ad   :  { %v1479_v4 = vpack.c.bf16 %v1463_v44, %v1463_v44 }
 0x1af   :  { %1496 = vst.msk [vmem:[%s2702_s4 + $0x3c] sm:$0xf] %vm1480_vm1, %v1479_v4 }

// kernel: resnet_forward.27
= control target key start
LH: loop header
LB: loop body
LE: loop exit
PB: predicated region body
PF: predicated region fallthrough
CT: control target
= control target key end

     0   :  { %vm45_vm0 = vcmask 130048   ;;  %vm499_vm1 = vcmask 257024   ;;  %s849_s1 = inlined_call_operand.vmem [shape: bf16[9,16,32], index: 1, kind: input, shape index: {}]   ;;  %s850_s0 = inlined_call_operand.vmem [shape: bf16[9,32,16], index: 0, kind: input, shape index: {}]   ;;  %s851_s2 = inlined_call_operand.vmem [shape: f32[1,32], index: 2, kind: input, shape index: {}]   ;;  %s852_s3 = inlined_call_operand.vmem [shape: bf16[32,32], index: 3, kind: output, shape index: {}]  }
   0x1   :  { %v687_v0 = vld [vmem:[%s849_s1 + $0x8] sm:$0xff]  ;;  %v685_v1 = vld [vmem:[%s850_s0 + $0x10] sm:$0xff]  ;;  %v686_v2 = vld [vmem:[%s850_s0 + $0x18] sm:$0xff] }
   0x2   :  { %v684_v3 = vld [vmem:[%s849_s1] sm:$0xff]  ;;  %v690_v4 = vld [vmem:[%s849_s1 + $0x10] sm:$0xff]  ;;  %v693_v5 = vld [vmem:[%s849_s1 + $0x18] sm:$0xff]  ;;  %59 = vmatpush.bf16.msra.mxu0 %v687_v0  ;;  %709 = vmatpush.bf16.msra.mxu1 %v687_v0 }
   0x3   :  { %v688_v6 = vld [vmem:[%s850_s0 + $0x20] sm:$0xff]  ;;  %149 = vmatpush.bf16.msra.mxu2 %v690_v4  ;;  %v691_v8 = vld [vmem:[%s850_s0 + $0x30] sm:$0xff]  ;;  %v705_v10 = vld [vmem:[%s849_s1 + $0x38] sm:$0xff]  ;;  %202 = vmatpush.bf16.msra.mxu3 %v693_v5 }
   0x4   :  { %v696_v7 = vld [vmem:[%s849_s1 + $0x20] sm:$0xff]  ;;  %v702_v9 = vld [vmem:[%s849_s1 + $0x30] sm:$0xff]  ;;  %v699_v11 = vld [vmem:[%s849_s1 + $0x28] sm:$0xff] }
   0x5   :  { %526 = vmatmul.msk.bf16.vlgmr.msra.gmra.mxu0 %vm45_vm0, %v685_v1  ;;  %527 = vmatmul.msk.bf16.vlgmr.msra.gmra.mxu1 %vm45_vm0, %v686_v2  ;;  %v708_v12 = vld [vmem:[%s849_s1 + $0x40] sm:$0xff]  ;;  %v689_v15 = vld [vmem:[%s850_s0 + $0x28] sm:$0xff]  ;;  %v692_v16 = vld [vmem:[%s850_s0 + $0x38] sm:$0xff] }
   0x6   :  { %100 = vmatpush.bf16.msrb.mxu1 %v684_v3  ;;  %255 = vmatpush.bf16.msrb.mxu0 %v696_v7  ;;  %v682_v13 = vld [vmem:[%s850_s0] sm:$0xff]  ;;  %v683_v17 = vld [vmem:[%s850_s0 + $0x8] sm:$0xff]  ;;  %v703_v20 = vld [vmem:[%s850_s0 + $0x70] sm:$0xff] }
   0x7   :  { %560 = vmatmul.msk.bf16.vlgmr.msra.gmra.mxu2 %vm45_vm0, %v688_v6  ;;  %414 = vmatpush.bf16.msrb.mxu3 %v705_v10  ;;  %v694_v14 = vld [vmem:[%s850_s0 + $0x40] sm:$0xff]  ;;  %v695_v18 = vld [vmem:[%s850_s0 + $0x48] sm:$0xff]  ;;  %v697_v21 = vld [vmem:[%s850_s0 + $0x50] sm:$0xff] }
   0x8   :  { %580 = vmatmul.msk.bf16.vlgmr.msra.gmra.mxu3 %vm45_vm0, %v691_v8  ;;  %361 = vmatpush.bf16.msrb.mxu2 %v702_v9  ;;  %v700_v19 = vld [vmem:[%s850_s0 + $0x60] sm:$0xff]  ;;  %v701_v23 = vld [vmem:[%s850_s0 + $0x68] sm:$0xff]  ;;  %v704_v24 = vld [vmem:[%s850_s0 + $0x78] sm:$0xff] }
   0x9   :  { %v706_v22 = vld [vmem:[%s850_s0 + $0x80] sm:$0xff]  ;;  %v698_v25 = vld [vmem:[%s850_s0 + $0x58] sm:$0xff]  ;;  %v707_v26 = vld [vmem:[%s850_s0 + $0x88] sm:$0xff] }
   0xa   :  { %308 = vmatpush.bf16.msra.mxu1 %v699_v11  ;;  %467 = vmatpush.bf16.msra.mxu0 %v708_v12  ;;  %v710_v62 = vld [vmem:[%s851_s2] ss:$0 sm:$0xff] }
  0x15   :  { %540 = vmatmul.msk.bf16.vlgmr.msrb.gmra.mxu1 %vm45_vm0, %v682_v13  ;;  %600 = vmatmul.msk.bf16.vlgmr.msrb.gmra.mxu0 %vm45_vm0, %v694_v14 }
  0x17   :  { %561 = vmatmul.msk.bf16.gmra.mxu2 %vm45_vm0, %v689_v15 }
  0x18   :  { %581 = vmatmul.msk.bf16.gmra.mxu3 %vm45_vm0, %v692_v16 }
  0x25   :  { %541 = vmatmul.msk.bf16.gmra.mxu1 %vm45_vm0, %v683_v17  ;;  %601 = vmatmul.msk.bf16.gmra.mxu0 %vm45_vm0, %v695_v18 }
  0x27   :  { %640 = vmatmul.msk.bf16.vlgmr.msrb.gmra.mxu2 %vm45_vm0, %v700_v19 }
  0x28   :  { %660 = vmatmul.msk.bf16.vlgmr.msrb.gmra.mxu3 %vm45_vm0, %v703_v20 }
  0x35   :  { %620 = vmatmul.msk.bf16.vlgmr.msra.gmra.mxu1 %vm45_vm0, %v697_v21  ;;  %680 = vmatmul.msk.bf16.vlgmr.msra.gmra.mxu0 %vm45_vm0, %v706_v22 }
  0x37   :  { %641 = vmatmul.msk.bf16.gmra.mxu2 %vm45_vm0, %v701_v23 }
  0x38   :  { %661 = vmatmul.msk.bf16.gmra.mxu3 %vm45_vm0, %v704_v24 }
  0x45   :  { %621 = vmatmul.msk.bf16.gmra.mxu1 %vm45_vm0, %v698_v25  ;;  %681 = vmatmul.msk.bf16.gmra.mxu0 %vm45_vm0, %v707_v26 }
  0x82   :  { %v61_v27 = vpop.f32.mrf.mxu0  ;;  %v66_v28 = vpop.f32.mrf.mxu1 }
  0x8a   :  { %v151_v29 = vpop.f32.mrf.mxu2  ;;  %v63_v30 = vpop.f32.mrf.mxu0 }
  0x8b   :  { %v68_v31 = vpop.f32.mrf.mxu1  ;;  %v204_v32 = vpop.f32.mrf.mxu3 }
  0x92   :  { %v153_v33 = vpop.f32.mrf.mxu2  ;;  %v257_v35 = vpop.f32.mrf.mxu0 }
  0x93   :  { %v102_v34 = vpop.f32.mrf.mxu1  ;;  %v206_v36 = vpop.f32.mrf.mxu3 }
  0x94   :  { %v103_v44 = vadd.f32 %v102_v34, %v61_v27 }
  0x96   :  { %v161_v46 = vadd.f32 %v151_v29, %v103_v44 }
  0x98   :  { %v214_v49 = vadd.f32 %v204_v32, %v161_v46 }
  0x9a   :  { %v156_v37 = vpop.f32.mrf.mxu2  ;;  %v259_v39 = vpop.f32.mrf.mxu0  ;;  %v267_v53 = vadd.f32 %v257_v35, %v214_v49 }
  0x9b   :  { %v104_v38 = vpop.f32.mrf.mxu1  ;;  %v209_v40 = vpop.f32.mrf.mxu3 }
  0x9c   :  { %v105_v50 = vadd.f32 %v104_v38, %v63_v30 }
  0x9e   :  { %v162_v54 = vadd.f32 %v153_v33, %v105_v50 }
  0xa0   :  { %v215_v58 = vadd.f32 %v206_v36, %v162_v54 }
  0xa2   :  { %v262_v42 = vpop.f32.mrf.mxu0  ;;  %v158_v43 = vpop.f32.mrf.mxu2  ;;  %v268_v0 = vadd.f32 %v259_v39, %v215_v58 }
  0xa3   :  { %v107_v41 = vpop.f32.mrf.mxu1  ;;  %v211_v45 = vpop.f32.mrf.mxu3 }
  0xa4   :  { %v108_v59 = vadd.f32 %v107_v41, %v66_v28 }
  0xa6   :  { %v163_v1 = vadd.f32 %v156_v37, %v108_v59 }
  0xa8   :  { %v216_v8 = vadd.f32 %v209_v40, %v163_v1 }
  0xaa   :  { %v264_v48 = vpop.f32.mrf.mxu0  ;;  %v363_v51 = vpop.f32.mrf.mxu2  ;;  %v269_v14 = vadd.f32 %v262_v42, %v216_v8 }
  0xab   :  { %v109_v47 = vpop.f32.mrf.mxu1  ;;  %v416_v52 = vpop.f32.mrf.mxu3 }
  0xac   :  { %v110_v9 = vadd.f32 %v109_v47, %v68_v31 }
  0xae   :  { %v164_v15 = vadd.f32 %v158_v43, %v110_v9 }
  0xb0   :  { %v217_v22 = vadd.f32 %v211_v45, %v164_v15 }
  0xb2   :  { %v469_v56 = vpop.f32.mrf.mxu0  ;;  %v365_v63 = vpop.f32.mrf.mxu2  ;;  %v270_v28 = vadd.f32 %v264_v48, %v217_v22 }
  0xb3   :  { %v310_v55 = vpop.f32.mrf.mxu1  ;;  %v418_v3 = vpop.f32.mrf.mxu3 }
  0xb4   :  { %v320_v57 = vadd.f32 %v310_v55, %v267_v53 }
  0xb6   :  { %v373_v60 = vadd.f32 %v363_v51, %v320_v57 }
  0xb8   :  { %v426_v61 = vadd.f32 %v416_v52, %v373_v60 }
  0xba   :  { %v479_v2 = vadd.f32 %v469_v56, %v426_v61  ;;  %v471_v7 = vpop.f32.mrf.mxu0  ;;  %v368_v17 = vpop.f32.mrf.mxu2 }
  0xbb   :  { %v312_v4 = vpop.f32.mrf.mxu1  ;;  %v421_v21 = vpop.f32.mrf.mxu3 }
  0xbc   :  { %v487_v5 = vadd.f32 %v710_v62, %v479_v2  ;;  %v321_v6 = vadd.f32 %v312_v4, %v268_v0 }
  0xbe   :  { %v491_v10 = vmax.f32 %v487_v5, 0.0  ;;  %v374_v11 = vadd.f32 %v365_v63, %v321_v6 }
  0xc0   :  { %v495_v12 = vpack.c.bf16 %v491_v10, %v491_v10  ;;  %v427_v13 = vadd.f32 %v418_v3, %v374_v11 }
  0xc2   :  { %500 = vst.msk [vmem:[%s852_s3] sm:$0xf] %vm499_vm1, %v495_v12  ;;  %v480_v16 = vadd.f32 %v471_v7, %v427_v13  ;;  %v474_v25 = vpop.f32.mrf.mxu0  ;;  %v370_v33 = vpop.f32.mrf.mxu2 }
  0xc3   :  { %v315_v18 = vpop.f32.mrf.mxu1  ;;  %v423_v36 = vpop.f32.mrf.mxu3 }
  0xc4   :  { %v488_v19 = vadd.f32 %v710_v62, %v480_v16  ;;  %v322_v20 = vadd.f32 %v315_v18, %v269_v14 }
  0xc6   :  { %v492_v23 = vmax.f32 %v488_v19, 0.0  ;;  %v375_v24 = vadd.f32 %v368_v17, %v322_v20 }
  0xc8   :  { %v496_v26 = vpack.c.bf16 %v492_v23, %v492_v23  ;;  %v428_v27 = vadd.f32 %v421_v21, %v375_v24 }
  0xca   :  { %501 = vst.msk [vmem:[%s852_s3 + $0x4] sm:$0xf] %vm499_vm1, %v496_v26  ;;  %v481_v29 = vadd.f32 %v474_v25, %v428_v27  ;;  %v476_v39 = vpop.f32.mrf.mxu0 }
  0xcb   :  { %v317_v30 = vpop.f32.mrf.mxu1 }
  0xcc   :  { %v489_v31 = vadd.f32 %v710_v62, %v481_v29  ;;  %v323_v32 = vadd.f32 %v317_v30, %v270_v28 }
  0xce   :  { %v493_v34 = vmax.f32 %v489_v31, 0.0  ;;  %v376_v35 = vadd.f32 %v370_v33, %v323_v32 }
  0xd0   :  { %v497_v37 = vpack.c.bf16 %v493_v34, %v493_v34  ;;  %v429_v38 = vadd.f32 %v423_v36, %v376_v35 }
  0xd2   :  { %502 = vst.msk [vmem:[%s852_s3 + $0x8] sm:$0xf] %vm499_vm1, %v497_v37  ;;  %v482_v40 = vadd.f32 %v476_v39, %v429_v38 }
  0xd4   :  { %v490_v41 = vadd.f32 %v710_v62, %v482_v40 }
  0xd6   :  { %v494_v42 = vmax.f32 %v490_v41, 0.0 }
  0xd8   :  { %v498_v43 = vpack.c.bf16 %v494_v42, %v494_v42 }
  0xda   :  { %503 = vst.msk [vmem:[%s852_s3 + $0xc] sm:$0xf] %vm499_vm1, %v498_v43 }

// kernel: resnet_forward.28
= control target key start
LH: loop header
LB: loop body
LE: loop exit
PB: predicated region body
PF: predicated region fallthrough
CT: control target
= control target key end

     0   :  { %vm41_vm0 = vcmask 130048   ;;  %vm71_vm1 = vcmask 257024   ;;  %s143_s1 = inlined_call_operand.vmem [shape: bf16[1,16,32], index: 1, kind: input, shape index: {}]   ;;  %s144_s0 = inlined_call_operand.vmem [shape: bf16[1,32,16], index: 0, kind: input, shape index: {}]   ;;  %s145_s2 = inlined_call_operand.vmem [shape: f32[1,32], index: 2, kind: input, shape index: {}]   ;;  %s146_s3 = inlined_call_operand.vmem [shape: bf16[32,32], index: 3, kind: output, shape index: {}]  }
   0x1   :  { %v96_v0 = vld [vmem:[%s143_s1] sm:$0xff]  ;;  %v95_v2 = vld [vmem:[%s144_s0 + $0x8] sm:$0xff] }
   0x2   :  { %v94_v1 = vld [vmem:[%s144_s0] sm:$0xff]  ;;  %55 = vmatpush.bf16.msra.mxu0 %v96_v0  ;;  %97 = vmatpush.bf16.msra.mxu1 %v96_v0 }
   0x3   :  { %v98_v3 = vld [vmem:[%s145_s2] ss:$0 sm:$0xff] }
   0x5   :  { %92 = vmatmul.msk.bf16.vlgmr.msra.gmra.mxu0 %vm41_vm0, %v94_v1  ;;  %93 = vmatmul.msk.bf16.vlgmr.msra.gmra.mxu1 %vm41_vm0, %v95_v2 }
  0x82   :  { %v57_v4 = vpop.f32.mrf.mxu0  ;;  %v62_v5 = vpop.f32.mrf.mxu1 }
  0x83   :  { %v58_v6 = vadd.f32 %v98_v3, %v57_v4  ;;  %v63_v7 = vadd.f32 %v98_v3, %v62_v5 }
  0x85   :  { %v67_v8 = vpack.c.bf16 %v58_v6, %v58_v6  ;;  %v69_v9 = vpack.c.bf16 %v63_v7, %v63_v7 }
  0x87   :  { %72 = vst.msk [vmem:[%s146_s3] sm:$0xf] %vm71_vm1, %v67_v8 }
  0x88   :  { %74 = vst.msk [vmem:[%s146_s3 + $0x8] sm:$0xf] %vm71_vm1, %v69_v9 }
  0x8a   :  { %v59_v10 = vpop.f32.mrf.mxu0  ;;  %v64_v11 = vpop.f32.mrf.mxu1 }
  0x8b   :  { %v60_v12 = vadd.f32 %v98_v3, %v59_v10  ;;  %v65_v13 = vadd.f32 %v98_v3, %v64_v11 }
  0x8d   :  { %v68_v14 = vpack.c.bf16 %v60_v12, %v60_v12  ;;  %v70_v15 = vpack.c.bf16 %v65_v13, %v65_v13 }
  0x8f   :  { %73 = vst.msk [vmem:[%s146_s3 + $0x4] sm:$0xf] %vm71_vm1, %v68_v14 }
  0x90   :  { %75 = vst.msk [vmem:[%s146_s3 + $0xc] sm:$0xf] %vm71_vm1, %v70_v15 }

// kernel: resnet_forward.30
= control target key start
LH: loop header
LB: loop body
LE: loop exit
PB: predicated region body
PF: predicated region fallthrough
CT: control target
= control target key end

     0   :  { %vm55_vm0 = vcmask 261120   ;;  %vm571_vm1 = vcmask 257024   ;;  %s1010_s1 = inlined_call_operand.vmem [shape: bf16[9,32,32], index: 1, kind: input, shape index: {}]   ;;  %s1011_s0 = inlined_call_operand.vmem [shape: bf16[9,32,32], index: 0, kind: input, shape index: {}]   ;;  %s1012_s2 = inlined_call_operand.vmem [shape: f32[1,32], index: 2, kind: input, shape index: {}]   ;;  %s1013_s3 = inlined_call_operand.vmem [shape: bf16[32,32], index: 3, kind: output, shape index: {}]  }
   0x1   :  { %v813_v0 = vld [vmem:[%s1010_s1 + $0x18] sm:$0xff]  ;;  %v817_v1 = vld [vmem:[%s1010_s1 + $0x28] sm:$0xff]  ;;  %v812_v3 = vld [vmem:[%s1010_s1 + $0x10] sm:$0xff] }
   0x2   :  { %v821_v2 = vld [vmem:[%s1010_s1 + $0x38] sm:$0xff]  ;;  %68 = vmatpush.bf16.msra.mxu0 %v813_v0  ;;  %842 = vmatpush.bf16.msra.mxu1 %v813_v0  ;;  %v809_v4 = vld [vmem:[%s1010_s1 + $0x8] sm:$0xff]  ;;  %v816_v5 = vld [vmem:[%s1010_s1 + $0x20] sm:$0xff] }
   0x3   :  { %172 = vmatpush.bf16.msra.mxu2 %v817_v1  ;;  %233 = vmatpush.bf16.msra.mxu3 %v821_v2  ;;  %v820_v6 = vld [vmem:[%s1010_s1 + $0x30] sm:$0xff]  ;;  %v825_v7 = vld [vmem:[%s1010_s1 + $0x48] sm:$0xff]  ;;  %v811_v9 = vld [vmem:[%s1011_s0 + $0x18] sm:$0xff] }
   0x4   :  { %v810_v8 = vld [vmem:[%s1011_s0 + $0x10] sm:$0xff]  ;;  %v814_v10 = vld [vmem:[%s1011_s0 + $0x20] sm:$0xff]  ;;  %v837_v11 = vld [vmem:[%s1010_s1 + $0x78] sm:$0xff] }
   0x5   :  { %v818_v12 = vld [vmem:[%s1011_s0 + $0x30] sm:$0xff]  ;;  %v808_v13 = vld [vmem:[%s1010_s1] sm:$0xff]  ;;  %v833_v14 = vld [vmem:[%s1010_s1 + $0x68] sm:$0xff] }
   0x6   :  { %69 = vmatpush.bf16.msra.mxu0 %v812_v3  ;;  %843 = vmatpush.bf16.msra.mxu1 %v812_v3  ;;  %v824_v15 = vld [vmem:[%s1010_s1 + $0x40] sm:$0xff]  ;;  %v829_v16 = vld [vmem:[%s1010_s1 + $0x58] sm:$0xff]  ;;  %v841_v17 = vld [vmem:[%s1010_s1 + $0x88] sm:$0xff] }
   0x7   :  { %173 = vmatpush.bf16.msra.mxu2 %v816_v5  ;;  %234 = vmatpush.bf16.msra.mxu3 %v820_v6  ;;  %v836_v18 = vld [vmem:[%s1010_s1 + $0x70] sm:$0xff]  ;;  %v832_v19 = vld [vmem:[%s1010_s1 + $0x60] sm:$0xff]  ;;  %v815_v24 = vld [vmem:[%s1011_s0 + $0x28] sm:$0xff] }
   0x8   :  { %v828_v20 = vld [vmem:[%s1010_s1 + $0x50] sm:$0xff]  ;;  %v840_v21 = vld [vmem:[%s1010_s1 + $0x80] sm:$0xff]  ;;  %v819_v25 = vld [vmem:[%s1011_s0 + $0x38] sm:$0xff] }
   0x9   :  { %604 = vmatmul.msk.bf16.vlgmr.msra.gmra.mxu0 %vm55_vm0, %v810_v8  ;;  %605 = vmatmul.msk.bf16.vlgmr.msra.gmra.mxu1 %vm55_vm0, %v811_v9  ;;  %v806_v22 = vld [vmem:[%s1011_s0] sm:$0xff]  ;;  %v807_v26 = vld [vmem:[%s1011_s0 + $0x8] sm:$0xff]  ;;  %v834_v29 = vld [vmem:[%s1011_s0 + $0x70] sm:$0xff] }
   0xa   :  { %115 = vmatpush.bf16.msrb.mxu1 %v809_v4  ;;  %294 = vmatpush.bf16.msrb.mxu0 %v825_v7  ;;  %v822_v23 = vld [vmem:[%s1011_s0 + $0x40] sm:$0xff]  ;;  %v823_v27 = vld [vmem:[%s1011_s0 + $0x48] sm:$0xff]  ;;  %v826_v30 = vld [vmem:[%s1011_s0 + $0x50] sm:$0xff] }
   0xb   :  { %648 = vmatmul.msk.bf16.vlgmr.msra.gmra.mxu2 %vm55_vm0, %v814_v10  ;;  %477 = vmatpush.bf16.msrb.mxu3 %v837_v11  ;;  %v830_v28 = vld [vmem:[%s1011_s0 + $0x60] sm:$0xff]  ;;  %v831_v32 = vld [vmem:[%s1011_s0 + $0x68] sm:$0xff]  ;;  %v835_v33 = vld [vmem:[%s1011_s0 + $0x78] sm:$0xff] }
   0xc   :  { %674 = vmatmul.msk.bf16.vlgmr.msra.gmra.mxu3 %vm55_vm0, %v818_v12  ;;  %416 = vmatpush.bf16.msrb.mxu2 %v833_v14  ;;  %v838_v31 = vld [vmem:[%s1011_s0 + $0x80] sm:$0xff]  ;;  %v827_v34 = vld [vmem:[%s1011_s0 + $0x58] sm:$0xff]  ;;  %v839_v35 = vld [vmem:[%s1011_s0 + $0x88] sm:$0xff] }
   0xd   :  { %v844_v7 = vld [vmem:[%s1012_s2] ss:$0 sm:$0xff] }
   0xe   :  { %116 = vmatpush.bf16.msrb.mxu1 %v808_v13  ;;  %295 = vmatpush.bf16.msrb.mxu0 %v824_v15 }
   0xf   :  { %478 = vmatpush.bf16.msrb.mxu3 %v836_v18 }
  0x10   :  { %417 = vmatpush.bf16.msrb.mxu2 %v832_v19 }
  0x12   :  { %355 = vmatpush.bf16.msra.mxu1 %v829_v16  ;;  %538 = vmatpush.bf16.msra.mxu0 %v841_v17 }
  0x16   :  { %356 = vmatpush.bf16.msra.mxu1 %v828_v20  ;;  %539 = vmatpush.bf16.msra.mxu0 %v840_v21 }
  0x19   :  { %622 = vmatmul.msk.bf16.vlgmr.msrb.gmra.mxu1 %vm55_vm0, %v806_v22  ;;  %700 = vmatmul.msk.bf16.vlgmr.msrb.gmra.mxu0 %vm55_vm0, %v822_v23 }
  0x1b   :  { %649 = vmatmul.msk.bf16.gmra.mxu2 %vm55_vm0, %v815_v24 }
  0x1c   :  { %675 = vmatmul.msk.bf16.gmra.mxu3 %vm55_vm0, %v819_v25 }
  0x29   :  { %623 = vmatmul.msk.bf16.gmra.mxu1 %vm55_vm0, %v807_v26  ;;  %701 = vmatmul.msk.bf16.gmra.mxu0 %vm55_vm0, %v823_v27 }
  0x2b   :  { %752 = vmatmul.msk.bf16.vlgmr.msrb.gmra.mxu2 %vm55_vm0, %v830_v28 }
  0x2c   :  { %778 = vmatmul.msk.bf16.vlgmr.msrb.gmra.mxu3 %vm55_vm0, %v834_v29 }
  0x39   :  { %726 = vmatmul.msk.bf16.vlgmr.msra.gmra.mxu1 %vm55_vm0, %v826_v30  ;;  %804 = vmatmul.msk.bf16.vlgmr.msra.gmra.mxu0 %vm55_vm0, %v838_v31 }
  0x3b   :  { %753 = vmatmul.msk.bf16.gmra.mxu2 %vm55_vm0, %v831_v32 }
  0x3c   :  { %779 = vmatmul.msk.bf16.gmra.mxu3 %vm55_vm0, %v835_v33 }
  0x49   :  { %727 = vmatmul.msk.bf16.gmra.mxu1 %vm55_vm0, %v827_v34  ;;  %805 = vmatmul.msk.bf16.gmra.mxu0 %vm55_vm0, %v839_v35 }
  0x86   :  { %v71_v36 = vpop.f32.mrf.mxu0  ;;  %v76_v37 = vpop.f32.mrf.mxu1 }
  0x8e   :  { %v175_v38 = vpop.f32.mrf.mxu2  ;;  %v73_v39 = vpop.f32.mrf.mxu0 }
  0x8f   :  { %v78_v40 = vpop.f32.mrf.mxu1  ;;  %v236_v41 = vpop.f32.mrf.mxu3 }
  0x96   :  { %v177_v42 = vpop.f32.mrf.mxu2  ;;  %v297_v44 = vpop.f32.mrf.mxu0 }
  0x97   :  { %v118_v43 = vpop.f32.mrf.mxu1  ;;  %v238_v45 = vpop.f32.mrf.mxu3 }
  0x98   :  { %v119_v53 = vadd.f32 %v118_v43, %v71_v36 }
  0x9a   :  { %v185_v55 = vadd.f32 %v175_v38, %v119_v53 }
  0x9c   :  { %v246_v58 = vadd.f32 %v236_v41, %v185_v55 }
  0x9e   :  { %v180_v46 = vpop.f32.mrf.mxu2  ;;  %v299_v48 = vpop.f32.mrf.mxu0  ;;  %v307_v62 = vadd.f32 %v297_v44, %v246_v58 }
  0x9f   :  { %v120_v47 = vpop.f32.mrf.mxu1  ;;  %v241_v49 = vpop.f32.mrf.mxu3 }
  0xa0   :  { %v121_v59 = vadd.f32 %v120_v47, %v73_v39 }
  0xa2   :  { %v186_v63 = vadd.f32 %v177_v42, %v121_v59 }
  0xa4   :  { %v247_v3 = vadd.f32 %v238_v45, %v186_v63 }
  0xa6   :  { %v302_v51 = vpop.f32.mrf.mxu0  ;;  %v182_v52 = vpop.f32.mrf.mxu2  ;;  %v308_v9 = vadd.f32 %v299_v48, %v247_v3 }
  0xa7   :  { %v123_v50 = vpop.f32.mrf.mxu1  ;;  %v243_v54 = vpop.f32.mrf.mxu3 }
  0xa8   :  { %v124_v4 = vadd.f32 %v123_v50, %v76_v37 }
  0xaa   :  { %v187_v10 = vadd.f32 %v180_v46, %v124_v4 }
  0xac   :  { %v248_v17 = vadd.f32 %v241_v49, %v187_v10 }
  0xae   :  { %v304_v57 = vpop.f32.mrf.mxu0  ;;  %v419_v60 = vpop.f32.mrf.mxu2  ;;  %v309_v23 = vadd.f32 %v302_v51, %v248_v17 }
  0xaf   :  { %v125_v56 = vpop.f32.mrf.mxu1  ;;  %v480_v61 = vpop.f32.mrf.mxu3 }
  0xb0   :  { %v126_v18 = vadd.f32 %v125_v56, %v78_v40 }
  0xb2   :  { %v188_v24 = vadd.f32 %v182_v52, %v126_v18 }
  0xb4   :  { %v249_v31 = vadd.f32 %v243_v54, %v188_v24 }
  0xb6   :  { %v541_v1 = vpop.f32.mrf.mxu0  ;;  %v421_v8 = vpop.f32.mrf.mxu2  ;;  %v310_v37 = vadd.f32 %v304_v57, %v249_v31 }
  0xb7   :  { %v358_v0 = vpop.f32.mrf.mxu1  ;;  %v482_v12 = vpop.f32.mrf.mxu3 }
  0xb8   :  { %v368_v2 = vadd.f32 %v358_v0, %v307_v62 }
  0xba   :  { %v429_v5 = vadd.f32 %v419_v60, %v368_v2 }
  0xbc   :  { %v490_v6 = vadd.f32 %v480_v61, %v429_v5 }
  0xbe   :  { %v551_v11 = vadd.f32 %v541_v1, %v490_v6  ;;  %v543_v16 = vpop.f32.mrf.mxu0  ;;  %v424_v26 = vpop.f32.mrf.mxu2 }
  0xbf   :  { %v360_v13 = vpop.f32.mrf.mxu1  ;;  %v485_v30 = vpop.f32.mrf.mxu3 }
  0xc0   :  { %v559_v14 = vadd.f32 %v844_v7, %v551_v11  ;;  %v369_v15 = vadd.f32 %v360_v13, %v308_v9 }
  0xc2   :  { %v563_v19 = vmax.f32 %v559_v14, 0.0  ;;  %v430_v20 = vadd.f32 %v421_v8, %v369_v15 }
  0xc4   :  { %v567_v21 = vpack.c.bf16 %v563_v19, %v563_v19  ;;  %v491_v22 = vadd.f32 %v482_v12, %v430_v20 }
  0xc6   :  { %572 = vst.msk [vmem:[%s1013_s3] sm:$0xf] %vm571_vm1, %v567_v21  ;;  %v552_v25 = vadd.f32 %v543_v16, %v491_v22  ;;  %v546_v34 = vpop.f32.mrf.mxu0  ;;  %v426_v42 = vpop.f32.mrf.mxu2 }
  0xc7   :  { %v363_v27 = vpop.f32.mrf.mxu1  ;;  %v487_v45 = vpop.f32.mrf.mxu3 }
  0xc8   :  { %v560_v28 = vadd.f32 %v844_v7, %v552_v25  ;;  %v370_v29 = vadd.f32 %v363_v27, %v309_v23 }
  0xca   :  { %v564_v32 = vmax.f32 %v560_v28, 0.0  ;;  %v431_v33 = vadd.f32 %v424_v26, %v370_v29 }
  0xcc   :  { %v568_v35 = vpack.c.bf16 %v564_v32, %v564_v32  ;;  %v492_v36 = vadd.f32 %v485_v30, %v431_v33 }
  0xce   :  { %573 = vst.msk [vmem:[%s1013_s3 + $0x4] sm:$0xf] %vm571_vm1, %v568_v35  ;;  %v553_v38 = vadd.f32 %v546_v34, %v492_v36  ;;  %v548_v48 = vpop.f32.mrf.mxu0 }
  0xcf   :  { %v365_v39 = vpop.f32.mrf.mxu1 }
  0xd0   :  { %v561_v40 = vadd.f32 %v844_v7, %v553_v38  ;;  %v371_v41 = vadd.f32 %v365_v39, %v310_v37 }
  0xd2   :  { %v565_v43 = vmax.f32 %v561_v40, 0.0  ;;  %v432_v44 = vadd.f32 %v426_v42, %v371_v41 }
  0xd4   :  { %v569_v46 = vpack.c.bf16 %v565_v43, %v565_v43  ;;  %v493_v47 = vadd.f32 %v487_v45, %v432_v44 }
  0xd6   :  { %574 = vst.msk [vmem:[%s1013_s3 + $0x8] sm:$0xf] %vm571_vm1, %v569_v46  ;;  %v554_v49 = vadd.f32 %v548_v48, %v493_v47 }
  0xd8   :  { %v562_v50 = vadd.f32 %v844_v7, %v554_v49 }
  0xda   :  { %v566_v51 = vmax.f32 %v562_v50, 0.0 }
  0xdc   :  { %v570_v52 = vpack.c.bf16 %v566_v51, %v566_v51 }
  0xde   :  { %575 = vst.msk [vmem:[%s1013_s3 + $0xc] sm:$0xf] %vm571_vm1, %v570_v52 }

// kernel: resnet_forward.29
= control target key start
LH: loop header
LB: loop body
LE: loop exit
PB: predicated region body
PF: predicated region fallthrough
CT: control target
= control target key end

     0   :  { %vm58_vm0 = vcmask 261120   ;;  %vm586_vm1 = vcmask 257024   ;;  %s1045_s1 = inlined_call_operand.vmem [shape: bf16[9,32,32], index: 1, kind: input, shape index: {}]   ;;  %s1046_s0 = inlined_call_operand.vmem [shape: bf16[9,32,32], index: 0, kind: input, shape index: {}]   ;;  %s1047_s2 = inlined_call_operand.vmem [shape: f32[1,32], index: 2, kind: input, shape index: {}]   ;;  %s1048_s3 = inlined_call_operand.vmem [shape: bf16[32,32], index: 3, kind: input, shape index: {}]   ;;  %s1049_s4 = inlined_call_operand.vmem [shape: bf16[32,32], index: 4, kind: output, shape index: {}]  }
   0x1   :  { %v828_v0 = vld [vmem:[%s1045_s1 + $0x18] sm:$0xff]  ;;  %v832_v1 = vld [vmem:[%s1045_s1 + $0x28] sm:$0xff]  ;;  %v827_v3 = vld [vmem:[%s1045_s1 + $0x10] sm:$0xff] }
   0x2   :  { %v836_v2 = vld [vmem:[%s1045_s1 + $0x38] sm:$0xff]  ;;  %71 = vmatpush.bf16.msra.mxu0 %v828_v0  ;;  %866 = vmatpush.bf16.msra.mxu1 %v828_v0  ;;  %v824_v4 = vld [vmem:[%s1045_s1 + $0x8] sm:$0xff]  ;;  %v831_v5 = vld [vmem:[%s1045_s1 + $0x20] sm:$0xff] }
   0x3   :  { %175 = vmatpush.bf16.msra.mxu2 %v832_v1  ;;  %236 = vmatpush.bf16.msra.mxu3 %v836_v2  ;;  %v835_v6 = vld [vmem:[%s1045_s1 + $0x30] sm:$0xff]  ;;  %v840_v7 = vld [vmem:[%s1045_s1 + $0x48] sm:$0xff]  ;;  %v826_v9 = vld [vmem:[%s1046_s0 + $0x18] sm:$0xff] }
   0x4   :  { %v825_v8 = vld [vmem:[%s1046_s0 + $0x10] sm:$0xff]  ;;  %v829_v10 = vld [vmem:[%s1046_s0 + $0x20] sm:$0xff]  ;;  %v852_v11 = vld [vmem:[%s1045_s1 + $0x78] sm:$0xff] }
   0x5   :  { %v833_v12 = vld [vmem:[%s1046_s0 + $0x30] sm:$0xff]  ;;  %v823_v13 = vld [vmem:[%s1045_s1] sm:$0xff]  ;;  %v848_v14 = vld [vmem:[%s1045_s1 + $0x68] sm:$0xff] }
   0x6   :  { %72 = vmatpush.bf16.msra.mxu0 %v827_v3  ;;  %867 = vmatpush.bf16.msra.mxu1 %v827_v3  ;;  %v839_v15 = vld [vmem:[%s1045_s1 + $0x40] sm:$0xff]  ;;  %v844_v16 = vld [vmem:[%s1045_s1 + $0x58] sm:$0xff]  ;;  %v856_v17 = vld [vmem:[%s1045_s1 + $0x88] sm:$0xff] }
   0x7   :  { %176 = vmatpush.bf16.msra.mxu2 %v831_v5  ;;  %237 = vmatpush.bf16.msra.mxu3 %v835_v6  ;;  %v851_v18 = vld [vmem:[%s1045_s1 + $0x70] sm:$0xff]  ;;  %v847_v19 = vld [vmem:[%s1045_s1 + $0x60] sm:$0xff]  ;;  %v830_v24 = vld [vmem:[%s1046_s0 + $0x28] sm:$0xff] }
   0x8   :  { %v843_v20 = vld [vmem:[%s1045_s1 + $0x50] sm:$0xff]  ;;  %v855_v21 = vld [vmem:[%s1045_s1 + $0x80] sm:$0xff]  ;;  %v834_v25 = vld [vmem:[%s1046_s0 + $0x38] sm:$0xff] }
   0x9   :  { %619 = vmatmul.msk.bf16.vlgmr.msra.gmra.mxu0 %vm58_vm0, %v825_v8  ;;  %620 = vmatmul.msk.bf16.vlgmr.msra.gmra.mxu1 %vm58_vm0, %v826_v9  ;;  %v821_v22 = vld [vmem:[%s1046_s0] sm:$0xff]  ;;  %v822_v26 = vld [vmem:[%s1046_s0 + $0x8] sm:$0xff]  ;;  %v849_v29 = vld [vmem:[%s1046_s0 + $0x70] sm:$0xff] }
   0xa   :  { %118 = vmatpush.bf16.msrb.mxu1 %v824_v4  ;;  %297 = vmatpush.bf16.msrb.mxu0 %v840_v7  ;;  %v837_v23 = vld [vmem:[%s1046_s0 + $0x40] sm:$0xff]  ;;  %v838_v27 = vld [vmem:[%s1046_s0 + $0x48] sm:$0xff]  ;;  %v841_v30 = vld [vmem:[%s1046_s0 + $0x50] sm:$0xff] }
   0xb   :  { %663 = vmatmul.msk.bf16.vlgmr.msra.gmra.mxu2 %vm58_vm0, %v829_v10  ;;  %480 = vmatpush.bf16.msrb.mxu3 %v852_v11  ;;  %v845_v28 = vld [vmem:[%s1046_s0 + $0x60] sm:$0xff]  ;;  %v846_v32 = vld [vmem:[%s1046_s0 + $0x68] sm:$0xff]  ;;  %v850_v33 = vld [vmem:[%s1046_s0 + $0x78] sm:$0xff] }
   0xc   :  { %689 = vmatmul.msk.bf16.vlgmr.msra.gmra.mxu3 %vm58_vm0, %v833_v12  ;;  %419 = vmatpush.bf16.msrb.mxu2 %v848_v14  ;;  %v853_v31 = vld [vmem:[%s1046_s0 + $0x80] sm:$0xff]  ;;  %v842_v34 = vld [vmem:[%s1046_s0 + $0x58] sm:$0xff]  ;;  %v854_v35 = vld [vmem:[%s1046_s0 + $0x88] sm:$0xff] }
   0xd   :  { %v858_v6 = vld [vmem:[%s1048_s3] sm:$0xff]  }
   0xe   :  { %119 = vmatpush.bf16.msrb.mxu1 %v823_v13  ;;  %298 = vmatpush.bf16.msrb.mxu0 %v839_v15  ;;  %v868_v8 = vld [vmem:[%s1047_s2] ss:$0 sm:$0xff]  ;;  %v859_v13 = vunpack.c.l.bf16 %v858_v6 }
   0xf   :  { %481 = vmatpush.bf16.msrb.mxu3 %v851_v18 }
  0x10   :  { %420 = vmatpush.bf16.msrb.mxu2 %v847_v19 }
  0x12   :  { %358 = vmatpush.bf16.msra.mxu1 %v844_v16  ;;  %541 = vmatpush.bf16.msra.mxu0 %v856_v17 }
  0x16   :  { %359 = vmatpush.bf16.msra.mxu1 %v843_v20  ;;  %542 = vmatpush.bf16.msra.mxu0 %v855_v21 }
  0x19   :  { %637 = vmatmul.msk.bf16.vlgmr.msrb.gmra.mxu1 %vm58_vm0, %v821_v22  ;;  %715 = vmatmul.msk.bf16.vlgmr.msrb.gmra.mxu0 %vm58_vm0, %v837_v23 }
  0x1b   :  { %664 = vmatmul.msk.bf16.gmra.mxu2 %vm58_vm0, %v830_v24 }
  0x1c   :  { %690 = vmatmul.msk.bf16.gmra.mxu3 %vm58_vm0, %v834_v25  ;;  %v860_v25 = vunpack.c.h.bf16 %v858_v6 }
  0x29   :  { %638 = vmatmul.msk.bf16.gmra.mxu1 %vm58_vm0, %v822_v26  ;;  %716 = vmatmul.msk.bf16.gmra.mxu0 %vm58_vm0, %v838_v27 }
  0x2b   :  { %767 = vmatmul.msk.bf16.vlgmr.msrb.gmra.mxu2 %vm58_vm0, %v845_v28 }
  0x2c   :  { %793 = vmatmul.msk.bf16.vlgmr.msrb.gmra.mxu3 %vm58_vm0, %v849_v29 }
  0x39   :  { %741 = vmatmul.msk.bf16.vlgmr.msra.gmra.mxu1 %vm58_vm0, %v841_v30  ;;  %819 = vmatmul.msk.bf16.vlgmr.msra.gmra.mxu0 %vm58_vm0, %v853_v31 }
  0x3b   :  { %768 = vmatmul.msk.bf16.gmra.mxu2 %vm58_vm0, %v846_v32 }
  0x3c   :  { %794 = vmatmul.msk.bf16.gmra.mxu3 %vm58_vm0, %v850_v33 }
  0x49   :  { %742 = vmatmul.msk.bf16.gmra.mxu1 %vm58_vm0, %v842_v34  ;;  %820 = vmatmul.msk.bf16.gmra.mxu0 %vm58_vm0, %v854_v35 }
  0x86   :  { %v74_v36 = vpop.f32.mrf.mxu0  ;;  %v79_v37 = vpop.f32.mrf.mxu1 }
  0x8e   :  { %v178_v38 = vpop.f32.mrf.mxu2  ;;  %v76_v39 = vpop.f32.mrf.mxu0 }
  0x8f   :  { %v81_v40 = vpop.f32.mrf.mxu1  ;;  %v239_v41 = vpop.f32.mrf.mxu3 }
  0x96   :  { %v180_v42 = vpop.f32.mrf.mxu2  ;;  %v300_v44 = vpop.f32.mrf.mxu0 }
  0x97   :  { %v121_v43 = vpop.f32.mrf.mxu1  ;;  %v241_v45 = vpop.f32.mrf.mxu3 }
  0x98   :  { %v122_v53 = vadd.f32 %v121_v43, %v74_v36 }
  0x9a   :  { %v188_v55 = vadd.f32 %v178_v38, %v122_v53 }
  0x9c   :  { %v249_v58 = vadd.f32 %v239_v41, %v188_v55 }
  0x9e   :  { %v183_v46 = vpop.f32.mrf.mxu2  ;;  %v302_v48 = vpop.f32.mrf.mxu0  ;;  %v310_v62 = vadd.f32 %v300_v44, %v249_v58 }
  0x9f   :  { %v123_v47 = vpop.f32.mrf.mxu1  ;;  %v244_v49 = vpop.f32.mrf.mxu3 }
  0xa0   :  { %v124_v59 = vadd.f32 %v123_v47, %v76_v39  ;;  %v865_v39 = vld [vmem:[%s1048_s3 + $0x8] sm:$0xff]  }
  0xa1   :  { %v864_v58 = vunpack.c.h.bf16 %v865_v39 }
  0xa2   :  { %v189_v63 = vadd.f32 %v180_v42, %v124_v59 }
  0xa4   :  { %v250_v3 = vadd.f32 %v241_v45, %v189_v63  ;;  %v863_v45 = vunpack.c.l.bf16 %v865_v39 }
  0xa6   :  { %v305_v51 = vpop.f32.mrf.mxu0  ;;  %v185_v52 = vpop.f32.mrf.mxu2  ;;  %v311_v10 = vadd.f32 %v302_v48, %v250_v3 }
  0xa7   :  { %v126_v50 = vpop.f32.mrf.mxu1  ;;  %v246_v54 = vpop.f32.mrf.mxu3 }
  0xa8   :  { %v127_v4 = vadd.f32 %v126_v50, %v79_v37 }
  0xaa   :  { %v190_v11 = vadd.f32 %v183_v46, %v127_v4 }
  0xac   :  { %v251_v19 = vadd.f32 %v244_v49, %v190_v11 }
  0xae   :  { %v307_v57 = vpop.f32.mrf.mxu0  ;;  %v422_v60 = vpop.f32.mrf.mxu2  ;;  %v312_v26 = vadd.f32 %v305_v51, %v251_v19 }
  0xaf   :  { %v128_v56 = vpop.f32.mrf.mxu1  ;;  %v483_v61 = vpop.f32.mrf.mxu3 }
  0xb0   :  { %v129_v20 = vadd.f32 %v128_v56, %v81_v40 }
  0xb2   :  { %v191_v27 = vadd.f32 %v185_v52, %v129_v20 }
  0xb4   :  { %v252_v35 = vadd.f32 %v246_v54, %v191_v27 }
  0xb6   :  { %v544_v1 = vpop.f32.mrf.mxu0  ;;  %v424_v9 = vpop.f32.mrf.mxu2  ;;  %v313_v42 = vadd.f32 %v307_v57, %v252_v35 }
  0xb7   :  { %v361_v0 = vpop.f32.mrf.mxu1  ;;  %v485_v14 = vpop.f32.mrf.mxu3 }
  0xb8   :  { %v371_v2 = vadd.f32 %v361_v0, %v310_v62 }
  0xba   :  { %v432_v5 = vadd.f32 %v422_v60, %v371_v2 }
  0xbc   :  { %v493_v7 = vadd.f32 %v483_v61, %v432_v5 }
  0xbe   :  { %v554_v12 = vadd.f32 %v544_v1, %v493_v7  ;;  %v546_v18 = vpop.f32.mrf.mxu0  ;;  %v427_v30 = vpop.f32.mrf.mxu2 }
  0xbf   :  { %v363_v15 = vpop.f32.mrf.mxu1  ;;  %v488_v34 = vpop.f32.mrf.mxu3 }
  0xc0   :  { %v562_v16 = vadd.f32 %v868_v8, %v554_v12  ;;  %v372_v17 = vadd.f32 %v363_v15, %v311_v10 }
  0xc2   :  { %v574_v21 = vadd.f32 %v859_v13, %v562_v16  ;;  %v433_v22 = vadd.f32 %v424_v9, %v372_v17 }
  0xc4   :  { %v578_v23 = vmax.f32 %v574_v21, 0.0  ;;  %v494_v24 = vadd.f32 %v485_v14, %v433_v22 }
  0xc6   :  { %v582_v28 = vpack.c.bf16 %v578_v23, %v578_v23  ;;  %v555_v29 = vadd.f32 %v546_v18, %v494_v24  ;;  %v549_v38 = vpop.f32.mrf.mxu0  ;;  %v429_v49 = vpop.f32.mrf.mxu2 }
  0xc7   :  { %v366_v31 = vpop.f32.mrf.mxu1  ;;  %v490_v52 = vpop.f32.mrf.mxu3 }
  0xc8   :  { %587 = vst.msk [vmem:[%s1049_s4] sm:$0xf] %vm586_vm1, %v582_v28  ;;  %v563_v32 = vadd.f32 %v868_v8, %v555_v29  ;;  %v373_v33 = vadd.f32 %v366_v31, %v312_v26 }
  0xca   :  { %v575_v36 = vadd.f32 %v860_v25, %v563_v32  ;;  %v434_v37 = vadd.f32 %v427_v30, %v373_v33 }
  0xcc   :  { %v579_v40 = vmax.f32 %v575_v36, 0.0  ;;  %v495_v41 = vadd.f32 %v488_v34, %v434_v37 }
  0xce   :  { %v583_v43 = vpack.c.bf16 %v579_v40, %v579_v40  ;;  %v556_v44 = vadd.f32 %v549_v38, %v495_v41  ;;  %v551_v55 = vpop.f32.mrf.mxu0 }
  0xcf   :  { %v368_v46 = vpop.f32.mrf.mxu1 }
  0xd0   :  { %588 = vst.msk [vmem:[%s1049_s4 + $0x4] sm:$0xf] %vm586_vm1, %v583_v43  ;;  %v564_v47 = vadd.f32 %v868_v8, %v556_v44  ;;  %v374_v48 = vadd.f32 %v368_v46, %v313_v42 }
  0xd2   :  { %v576_v50 = vadd.f32 %v863_v45, %v564_v47  ;;  %v435_v51 = vadd.f32 %v429_v49, %v374_v48 }
  0xd4   :  { %v580_v53 = vmax.f32 %v576_v50, 0.0  ;;  %v496_v54 = vadd.f32 %v490_v52, %v435_v51 }
  0xd6   :  { %v584_v56 = vpack.c.bf16 %v580_v53, %v580_v53  ;;  %v557_v57 = vadd.f32 %v551_v55, %v496_v54 }
  0xd8   :  { %589 = vst.msk [vmem:[%s1049_s4 + $0x8] sm:$0xf] %vm586_vm1, %v584_v56  ;;  %v565_v59 = vadd.f32 %v868_v8, %v557_v57 }
  0xda   :  { %v577_v60 = vadd.f32 %v864_v58, %v565_v59 }
  0xdc   :  { %v581_v61 = vmax.f32 %v577_v60, 0.0 }
  0xde   :  { %v585_v62 = vpack.c.bf16 %v581_v61, %v581_v61 }
  0xe0   :  { %590 = vst.msk [vmem:[%s1049_s4 + $0xc] sm:$0xf] %vm586_vm1, %v585_v62 }

// kernel: resnet_forward.33
= control target key start
LH: loop header
LB: loop body
LE: loop exit
PB: predicated region body
PF: predicated region fallthrough
CT: control target
= control target key end

     0   :  { %vm36_vm0 = vcmask 261120   ;;  %vm54_vm1 = vcmask 519168   ;;  %s107_s1 = inlined_call_operand.vmem [shape: bf16[1,32,64], index: 1, kind: input, shape index: {}]   ;;  %s108_s2 = inlined_call_operand.vmem [shape: f32[1,64], index: 2, kind: input, shape index: {}]   ;;  %s109_s0 = inlined_call_operand.vmem [shape: bf16[1,8,32], index: 0, kind: input, shape index: {}]   ;;  %s110_s3 = inlined_call_operand.vmem [shape: bf16[8,64], index: 3, kind: output, shape index: {}]  }
   0x1   :  { %v70_v0 = vld [vmem:[%s107_s1 + $0x8] sm:$0xff]  ;;  %v69_v1 = vld [vmem:[%s107_s1] sm:$0xff] }
   0x2   :  { %46 = vmatpush.bf16.msra.mxu0 %v70_v0  ;;  %v15_v2 = vld [vmem:[%s109_s0] sm:$0xf] }
   0x3   :  { %v71_v3 = vld [vmem:[%s108_s2] ss:$0 sm:$0xff] }
   0x6   :  { %47 = vmatpush.bf16.msra.mxu0 %v69_v1 }
   0x9   :  { %68 = vmatmul.msk.bf16.vlgmr.msra.gmra.mxu0 %vm36_vm0, %v15_v2 }
  0x86   :  { %v49_v4 = vpop.f32.mrf.mxu0 }
  0x87   :  { %v50_v5 = vadd.f32 %v71_v3, %v49_v4 }
  0x89   :  { %v53_v6 = vpack.c.bf16 %v50_v5, %v50_v5 }
  0x8b   :  { %55 = vst.msk [vmem:[%s110_s3] sm:$0xf] %vm54_vm1, %v53_v6 }
  0x8e   :  { %v51_v7 = vpop.f32.mrf.mxu0 }

// kernel: resnet_forward.32
= control target key start
LH: loop header
LB: loop body
LE: loop exit
PB: predicated region body
PF: predicated region fallthrough
CT: control target
= control target key end

     0   :  { %vm39_vm0 = vcmask 261120   ;;  %vm343_vm1 = vcmask 519168   ;;  %s605_s1 = inlined_call_operand.vmem [shape: bf16[9,32,64], index: 1, kind: input, shape index: {}]   ;;  %s606_s0 = inlined_call_operand.vmem [shape: bf16[9,8,32], index: 0, kind: input, shape index: {}]   ;;  %s607_s2 = inlined_call_operand.vmem [shape: f32[1,64], index: 2, kind: input, shape index: {}]   ;;  %s608_s3 = inlined_call_operand.vmem [shape: bf16[8,64], index: 3, kind: output, shape index: {}]  }
   0x1   :  { %v473_v0 = vld [vmem:[%s605_s1 + $0x18] sm:$0xff]  ;;  %v471_v1 = vld [vmem:[%s605_s1 + $0x8] sm:$0xff]  ;;  %v472_v4 = vld [vmem:[%s605_s1 + $0x10] sm:$0xff] }
   0x2   :  { %v475_v2 = vld [vmem:[%s605_s1 + $0x28] sm:$0xff]  ;;  %v477_v3 = vld [vmem:[%s605_s1 + $0x38] sm:$0xff]  ;;  %49 = vmatpush.bf16.msra.mxu0 %v473_v0  ;;  %77 = vmatpush.bf16.msra.mxu1 %v471_v1  ;;  %v470_v5 = vld [vmem:[%s605_s1] sm:$0xff] }
   0x3   :  { %112 = vmatpush.bf16.msra.mxu2 %v475_v2  ;;  %148 = vmatpush.bf16.msra.mxu3 %v477_v3  ;;  %v474_v6 = vld [vmem:[%s605_s1 + $0x20] sm:$0xff]  ;;  %v476_v7 = vld [vmem:[%s605_s1 + $0x30] sm:$0xff]  ;;  %v479_v8 = vld [vmem:[%s605_s1 + $0x48] sm:$0xff] }
   0x4   :  { %v483_v9 = vld [vmem:[%s605_s1 + $0x68] sm:$0xff]  ;;  %v349_v10 = vld [vmem:[%s606_s0 + $0x4] sm:$0xf]  ;;  %v15_v11 = vld [vmem:[%s606_s0] sm:$0xf] }
   0x5   :  { %v372_v12 = vld [vmem:[%s606_s0 + $0x8] sm:$0xf]  ;;  %v386_v13 = vld [vmem:[%s606_s0 + $0xc] sm:$0xf]  ;;  %v485_v14 = vld [vmem:[%s605_s1 + $0x78] sm:$0xff] }
   0x6   :  { %50 = vmatpush.bf16.msra.mxu0 %v472_v4  ;;  %78 = vmatpush.bf16.msra.mxu1 %v470_v5  ;;  %v481_v15 = vld [vmem:[%s605_s1 + $0x58] sm:$0xff]  ;;  %v478_v16 = vld [vmem:[%s605_s1 + $0x40] sm:$0xff]  ;;  %v487_v18 = vld [vmem:[%s605_s1 + $0x88] sm:$0xff] }
   0x7   :  { %113 = vmatpush.bf16.msra.mxu2 %v474_v6  ;;  %149 = vmatpush.bf16.msra.mxu3 %v476_v7  ;;  %v482_v17 = vld [vmem:[%s605_s1 + $0x60] sm:$0xff]  ;;  %v484_v19 = vld [vmem:[%s605_s1 + $0x70] sm:$0xff]  ;;  %v428_v24 = vld [vmem:[%s606_s0 + $0x18] sm:$0xf] }
   0x8   :  { %v480_v20 = vld [vmem:[%s605_s1 + $0x50] sm:$0xff]  ;;  %v486_v21 = vld [vmem:[%s605_s1 + $0x80] sm:$0xff]  ;;  %v442_v25 = vld [vmem:[%s606_s0 + $0x1c] sm:$0xf] }
   0x9   :  { %362 = vmatmul.msk.bf16.vlgmr.msra.gmra.mxu0 %vm39_vm0, %v349_v10  ;;  %371 = vmatmul.msk.bf16.vlgmr.msra.gmra.mxu1 %vm39_vm0, %v15_v11  ;;  %v400_v22 = vld [vmem:[%s606_s0 + $0x10] sm:$0xf]  ;;  %v414_v23 = vld [vmem:[%s606_s0 + $0x14] sm:$0xf]  ;;  %v456_v26 = vld [vmem:[%s606_s0 + $0x20] sm:$0xf] }
   0xa   :  { %184 = vmatpush.bf16.msrb.mxu0 %v479_v8  ;;  %385 = vmatmul.msk.bf16.vlgmr.msra.gmra.mxu2 %vm39_vm0, %v372_v12  ;;  %v488_v50 = vld [vmem:[%s607_s2] ss:$0 sm:$0xff] }
   0xb   :  { %256 = vmatpush.bf16.msrb.mxu2 %v483_v9  ;;  %399 = vmatmul.msk.bf16.vlgmr.msra.gmra.mxu3 %vm39_vm0, %v386_v13 }
   0xc   :  { %292 = vmatpush.bf16.msrb.mxu3 %v485_v14  ;;  %220 = vmatpush.bf16.msrb.mxu1 %v481_v15 }
   0xe   :  { %185 = vmatpush.bf16.msrb.mxu0 %v478_v16 }
   0xf   :  { %257 = vmatpush.bf16.msrb.mxu2 %v482_v17 }
  0x10   :  { %293 = vmatpush.bf16.msrb.mxu3 %v484_v19  ;;  %221 = vmatpush.bf16.msrb.mxu1 %v480_v20 }
  0x12   :  { %328 = vmatpush.bf16.msra.mxu0 %v487_v18 }
  0x16   :  { %329 = vmatpush.bf16.msra.mxu0 %v486_v21 }
  0x19   :  { %413 = vmatmul.msk.bf16.vlgmr.msrb.gmra.mxu0 %vm39_vm0, %v400_v22  ;;  %427 = vmatmul.msk.bf16.vlgmr.msrb.gmra.mxu1 %vm39_vm0, %v414_v23 }
  0x1a   :  { %441 = vmatmul.msk.bf16.vlgmr.msrb.gmra.mxu2 %vm39_vm0, %v428_v24 }
  0x1b   :  { %455 = vmatmul.msk.bf16.vlgmr.msrb.gmra.mxu3 %vm39_vm0, %v442_v25 }
  0x29   :  { %469 = vmatmul.msk.bf16.vlgmr.msra.gmra.mxu0 %vm39_vm0, %v456_v26 }
  0x86   :  { %v52_v27 = vpop.f32.mrf.mxu0  ;;  %v80_v28 = vpop.f32.mrf.mxu1 }
  0x87   :  { %v81_v33 = vadd.f32 %v80_v28, %v52_v27 }
  0x8d   :  { %v115_v29 = vpop.f32.mrf.mxu2 }
  0x8e   :  { %v151_v30 = vpop.f32.mrf.mxu3  ;;  %v54_v31 = vpop.f32.mrf.mxu0  ;;  %v119_v34 = vadd.f32 %v115_v29, %v81_v33 }
  0x8f   :  { %v82_v32 = vpop.f32.mrf.mxu1 }
  0x90   :  { %v155_v39 = vadd.f32 %v151_v30, %v119_v34 }
  0x95   :  { %v117_v35 = vpop.f32.mrf.mxu2 }
  0x96   :  { %v153_v36 = vpop.f32.mrf.mxu3  ;;  %v187_v37 = vpop.f32.mrf.mxu0 }
  0x97   :  { %v223_v38 = vpop.f32.mrf.mxu1  ;;  %v191_v40 = vadd.f32 %v187_v37, %v155_v39 }
  0x99   :  { %v227_v45 = vadd.f32 %v223_v38, %v191_v40 }
  0x9d   :  { %v259_v41 = vpop.f32.mrf.mxu2 }
  0x9e   :  { %v295_v42 = vpop.f32.mrf.mxu3  ;;  %v189_v43 = vpop.f32.mrf.mxu0  ;;  %v263_v46 = vadd.f32 %v259_v41, %v227_v45 }
  0x9f   :  { %v225_v44 = vpop.f32.mrf.mxu1 }
  0xa0   :  { %v299_v47 = vadd.f32 %v295_v42, %v263_v46 }
  0xa5   :  { %v261_v48 = vpop.f32.mrf.mxu2 }
  0xa6   :  { %v297_v49 = vpop.f32.mrf.mxu3  ;;  %v331_v51 = vpop.f32.mrf.mxu0 }
  0xa7   :  { %v335_v52 = vadd.f32 %v331_v51, %v299_v47 }
  0xa9   :  { %v340_v53 = vadd.f32 %v488_v50, %v335_v52 }
  0xab   :  { %v341_v54 = vmax.f32 %v340_v53, 0.0 }
  0xad   :  { %v342_v55 = vpack.c.bf16 %v341_v54, %v341_v54 }
  0xae   :  { %v333_v56 = vpop.f32.mrf.mxu0 }
  0xaf   :  { %344 = vst.msk [vmem:[%s608_s3] sm:$0xf] %vm343_vm1, %v342_v55 }

// kernel: resnet_forward.34
= control target key start
LH: loop header
LB: loop body
LE: loop exit
PB: predicated region body
PF: predicated region fallthrough
CT: control target
= control target key end

     0   :  { %vm62_vm0 = vcmask 523264   ;;  %vm493_vm1 = vcmask 519168   ;;  %s939_s1 = inlined_call_operand.vmem [shape: bf16[9,64,64], index: 1, kind: input, shape index: {}]   ;;  %s940_s0 = inlined_call_operand.vmem [shape: bf16[9,8,64], index: 0, kind: input, shape index: {}]   ;;  %s941_s2 = inlined_call_operand.vmem [shape: f32[1,64], index: 2, kind: input, shape index: {}]   ;;  %s942_s3 = inlined_call_operand.vmem [shape: bf16[8,64], index: 3, kind: input, shape index: {}]   ;;  %s943_s4 = inlined_call_operand.vmem [shape: bf16[8,64], index: 4, kind: output, shape index: {}]  }
   0x1   :  { %v731_v0 = vld [vmem:[%s939_s1 + $0x38] sm:$0xff]  ;;  %v730_v4 = vld [vmem:[%s939_s1 + $0x30] sm:$0xff]  ;;  %v729_v8 = vld [vmem:[%s939_s1 + $0x28] sm:$0xff] }
   0x2   :  { %v727_v1 = vld [vmem:[%s939_s1 + $0x18] sm:$0xff]  ;;  %70 = vmatpush.bf16.msra.mxu0 %v731_v0  ;;  %v726_v5 = vld [vmem:[%s939_s1 + $0x10] sm:$0xff]  ;;  %v725_v9 = vld [vmem:[%s939_s1 + $0x8] sm:$0xff] }
   0x3   :  { %v735_v2 = vld [vmem:[%s939_s1 + $0x58] sm:$0xff]  ;;  %110 = vmatpush.bf16.msra.mxu1 %v727_v1  ;;  %v734_v6 = vld [vmem:[%s939_s1 + $0x50] sm:$0xff]  ;;  %v733_v10 = vld [vmem:[%s939_s1 + $0x48] sm:$0xff] }
   0x4   :  { %v739_v3 = vld [vmem:[%s939_s1 + $0x78] sm:$0xff]  ;;  %161 = vmatpush.bf16.msra.mxu2 %v735_v2  ;;  %v738_v7 = vld [vmem:[%s939_s1 + $0x70] sm:$0xff]  ;;  %v737_v11 = vld [vmem:[%s939_s1 + $0x68] sm:$0xff] }
   0x5   :  { %213 = vmatpush.bf16.msra.mxu3 %v739_v3  ;;  %v728_v12 = vld [vmem:[%s939_s1 + $0x20] sm:$0xff]  ;;  %v743_v16 = vld [vmem:[%s939_s1 + $0x98] sm:$0xff]  ;;  %v542_v20 = vld [vmem:[%s940_s0 + $0x8] sm:$0xf] }
   0x6   :  { %71 = vmatpush.bf16.msra.mxu0 %v730_v4  ;;  %v724_v13 = vld [vmem:[%s939_s1] sm:$0xff]  ;;  %v751_v17 = vld [vmem:[%s939_s1 + $0xd8] sm:$0xff]  ;;  %v568_v21 = vld [vmem:[%s940_s0 + $0xc] sm:$0xf] }
   0x7   :  { %111 = vmatpush.bf16.msra.mxu1 %v726_v5  ;;  %v732_v14 = vld [vmem:[%s939_s1 + $0x40] sm:$0xff]  ;;  %v755_v22 = vld [vmem:[%s939_s1 + $0xf8] sm:$0xff]  ;;  %v742_v24 = vld [vmem:[%s939_s1 + $0x90] sm:$0xff] }
   0x8   :  { %162 = vmatpush.bf16.msra.mxu2 %v734_v6  ;;  %v736_v15 = vld [vmem:[%s939_s1 + $0x60] sm:$0xff]  ;;  %v747_v23 = vld [vmem:[%s939_s1 + $0xb8] sm:$0xff]  ;;  %v750_v25 = vld [vmem:[%s939_s1 + $0xd0] sm:$0xff] }
   0x9   :  { %214 = vmatpush.bf16.msra.mxu3 %v738_v7  ;;  %v499_v18 = vld [vmem:[%s940_s0 + $0x4] sm:$0xf]  ;;  %v18_v19 = vld [vmem:[%s940_s0] sm:$0xf]  ;;  %v754_v26 = vld [vmem:[%s939_s1 + $0xf0] sm:$0xff] }
   0xa   :  { %72 = vmatpush.bf16.msra.mxu0 %v729_v8  ;;  %v746_v27 = vld [vmem:[%s939_s1 + $0xb0] sm:$0xff]  ;;  %v741_v28 = vld [vmem:[%s939_s1 + $0x88] sm:$0xff]  ;;  %v740_v32 = vld [vmem:[%s939_s1 + $0x80] sm:$0xff] }
   0xb   :  { %112 = vmatpush.bf16.msra.mxu1 %v725_v9  ;;  %v749_v29 = vld [vmem:[%s939_s1 + $0xc8] sm:$0xff]  ;;  %v748_v33 = vld [vmem:[%s939_s1 + $0xc0] sm:$0xff]  ;;  %v759_v34 = vld [vmem:[%s939_s1 + $0x118] sm:$0xff] }
   0xc   :  { %163 = vmatpush.bf16.msra.mxu2 %v733_v10  ;;  %v753_v30 = vld [vmem:[%s939_s1 + $0xe8] sm:$0xff]  ;;  %v752_v35 = vld [vmem:[%s939_s1 + $0xe0] sm:$0xff]  ;;  %v594_v37 = vld [vmem:[%s940_s0 + $0x10] sm:$0xf] }
   0xd   :  { %215 = vmatpush.bf16.msra.mxu3 %v737_v11  ;;  %v745_v31 = vld [vmem:[%s939_s1 + $0xa8] sm:$0xff]  ;;  %v744_v36 = vld [vmem:[%s939_s1 + $0xa0] sm:$0xff]  ;;  %v646_v38 = vld [vmem:[%s940_s0 + $0x18] sm:$0xf] }
   0xe   :  { %73 = vmatpush.bf16.msra.mxu0 %v728_v12  ;;  %v672_v39 = vld [vmem:[%s940_s0 + $0x1c] sm:$0xf]  ;;  %v758_v40 = vld [vmem:[%s939_s1 + $0x110] sm:$0xff]  ;;  %v757_v42 = vld [vmem:[%s939_s1 + $0x108] sm:$0xff] }
   0xf   :  { %113 = vmatpush.bf16.msra.mxu1 %v724_v13  ;;  %v620_v41 = vld [vmem:[%s940_s0 + $0x14] sm:$0xf]  ;;  %v756_v43 = vld [vmem:[%s939_s1 + $0x100] sm:$0xff] }
  0x10   :  { %164 = vmatpush.bf16.msra.mxu2 %v732_v14  ;;  %v698_v44 = vld [vmem:[%s940_s0 + $0x20] sm:$0xf] }
  0x11   :  { %216 = vmatpush.bf16.msra.mxu3 %v736_v15  ;;  %524 = vmatmul.msk.bf16.vlgmr.msra.gmra.mxu0 %vm62_vm0, %v499_v18  ;;  %v488_v1 = vld [vmem:[%s942_s3] sm:$0xf] }
  0x12   :  { %265 = vmatpush.bf16.msrb.mxu0 %v743_v16  ;;  %541 = vmatmul.msk.bf16.vlgmr.msra.gmra.mxu1 %vm62_vm0, %v18_v19  ;;  %v760_v5 = vld [vmem:[%s941_s2] ss:$0 sm:$0xff]  ;;  %v489_v8 = vunpack.c.l.bf16 %v488_v1 }
  0x13   :  { %567 = vmatmul.msk.bf16.vlgmr.msra.gmra.mxu2 %vm62_vm0, %v542_v20  ;;  %317 = vmatpush.bf16.msrb.mxu1 %v747_v23 }
  0x14   :  { %369 = vmatpush.bf16.msrb.mxu2 %v751_v17  ;;  %593 = vmatmul.msk.bf16.vlgmr.msra.gmra.mxu3 %vm62_vm0, %v568_v21 }
  0x15   :  { %421 = vmatpush.bf16.msrb.mxu3 %v755_v22 }
  0x16   :  { %266 = vmatpush.bf16.msrb.mxu0 %v742_v24 }
  0x17   :  { %318 = vmatpush.bf16.msrb.mxu1 %v746_v27 }
  0x18   :  { %370 = vmatpush.bf16.msrb.mxu2 %v750_v25 }
  0x19   :  { %422 = vmatpush.bf16.msrb.mxu3 %v754_v26 }
  0x1a   :  { %267 = vmatpush.bf16.msrb.mxu0 %v741_v28 }
  0x1b   :  { %319 = vmatpush.bf16.msrb.mxu1 %v745_v31 }
  0x1c   :  { %371 = vmatpush.bf16.msrb.mxu2 %v749_v29 }
  0x1d   :  { %423 = vmatpush.bf16.msrb.mxu3 %v753_v30 }
  0x1e   :  { %268 = vmatpush.bf16.msrb.mxu0 %v740_v32 }
  0x1f   :  { %320 = vmatpush.bf16.msrb.mxu1 %v744_v36 }
  0x20   :  { %372 = vmatpush.bf16.msrb.mxu2 %v748_v33 }
  0x21   :  { %424 = vmatpush.bf16.msrb.mxu3 %v752_v35  ;;  %619 = vmatmul.msk.bf16.vlgmr.msrb.gmra.mxu0 %vm62_vm0, %v594_v37 }
  0x22   :  { %473 = vmatpush.bf16.msra.mxu0 %v759_v34  ;;  %645 = vmatmul.msk.bf16.vlgmr.msrb.gmra.mxu1 %vm62_vm0, %v620_v41 }
  0x23   :  { %671 = vmatmul.msk.bf16.vlgmr.msrb.gmra.mxu2 %vm62_vm0, %v646_v38 }
  0x24   :  { %697 = vmatmul.msk.bf16.vlgmr.msrb.gmra.mxu3 %vm62_vm0, %v672_v39 }
  0x26   :  { %474 = vmatpush.bf16.msra.mxu0 %v758_v40 }
  0x2a   :  { %475 = vmatpush.bf16.msra.mxu0 %v757_v42 }
  0x2e   :  { %476 = vmatpush.bf16.msra.mxu0 %v756_v43 }
  0x31   :  { %723 = vmatmul.msk.bf16.vlgmr.msra.gmra.mxu0 %vm62_vm0, %v698_v44 }
  0x8e   :  { %v75_v45 = vpop.f32.mrf.mxu0 }
  0x8f   :  { %v115_v46 = vpop.f32.mrf.mxu1 }
  0x90   :  { %v116_v51 = vadd.f32 %v115_v46, %v75_v45 }
  0x96   :  { %v166_v47 = vpop.f32.mrf.mxu2  ;;  %v77_v49 = vpop.f32.mrf.mxu0 }
  0x97   :  { %v218_v48 = vpop.f32.mrf.mxu3  ;;  %v117_v50 = vpop.f32.mrf.mxu1  ;;  %v170_v52 = vadd.f32 %v166_v47, %v116_v51 }
  0x99   :  { %v222_v57 = vadd.f32 %v218_v48, %v170_v52 }
  0x9e   :  { %v168_v53 = vpop.f32.mrf.mxu2  ;;  %v270_v55 = vpop.f32.mrf.mxu0 }
  0x9f   :  { %v220_v54 = vpop.f32.mrf.mxu3  ;;  %v322_v56 = vpop.f32.mrf.mxu1  ;;  %v274_v58 = vadd.f32 %v270_v55, %v222_v57 }
  0xa1   :  { %v326_v62 = vadd.f32 %v322_v56, %v274_v58 }
  0xa6   :  { %v374_v59 = vpop.f32.mrf.mxu2  ;;  %v272_v61 = vpop.f32.mrf.mxu0 }
  0xa7   :  { %v426_v60 = vpop.f32.mrf.mxu3  ;;  %v324_v63 = vpop.f32.mrf.mxu1  ;;  %v378_v0 = vadd.f32 %v374_v59, %v326_v62 }
  0xa9   :  { %v430_v2 = vadd.f32 %v426_v60, %v378_v0 }
  0xae   :  { %v376_v3 = vpop.f32.mrf.mxu2  ;;  %v478_v6 = vpop.f32.mrf.mxu0 }
  0xaf   :  { %v428_v4 = vpop.f32.mrf.mxu3  ;;  %v482_v7 = vadd.f32 %v478_v6, %v430_v2 }
  0xb1   :  { %v487_v9 = vadd.f32 %v760_v5, %v482_v7 }
  0xb3   :  { %v490_v10 = vadd.f32 %v489_v8, %v487_v9 }
  0xb5   :  { %v491_v11 = vmax.f32 %v490_v10, 0.0 }
  0xb6   :  { %v480_v12 = vpop.f32.mrf.mxu0 }
  0xb7   :  { %v492_v13 = vpack.c.bf16 %v491_v11, %v491_v11 }
  0xb9   :  { %494 = vst.msk [vmem:[%s943_s4] sm:$0xf] %vm493_vm1, %v492_v13 }

// kernel: resnet_forward.35
= control target key start
LH: loop header
LB: loop body
LE: loop exit
PB: predicated region body
PF: predicated region fallthrough
CT: control target
= control target key end

     0   :  { %vm59_vm0 = vcmask 523264   ;;  %vm487_vm1 = vcmask 519168   ;;  %s925_s1 = inlined_call_operand.vmem [shape: bf16[9,64,64], index: 1, kind: input, shape index: {}]   ;;  %s926_s0 = inlined_call_operand.vmem [shape: bf16[9,8,64], index: 0, kind: input, shape index: {}]   ;;  %s927_s2 = inlined_call_operand.vmem [shape: f32[1,64], index: 2, kind: input, shape index: {}]   ;;  %s928_s3 = inlined_call_operand.vmem [shape: bf16[8,64], index: 3, kind: output, shape index: {}]  }
   0x1   :  { %v725_v0 = vld [vmem:[%s925_s1 + $0x38] sm:$0xff]  ;;  %v724_v4 = vld [vmem:[%s925_s1 + $0x30] sm:$0xff]  ;;  %v723_v8 = vld [vmem:[%s925_s1 + $0x28] sm:$0xff] }
   0x2   :  { %v721_v1 = vld [vmem:[%s925_s1 + $0x18] sm:$0xff]  ;;  %67 = vmatpush.bf16.msra.mxu0 %v725_v0  ;;  %v720_v5 = vld [vmem:[%s925_s1 + $0x10] sm:$0xff]  ;;  %v719_v9 = vld [vmem:[%s925_s1 + $0x8] sm:$0xff] }
   0x3   :  { %v729_v2 = vld [vmem:[%s925_s1 + $0x58] sm:$0xff]  ;;  %107 = vmatpush.bf16.msra.mxu1 %v721_v1  ;;  %v728_v6 = vld [vmem:[%s925_s1 + $0x50] sm:$0xff]  ;;  %v727_v10 = vld [vmem:[%s925_s1 + $0x48] sm:$0xff] }
   0x4   :  { %v733_v3 = vld [vmem:[%s925_s1 + $0x78] sm:$0xff]  ;;  %158 = vmatpush.bf16.msra.mxu2 %v729_v2  ;;  %v732_v7 = vld [vmem:[%s925_s1 + $0x70] sm:$0xff]  ;;  %v731_v11 = vld [vmem:[%s925_s1 + $0x68] sm:$0xff] }
   0x5   :  { %210 = vmatpush.bf16.msra.mxu3 %v733_v3  ;;  %v722_v12 = vld [vmem:[%s925_s1 + $0x20] sm:$0xff]  ;;  %v737_v16 = vld [vmem:[%s925_s1 + $0x98] sm:$0xff]  ;;  %v536_v20 = vld [vmem:[%s926_s0 + $0x8] sm:$0xf] }
   0x6   :  { %68 = vmatpush.bf16.msra.mxu0 %v724_v4  ;;  %v718_v13 = vld [vmem:[%s925_s1] sm:$0xff]  ;;  %v745_v17 = vld [vmem:[%s925_s1 + $0xd8] sm:$0xff]  ;;  %v562_v21 = vld [vmem:[%s926_s0 + $0xc] sm:$0xf] }
   0x7   :  { %108 = vmatpush.bf16.msra.mxu1 %v720_v5  ;;  %v726_v14 = vld [vmem:[%s925_s1 + $0x40] sm:$0xff]  ;;  %v749_v22 = vld [vmem:[%s925_s1 + $0xf8] sm:$0xff]  ;;  %v736_v24 = vld [vmem:[%s925_s1 + $0x90] sm:$0xff] }
   0x8   :  { %159 = vmatpush.bf16.msra.mxu2 %v728_v6  ;;  %v730_v15 = vld [vmem:[%s925_s1 + $0x60] sm:$0xff]  ;;  %v741_v23 = vld [vmem:[%s925_s1 + $0xb8] sm:$0xff]  ;;  %v744_v25 = vld [vmem:[%s925_s1 + $0xd0] sm:$0xff] }
   0x9   :  { %211 = vmatpush.bf16.msra.mxu3 %v732_v7  ;;  %v493_v18 = vld [vmem:[%s926_s0 + $0x4] sm:$0xf]  ;;  %v15_v19 = vld [vmem:[%s926_s0] sm:$0xf]  ;;  %v748_v26 = vld [vmem:[%s925_s1 + $0xf0] sm:$0xff] }
   0xa   :  { %69 = vmatpush.bf16.msra.mxu0 %v723_v8  ;;  %v740_v27 = vld [vmem:[%s925_s1 + $0xb0] sm:$0xff]  ;;  %v735_v28 = vld [vmem:[%s925_s1 + $0x88] sm:$0xff]  ;;  %v734_v32 = vld [vmem:[%s925_s1 + $0x80] sm:$0xff] }
   0xb   :  { %109 = vmatpush.bf16.msra.mxu1 %v719_v9  ;;  %v743_v29 = vld [vmem:[%s925_s1 + $0xc8] sm:$0xff]  ;;  %v742_v33 = vld [vmem:[%s925_s1 + $0xc0] sm:$0xff]  ;;  %v753_v34 = vld [vmem:[%s925_s1 + $0x118] sm:$0xff] }
   0xc   :  { %160 = vmatpush.bf16.msra.mxu2 %v727_v10  ;;  %v747_v30 = vld [vmem:[%s925_s1 + $0xe8] sm:$0xff]  ;;  %v746_v35 = vld [vmem:[%s925_s1 + $0xe0] sm:$0xff]  ;;  %v588_v37 = vld [vmem:[%s926_s0 + $0x10] sm:$0xf] }
   0xd   :  { %212 = vmatpush.bf16.msra.mxu3 %v731_v11  ;;  %v739_v31 = vld [vmem:[%s925_s1 + $0xa8] sm:$0xff]  ;;  %v738_v36 = vld [vmem:[%s925_s1 + $0xa0] sm:$0xff]  ;;  %v640_v38 = vld [vmem:[%s926_s0 + $0x18] sm:$0xf] }
   0xe   :  { %70 = vmatpush.bf16.msra.mxu0 %v722_v12  ;;  %v666_v39 = vld [vmem:[%s926_s0 + $0x1c] sm:$0xf]  ;;  %v752_v40 = vld [vmem:[%s925_s1 + $0x110] sm:$0xff]  ;;  %v751_v42 = vld [vmem:[%s925_s1 + $0x108] sm:$0xff] }
   0xf   :  { %110 = vmatpush.bf16.msra.mxu1 %v718_v13  ;;  %v614_v41 = vld [vmem:[%s926_s0 + $0x14] sm:$0xf]  ;;  %v750_v43 = vld [vmem:[%s925_s1 + $0x100] sm:$0xff] }
  0x10   :  { %161 = vmatpush.bf16.msra.mxu2 %v726_v14  ;;  %v692_v44 = vld [vmem:[%s926_s0 + $0x20] sm:$0xf] }
  0x11   :  { %213 = vmatpush.bf16.msra.mxu3 %v730_v15  ;;  %518 = vmatmul.msk.bf16.vlgmr.msra.gmra.mxu0 %vm59_vm0, %v493_v18  ;;  %v754_v4 = vld [vmem:[%s927_s2] ss:$0 sm:$0xff] }
  0x12   :  { %262 = vmatpush.bf16.msrb.mxu0 %v737_v16  ;;  %535 = vmatmul.msk.bf16.vlgmr.msra.gmra.mxu1 %vm59_vm0, %v15_v19 }
  0x13   :  { %561 = vmatmul.msk.bf16.vlgmr.msra.gmra.mxu2 %vm59_vm0, %v536_v20  ;;  %314 = vmatpush.bf16.msrb.mxu1 %v741_v23 }
  0x14   :  { %366 = vmatpush.bf16.msrb.mxu2 %v745_v17  ;;  %587 = vmatmul.msk.bf16.vlgmr.msra.gmra.mxu3 %vm59_vm0, %v562_v21 }
  0x15   :  { %418 = vmatpush.bf16.msrb.mxu3 %v749_v22 }
  0x16   :  { %263 = vmatpush.bf16.msrb.mxu0 %v736_v24 }
  0x17   :  { %315 = vmatpush.bf16.msrb.mxu1 %v740_v27 }
  0x18   :  { %367 = vmatpush.bf16.msrb.mxu2 %v744_v25 }
  0x19   :  { %419 = vmatpush.bf16.msrb.mxu3 %v748_v26 }
  0x1a   :  { %264 = vmatpush.bf16.msrb.mxu0 %v735_v28 }
  0x1b   :  { %316 = vmatpush.bf16.msrb.mxu1 %v739_v31 }
  0x1c   :  { %368 = vmatpush.bf16.msrb.mxu2 %v743_v29 }
  0x1d   :  { %420 = vmatpush.bf16.msrb.mxu3 %v747_v30 }
  0x1e   :  { %265 = vmatpush.bf16.msrb.mxu0 %v734_v32 }
  0x1f   :  { %317 = vmatpush.bf16.msrb.mxu1 %v738_v36 }
  0x20   :  { %369 = vmatpush.bf16.msrb.mxu2 %v742_v33 }
  0x21   :  { %421 = vmatpush.bf16.msrb.mxu3 %v746_v35  ;;  %613 = vmatmul.msk.bf16.vlgmr.msrb.gmra.mxu0 %vm59_vm0, %v588_v37 }
  0x22   :  { %470 = vmatpush.bf16.msra.mxu0 %v753_v34  ;;  %639 = vmatmul.msk.bf16.vlgmr.msrb.gmra.mxu1 %vm59_vm0, %v614_v41 }
  0x23   :  { %665 = vmatmul.msk.bf16.vlgmr.msrb.gmra.mxu2 %vm59_vm0, %v640_v38 }
  0x24   :  { %691 = vmatmul.msk.bf16.vlgmr.msrb.gmra.mxu3 %vm59_vm0, %v666_v39 }
  0x26   :  { %471 = vmatpush.bf16.msra.mxu0 %v752_v40 }
  0x2a   :  { %472 = vmatpush.bf16.msra.mxu0 %v751_v42 }
  0x2e   :  { %473 = vmatpush.bf16.msra.mxu0 %v750_v43 }
  0x31   :  { %717 = vmatmul.msk.bf16.vlgmr.msra.gmra.mxu0 %vm59_vm0, %v692_v44 }
  0x8e   :  { %v72_v45 = vpop.f32.mrf.mxu0 }
  0x8f   :  { %v112_v46 = vpop.f32.mrf.mxu1 }
  0x90   :  { %v113_v51 = vadd.f32 %v112_v46, %v72_v45 }
  0x96   :  { %v163_v47 = vpop.f32.mrf.mxu2  ;;  %v74_v49 = vpop.f32.mrf.mxu0 }
  0x97   :  { %v215_v48 = vpop.f32.mrf.mxu3  ;;  %v114_v50 = vpop.f32.mrf.mxu1  ;;  %v167_v52 = vadd.f32 %v163_v47, %v113_v51 }
  0x99   :  { %v219_v57 = vadd.f32 %v215_v48, %v167_v52 }
  0x9e   :  { %v165_v53 = vpop.f32.mrf.mxu2  ;;  %v267_v55 = vpop.f32.mrf.mxu0 }
  0x9f   :  { %v217_v54 = vpop.f32.mrf.mxu3  ;;  %v319_v56 = vpop.f32.mrf.mxu1  ;;  %v271_v58 = vadd.f32 %v267_v55, %v219_v57 }
  0xa1   :  { %v323_v62 = vadd.f32 %v319_v56, %v271_v58 }
  0xa6   :  { %v371_v59 = vpop.f32.mrf.mxu2  ;;  %v269_v61 = vpop.f32.mrf.mxu0 }
  0xa7   :  { %v423_v60 = vpop.f32.mrf.mxu3  ;;  %v321_v63 = vpop.f32.mrf.mxu1  ;;  %v375_v0 = vadd.f32 %v371_v59, %v323_v62 }
  0xa9   :  { %v427_v1 = vadd.f32 %v423_v60, %v375_v0 }
  0xae   :  { %v373_v2 = vpop.f32.mrf.mxu2  ;;  %v475_v5 = vpop.f32.mrf.mxu0 }
  0xaf   :  { %v425_v3 = vpop.f32.mrf.mxu3  ;;  %v479_v6 = vadd.f32 %v475_v5, %v427_v1 }
  0xb1   :  { %v484_v7 = vadd.f32 %v754_v4, %v479_v6 }
  0xb3   :  { %v485_v8 = vmax.f32 %v484_v7, 0.0 }
  0xb5   :  { %v486_v9 = vpack.c.bf16 %v485_v8, %v485_v8 }
  0xb6   :  { %v477_v10 = vpop.f32.mrf.mxu0 }
  0xb7   :  { %488 = vst.msk [vmem:[%s928_s3] sm:$0xf] %vm487_vm1, %v486_v9 }

// kernel: resnet_forward.38
= control target key start
LH: loop header
LB: loop body
LE: loop exit
PB: predicated region body
PF: predicated region fallthrough
CT: control target
= control target key end

     0   :  { %vm52_vm0 = vcmask 523264   ;;  %s138_s1 = inlined_call_operand.vmem [shape: bf16[1,64,128], index: 1, kind: input, shape index: {}]   ;;  %s139_s2 = inlined_call_operand.vmem [shape: f32[1,128], index: 2, kind: input, shape index: {}]   ;;  %s140_s0 = inlined_call_operand.vmem [shape: bf16[1,8,64], index: 0, kind: input, shape index: {}]   ;;  %s141_s3 = inlined_call_operand.vmem [shape: bf16[8,128], index: 3, kind: output, shape index: {}]  }
   0x1   :  { %v95_v0 = vld [vmem:[%s138_s1 + $0x18] sm:$0xff]  ;;  %v94_v1 = vld [vmem:[%s138_s1 + $0x10] sm:$0xff]  ;;  %v93_v2 = vld [vmem:[%s138_s1 + $0x8] sm:$0xff] }
   0x2   :  { %60 = vmatpush.bf16.msra.mxu0 %v95_v0  ;;  %v92_v3 = vld [vmem:[%s138_s1] sm:$0xff] }
   0x3   :  { %v15_v4 = vld [vmem:[%s140_s0] sm:$0xf] }
   0x4   :  { %v96_v5 = vld [vmem:[%s139_s2] ss:$0 sm:$0xff] }
   0x6   :  { %61 = vmatpush.bf16.msra.mxu0 %v94_v1 }
   0xa   :  { %62 = vmatpush.bf16.msra.mxu0 %v93_v2 }
   0xe   :  { %63 = vmatpush.bf16.msra.mxu0 %v92_v3 }
  0x11   :  { %91 = vmatmul.msk.bf16.vlgmr.msra.gmra.mxu0 %vm52_vm0, %v15_v4 }
  0x8e   :  { %v65_v6 = vpop.f32.mrf.mxu0 }
  0x8f   :  { %v66_v7 = vadd.f32 %v96_v5, %v65_v6 }
  0x91   :  { %v69_v8 = vpack.c.bf16 %v66_v7, %v66_v7 }
  0x93   :  { %70 = vst [vmem:[%s141_s3] sm:$0xf] %v69_v8 }
  0x96   :  { %v67_v9 = vpop.f32.mrf.mxu0 }

// kernel: resnet_forward.37
= control target key start
LH: loop header
LB: loop body
LE: loop exit
PB: predicated region body
PF: predicated region fallthrough
CT: control target
= control target key end

     0   :  { %vm59_vm0 = vcmask 523264   ;;  %s924_s1 = inlined_call_operand.vmem [shape: bf16[9,64,128], index: 1, kind: input, shape index: {}]   ;;  %s925_s0 = inlined_call_operand.vmem [shape: bf16[9,8,64], index: 0, kind: input, shape index: {}]   ;;  %s926_s2 = inlined_call_operand.vmem [shape: f32[1,128], index: 2, kind: input, shape index: {}]   ;;  %s927_s3 = inlined_call_operand.vmem [shape: bf16[8,128], index: 3, kind: output, shape index: {}]  }
   0x1   :  { %v724_v0 = vld [vmem:[%s924_s1 + $0x38] sm:$0xff]  ;;  %v723_v4 = vld [vmem:[%s924_s1 + $0x30] sm:$0xff]  ;;  %v722_v8 = vld [vmem:[%s924_s1 + $0x28] sm:$0xff] }
   0x2   :  { %v720_v1 = vld [vmem:[%s924_s1 + $0x18] sm:$0xff]  ;;  %67 = vmatpush.bf16.msra.mxu0 %v724_v0  ;;  %v719_v5 = vld [vmem:[%s924_s1 + $0x10] sm:$0xff]  ;;  %v718_v9 = vld [vmem:[%s924_s1 + $0x8] sm:$0xff] }
   0x3   :  { %v728_v2 = vld [vmem:[%s924_s1 + $0x58] sm:$0xff]  ;;  %107 = vmatpush.bf16.msra.mxu1 %v720_v1  ;;  %v727_v6 = vld [vmem:[%s924_s1 + $0x50] sm:$0xff]  ;;  %v726_v10 = vld [vmem:[%s924_s1 + $0x48] sm:$0xff] }
   0x4   :  { %v732_v3 = vld [vmem:[%s924_s1 + $0x78] sm:$0xff]  ;;  %158 = vmatpush.bf16.msra.mxu2 %v728_v2  ;;  %v731_v7 = vld [vmem:[%s924_s1 + $0x70] sm:$0xff]  ;;  %v730_v11 = vld [vmem:[%s924_s1 + $0x68] sm:$0xff] }
   0x5   :  { %210 = vmatpush.bf16.msra.mxu3 %v732_v3  ;;  %v721_v12 = vld [vmem:[%s924_s1 + $0x20] sm:$0xff]  ;;  %v736_v16 = vld [vmem:[%s924_s1 + $0x98] sm:$0xff]  ;;  %v535_v20 = vld [vmem:[%s925_s0 + $0x8] sm:$0xf] }
   0x6   :  { %68 = vmatpush.bf16.msra.mxu0 %v723_v4  ;;  %v717_v13 = vld [vmem:[%s924_s1] sm:$0xff]  ;;  %v744_v17 = vld [vmem:[%s924_s1 + $0xd8] sm:$0xff]  ;;  %v561_v21 = vld [vmem:[%s925_s0 + $0xc] sm:$0xf] }
   0x7   :  { %108 = vmatpush.bf16.msra.mxu1 %v719_v5  ;;  %v725_v14 = vld [vmem:[%s924_s1 + $0x40] sm:$0xff]  ;;  %v748_v22 = vld [vmem:[%s924_s1 + $0xf8] sm:$0xff]  ;;  %v735_v24 = vld [vmem:[%s924_s1 + $0x90] sm:$0xff] }
   0x8   :  { %159 = vmatpush.bf16.msra.mxu2 %v727_v6  ;;  %v729_v15 = vld [vmem:[%s924_s1 + $0x60] sm:$0xff]  ;;  %v740_v23 = vld [vmem:[%s924_s1 + $0xb8] sm:$0xff]  ;;  %v743_v25 = vld [vmem:[%s924_s1 + $0xd0] sm:$0xff] }
   0x9   :  { %211 = vmatpush.bf16.msra.mxu3 %v731_v7  ;;  %v492_v18 = vld [vmem:[%s925_s0 + $0x4] sm:$0xf]  ;;  %v15_v19 = vld [vmem:[%s925_s0] sm:$0xf]  ;;  %v747_v26 = vld [vmem:[%s924_s1 + $0xf0] sm:$0xff] }
   0xa   :  { %69 = vmatpush.bf16.msra.mxu0 %v722_v8  ;;  %v739_v27 = vld [vmem:[%s924_s1 + $0xb0] sm:$0xff]  ;;  %v734_v28 = vld [vmem:[%s924_s1 + $0x88] sm:$0xff]  ;;  %v733_v32 = vld [vmem:[%s924_s1 + $0x80] sm:$0xff] }
   0xb   :  { %109 = vmatpush.bf16.msra.mxu1 %v718_v9  ;;  %v742_v29 = vld [vmem:[%s924_s1 + $0xc8] sm:$0xff]  ;;  %v741_v33 = vld [vmem:[%s924_s1 + $0xc0] sm:$0xff]  ;;  %v752_v34 = vld [vmem:[%s924_s1 + $0x118] sm:$0xff] }
   0xc   :  { %160 = vmatpush.bf16.msra.mxu2 %v726_v10  ;;  %v746_v30 = vld [vmem:[%s924_s1 + $0xe8] sm:$0xff]  ;;  %v745_v35 = vld [vmem:[%s924_s1 + $0xe0] sm:$0xff]  ;;  %v587_v37 = vld [vmem:[%s925_s0 + $0x10] sm:$0xf] }
   0xd   :  { %212 = vmatpush.bf16.msra.mxu3 %v730_v11  ;;  %v738_v31 = vld [vmem:[%s924_s1 + $0xa8] sm:$0xff]  ;;  %v737_v36 = vld [vmem:[%s924_s1 + $0xa0] sm:$0xff]  ;;  %v639_v38 = vld [vmem:[%s925_s0 + $0x18] sm:$0xf] }
   0xe   :  { %70 = vmatpush.bf16.msra.mxu0 %v721_v12  ;;  %v665_v39 = vld [vmem:[%s925_s0 + $0x1c] sm:$0xf]  ;;  %v751_v40 = vld [vmem:[%s924_s1 + $0x110] sm:$0xff]  ;;  %v750_v42 = vld [vmem:[%s924_s1 + $0x108] sm:$0xff] }
   0xf   :  { %110 = vmatpush.bf16.msra.mxu1 %v717_v13  ;;  %v613_v41 = vld [vmem:[%s925_s0 + $0x14] sm:$0xf]  ;;  %v749_v43 = vld [vmem:[%s924_s1 + $0x100] sm:$0xff] }
  0x10   :  { %161 = vmatpush.bf16.msra.mxu2 %v725_v14  ;;  %v691_v44 = vld [vmem:[%s925_s0 + $0x20] sm:$0xf] }
  0x11   :  { %213 = vmatpush.bf16.msra.mxu3 %v729_v15  ;;  %517 = vmatmul.msk.bf16.vlgmr.msra.gmra.mxu0 %vm59_vm0, %v492_v18  ;;  %v753_v4 = vld [vmem:[%s926_s2] ss:$0 sm:$0xff] }
  0x12   :  { %262 = vmatpush.bf16.msrb.mxu0 %v736_v16  ;;  %534 = vmatmul.msk.bf16.vlgmr.msra.gmra.mxu1 %vm59_vm0, %v15_v19 }
  0x13   :  { %560 = vmatmul.msk.bf16.vlgmr.msra.gmra.mxu2 %vm59_vm0, %v535_v20  ;;  %314 = vmatpush.bf16.msrb.mxu1 %v740_v23 }
  0x14   :  { %366 = vmatpush.bf16.msrb.mxu2 %v744_v17  ;;  %586 = vmatmul.msk.bf16.vlgmr.msra.gmra.mxu3 %vm59_vm0, %v561_v21 }
  0x15   :  { %418 = vmatpush.bf16.msrb.mxu3 %v748_v22 }
  0x16   :  { %263 = vmatpush.bf16.msrb.mxu0 %v735_v24 }
  0x17   :  { %315 = vmatpush.bf16.msrb.mxu1 %v739_v27 }
  0x18   :  { %367 = vmatpush.bf16.msrb.mxu2 %v743_v25 }
  0x19   :  { %419 = vmatpush.bf16.msrb.mxu3 %v747_v26 }
  0x1a   :  { %264 = vmatpush.bf16.msrb.mxu0 %v734_v28 }
  0x1b   :  { %316 = vmatpush.bf16.msrb.mxu1 %v738_v31 }
  0x1c   :  { %368 = vmatpush.bf16.msrb.mxu2 %v742_v29 }
  0x1d   :  { %420 = vmatpush.bf16.msrb.mxu3 %v746_v30 }
  0x1e   :  { %265 = vmatpush.bf16.msrb.mxu0 %v733_v32 }
  0x1f   :  { %317 = vmatpush.bf16.msrb.mxu1 %v737_v36 }
  0x20   :  { %369 = vmatpush.bf16.msrb.mxu2 %v741_v33 }
  0x21   :  { %421 = vmatpush.bf16.msrb.mxu3 %v745_v35  ;;  %612 = vmatmul.msk.bf16.vlgmr.msrb.gmra.mxu0 %vm59_vm0, %v587_v37 }
  0x22   :  { %470 = vmatpush.bf16.msra.mxu0 %v752_v34  ;;  %638 = vmatmul.msk.bf16.vlgmr.msrb.gmra.mxu1 %vm59_vm0, %v613_v41 }
  0x23   :  { %664 = vmatmul.msk.bf16.vlgmr.msrb.gmra.mxu2 %vm59_vm0, %v639_v38 }
  0x24   :  { %690 = vmatmul.msk.bf16.vlgmr.msrb.gmra.mxu3 %vm59_vm0, %v665_v39 }
  0x26   :  { %471 = vmatpush.bf16.msra.mxu0 %v751_v40 }
  0x2a   :  { %472 = vmatpush.bf16.msra.mxu0 %v750_v42 }
  0x2e   :  { %473 = vmatpush.bf16.msra.mxu0 %v749_v43 }
  0x31   :  { %716 = vmatmul.msk.bf16.vlgmr.msra.gmra.mxu0 %vm59_vm0, %v691_v44 }
  0x8e   :  { %v72_v45 = vpop.f32.mrf.mxu0 }
  0x8f   :  { %v112_v46 = vpop.f32.mrf.mxu1 }
  0x90   :  { %v113_v51 = vadd.f32 %v112_v46, %v72_v45 }
  0x96   :  { %v163_v47 = vpop.f32.mrf.mxu2  ;;  %v74_v49 = vpop.f32.mrf.mxu0 }
  0x97   :  { %v215_v48 = vpop.f32.mrf.mxu3  ;;  %v114_v50 = vpop.f32.mrf.mxu1  ;;  %v167_v52 = vadd.f32 %v163_v47, %v113_v51 }
  0x99   :  { %v219_v57 = vadd.f32 %v215_v48, %v167_v52 }
  0x9e   :  { %v165_v53 = vpop.f32.mrf.mxu2  ;;  %v267_v55 = vpop.f32.mrf.mxu0 }
  0x9f   :  { %v217_v54 = vpop.f32.mrf.mxu3  ;;  %v319_v56 = vpop.f32.mrf.mxu1  ;;  %v271_v58 = vadd.f32 %v267_v55, %v219_v57 }
  0xa1   :  { %v323_v62 = vadd.f32 %v319_v56, %v271_v58 }
  0xa6   :  { %v371_v59 = vpop.f32.mrf.mxu2  ;;  %v269_v61 = vpop.f32.mrf.mxu0 }
  0xa7   :  { %v423_v60 = vpop.f32.mrf.mxu3  ;;  %v321_v63 = vpop.f32.mrf.mxu1  ;;  %v375_v0 = vadd.f32 %v371_v59, %v323_v62 }
  0xa9   :  { %v427_v1 = vadd.f32 %v423_v60, %v375_v0 }
  0xae   :  { %v373_v2 = vpop.f32.mrf.mxu2  ;;  %v475_v5 = vpop.f32.mrf.mxu0 }
  0xaf   :  { %v425_v3 = vpop.f32.mrf.mxu3  ;;  %v479_v6 = vadd.f32 %v475_v5, %v427_v1 }
  0xb1   :  { %v484_v7 = vadd.f32 %v753_v4, %v479_v6 }
  0xb3   :  { %v485_v8 = vmax.f32 %v484_v7, 0.0 }
  0xb5   :  { %v486_v9 = vpack.c.bf16 %v485_v8, %v485_v8 }
  0xb6   :  { %v477_v10 = vpop.f32.mrf.mxu0 }
  0xb7   :  { %487 = vst [vmem:[%s927_s3] sm:$0xf] %v486_v9 }

// kernel: resnet_forward.40
= control target key start
LH: loop header
LB: loop body
LE: loop exit
PB: predicated region body
PF: predicated region fallthrough
CT: control target
= control target key end

     0   :  { %s1517_s1 = inlined_call_operand.vmem [shape: bf16[9,128,128], index: 1, kind: input, shape index: {}]   ;;  %s1518_s0 = inlined_call_operand.vmem [shape: bf16[9,8,128], index: 0, kind: input, shape index: {}]   ;;  %s1519_s2 = inlined_call_operand.vmem [shape: f32[1,128], index: 2, kind: input, shape index: {}]   ;;  %s1520_s3 = inlined_call_operand.vmem [shape: bf16[8,128], index: 3, kind: output, shape index: {}]  }
   0x1   :  { %v1190_v0 = vld [vmem:[%s1517_s1 + $0x78] sm:$0xff]  ;;  %v1189_v4 = vld [vmem:[%s1517_s1 + $0x70] sm:$0xff]  ;;  %v1188_v8 = vld [vmem:[%s1517_s1 + $0x68] sm:$0xff] }
   0x2   :  { %v1198_v1 = vld [vmem:[%s1517_s1 + $0xb8] sm:$0xff]  ;;  %98 = vmatpush.bf16.msra.mxu0 %v1190_v0  ;;  %v1197_v5 = vld [vmem:[%s1517_s1 + $0xb0] sm:$0xff]  ;;  %v1196_v9 = vld [vmem:[%s1517_s1 + $0xa8] sm:$0xff] }
   0x3   :  { %v1206_v2 = vld [vmem:[%s1517_s1 + $0xf8] sm:$0xff]  ;;  %239 = vmatpush.bf16.msra.mxu2 %v1198_v1  ;;  %v1205_v6 = vld [vmem:[%s1517_s1 + $0xf0] sm:$0xff]  ;;  %v1204_v10 = vld [vmem:[%s1517_s1 + $0xe8] sm:$0xff] }
   0x4   :  { %v1182_v3 = vld [vmem:[%s1517_s1 + $0x38] sm:$0xff]  ;;  %320 = vmatpush.bf16.msra.mxu3 %v1206_v2  ;;  %v1181_v7 = vld [vmem:[%s1517_s1 + $0x30] sm:$0xff]  ;;  %v1180_v11 = vld [vmem:[%s1517_s1 + $0x28] sm:$0xff] }
   0x5   :  { %159 = vmatpush.bf16.msra.mxu1 %v1182_v3  ;;  %v1187_v12 = vld [vmem:[%s1517_s1 + $0x60] sm:$0xff]  ;;  %v1186_v16 = vld [vmem:[%s1517_s1 + $0x58] sm:$0xff]  ;;  %v1185_v20 = vld [vmem:[%s1517_s1 + $0x50] sm:$0xff] }
   0x6   :  { %99 = vmatpush.bf16.msra.mxu0 %v1189_v4  ;;  %v1195_v13 = vld [vmem:[%s1517_s1 + $0xa0] sm:$0xff]  ;;  %v1194_v17 = vld [vmem:[%s1517_s1 + $0x98] sm:$0xff]  ;;  %v1193_v21 = vld [vmem:[%s1517_s1 + $0x90] sm:$0xff] }
   0x7   :  { %240 = vmatpush.bf16.msra.mxu2 %v1197_v5  ;;  %v1203_v14 = vld [vmem:[%s1517_s1 + $0xe0] sm:$0xff]  ;;  %v1202_v18 = vld [vmem:[%s1517_s1 + $0xd8] sm:$0xff]  ;;  %v1201_v22 = vld [vmem:[%s1517_s1 + $0xd0] sm:$0xff] }
   0x8   :  { %321 = vmatpush.bf16.msra.mxu3 %v1205_v6  ;;  %v1179_v15 = vld [vmem:[%s1517_s1 + $0x20] sm:$0xff]  ;;  %v1178_v19 = vld [vmem:[%s1517_s1 + $0x18] sm:$0xff]  ;;  %v1177_v23 = vld [vmem:[%s1517_s1 + $0x10] sm:$0xff] }
   0x9   :  { %160 = vmatpush.bf16.msra.mxu1 %v1181_v7  ;;  %v1184_v24 = vld [vmem:[%s1517_s1 + $0x48] sm:$0xff]  ;;  %v1183_v28 = vld [vmem:[%s1517_s1 + $0x40] sm:$0xff]  ;;  %v1214_v30 = vld [vmem:[%s1517_s1 + $0x138] sm:$0xff] }
   0xa   :  { %100 = vmatpush.bf16.msra.mxu0 %v1188_v8  ;;  %v1192_v25 = vld [vmem:[%s1517_s1 + $0x88] sm:$0xff]  ;;  %v1191_v29 = vld [vmem:[%s1517_s1 + $0x80] sm:$0xff]  ;;  %v1230_v31 = vld [vmem:[%s1517_s1 + $0x1b8] sm:$0xff] }
   0xb   :  { %241 = vmatpush.bf16.msra.mxu2 %v1196_v9  ;;  %v1200_v26 = vld [vmem:[%s1517_s1 + $0xc8] sm:$0xff]  ;;  %v1199_v32 = vld [vmem:[%s1517_s1 + $0xc0] sm:$0xff]  ;;  %v1238_v34 = vld [vmem:[%s1517_s1 + $0x1f8] sm:$0xff] }
   0xc   :  { %322 = vmatpush.bf16.msra.mxu3 %v1204_v10  ;;  %v1176_v27 = vld [vmem:[%s1517_s1 + $0x8] sm:$0xff]  ;;  %v1175_v33 = vld [vmem:[%s1517_s1] sm:$0xff]  ;;  %v1222_v35 = vld [vmem:[%s1517_s1 + $0x178] sm:$0xff] }
   0xd   :  { %161 = vmatpush.bf16.msra.mxu1 %v1180_v11  ;;  %v1213_v36 = vld [vmem:[%s1517_s1 + $0x130] sm:$0xff]  ;;  %v832_v38 = vld [vmem:[%s1518_s0 + $0x8] sm:$0xf]  ;;  %v751_v39 = vld [vmem:[%s1518_s0 + $0x4] sm:$0xf] }
   0xe   :  { %101 = vmatpush.bf16.msra.mxu0 %v1187_v12  ;;  %v1229_v37 = vld [vmem:[%s1517_s1 + $0x1b0] sm:$0xff]  ;;  %v881_v42 = vld [vmem:[%s1518_s0 + $0xc] sm:$0xf]  ;;  %v14_v43 = vld [vmem:[%s1518_s0] sm:$0xf] }
   0xf   :  { %242 = vmatpush.bf16.msra.mxu2 %v1195_v13  ;;  %v1237_v40 = vld [vmem:[%s1517_s1 + $0x1f0] sm:$0xff]  ;;  %v1212_v44 = vld [vmem:[%s1517_s1 + $0x128] sm:$0xff]  ;;  %v1211_v48 = vld [vmem:[%s1517_s1 + $0x120] sm:$0xff] }
  0x10   :  { %323 = vmatpush.bf16.msra.mxu3 %v1203_v14  ;;  %v1221_v41 = vld [vmem:[%s1517_s1 + $0x170] sm:$0xff]  ;;  %v1228_v45 = vld [vmem:[%s1517_s1 + $0x1a8] sm:$0xff]  ;;  %v1227_v49 = vld [vmem:[%s1517_s1 + $0x1a0] sm:$0xff] }
  0x11   :  { %162 = vmatpush.bf16.msra.mxu1 %v1179_v15  ;;  %v1236_v46 = vld [vmem:[%s1517_s1 + $0x1e8] sm:$0xff]  ;;  %v1235_v50 = vld [vmem:[%s1517_s1 + $0x1e0] sm:$0xff]  ;;  %v1210_v52 = vld [vmem:[%s1517_s1 + $0x118] sm:$0xff] }
  0x12   :  { %102 = vmatpush.bf16.msra.mxu0 %v1186_v16  ;;  %v1220_v47 = vld [vmem:[%s1517_s1 + $0x168] sm:$0xff]  ;;  %v1219_v51 = vld [vmem:[%s1517_s1 + $0x160] sm:$0xff]  ;;  %v1226_v53 = vld [vmem:[%s1517_s1 + $0x198] sm:$0xff] }
  0x13   :  { %243 = vmatpush.bf16.msra.mxu2 %v1194_v17  ;;  %v1234_v54 = vld [vmem:[%s1517_s1 + $0x1d8] sm:$0xff]  ;;  %v1209_v56 = vld [vmem:[%s1517_s1 + $0x110] sm:$0xff]  ;;  %v1208_v60 = vld [vmem:[%s1517_s1 + $0x108] sm:$0xff] }
  0x14   :  { %324 = vmatpush.bf16.msra.mxu3 %v1202_v18  ;;  %v1218_v55 = vld [vmem:[%s1517_s1 + $0x158] sm:$0xff]  ;;  %v1225_v57 = vld [vmem:[%s1517_s1 + $0x190] sm:$0xff]  ;;  %v1224_v61 = vld [vmem:[%s1517_s1 + $0x188] sm:$0xff] }
  0x15   :  { %163 = vmatpush.bf16.msra.mxu1 %v1178_v19  ;;  %v1233_v58 = vld [vmem:[%s1517_s1 + $0x1d0] sm:$0xff]  ;;  %v1232_v62 = vld [vmem:[%s1517_s1 + $0x1c8] sm:$0xff]  ;;  %v1207_v0 = vld [vmem:[%s1517_s1 + $0x100] sm:$0xff] }
  0x16   :  { %103 = vmatpush.bf16.msra.mxu0 %v1185_v20  ;;  %v1217_v59 = vld [vmem:[%s1517_s1 + $0x150] sm:$0xff]  ;;  %v1216_v63 = vld [vmem:[%s1517_s1 + $0x148] sm:$0xff]  ;;  %v1223_v1 = vld [vmem:[%s1517_s1 + $0x180] sm:$0xff] }
  0x17   :  { %244 = vmatpush.bf16.msra.mxu2 %v1193_v21  ;;  %v1246_v2 = vld [vmem:[%s1517_s1 + $0x238] sm:$0xff]  ;;  %v1231_v3 = vld [vmem:[%s1517_s1 + $0x1c0] sm:$0xff]  ;;  %v930_v6 = vld [vmem:[%s1518_s0 + $0x10] sm:$0xf] }
  0x18   :  { %325 = vmatpush.bf16.msra.mxu3 %v1201_v22  ;;  %v1215_v4 = vld [vmem:[%s1517_s1 + $0x140] sm:$0xff]  ;;  %v1028_v5 = vld [vmem:[%s1518_s0 + $0x18] sm:$0xf]  ;;  %v1245_v7 = vld [vmem:[%s1517_s1 + $0x230] sm:$0xff] }
  0x19   :  { %164 = vmatpush.bf16.msra.mxu1 %v1177_v23  ;;  %v1077_v8 = vld [vmem:[%s1518_s0 + $0x1c] sm:$0xf]  ;;  %v979_v9 = vld [vmem:[%s1518_s0 + $0x14] sm:$0xf]  ;;  %v1244_v10 = vld [vmem:[%s1517_s1 + $0x228] sm:$0xff] }
  0x1a   :  { %104 = vmatpush.bf16.msra.mxu0 %v1184_v24  ;;  %v1243_v11 = vld [vmem:[%s1517_s1 + $0x220] sm:$0xff]  ;;  %v1242_v12 = vld [vmem:[%s1517_s1 + $0x218] sm:$0xff]  ;;  %v1241_v13 = vld [vmem:[%s1517_s1 + $0x210] sm:$0xff] }
  0x1b   :  { %245 = vmatpush.bf16.msra.mxu2 %v1192_v25  ;;  %v1240_v14 = vld [vmem:[%s1517_s1 + $0x208] sm:$0xff]  ;;  %v1239_v15 = vld [vmem:[%s1517_s1 + $0x200] sm:$0xff] }
  0x1c   :  { %326 = vmatpush.bf16.msra.mxu3 %v1200_v26  ;;  %v1126_v16 = vld [vmem:[%s1518_s0 + $0x20] sm:$0xf] }
  0x1d   :  { %165 = vmatpush.bf16.msra.mxu1 %v1176_v27 }
  0x1e   :  { %105 = vmatpush.bf16.msra.mxu0 %v1183_v28 }
  0x1f   :  { %246 = vmatpush.bf16.msra.mxu2 %v1191_v29 }
  0x20   :  { %327 = vmatpush.bf16.msra.mxu3 %v1199_v32 }
  0x21   :  { %166 = vmatpush.bf16.msra.mxu1 %v1175_v33  ;;  %106 = vmatmul.bf16.vlgmr.msra.gmra.mxu0 %v751_v39 }
  0x22   :  { %401 = vmatpush.bf16.msrb.mxu0 %v1214_v30  ;;  %247 = vmatmul.bf16.vlgmr.msra.gmra.mxu2 %v832_v38 }
  0x23   :  { %563 = vmatpush.bf16.msrb.mxu2 %v1230_v31  ;;  %328 = vmatmul.bf16.vlgmr.msra.gmra.mxu3 %v881_v42 }
  0x24   :  { %644 = vmatpush.bf16.msrb.mxu3 %v1238_v34  ;;  %167 = vmatmul.bf16.vlgmr.msra.gmra.mxu1 %v14_v43 }
  0x25   :  { %482 = vmatpush.bf16.msrb.mxu1 %v1222_v35 }
  0x26   :  { %402 = vmatpush.bf16.msrb.mxu0 %v1213_v36 }
  0x27   :  { %564 = vmatpush.bf16.msrb.mxu2 %v1229_v37 }
  0x28   :  { %645 = vmatpush.bf16.msrb.mxu3 %v1237_v40  ;;  %v1247_v40 = vld [vmem:[%s1519_s2] ss:$0 sm:$0xff] }
  0x29   :  { %483 = vmatpush.bf16.msrb.mxu1 %v1221_v41 }
  0x2a   :  { %403 = vmatpush.bf16.msrb.mxu0 %v1212_v44 }
  0x2b   :  { %565 = vmatpush.bf16.msrb.mxu2 %v1228_v45 }
  0x2c   :  { %646 = vmatpush.bf16.msrb.mxu3 %v1236_v46 }
  0x2d   :  { %484 = vmatpush.bf16.msrb.mxu1 %v1220_v47 }
  0x2e   :  { %404 = vmatpush.bf16.msrb.mxu0 %v1211_v48 }
  0x2f   :  { %566 = vmatpush.bf16.msrb.mxu2 %v1227_v49 }
  0x30   :  { %647 = vmatpush.bf16.msrb.mxu3 %v1235_v50 }
  0x31   :  { %485 = vmatpush.bf16.msrb.mxu1 %v1219_v51 }
  0x32   :  { %405 = vmatpush.bf16.msrb.mxu0 %v1210_v52 }
  0x33   :  { %567 = vmatpush.bf16.msrb.mxu2 %v1226_v53 }
  0x34   :  { %648 = vmatpush.bf16.msrb.mxu3 %v1234_v54 }
  0x35   :  { %486 = vmatpush.bf16.msrb.mxu1 %v1218_v55 }
  0x36   :  { %406 = vmatpush.bf16.msrb.mxu0 %v1209_v56 }
  0x37   :  { %568 = vmatpush.bf16.msrb.mxu2 %v1225_v57 }
  0x38   :  { %649 = vmatpush.bf16.msrb.mxu3 %v1233_v58 }
  0x39   :  { %487 = vmatpush.bf16.msrb.mxu1 %v1217_v59 }
  0x3a   :  { %407 = vmatpush.bf16.msrb.mxu0 %v1208_v60 }
  0x3b   :  { %569 = vmatpush.bf16.msrb.mxu2 %v1224_v61 }
  0x3c   :  { %650 = vmatpush.bf16.msrb.mxu3 %v1232_v62 }
  0x3d   :  { %488 = vmatpush.bf16.msrb.mxu1 %v1216_v63 }
  0x3e   :  { %408 = vmatpush.bf16.msrb.mxu0 %v1207_v0 }
  0x3f   :  { %570 = vmatpush.bf16.msrb.mxu2 %v1223_v1 }
  0x40   :  { %651 = vmatpush.bf16.msrb.mxu3 %v1231_v3 }
  0x41   :  { %489 = vmatpush.bf16.msrb.mxu1 %v1215_v4  ;;  %409 = vmatmul.bf16.vlgmr.msrb.gmra.mxu0 %v930_v6 }
  0x42   :  { %725 = vmatpush.bf16.msra.mxu0 %v1246_v2  ;;  %571 = vmatmul.bf16.vlgmr.msrb.gmra.mxu2 %v1028_v5 }
  0x43   :  { %652 = vmatmul.bf16.vlgmr.msrb.gmra.mxu3 %v1077_v8 }
  0x44   :  { %490 = vmatmul.bf16.vlgmr.msrb.gmra.mxu1 %v979_v9 }
  0x46   :  { %726 = vmatpush.bf16.msra.mxu0 %v1245_v7 }
  0x4a   :  { %727 = vmatpush.bf16.msra.mxu0 %v1244_v10 }
  0x4e   :  { %728 = vmatpush.bf16.msra.mxu0 %v1243_v11 }
  0x52   :  { %729 = vmatpush.bf16.msra.mxu0 %v1242_v12 }
  0x56   :  { %730 = vmatpush.bf16.msra.mxu0 %v1241_v13 }
  0x5a   :  { %731 = vmatpush.bf16.msra.mxu0 %v1240_v14 }
  0x5e   :  { %732 = vmatpush.bf16.msra.mxu0 %v1239_v15 }
  0x61   :  { %733 = vmatmul.bf16.vlgmr.msra.gmra.mxu0 %v1126_v16 }
  0x9e   :  { %v107_v17 = vpop.f32.mrf.mxu0 }
  0xa1   :  { %v168_v18 = vpop.f32.mrf.mxu1 }
  0xa2   :  { %v169_v27 = vadd.f32 %v168_v18, %v107_v17 }
  0xa5   :  { %v248_v19 = vpop.f32.mrf.mxu2 }
  0xa6   :  { %v329_v20 = vpop.f32.mrf.mxu3  ;;  %v109_v21 = vpop.f32.mrf.mxu0  ;;  %v252_v29 = vadd.f32 %v248_v19, %v169_v27 }
  0xa8   :  { %v333_v33 = vadd.f32 %v329_v20, %v252_v29 }
  0xa9   :  { %v170_v22 = vpop.f32.mrf.mxu1 }
  0xad   :  { %v250_v23 = vpop.f32.mrf.mxu2 }
  0xae   :  { %v331_v24 = vpop.f32.mrf.mxu3 }
  0xbe   :  { %v410_v25 = vpop.f32.mrf.mxu0 }
  0xbf   :  { %v414_v35 = vadd.f32 %v410_v25, %v333_v33 }
  0xc1   :  { %v491_v26 = vpop.f32.mrf.mxu1 }
  0xc2   :  { %v495_v37 = vadd.f32 %v491_v26, %v414_v35 }
  0xc5   :  { %v572_v28 = vpop.f32.mrf.mxu2 }
  0xc6   :  { %v653_v30 = vpop.f32.mrf.mxu3  ;;  %v412_v31 = vpop.f32.mrf.mxu0  ;;  %v576_v38 = vadd.f32 %v572_v28, %v495_v37 }
  0xc8   :  { %v657_v39 = vadd.f32 %v653_v30, %v576_v38 }
  0xc9   :  { %v493_v32 = vpop.f32.mrf.mxu1 }
  0xcd   :  { %v574_v34 = vpop.f32.mrf.mxu2 }
  0xce   :  { %v655_v36 = vpop.f32.mrf.mxu3 }
  0xde   :  { %v734_v41 = vpop.f32.mrf.mxu0 }
  0xdf   :  { %v738_v42 = vadd.f32 %v734_v41, %v657_v39 }
  0xe1   :  { %v743_v43 = vadd.f32 %v1247_v40, %v738_v42 }
  0xe3   :  { %v744_v44 = vmax.f32 %v743_v43, 0.0 }
  0xe5   :  { %v745_v45 = vpack.c.bf16 %v744_v44, %v744_v44 }
  0xe6   :  { %v736_v46 = vpop.f32.mrf.mxu0 }
  0xe7   :  { %746 = vst [vmem:[%s1520_s3] sm:$0xf] %v745_v45 }

// kernel: resnet_forward.39
= control target key start
LH: loop header
LB: loop body
LE: loop exit
PB: predicated region body
PF: predicated region fallthrough
CT: control target
= control target key end

     0   :  { %s1531_s1 = inlined_call_operand.vmem [shape: bf16[9,128,128], index: 1, kind: input, shape index: {}]   ;;  %s1532_s0 = inlined_call_operand.vmem [shape: bf16[9,8,128], index: 0, kind: input, shape index: {}]   ;;  %s1533_s2 = inlined_call_operand.vmem [shape: f32[1,128], index: 2, kind: input, shape index: {}]   ;;  %s1534_s3 = inlined_call_operand.vmem [shape: bf16[8,128], index: 3, kind: input, shape index: {}]   ;;  %s1535_s4 = inlined_call_operand.vmem [shape: bf16[8,128], index: 4, kind: output, shape index: {}]  }
   0x1   :  { %v1196_v0 = vld [vmem:[%s1531_s1 + $0x78] sm:$0xff]  ;;  %v1195_v4 = vld [vmem:[%s1531_s1 + $0x70] sm:$0xff]  ;;  %v1194_v8 = vld [vmem:[%s1531_s1 + $0x68] sm:$0xff] }
   0x2   :  { %v1204_v1 = vld [vmem:[%s1531_s1 + $0xb8] sm:$0xff]  ;;  %101 = vmatpush.bf16.msra.mxu0 %v1196_v0  ;;  %v1203_v5 = vld [vmem:[%s1531_s1 + $0xb0] sm:$0xff]  ;;  %v1202_v9 = vld [vmem:[%s1531_s1 + $0xa8] sm:$0xff] }
   0x3   :  { %v1212_v2 = vld [vmem:[%s1531_s1 + $0xf8] sm:$0xff]  ;;  %242 = vmatpush.bf16.msra.mxu2 %v1204_v1  ;;  %v1211_v6 = vld [vmem:[%s1531_s1 + $0xf0] sm:$0xff]  ;;  %v1210_v10 = vld [vmem:[%s1531_s1 + $0xe8] sm:$0xff] }
   0x4   :  { %v1188_v3 = vld [vmem:[%s1531_s1 + $0x38] sm:$0xff]  ;;  %323 = vmatpush.bf16.msra.mxu3 %v1212_v2  ;;  %v1187_v7 = vld [vmem:[%s1531_s1 + $0x30] sm:$0xff]  ;;  %v1186_v11 = vld [vmem:[%s1531_s1 + $0x28] sm:$0xff] }
   0x5   :  { %162 = vmatpush.bf16.msra.mxu1 %v1188_v3  ;;  %v1193_v12 = vld [vmem:[%s1531_s1 + $0x60] sm:$0xff]  ;;  %v1192_v16 = vld [vmem:[%s1531_s1 + $0x58] sm:$0xff]  ;;  %v1191_v20 = vld [vmem:[%s1531_s1 + $0x50] sm:$0xff] }
   0x6   :  { %102 = vmatpush.bf16.msra.mxu0 %v1195_v4  ;;  %v1201_v13 = vld [vmem:[%s1531_s1 + $0xa0] sm:$0xff]  ;;  %v1200_v17 = vld [vmem:[%s1531_s1 + $0x98] sm:$0xff]  ;;  %v1199_v21 = vld [vmem:[%s1531_s1 + $0x90] sm:$0xff] }
   0x7   :  { %243 = vmatpush.bf16.msra.mxu2 %v1203_v5  ;;  %v1209_v14 = vld [vmem:[%s1531_s1 + $0xe0] sm:$0xff]  ;;  %v1208_v18 = vld [vmem:[%s1531_s1 + $0xd8] sm:$0xff]  ;;  %v1207_v22 = vld [vmem:[%s1531_s1 + $0xd0] sm:$0xff] }
   0x8   :  { %324 = vmatpush.bf16.msra.mxu3 %v1211_v6  ;;  %v1185_v15 = vld [vmem:[%s1531_s1 + $0x20] sm:$0xff]  ;;  %v1184_v19 = vld [vmem:[%s1531_s1 + $0x18] sm:$0xff]  ;;  %v1183_v23 = vld [vmem:[%s1531_s1 + $0x10] sm:$0xff] }
   0x9   :  { %163 = vmatpush.bf16.msra.mxu1 %v1187_v7  ;;  %v1190_v24 = vld [vmem:[%s1531_s1 + $0x48] sm:$0xff]  ;;  %v1189_v28 = vld [vmem:[%s1531_s1 + $0x40] sm:$0xff]  ;;  %v1220_v30 = vld [vmem:[%s1531_s1 + $0x138] sm:$0xff] }
   0xa   :  { %103 = vmatpush.bf16.msra.mxu0 %v1194_v8  ;;  %v1198_v25 = vld [vmem:[%s1531_s1 + $0x88] sm:$0xff]  ;;  %v1197_v29 = vld [vmem:[%s1531_s1 + $0x80] sm:$0xff]  ;;  %v1236_v31 = vld [vmem:[%s1531_s1 + $0x1b8] sm:$0xff] }
   0xb   :  { %244 = vmatpush.bf16.msra.mxu2 %v1202_v9  ;;  %v1206_v26 = vld [vmem:[%s1531_s1 + $0xc8] sm:$0xff]  ;;  %v1205_v32 = vld [vmem:[%s1531_s1 + $0xc0] sm:$0xff]  ;;  %v1244_v34 = vld [vmem:[%s1531_s1 + $0x1f8] sm:$0xff] }
   0xc   :  { %325 = vmatpush.bf16.msra.mxu3 %v1210_v10  ;;  %v1182_v27 = vld [vmem:[%s1531_s1 + $0x8] sm:$0xff]  ;;  %v1181_v33 = vld [vmem:[%s1531_s1] sm:$0xff]  ;;  %v1228_v35 = vld [vmem:[%s1531_s1 + $0x178] sm:$0xff] }
   0xd   :  { %164 = vmatpush.bf16.msra.mxu1 %v1186_v11  ;;  %v1219_v36 = vld [vmem:[%s1531_s1 + $0x130] sm:$0xff]  ;;  %v838_v38 = vld [vmem:[%s1532_s0 + $0x8] sm:$0xf]  ;;  %v757_v39 = vld [vmem:[%s1532_s0 + $0x4] sm:$0xf] }
   0xe   :  { %104 = vmatpush.bf16.msra.mxu0 %v1193_v12  ;;  %v1235_v37 = vld [vmem:[%s1531_s1 + $0x1b0] sm:$0xff]  ;;  %v887_v42 = vld [vmem:[%s1532_s0 + $0xc] sm:$0xf]  ;;  %v17_v43 = vld [vmem:[%s1532_s0] sm:$0xf] }
   0xf   :  { %245 = vmatpush.bf16.msra.mxu2 %v1201_v13  ;;  %v1243_v40 = vld [vmem:[%s1531_s1 + $0x1f0] sm:$0xff]  ;;  %v1218_v44 = vld [vmem:[%s1531_s1 + $0x128] sm:$0xff]  ;;  %v1217_v48 = vld [vmem:[%s1531_s1 + $0x120] sm:$0xff] }
  0x10   :  { %326 = vmatpush.bf16.msra.mxu3 %v1209_v14  ;;  %v1227_v41 = vld [vmem:[%s1531_s1 + $0x170] sm:$0xff]  ;;  %v1234_v45 = vld [vmem:[%s1531_s1 + $0x1a8] sm:$0xff]  ;;  %v1233_v49 = vld [vmem:[%s1531_s1 + $0x1a0] sm:$0xff] }
  0x11   :  { %165 = vmatpush.bf16.msra.mxu1 %v1185_v15  ;;  %v1242_v46 = vld [vmem:[%s1531_s1 + $0x1e8] sm:$0xff]  ;;  %v1241_v50 = vld [vmem:[%s1531_s1 + $0x1e0] sm:$0xff]  ;;  %v1216_v52 = vld [vmem:[%s1531_s1 + $0x118] sm:$0xff] }
  0x12   :  { %105 = vmatpush.bf16.msra.mxu0 %v1192_v16  ;;  %v1226_v47 = vld [vmem:[%s1531_s1 + $0x168] sm:$0xff]  ;;  %v1225_v51 = vld [vmem:[%s1531_s1 + $0x160] sm:$0xff]  ;;  %v1232_v53 = vld [vmem:[%s1531_s1 + $0x198] sm:$0xff] }
  0x13   :  { %246 = vmatpush.bf16.msra.mxu2 %v1200_v17  ;;  %v1240_v54 = vld [vmem:[%s1531_s1 + $0x1d8] sm:$0xff]  ;;  %v1215_v56 = vld [vmem:[%s1531_s1 + $0x110] sm:$0xff]  ;;  %v1214_v60 = vld [vmem:[%s1531_s1 + $0x108] sm:$0xff] }
  0x14   :  { %327 = vmatpush.bf16.msra.mxu3 %v1208_v18  ;;  %v1224_v55 = vld [vmem:[%s1531_s1 + $0x158] sm:$0xff]  ;;  %v1231_v57 = vld [vmem:[%s1531_s1 + $0x190] sm:$0xff]  ;;  %v1230_v61 = vld [vmem:[%s1531_s1 + $0x188] sm:$0xff] }
  0x15   :  { %166 = vmatpush.bf16.msra.mxu1 %v1184_v19  ;;  %v1239_v58 = vld [vmem:[%s1531_s1 + $0x1d0] sm:$0xff]  ;;  %v1238_v62 = vld [vmem:[%s1531_s1 + $0x1c8] sm:$0xff]  ;;  %v1213_v0 = vld [vmem:[%s1531_s1 + $0x100] sm:$0xff] }
  0x16   :  { %106 = vmatpush.bf16.msra.mxu0 %v1191_v20  ;;  %v1223_v59 = vld [vmem:[%s1531_s1 + $0x150] sm:$0xff]  ;;  %v1222_v63 = vld [vmem:[%s1531_s1 + $0x148] sm:$0xff]  ;;  %v1229_v1 = vld [vmem:[%s1531_s1 + $0x180] sm:$0xff] }
  0x17   :  { %247 = vmatpush.bf16.msra.mxu2 %v1199_v21  ;;  %v1252_v2 = vld [vmem:[%s1531_s1 + $0x238] sm:$0xff]  ;;  %v1237_v3 = vld [vmem:[%s1531_s1 + $0x1c0] sm:$0xff]  ;;  %v936_v6 = vld [vmem:[%s1532_s0 + $0x10] sm:$0xf] }
  0x18   :  { %328 = vmatpush.bf16.msra.mxu3 %v1207_v22  ;;  %v1221_v4 = vld [vmem:[%s1531_s1 + $0x140] sm:$0xff]  ;;  %v1034_v5 = vld [vmem:[%s1532_s0 + $0x18] sm:$0xf]  ;;  %v1251_v7 = vld [vmem:[%s1531_s1 + $0x230] sm:$0xff] }
  0x19   :  { %167 = vmatpush.bf16.msra.mxu1 %v1183_v23  ;;  %v1083_v8 = vld [vmem:[%s1532_s0 + $0x1c] sm:$0xf]  ;;  %v985_v9 = vld [vmem:[%s1532_s0 + $0x14] sm:$0xf]  ;;  %v1250_v10 = vld [vmem:[%s1531_s1 + $0x228] sm:$0xff] }
  0x1a   :  { %107 = vmatpush.bf16.msra.mxu0 %v1190_v24  ;;  %v1249_v11 = vld [vmem:[%s1531_s1 + $0x220] sm:$0xff]  ;;  %v1248_v12 = vld [vmem:[%s1531_s1 + $0x218] sm:$0xff]  ;;  %v1247_v13 = vld [vmem:[%s1531_s1 + $0x210] sm:$0xff] }
  0x1b   :  { %248 = vmatpush.bf16.msra.mxu2 %v1198_v25  ;;  %v1246_v14 = vld [vmem:[%s1531_s1 + $0x208] sm:$0xff]  ;;  %v1245_v15 = vld [vmem:[%s1531_s1 + $0x200] sm:$0xff] }
  0x1c   :  { %329 = vmatpush.bf16.msra.mxu3 %v1206_v26  ;;  %v1132_v16 = vld [vmem:[%s1532_s0 + $0x20] sm:$0xf] }
  0x1d   :  { %168 = vmatpush.bf16.msra.mxu1 %v1182_v27 }
  0x1e   :  { %108 = vmatpush.bf16.msra.mxu0 %v1189_v28 }
  0x1f   :  { %249 = vmatpush.bf16.msra.mxu2 %v1197_v29 }
  0x20   :  { %330 = vmatpush.bf16.msra.mxu3 %v1205_v32 }
  0x21   :  { %169 = vmatpush.bf16.msra.mxu1 %v1181_v33  ;;  %109 = vmatmul.bf16.vlgmr.msra.gmra.mxu0 %v757_v39  ;;  %v747_v39 = vld [vmem:[%s1534_s3] sm:$0xf] }
  0x22   :  { %404 = vmatpush.bf16.msrb.mxu0 %v1220_v30  ;;  %250 = vmatmul.bf16.vlgmr.msra.gmra.mxu2 %v838_v38 }
  0x23   :  { %566 = vmatpush.bf16.msrb.mxu2 %v1236_v31  ;;  %331 = vmatmul.bf16.vlgmr.msra.gmra.mxu3 %v887_v42 }
  0x24   :  { %647 = vmatpush.bf16.msrb.mxu3 %v1244_v34  ;;  %170 = vmatmul.bf16.vlgmr.msra.gmra.mxu1 %v17_v43 }
  0x25   :  { %485 = vmatpush.bf16.msrb.mxu1 %v1228_v35 }
  0x26   :  { %405 = vmatpush.bf16.msrb.mxu0 %v1219_v36 }
  0x27   :  { %567 = vmatpush.bf16.msrb.mxu2 %v1235_v37 }
  0x28   :  { %648 = vmatpush.bf16.msrb.mxu3 %v1243_v40 }
  0x29   :  { %486 = vmatpush.bf16.msrb.mxu1 %v1227_v41  ;;  %v1253_v41 = vld [vmem:[%s1533_s2] ss:$0 sm:$0xff] }
  0x2a   :  { %406 = vmatpush.bf16.msrb.mxu0 %v1218_v44  ;;  %v748_v44 = vunpack.c.l.bf16 %v747_v39 }
  0x2b   :  { %568 = vmatpush.bf16.msrb.mxu2 %v1234_v45 }
  0x2c   :  { %649 = vmatpush.bf16.msrb.mxu3 %v1242_v46 }
  0x2d   :  { %487 = vmatpush.bf16.msrb.mxu1 %v1226_v47 }
  0x2e   :  { %407 = vmatpush.bf16.msrb.mxu0 %v1217_v48 }
  0x2f   :  { %569 = vmatpush.bf16.msrb.mxu2 %v1233_v49 }
  0x30   :  { %650 = vmatpush.bf16.msrb.mxu3 %v1241_v50 }
  0x31   :  { %488 = vmatpush.bf16.msrb.mxu1 %v1225_v51 }
  0x32   :  { %408 = vmatpush.bf16.msrb.mxu0 %v1216_v52 }
  0x33   :  { %570 = vmatpush.bf16.msrb.mxu2 %v1232_v53 }
  0x34   :  { %651 = vmatpush.bf16.msrb.mxu3 %v1240_v54 }
  0x35   :  { %489 = vmatpush.bf16.msrb.mxu1 %v1224_v55 }
  0x36   :  { %409 = vmatpush.bf16.msrb.mxu0 %v1215_v56 }
  0x37   :  { %571 = vmatpush.bf16.msrb.mxu2 %v1231_v57 }
  0x38   :  { %652 = vmatpush.bf16.msrb.mxu3 %v1239_v58 }
  0x39   :  { %490 = vmatpush.bf16.msrb.mxu1 %v1223_v59 }
  0x3a   :  { %410 = vmatpush.bf16.msrb.mxu0 %v1214_v60 }
  0x3b   :  { %572 = vmatpush.bf16.msrb.mxu2 %v1230_v61 }
  0x3c   :  { %653 = vmatpush.bf16.msrb.mxu3 %v1238_v62 }
  0x3d   :  { %491 = vmatpush.bf16.msrb.mxu1 %v1222_v63 }
  0x3e   :  { %411 = vmatpush.bf16.msrb.mxu0 %v1213_v0 }
  0x3f   :  { %573 = vmatpush.bf16.msrb.mxu2 %v1229_v1 }
  0x40   :  { %654 = vmatpush.bf16.msrb.mxu3 %v1237_v3 }
  0x41   :  { %492 = vmatpush.bf16.msrb.mxu1 %v1221_v4  ;;  %412 = vmatmul.bf16.vlgmr.msrb.gmra.mxu0 %v936_v6 }
  0x42   :  { %728 = vmatpush.bf16.msra.mxu0 %v1252_v2  ;;  %574 = vmatmul.bf16.vlgmr.msrb.gmra.mxu2 %v1034_v5 }
  0x43   :  { %655 = vmatmul.bf16.vlgmr.msrb.gmra.mxu3 %v1083_v8 }
  0x44   :  { %493 = vmatmul.bf16.vlgmr.msrb.gmra.mxu1 %v985_v9 }
  0x46   :  { %729 = vmatpush.bf16.msra.mxu0 %v1251_v7 }
  0x4a   :  { %730 = vmatpush.bf16.msra.mxu0 %v1250_v10 }
  0x4e   :  { %731 = vmatpush.bf16.msra.mxu0 %v1249_v11 }
  0x52   :  { %732 = vmatpush.bf16.msra.mxu0 %v1248_v12 }
  0x56   :  { %733 = vmatpush.bf16.msra.mxu0 %v1247_v13 }
  0x5a   :  { %734 = vmatpush.bf16.msra.mxu0 %v1246_v14 }
  0x5e   :  { %735 = vmatpush.bf16.msra.mxu0 %v1245_v15 }
  0x61   :  { %736 = vmatmul.bf16.vlgmr.msra.gmra.mxu0 %v1132_v16 }
  0x9e   :  { %v110_v17 = vpop.f32.mrf.mxu0 }
  0xa1   :  { %v171_v18 = vpop.f32.mrf.mxu1 }
  0xa2   :  { %v172_v27 = vadd.f32 %v171_v18, %v110_v17 }
  0xa5   :  { %v251_v19 = vpop.f32.mrf.mxu2 }
  0xa6   :  { %v332_v20 = vpop.f32.mrf.mxu3  ;;  %v112_v21 = vpop.f32.mrf.mxu0  ;;  %v255_v29 = vadd.f32 %v251_v19, %v172_v27 }
  0xa8   :  { %v336_v33 = vadd.f32 %v332_v20, %v255_v29 }
  0xa9   :  { %v173_v22 = vpop.f32.mrf.mxu1 }
  0xad   :  { %v253_v23 = vpop.f32.mrf.mxu2 }
  0xae   :  { %v334_v24 = vpop.f32.mrf.mxu3 }
  0xbe   :  { %v413_v25 = vpop.f32.mrf.mxu0 }
  0xbf   :  { %v417_v35 = vadd.f32 %v413_v25, %v336_v33 }
  0xc1   :  { %v494_v26 = vpop.f32.mrf.mxu1 }
  0xc2   :  { %v498_v37 = vadd.f32 %v494_v26, %v417_v35 }
  0xc5   :  { %v575_v28 = vpop.f32.mrf.mxu2 }
  0xc6   :  { %v656_v30 = vpop.f32.mrf.mxu3  ;;  %v415_v31 = vpop.f32.mrf.mxu0  ;;  %v579_v38 = vadd.f32 %v575_v28, %v498_v37 }
  0xc8   :  { %v660_v40 = vadd.f32 %v656_v30, %v579_v38 }
  0xc9   :  { %v496_v32 = vpop.f32.mrf.mxu1 }
  0xcd   :  { %v577_v34 = vpop.f32.mrf.mxu2 }
  0xce   :  { %v658_v36 = vpop.f32.mrf.mxu3 }
  0xde   :  { %v737_v42 = vpop.f32.mrf.mxu0 }
  0xdf   :  { %v741_v43 = vadd.f32 %v737_v42, %v660_v40 }
  0xe1   :  { %v746_v45 = vadd.f32 %v1253_v41, %v741_v43 }
  0xe3   :  { %v749_v46 = vadd.f32 %v748_v44, %v746_v45 }
  0xe5   :  { %v750_v47 = vmax.f32 %v749_v46, 0.0 }
  0xe6   :  { %v739_v48 = vpop.f32.mrf.mxu0 }
  0xe7   :  { %v751_v49 = vpack.c.bf16 %v750_v47, %v750_v47 }
  0xe9   :  { %752 = vst [vmem:[%s1535_s4] sm:$0xf] %v751_v49 }

</bundles_post_ra>
